<compile_context>
chip_gen: v5e
topology: v5e:2x2
jax: 0.10.0
libtpu: 0.0.40
codegen_flags: <defaults>
</compile_context>

<pallas_src>
import functools
import math

import jax
import jax.numpy as jnp
from jax.experimental import pallas as pl
from jax.experimental.pallas import tpu as pltpu

_LN_EPS = 1e-5  # PyTorch nn.LayerNorm default


# ---------------------------------------------------------------------------
# In-kernel helpers (traced inside the single fused pallas kernel)
# ---------------------------------------------------------------------------

def _layernorm(h, g, b):
    mu = jnp.mean(h, axis=-1, keepdims=True)
    c = h - mu
    var = jnp.mean(c * c, axis=-1, keepdims=True)
    return c * jax.lax.rsqrt(var + _LN_EPS) * g + b


def _ffn(h, w1, b1, w2, b2):
    t = jnp.maximum(jnp.dot(h, w1, preferred_element_type=jnp.float32) + b1, 0.0)
    return jnp.dot(t, w2, preferred_element_type=jnp.float32) + b2


def _mha(q2, k2, v2, wo, bo, *, B, Lq, Lk, H, banned):
    """Multi-head attention, batched over (head, batch) with ONE softmax pass.

    q2: (B*Lq, D); k2, v2: (B*Lk, D); wo: (D, D); bo: (1, D).
    banned: optional (Lq, Lk) bool mask (triu(diagonal=1)), broadcast over
    the stacked (H*B) batch dimension.  Scores are scaled by 1/d_k (reference
    divides by d_k, not sqrt(d_k)).
    """
    D = q2.shape[-1]
    dk = D // H
    q3 = q2.reshape(B, Lq, D)
    k3 = k2.reshape(B, Lk, D)
    v3 = v2.reshape(B, Lk, D)
    # Stack head slices along a leading batch dim -> (H*B, L, dk).
    qh = jnp.concatenate([q3[:, :, h * dk:(h + 1) * dk] for h in range(H)], axis=0)
    kh = jnp.concatenate([k3[:, :, h * dk:(h + 1) * dk] for h in range(H)], axis=0)
    vh = jnp.concatenate([v3[:, :, h * dk:(h + 1) * dk] for h in range(H)], axis=0)

    s = jnp.einsum('bqd,bkd->bqk', qh, kh,
                   preferred_element_type=jnp.float32) * (1.0 / float(dk))
    if banned is not None:
        s = jnp.where(banned, -jnp.inf, s)
    # One max/exp/sum/divide over the whole stacked score tensor.
    s = s - jnp.max(s, axis=-1, keepdims=True)
    e = jnp.exp(s)
    p = e / jnp.sum(e, axis=-1, keepdims=True)
    oh = jnp.einsum('bqk,bkd->bqd', p, vh,
                    preferred_element_type=jnp.float32)            # (H*B, Lq, dk)

    # Output projection: accumulate each head straight through its row-slice
    # of wo (no concat of heads on the lane axis).
    acc = bo
    for h in range(H):
        acc = acc + jnp.dot(oh[h * B:(h + 1) * B].reshape(B * Lq, dk),
                            wo[h * dk:(h + 1) * dk, :],
                            preferred_element_type=jnp.float32)
    return acc


# ---------------------------------------------------------------------------
# The single fused whole-model kernel
# ---------------------------------------------------------------------------

def _transformer_kernel(
        xenc_ref, xdec_ref, stats_ref,
        emb_in_w_ref, emb_in_b_ref, emb_tg_w_ref, emb_tg_b_ref,
        e_wqkv_ref, e_bqkv_ref, e_wo_ref, e_w1_ref, e_bf1_ref, e_w2_ref, e_vec_ref,
        d_wqkv_ref, d_bqkv_ref, d_wo_ref, d_cwq_ref, d_cwkv_ref, d_cbkv_ref, d_cwo_ref,
        d_w1_ref, d_bf1_ref, d_w2_ref, d_vec_ref,
        fc_wd_ref, fc_ws_ref, fc_b_ref,
        out_ref,
        *, B, Le, Ld, H, num_enc, num_dec):
    D = emb_in_w_ref.shape[1]

    # ---- embeddings (+ positional encoding folded into the bias) ----------
    h_enc = jnp.dot(xenc_ref[...], emb_in_w_ref[...],
                    preferred_element_type=jnp.float32) + emb_in_b_ref[...]
    h_dec = jnp.dot(xdec_ref[...], emb_tg_w_ref[...],
                    preferred_element_type=jnp.float32) + emb_tg_b_ref[...]

    # ---- encoder stack (no mask) ------------------------------------------
    for l in range(num_enc):
        vec = e_vec_ref[l]                     # (6, D): bo, g1, b1, bf2, g2, b2
        bo, g1, b1, bf2, g2, b2 = (vec[0:1], vec[1:2], vec[2:3],
                                   vec[3:4], vec[4:5], vec[5:6])
        qkv = jnp.dot(h_enc, e_wqkv_ref[l],
                      preferred_element_type=jnp.float32) + e_bqkv_ref[l]
        q, k, v = qkv[:, :D], qkv[:, D:2 * D], qkv[:, 2 * D:]
        mha = _mha(q, k, v, e_wo_ref[l], bo, B=B, Lq=Le, Lk=Le, H=H, banned=None)
        h1 = _layernorm(h_enc + mha, g1, b1)
        ffn = _ffn(h1, e_w1_ref[l], e_bf1_ref[l], e_w2_ref[l], bf2)
        h_enc = _layernorm(h1 + ffn, g2, b2)

    # ---- causal mask (built once, in-kernel; triu(diagonal=1)) ------------
    row = jax.lax.broadcasted_iota(jnp.int32, (Ld, Ld), 0)
    col = jax.lax.broadcasted_iota(jnp.int32, (Ld, Ld), 1)
    banned = col > row

    # ---- decoder stack ------------------------------------------------------
    for l in range(num_dec):
        vec = d_vec_ref[l]   # (10, D): m_bo, g1, b1, c_bq, c_bo, g2, b2, bf2, g3, b3
        (m_bo, g1, b1, c_bq, c_bo, g2, b2, bf2, g3, b3) = (
            vec[0:1], vec[1:2], vec[2:3], vec[3:4], vec[4:5],
            vec[5:6], vec[6:7], vec[7:8], vec[8:9], vec[9:10])

        # masked self-attention
        qkv = jnp.dot(h_dec, d_wqkv_ref[l],
                      preferred_element_type=jnp.float32) + d_bqkv_ref[l]
        q, k, v = qkv[:, :D], qkv[:, D:2 * D], qkv[:, 2 * D:]
        m = _mha(q, k, v, d_wo_ref[l], m_bo, B=B, Lq=Ld, Lk=Ld, H=H, banned=banned)
        h1 = _layernorm(h_dec + m, g1, b1)

        # cross attention (query = h1, keys/values = final encoder output)
        cq = jnp.dot(h1, d_cwq_ref[l], preferred_element_type=jnp.float32) + c_bq
        ckv = jnp.dot(h_enc, d_cwkv_ref[l],
                      preferred_element_type=jnp.float32) + d_cbkv_ref[l]
        ck, cv = ckv[:, :D], ckv[:, D:]
        c = _mha(cq, ck, cv, d_cwo_ref[l], c_bo, B=B, Lq=Ld, Lk=Le, H=H, banned=None)
        h2 = _layernorm(h1 + c, g2, b2)

        # feed-forward
        ffn = _ffn(h2, d_w1_ref[l], d_bf1_ref[l], d_w2_ref[l], bf2)
        h_dec = _layernorm(h2 + ffn, g3, b3)

    # ---- final fc: concat([y_dec, stats_rep]) @ W + b, computed as a split --
    y = jnp.dot(h_dec, fc_wd_ref[...],
                preferred_element_type=jnp.float32) + fc_b_ref[...]       # (B*Ld, 1)
    sv = jnp.sum(stats_ref[...] * fc_ws_ref[...], axis=-1, keepdims=True)  # (B, 1)
    srep = jnp.concatenate(
        [jnp.broadcast_to(sv[b:b + 1, :], (Ld, 1)) for b in range(B)], axis=0)
    out_ref[...] = y + srep


# ---------------------------------------------------------------------------
# Wrapper
# ---------------------------------------------------------------------------

def _full_spec(shape):
    """Whole-array block, constant across the trivial grid."""
    if len(shape) == 2:
        return pl.BlockSpec(shape, lambda i: (0, 0))
    elif len(shape) == 3:
        return pl.BlockSpec(shape, lambda i: (0, 0, 0))
    raise ValueError(f"unsupported rank: {shape}")


def positional_row(embedding_dim):
    # Faithful to the reference: the PE row does NOT depend on position,
    # so it is a constant vector which we fold into the embedding bias.
    exp = jnp.arange(0, embedding_dim, 2, dtype=jnp.float32) / embedding_dim
    denom = jnp.power(jnp.float32(10000.0), exp)
    row = jnp.zeros((embedding_dim,), jnp.float32)
    row = row.at[0::2].set(jnp.sin(denom))
    row = row.at[1::2].set(jnp.cos(denom))
    return row.reshape(1, embedding_dim)


def transformer_forward(params, x_enc, stats, x_dec, *, input_length, num_heads,
                        embedding_dim):
    B, Le, Fe = x_enc.shape
    Ld, Fd = x_dec.shape[1], x_dec.shape[2]
    D = embedding_dim
    assert Ld == input_length  # required by the reference's stats repeat + concat

    pe = positional_row(D)
    emb_in_b = params["input_emb_b"] + pe      # embedding bias + PE, fused
    emb_tg_b = params["target_emb_b"] + pe

    xe = x_enc.reshape(B * Le, Fe)
    xd = x_dec.reshape(B * Ld, Fd)

    enc, dec = params["enc"], params["dec"]
    num_enc = enc["wqkv"].shape[0]
    num_dec = dec["wqkv"].shape[0]

    inputs = [
        xe, xd, stats,
        params["input_emb_w"], emb_in_b, params["target_emb_w"], emb_tg_b,
        enc["wqkv"], enc["bqkv"], enc["wo"],
        enc["w1"], enc["bf1"], enc["w2"], enc["vec"],
        dec["wqkv"], dec["bqkv"], dec["wo"],
        dec["cwq"], dec["cwkv"], dec["cbkv"], dec["cwo"],
        dec["w1"], dec["bf1"], dec["w2"], dec["vec"],
        params["fc_wd"], params["fc_ws"], params["fc_b"],
    ]

    kernel = functools.partial(
        _transformer_kernel, B=B, Le=Le, Ld=Ld, H=num_heads,
        num_enc=num_enc, num_dec=num_dec)

    out = pl.pallas_call(
        kernel,
        out_shape=jax.ShapeDtypeStruct((B * Ld, 1), jnp.float32),
        grid=(1,),
        in_specs=[_full_spec(a.shape) for a in inputs],
        out_specs=pl.BlockSpec((B * Ld, 1), lambda i: (0, 0)),
        compiler_params=pltpu.CompilerParams(dimension_semantics=("arbitrary",)),
    )(*inputs)
    return out.reshape(B, Ld, 1)


# ---------------------------------------------------------------------------
# Deterministic parameter initialization (synthetic weights, PyTorch-like bounds)
# ---------------------------------------------------------------------------

def init_params(key, *, enc_feat, dec_feat, stats_dim, embedding_dim, num_heads,
                hidden_dims, num_encoder_layers, num_decoder_layers):
    del num_heads
    D, F = embedding_dim, hidden_dims
    keys = iter(jax.random.split(key, 256))

    def lin(d_in, d_out):
        k1, k2 = jax.random.split(next(keys))
        bound = 1.0 / math.sqrt(d_in)
        w = jax.random.uniform(k1, (d_in, d_out), jnp.float32, -bound, bound)
        b = jax.random.uniform(k2, (1, d_out), jnp.float32, -bound, bound)
        return w, b

    ones = jnp.ones((1, D), jnp.float32)
    zeros = jnp.zeros((1, D), jnp.float32)

    params = {}
    params["input_emb_w"], params["input_emb_b"] = lin(enc_feat, D)
    params["target_emb_w"], params["target_emb_b"] = lin(dec_feat, D)

    # -- encoder layers: stacked along a leading layer axis, biases packed ----
    enc = {k: [] for k in ("wqkv", "bqkv", "wo", "w1", "bf1", "w2", "vec")}
    for _ in range(num_encoder_layers):
        wqkv, bqkv = lin(D, 3 * D)        # fused Q|K|V projection
        wo, bo = lin(D, D)
        w1, bf1 = lin(D, F)
        w2, bf2 = lin(F, D)
        vec = jnp.concatenate([bo, ones, zeros, bf2, ones, zeros], axis=0)  # (6, D)
        for n, v in (("wqkv", wqkv), ("bqkv", bqkv), ("wo", wo),
                     ("w1", w1), ("bf1", bf1), ("w2", w2), ("vec", vec)):
            enc[n].append(v)
    params["enc"] = {k: jnp.stack(v) for k, v in enc.items()}

    # -- decoder layers -------------------------------------------------------
    dec = {k: [] for k in ("wqkv", "bqkv", "wo", "cwq", "cwkv", "cbkv", "cwo",
                           "w1", "bf1", "w2", "vec")}
    for _ in range(num_decoder_layers):
        m_wqkv, m_bqkv = lin(D, 3 * D)    # masked self-attn fused QKV
        m_wo, m_bo = lin(D, D)
        c_wq, c_bq = lin(D, D)            # cross-attn Q
        c_wkv, c_bkv = lin(D, 2 * D)      # cross-attn fused K|V
        c_wo, c_bo = lin(D, D)
        w1, bf1 = lin(D, F)
        w2, bf2 = lin(F, D)
        vec = jnp.concatenate([m_bo, ones, zeros, c_bq, c_bo, ones, zeros,
                               bf2, ones, zeros], axis=0)                   # (10, D)
        for n, v in (("wqkv", m_wqkv), ("bqkv", m_bqkv), ("wo", m_wo),
                     ("cwq", c_wq), ("cwkv", c_wkv), ("cbkv", c_bkv), ("cwo", c_wo),
                     ("w1", w1), ("bf1", bf1), ("w2", w2), ("vec", vec)):
            dec[n].append(v)
    params["dec"] = {k: jnp.stack(v) for k, v in dec.items()}

    # -- final fc on concat([y_dec, stats]): stored split ---------------------
    fc_w, fc_b = lin(D + stats_dim, 1)
    params["fc_wd"] = fc_w[:D, :]                 # (D, 1)
    params["fc_ws"] = fc_w[D:, :].T               # (1, S)
    params["fc_b"] = fc_b                         # (1, 1)
    return params


# ---------------------------------------------------------------------------

if __name__ == "__main__":
    # Small, forward-consistent shapes.
    input_length = 8          # sequence length (enc and dec; dec must match for concat)
    num_encoder_layers = 2
    num_decoder_layers = 2
    embedding_dim = 32
    num_heads = 4
    hidden_dims = 64          # FFN inner dim
    B = 2
    enc_feat = 4              # raw encoder feature dim (LazyLinear input)
    dec_feat = 4              # raw decoder feature dim (LazyLinear input)
    stats_dim = 3             # per-sample stats vector

    key = jax.random.PRNGKey(0)
    kp, k1, k2, k3 = jax.random.split(key, 4)

    params = init_params(
        kp, enc_feat=enc_feat, dec_feat=dec_feat, stats_dim=stats_dim,
        embedding_dim=embedding_dim, num_heads=num_heads, hidden_dims=hidden_dims,
        num_encoder_layers=num_encoder_layers, num_decoder_layers=num_decoder_layers)

    x_enc = jax.random.normal(k1, (B, input_length, enc_feat), jnp.float32)
    x_dec = jax.random.normal(k2, (B, input_length, dec_feat), jnp.float32)
    stats = jax.random.normal(k3, (B, stats_dim), jnp.float32)

    fwd = jax.jit(functools.partial(
        transformer_forward, input_length=input_length, num_heads=num_heads,
        embedding_dim=embedding_dim))

    out = jax.block_until_ready(fwd(params, x_enc, stats, x_dec))
    assert out.shape == (B, input_length, 1), out.shape
    assert bool(jnp.all(jnp.isfinite(out)))
    print("KERNEL_OK")
</pallas_src>

<mosaic_0001>
module attributes {stable_mosaic.version = 11 : i64} {
  func.func @_transformer_kernel(%arg0: i32, %arg1: memref<16x4xf32, #tpu.memory_space<vmem>>, %arg2: memref<16x4xf32, #tpu.memory_space<vmem>>, %arg3: memref<2x3xf32, #tpu.memory_space<vmem>>, %arg4: memref<4x32xf32, #tpu.memory_space<vmem>>, %arg5: memref<1x32xf32, #tpu.memory_space<vmem>>, %arg6: memref<4x32xf32, #tpu.memory_space<vmem>>, %arg7: memref<1x32xf32, #tpu.memory_space<vmem>>, %arg8: memref<2x32x96xf32, #tpu.memory_space<vmem>>, %arg9: memref<2x1x96xf32, #tpu.memory_space<vmem>>, %arg10: memref<2x32x32xf32, #tpu.memory_space<vmem>>, %arg11: memref<2x32x64xf32, #tpu.memory_space<vmem>>, %arg12: memref<2x1x64xf32, #tpu.memory_space<vmem>>, %arg13: memref<2x64x32xf32, #tpu.memory_space<vmem>>, %arg14: memref<2x6x32xf32, #tpu.memory_space<vmem>>, %arg15: memref<2x32x96xf32, #tpu.memory_space<vmem>>, %arg16: memref<2x1x96xf32, #tpu.memory_space<vmem>>, %arg17: memref<2x32x32xf32, #tpu.memory_space<vmem>>, %arg18: memref<2x32x32xf32, #tpu.memory_space<vmem>>, %arg19: memref<2x32x64xf32, #tpu.memory_space<vmem>>, %arg20: memref<2x1x64xf32, #tpu.memory_space<vmem>>, %arg21: memref<2x32x32xf32, #tpu.memory_space<vmem>>, %arg22: memref<2x32x64xf32, #tpu.memory_space<vmem>>, %arg23: memref<2x1x64xf32, #tpu.memory_space<vmem>>, %arg24: memref<2x64x32xf32, #tpu.memory_space<vmem>>, %arg25: memref<2x10x32xf32, #tpu.memory_space<vmem>>, %arg26: memref<32x1xf32, #tpu.memory_space<vmem>>, %arg27: memref<1x3xf32, #tpu.memory_space<vmem>>, %arg28: memref<1x1xf32, #tpu.memory_space<vmem>>, %arg29: memref<16x1xf32, #tpu.memory_space<vmem>>) attributes {dimension_semantics = [#tpu.dimension_semantics<arbitrary>], iteration_bounds = array<i64: 1>, scalar_prefetch = 0 : i64, scratch_operands = 0 : i64, tpu.core_type = #tpu.core_type<tc>, window_params = [{pipeline_mode = #tpu.pipeline_mode<synchronous>, transform_indices = @transform_0, window_bounds = array<i64: 16, 4>}, {pipeline_mode = #tpu.pipeline_mode<synchronous>, transform_indices = @transform_1, window_bounds = array<i64: 16, 4>}, {pipeline_mode = #tpu.pipeline_mode<synchronous>, transform_indices = @transform_2, window_bounds = array<i64: 2, 3>}, {pipeline_mode = #tpu.pipeline_mode<synchronous>, transform_indices = @transform_3, window_bounds = array<i64: 4, 32>}, {pipeline_mode = #tpu.pipeline_mode<synchronous>, transform_indices = @transform_4, window_bounds = array<i64: 1, 32>}, {pipeline_mode = #tpu.pipeline_mode<synchronous>, transform_indices = @transform_5, window_bounds = array<i64: 4, 32>}, {pipeline_mode = #tpu.pipeline_mode<synchronous>, transform_indices = @transform_6, window_bounds = array<i64: 1, 32>}, {pipeline_mode = #tpu.pipeline_mode<synchronous>, transform_indices = @transform_7, window_bounds = array<i64: 2, 32, 96>}, {pipeline_mode = #tpu.pipeline_mode<synchronous>, transform_indices = @transform_8, window_bounds = array<i64: 2, 1, 96>}, {pipeline_mode = #tpu.pipeline_mode<synchronous>, transform_indices = @transform_9, window_bounds = array<i64: 2, 32, 32>}, {pipeline_mode = #tpu.pipeline_mode<synchronous>, transform_indices = @transform_10, window_bounds = array<i64: 2, 32, 64>}, {pipeline_mode = #tpu.pipeline_mode<synchronous>, transform_indices = @transform_11, window_bounds = array<i64: 2, 1, 64>}, {pipeline_mode = #tpu.pipeline_mode<synchronous>, transform_indices = @transform_12, window_bounds = array<i64: 2, 64, 32>}, {pipeline_mode = #tpu.pipeline_mode<synchronous>, transform_indices = @transform_13, window_bounds = array<i64: 2, 6, 32>}, {pipeline_mode = #tpu.pipeline_mode<synchronous>, transform_indices = @transform_14, window_bounds = array<i64: 2, 32, 96>}, {pipeline_mode = #tpu.pipeline_mode<synchronous>, transform_indices = @transform_15, window_bounds = array<i64: 2, 1, 96>}, {pipeline_mode = #tpu.pipeline_mode<synchronous>, transform_indices = @transform_16, window_bounds = array<i64: 2, 32, 32>}, {pipeline_mode = #tpu.pipeline_mode<synchronous>, transform_indices = @transform_17, window_bounds = array<i64: 2, 32, 32>}, {pipeline_mode = #tpu.pipeline_mode<synchronous>, transform_indices = @transform_18, window_bounds = array<i64: 2, 32, 64>}, {pipeline_mode = #tpu.pipeline_mode<synchronous>, transform_indices = @transform_19, window_bounds = array<i64: 2, 1, 64>}, {pipeline_mode = #tpu.pipeline_mode<synchronous>, transform_indices = @transform_20, window_bounds = array<i64: 2, 32, 32>}, {pipeline_mode = #tpu.pipeline_mode<synchronous>, transform_indices = @transform_21, window_bounds = array<i64: 2, 32, 64>}, {pipeline_mode = #tpu.pipeline_mode<synchronous>, transform_indices = @transform_22, window_bounds = array<i64: 2, 1, 64>}, {pipeline_mode = #tpu.pipeline_mode<synchronous>, transform_indices = @transform_23, window_bounds = array<i64: 2, 64, 32>}, {pipeline_mode = #tpu.pipeline_mode<synchronous>, transform_indices = @transform_24, window_bounds = array<i64: 2, 10, 32>}, {pipeline_mode = #tpu.pipeline_mode<synchronous>, transform_indices = @transform_25, window_bounds = array<i64: 32, 1>}, {pipeline_mode = #tpu.pipeline_mode<synchronous>, transform_indices = @transform_26, window_bounds = array<i64: 1, 3>}, {pipeline_mode = #tpu.pipeline_mode<synchronous>, transform_indices = @transform_27, window_bounds = array<i64: 1, 1>}, {pipeline_mode = #tpu.pipeline_mode<synchronous>, transform_indices = @transform_28, window_bounds = array<i64: 16, 1>}]} {
    %c0 = arith.constant 0 : index
    %c0_0 = arith.constant 0 : index
    %0 = vector.load %arg1[%c0, %c0_0] : memref<16x4xf32, #tpu.memory_space<vmem>>, vector<16x4xf32>
    %c0_1 = arith.constant 0 : index
    %c0_2 = arith.constant 0 : index
    %1 = vector.load %arg4[%c0_1, %c0_2] : memref<4x32xf32, #tpu.memory_space<vmem>>, vector<4x32xf32>
    %cst = arith.constant dense<0.000000e+00> : vector<16x32xf32>
    %2 = tpu.matmul %0, %1, %cst {dimension_numbers = #tpu.dot_dimension_numbers<[1], [0], [0], [1], [0, 0, 1, 1], [], []>} : vector<16x4xf32>, vector<4x32xf32>, vector<16x32xf32> -> vector<16x32xf32>
    %c0_3 = arith.constant 0 : index
    %c0_4 = arith.constant 0 : index
    %3 = vector.load %arg5[%c0_3, %c0_4] : memref<1x32xf32, #tpu.memory_space<vmem>>, vector<1x32xf32>
    %4 = vector.broadcast %3 : vector<1x32xf32> to vector<16x32xf32>
    %5 = arith.addf %2, %4 : vector<16x32xf32>
    %c0_5 = arith.constant 0 : index
    %c0_6 = arith.constant 0 : index
    %6 = vector.load %arg2[%c0_5, %c0_6] : memref<16x4xf32, #tpu.memory_space<vmem>>, vector<16x4xf32>
    %c0_7 = arith.constant 0 : index
    %c0_8 = arith.constant 0 : index
    %7 = vector.load %arg6[%c0_7, %c0_8] : memref<4x32xf32, #tpu.memory_space<vmem>>, vector<4x32xf32>
    %cst_9 = arith.constant dense<0.000000e+00> : vector<16x32xf32>
    %8 = tpu.matmul %6, %7, %cst_9 {dimension_numbers = #tpu.dot_dimension_numbers<[1], [0], [0], [1], [0, 0, 1, 1], [], []>} : vector<16x4xf32>, vector<4x32xf32>, vector<16x32xf32> -> vector<16x32xf32>
    %c0_10 = arith.constant 0 : index
    %c0_11 = arith.constant 0 : index
    %9 = vector.load %arg7[%c0_10, %c0_11] : memref<1x32xf32, #tpu.memory_space<vmem>>, vector<1x32xf32>
    %10 = vector.broadcast %9 : vector<1x32xf32> to vector<16x32xf32>
    %11 = arith.addf %8, %10 : vector<16x32xf32>
    %c0_12 = arith.constant 0 : index
    %c0_13 = arith.constant 0 : index
    %c0_14 = arith.constant 0 : index
    %12 = vector.load %arg14[%c0_12, %c0_13, %c0_14] : memref<2x6x32xf32, #tpu.memory_space<vmem>>, vector<1x6x32xf32>
    %13 = vector.shape_cast %12 : vector<1x6x32xf32> to vector<6x32xf32>
    %14 = vector.extract_strided_slice %13 {offsets = [0, 0], sizes = [1, 32], strides = [1, 1]} : vector<6x32xf32> to vector<1x32xf32>
    %15 = vector.extract_strided_slice %13 {offsets = [1, 0], sizes = [1, 32], strides = [1, 1]} : vector<6x32xf32> to vector<1x32xf32>
    %16 = vector.extract_strided_slice %13 {offsets = [2, 0], sizes = [1, 32], strides = [1, 1]} : vector<6x32xf32> to vector<1x32xf32>
    %17 = vector.extract_strided_slice %13 {offsets = [3, 0], sizes = [1, 32], strides = [1, 1]} : vector<6x32xf32> to vector<1x32xf32>
    %18 = vector.extract_strided_slice %13 {offsets = [4, 0], sizes = [1, 32], strides = [1, 1]} : vector<6x32xf32> to vector<1x32xf32>
    %19 = vector.extract_strided_slice %13 {offsets = [5, 0], sizes = [1, 32], strides = [1, 1]} : vector<6x32xf32> to vector<1x32xf32>
    %c0_15 = arith.constant 0 : index
    %c0_16 = arith.constant 0 : index
    %c0_17 = arith.constant 0 : index
    %20 = vector.load %arg8[%c0_15, %c0_16, %c0_17] : memref<2x32x96xf32, #tpu.memory_space<vmem>>, vector<1x32x96xf32>
    %21 = vector.shape_cast %20 : vector<1x32x96xf32> to vector<32x96xf32>
    %cst_18 = arith.constant dense<0.000000e+00> : vector<16x96xf32>
    %22 = tpu.matmul %5, %21, %cst_18 {dimension_numbers = #tpu.dot_dimension_numbers<[1], [0], [0], [1], [0, 0, 1, 1], [], []>} : vector<16x32xf32>, vector<32x96xf32>, vector<16x96xf32> -> vector<16x96xf32>
    %c0_19 = arith.constant 0 : index
    %c0_20 = arith.constant 0 : index
    %c0_21 = arith.constant 0 : index
    %23 = vector.load %arg9[%c0_19, %c0_20, %c0_21] : memref<2x1x96xf32, #tpu.memory_space<vmem>>, vector<1x1x96xf32>
    %24 = vector.shape_cast %23 : vector<1x1x96xf32> to vector<1x96xf32>
    %25 = vector.broadcast %24 : vector<1x96xf32> to vector<16x96xf32>
    %26 = arith.addf %22, %25 : vector<16x96xf32>
    %27 = vector.extract_strided_slice %26 {offsets = [0, 0], sizes = [16, 32], strides = [1, 1]} : vector<16x96xf32> to vector<16x32xf32>
    %28 = vector.extract_strided_slice %26 {offsets = [0, 32], sizes = [16, 32], strides = [1, 1]} : vector<16x96xf32> to vector<16x32xf32>
    %29 = vector.extract_strided_slice %26 {offsets = [0, 64], sizes = [16, 32], strides = [1, 1]} : vector<16x96xf32> to vector<16x32xf32>
    %c0_22 = arith.constant 0 : index
    %c0_23 = arith.constant 0 : index
    %c0_24 = arith.constant 0 : index
    %30 = vector.load %arg10[%c0_22, %c0_23, %c0_24] : memref<2x32x32xf32, #tpu.memory_space<vmem>>, vector<1x32x32xf32>
    %31 = vector.shape_cast %30 : vector<1x32x32xf32> to vector<32x32xf32>
    %32 = vector.shape_cast %27 : vector<16x32xf32> to vector<2x8x32xf32>
    %33 = vector.shape_cast %28 : vector<16x32xf32> to vector<2x8x32xf32>
    %34 = vector.shape_cast %29 : vector<16x32xf32> to vector<2x8x32xf32>
    %35 = vector.extract_strided_slice %32 {offsets = [0, 0, 0], sizes = [2, 8, 8], strides = [1, 1, 1]} : vector<2x8x32xf32> to vector<2x8x8xf32>
    %36 = vector.extract_strided_slice %32 {offsets = [0, 0, 8], sizes = [2, 8, 8], strides = [1, 1, 1]} : vector<2x8x32xf32> to vector<2x8x8xf32>
    %37 = vector.extract_strided_slice %32 {offsets = [0, 0, 16], sizes = [2, 8, 8], strides = [1, 1, 1]} : vector<2x8x32xf32> to vector<2x8x8xf32>
    %38 = vector.extract_strided_slice %32 {offsets = [0, 0, 24], sizes = [2, 8, 8], strides = [1, 1, 1]} : vector<2x8x32xf32> to vector<2x8x8xf32>
    %39 = tpu.concatenate %35, %36, %37, %38 in 0 : vector<2x8x8xf32>, vector<2x8x8xf32>, vector<2x8x8xf32>, vector<2x8x8xf32> -> vector<8x8x8xf32>
    %40 = vector.extract_strided_slice %33 {offsets = [0, 0, 0], sizes = [2, 8, 8], strides = [1, 1, 1]} : vector<2x8x32xf32> to vector<2x8x8xf32>
    %41 = vector.extract_strided_slice %33 {offsets = [0, 0, 8], sizes = [2, 8, 8], strides = [1, 1, 1]} : vector<2x8x32xf32> to vector<2x8x8xf32>
    %42 = vector.extract_strided_slice %33 {offsets = [0, 0, 16], sizes = [2, 8, 8], strides = [1, 1, 1]} : vector<2x8x32xf32> to vector<2x8x8xf32>
    %43 = vector.extract_strided_slice %33 {offsets = [0, 0, 24], sizes = [2, 8, 8], strides = [1, 1, 1]} : vector<2x8x32xf32> to vector<2x8x8xf32>
    %44 = tpu.concatenate %40, %41, %42, %43 in 0 : vector<2x8x8xf32>, vector<2x8x8xf32>, vector<2x8x8xf32>, vector<2x8x8xf32> -> vector<8x8x8xf32>
    %45 = vector.extract_strided_slice %34 {offsets = [0, 0, 0], sizes = [2, 8, 8], strides = [1, 1, 1]} : vector<2x8x32xf32> to vector<2x8x8xf32>
    %46 = vector.extract_strided_slice %34 {offsets = [0, 0, 8], sizes = [2, 8, 8], strides = [1, 1, 1]} : vector<2x8x32xf32> to vector<2x8x8xf32>
    %47 = vector.extract_strided_slice %34 {offsets = [0, 0, 16], sizes = [2, 8, 8], strides = [1, 1, 1]} : vector<2x8x32xf32> to vector<2x8x8xf32>
    %48 = vector.extract_strided_slice %34 {offsets = [0, 0, 24], sizes = [2, 8, 8], strides = [1, 1, 1]} : vector<2x8x32xf32> to vector<2x8x8xf32>
    %49 = tpu.concatenate %45, %46, %47, %48 in 0 : vector<2x8x8xf32>, vector<2x8x8xf32>, vector<2x8x8xf32>, vector<2x8x8xf32> -> vector<8x8x8xf32>
    "tpu.trace_start"() <{level = 10 : i32, message = "bqd,bkd->bqk"}> : () -> ()
    %cst_25 = arith.constant dense<0.000000e+00> : vector<8x8x8xf32>
    %50 = tpu.matmul %39, %44, %cst_25 {dimension_numbers = #tpu.dot_dimension_numbers<[2], [2], [1], [1], [0, 0, 0, 1, 1, 1], [0], [0]>} : vector<8x8x8xf32>, vector<8x8x8xf32>, vector<8x8x8xf32> -> vector<8x8x8xf32>
    "tpu.trace_stop"() : () -> ()
    %cst_26 = arith.constant 1.250000e-01 : f32
    %51 = vector.broadcast %cst_26 : f32 to vector<8x8x8xf32>
    %52 = arith.mulf %50, %51 : vector<8x8x8xf32>
    %cst_27 = arith.constant dense<0xFF800000> : vector<8x8xf32>
    %53 = vector.multi_reduction <maximumf>, %52, %cst_27 [2] : vector<8x8x8xf32> to vector<8x8xf32>
    %54 = vector.shape_cast %53 : vector<8x8xf32> to vector<8x8x1xf32>
    %55 = vector.broadcast %54 : vector<8x8x1xf32> to vector<8x8x8xf32>
    %56 = arith.subf %52, %55 : vector<8x8x8xf32>
    %57 = math.exp %56 : vector<8x8x8xf32>
    %cst_28 = arith.constant dense<0.000000e+00> : vector<8x8xf32>
    %58 = vector.multi_reduction <add>, %57, %cst_28 [2] : vector<8x8x8xf32> to vector<8x8xf32>
    %59 = vector.shape_cast %58 : vector<8x8xf32> to vector<8x8x1xf32>
    %60 = vector.broadcast %59 : vector<8x8x1xf32> to vector<8x8x8xf32>
    %61 = arith.divf %57, %60 : vector<8x8x8xf32>
    "tpu.trace_start"() <{level = 10 : i32, message = "bqk,bkd->bqd"}> : () -> ()
    %cst_29 = arith.constant dense<0.000000e+00> : vector<8x8x8xf32>
    %62 = tpu.matmul %61, %49, %cst_29 {dimension_numbers = #tpu.dot_dimension_numbers<[2], [1], [1], [2], [0, 0, 0, 1, 1, 2], [0], [0]>} : vector<8x8x8xf32>, vector<8x8x8xf32>, vector<8x8x8xf32> -> vector<8x8x8xf32>
    "tpu.trace_stop"() : () -> ()
    %63 = vector.extract_strided_slice %62 {offsets = [0, 0, 0], sizes = [2, 8, 8], strides = [1, 1, 1]} : vector<8x8x8xf32> to vector<2x8x8xf32>
    %64 = vector.shape_cast %63 : vector<2x8x8xf32> to vector<16x8xf32>
    %65 = vector.extract_strided_slice %31 {offsets = [0, 0], sizes = [8, 32], strides = [1, 1]} : vector<32x32xf32> to vector<8x32xf32>
    %cst_30 = arith.constant dense<0.000000e+00> : vector<16x32xf32>
    %66 = tpu.matmul %64, %65, %cst_30 {dimension_numbers = #tpu.dot_dimension_numbers<[1], [0], [0], [1], [0, 0, 1, 1], [], []>} : vector<16x8xf32>, vector<8x32xf32>, vector<16x32xf32> -> vector<16x32xf32>
    %67 = vector.broadcast %14 : vector<1x32xf32> to vector<16x32xf32>
    %68 = arith.addf %67, %66 : vector<16x32xf32>
    %69 = vector.extract_strided_slice %62 {offsets = [2, 0, 0], sizes = [2, 8, 8], strides = [1, 1, 1]} : vector<8x8x8xf32> to vector<2x8x8xf32>
    %70 = vector.shape_cast %69 : vector<2x8x8xf32> to vector<16x8xf32>
    %71 = vector.extract_strided_slice %31 {offsets = [8, 0], sizes = [8, 32], strides = [1, 1]} : vector<32x32xf32> to vector<8x32xf32>
    %cst_31 = arith.constant dense<0.000000e+00> : vector<16x32xf32>
    %72 = tpu.matmul %70, %71, %cst_31 {dimension_numbers = #tpu.dot_dimension_numbers<[1], [0], [0], [1], [0, 0, 1, 1], [], []>} : vector<16x8xf32>, vector<8x32xf32>, vector<16x32xf32> -> vector<16x32xf32>
    %73 = arith.addf %68, %72 : vector<16x32xf32>
    %74 = vector.extract_strided_slice %62 {offsets = [4, 0, 0], sizes = [2, 8, 8], strides = [1, 1, 1]} : vector<8x8x8xf32> to vector<2x8x8xf32>
    %75 = vector.shape_cast %74 : vector<2x8x8xf32> to vector<16x8xf32>
    %76 = vector.extract_strided_slice %31 {offsets = [16, 0], sizes = [8, 32], strides = [1, 1]} : vector<32x32xf32> to vector<8x32xf32>
    %cst_32 = arith.constant dense<0.000000e+00> : vector<16x32xf32>
    %77 = tpu.matmul %75, %76, %cst_32 {dimension_numbers = #tpu.dot_dimension_numbers<[1], [0], [0], [1], [0, 0, 1, 1], [], []>} : vector<16x8xf32>, vector<8x32xf32>, vector<16x32xf32> -> vector<16x32xf32>
    %78 = arith.addf %73, %77 : vector<16x32xf32>
    %79 = vector.extract_strided_slice %62 {offsets = [6, 0, 0], sizes = [2, 8, 8], strides = [1, 1, 1]} : vector<8x8x8xf32> to vector<2x8x8xf32>
    %80 = vector.shape_cast %79 : vector<2x8x8xf32> to vector<16x8xf32>
    %81 = vector.extract_strided_slice %31 {offsets = [24, 0], sizes = [8, 32], strides = [1, 1]} : vector<32x32xf32> to vector<8x32xf32>
    %cst_33 = arith.constant dense<0.000000e+00> : vector<16x32xf32>
    %82 = tpu.matmul %80, %81, %cst_33 {dimension_numbers = #tpu.dot_dimension_numbers<[1], [0], [0], [1], [0, 0, 1, 1], [], []>} : vector<16x8xf32>, vector<8x32xf32>, vector<16x32xf32> -> vector<16x32xf32>
    %83 = arith.addf %78, %82 : vector<16x32xf32>
    %84 = arith.addf %5, %83 : vector<16x32xf32>
    %cst_34 = arith.constant dense<0.000000e+00> : vector<16xf32>
    %85 = vector.multi_reduction <add>, %84, %cst_34 [1] : vector<16x32xf32> to vector<16xf32>
    %86 = vector.shape_cast %85 : vector<16xf32> to vector<16x1xf32>
    %cst_35 = arith.constant 3.200000e+01 : f32
    %87 = vector.broadcast %cst_35 : f32 to vector<16x1xf32>
    %88 = arith.divf %86, %87 : vector<16x1xf32>
    %89 = vector.broadcast %88 : vector<16x1xf32> to vector<16x32xf32>
    %90 = arith.subf %84, %89 : vector<16x32xf32>
    %91 = arith.mulf %90, %90 : vector<16x32xf32>
    %cst_36 = arith.constant dense<0.000000e+00> : vector<16xf32>
    %92 = vector.multi_reduction <add>, %91, %cst_36 [1] : vector<16x32xf32> to vector<16xf32>
    %93 = vector.shape_cast %92 : vector<16xf32> to vector<16x1xf32>
    %cst_37 = arith.constant 3.200000e+01 : f32
    %94 = vector.broadcast %cst_37 : f32 to vector<16x1xf32>
    %95 = arith.divf %93, %94 : vector<16x1xf32>
    %cst_38 = arith.constant 9.99999974E-6 : f32
    %96 = vector.broadcast %cst_38 : f32 to vector<16x1xf32>
    %97 = arith.addf %95, %96 : vector<16x1xf32>
    %98 = math.rsqrt %97 : vector<16x1xf32>
    %99 = vector.broadcast %98 : vector<16x1xf32> to vector<16x32xf32>
    %100 = arith.mulf %90, %99 : vector<16x32xf32>
    %101 = vector.broadcast %15 : vector<1x32xf32> to vector<16x32xf32>
    %102 = arith.mulf %100, %101 : vector<16x32xf32>
    %103 = vector.broadcast %16 : vector<1x32xf32> to vector<16x32xf32>
    %104 = arith.addf %102, %103 : vector<16x32xf32>
    %c0_39 = arith.constant 0 : index
    %c0_40 = arith.constant 0 : index
    %c0_41 = arith.constant 0 : index
    %105 = vector.load %arg11[%c0_39, %c0_40, %c0_41] : memref<2x32x64xf32, #tpu.memory_space<vmem>>, vector<1x32x64xf32>
    %106 = vector.shape_cast %105 : vector<1x32x64xf32> to vector<32x64xf32>
    %c0_42 = arith.constant 0 : index
    %c0_43 = arith.constant 0 : index
    %c0_44 = arith.constant 0 : index
    %107 = vector.load %arg12[%c0_42, %c0_43, %c0_44] : memref<2x1x64xf32, #tpu.memory_space<vmem>>, vector<1x1x64xf32>
    %108 = vector.shape_cast %107 : vector<1x1x64xf32> to vector<1x64xf32>
    %c0_45 = arith.constant 0 : index
    %c0_46 = arith.constant 0 : index
    %c0_47 = arith.constant 0 : index
    %109 = vector.load %arg13[%c0_45, %c0_46, %c0_47] : memref<2x64x32xf32, #tpu.memory_space<vmem>>, vector<1x64x32xf32>
    %110 = vector.shape_cast %109 : vector<1x64x32xf32> to vector<64x32xf32>
    %cst_48 = arith.constant dense<0.000000e+00> : vector<16x64xf32>
    %111 = tpu.matmul %104, %106, %cst_48 {dimension_numbers = #tpu.dot_dimension_numbers<[1], [0], [0], [1], [0, 0, 1, 1], [], []>} : vector<16x32xf32>, vector<32x64xf32>, vector<16x64xf32> -> vector<16x64xf32>
    %112 = vector.broadcast %108 : vector<1x64xf32> to vector<16x64xf32>
    %113 = arith.addf %111, %112 : vector<16x64xf32>
    %cst_49 = arith.constant 0.000000e+00 : f32
    %114 = vector.broadcast %cst_49 : f32 to vector<16x64xf32>
    %115 = arith.maximumf %113, %114 : vector<16x64xf32>
    %cst_50 = arith.constant dense<0.000000e+00> : vector<16x32xf32>
    %116 = tpu.matmul %115, %110, %cst_50 {dimension_numbers = #tpu.dot_dimension_numbers<[1], [0], [0], [1], [0, 0, 1, 1], [], []>} : vector<16x64xf32>, vector<64x32xf32>, vector<16x32xf32> -> vector<16x32xf32>
    %117 = vector.broadcast %17 : vector<1x32xf32> to vector<16x32xf32>
    %118 = arith.addf %116, %117 : vector<16x32xf32>
    %119 = arith.addf %104, %118 : vector<16x32xf32>
    %cst_51 = arith.constant dense<0.000000e+00> : vector<16xf32>
    %120 = vector.multi_reduction <add>, %119, %cst_51 [1] : vector<16x32xf32> to vector<16xf32>
    %121 = vector.shape_cast %120 : vector<16xf32> to vector<16x1xf32>
    %cst_52 = arith.constant 3.200000e+01 : f32
    %122 = vector.broadcast %cst_52 : f32 to vector<16x1xf32>
    %123 = arith.divf %121, %122 : vector<16x1xf32>
    %124 = vector.broadcast %123 : vector<16x1xf32> to vector<16x32xf32>
    %125 = arith.subf %119, %124 : vector<16x32xf32>
    %126 = arith.mulf %125, %125 : vector<16x32xf32>
    %cst_53 = arith.constant dense<0.000000e+00> : vector<16xf32>
    %127 = vector.multi_reduction <add>, %126, %cst_53 [1] : vector<16x32xf32> to vector<16xf32>
    %128 = vector.shape_cast %127 : vector<16xf32> to vector<16x1xf32>
    %cst_54 = arith.constant 3.200000e+01 : f32
    %129 = vector.broadcast %cst_54 : f32 to vector<16x1xf32>
    %130 = arith.divf %128, %129 : vector<16x1xf32>
    %cst_55 = arith.constant 9.99999974E-6 : f32
    %131 = vector.broadcast %cst_55 : f32 to vector<16x1xf32>
    %132 = arith.addf %130, %131 : vector<16x1xf32>
    %133 = math.rsqrt %132 : vector<16x1xf32>
    %134 = vector.broadcast %133 : vector<16x1xf32> to vector<16x32xf32>
    %135 = arith.mulf %125, %134 : vector<16x32xf32>
    %136 = vector.broadcast %18 : vector<1x32xf32> to vector<16x32xf32>
    %137 = arith.mulf %135, %136 : vector<16x32xf32>
    %138 = vector.broadcast %19 : vector<1x32xf32> to vector<16x32xf32>
    %139 = arith.addf %137, %138 : vector<16x32xf32>
    %c1 = arith.constant 1 : index
    %c0_56 = arith.constant 0 : index
    %c0_57 = arith.constant 0 : index
    %140 = vector.load %arg14[%c1, %c0_56, %c0_57] : memref<2x6x32xf32, #tpu.memory_space<vmem>>, vector<1x6x32xf32>
    %141 = vector.shape_cast %140 : vector<1x6x32xf32> to vector<6x32xf32>
    %142 = vector.extract_strided_slice %141 {offsets = [0, 0], sizes = [1, 32], strides = [1, 1]} : vector<6x32xf32> to vector<1x32xf32>
    %143 = vector.extract_strided_slice %141 {offsets = [1, 0], sizes = [1, 32], strides = [1, 1]} : vector<6x32xf32> to vector<1x32xf32>
    %144 = vector.extract_strided_slice %141 {offsets = [2, 0], sizes = [1, 32], strides = [1, 1]} : vector<6x32xf32> to vector<1x32xf32>
    %145 = vector.extract_strided_slice %141 {offsets = [3, 0], sizes = [1, 32], strides = [1, 1]} : vector<6x32xf32> to vector<1x32xf32>
    %146 = vector.extract_strided_slice %141 {offsets = [4, 0], sizes = [1, 32], strides = [1, 1]} : vector<6x32xf32> to vector<1x32xf32>
    %147 = vector.extract_strided_slice %141 {offsets = [5, 0], sizes = [1, 32], strides = [1, 1]} : vector<6x32xf32> to vector<1x32xf32>
    %c1_58 = arith.constant 1 : index
    %c0_59 = arith.constant 0 : index
    %c0_60 = arith.constant 0 : index
    %148 = vector.load %arg8[%c1_58, %c0_59, %c0_60] : memref<2x32x96xf32, #tpu.memory_space<vmem>>, vector<1x32x96xf32>
    %149 = vector.shape_cast %148 : vector<1x32x96xf32> to vector<32x96xf32>
    %cst_61 = arith.constant dense<0.000000e+00> : vector<16x96xf32>
    %150 = tpu.matmul %139, %149, %cst_61 {dimension_numbers = #tpu.dot_dimension_numbers<[1], [0], [0], [1], [0, 0, 1, 1], [], []>} : vector<16x32xf32>, vector<32x96xf32>, vector<16x96xf32> -> vector<16x96xf32>
    %c1_62 = arith.constant 1 : index
    %c0_63 = arith.constant 0 : index
    %c0_64 = arith.constant 0 : index
    %151 = vector.load %arg9[%c1_62, %c0_63, %c0_64] : memref<2x1x96xf32, #tpu.memory_space<vmem>>, vector<1x1x96xf32>
    %152 = vector.shape_cast %151 : vector<1x1x96xf32> to vector<1x96xf32>
    %153 = vector.broadcast %152 : vector<1x96xf32> to vector<16x96xf32>
    %154 = arith.addf %150, %153 : vector<16x96xf32>
    %155 = vector.extract_strided_slice %154 {offsets = [0, 0], sizes = [16, 32], strides = [1, 1]} : vector<16x96xf32> to vector<16x32xf32>
    %156 = vector.extract_strided_slice %154 {offsets = [0, 32], sizes = [16, 32], strides = [1, 1]} : vector<16x96xf32> to vector<16x32xf32>
    %157 = vector.extract_strided_slice %154 {offsets = [0, 64], sizes = [16, 32], strides = [1, 1]} : vector<16x96xf32> to vector<16x32xf32>
    %c1_65 = arith.constant 1 : index
    %c0_66 = arith.constant 0 : index
    %c0_67 = arith.constant 0 : index
    %158 = vector.load %arg10[%c1_65, %c0_66, %c0_67] : memref<2x32x32xf32, #tpu.memory_space<vmem>>, vector<1x32x32xf32>
    %159 = vector.shape_cast %158 : vector<1x32x32xf32> to vector<32x32xf32>
    %160 = vector.shape_cast %155 : vector<16x32xf32> to vector<2x8x32xf32>
    %161 = vector.shape_cast %156 : vector<16x32xf32> to vector<2x8x32xf32>
    %162 = vector.shape_cast %157 : vector<16x32xf32> to vector<2x8x32xf32>
    %163 = vector.extract_strided_slice %160 {offsets = [0, 0, 0], sizes = [2, 8, 8], strides = [1, 1, 1]} : vector<2x8x32xf32> to vector<2x8x8xf32>
    %164 = vector.extract_strided_slice %160 {offsets = [0, 0, 8], sizes = [2, 8, 8], strides = [1, 1, 1]} : vector<2x8x32xf32> to vector<2x8x8xf32>
    %165 = vector.extract_strided_slice %160 {offsets = [0, 0, 16], sizes = [2, 8, 8], strides = [1, 1, 1]} : vector<2x8x32xf32> to vector<2x8x8xf32>
    %166 = vector.extract_strided_slice %160 {offsets = [0, 0, 24], sizes = [2, 8, 8], strides = [1, 1, 1]} : vector<2x8x32xf32> to vector<2x8x8xf32>
    %167 = tpu.concatenate %163, %164, %165, %166 in 0 : vector<2x8x8xf32>, vector<2x8x8xf32>, vector<2x8x8xf32>, vector<2x8x8xf32> -> vector<8x8x8xf32>
    %168 = vector.extract_strided_slice %161 {offsets = [0, 0, 0], sizes = [2, 8, 8], strides = [1, 1, 1]} : vector<2x8x32xf32> to vector<2x8x8xf32>
    %169 = vector.extract_strided_slice %161 {offsets = [0, 0, 8], sizes = [2, 8, 8], strides = [1, 1, 1]} : vector<2x8x32xf32> to vector<2x8x8xf32>
    %170 = vector.extract_strided_slice %161 {offsets = [0, 0, 16], sizes = [2, 8, 8], strides = [1, 1, 1]} : vector<2x8x32xf32> to vector<2x8x8xf32>
    %171 = vector.extract_strided_slice %161 {offsets = [0, 0, 24], sizes = [2, 8, 8], strides = [1, 1, 1]} : vector<2x8x32xf32> to vector<2x8x8xf32>
    %172 = tpu.concatenate %168, %169, %170, %171 in 0 : vector<2x8x8xf32>, vector<2x8x8xf32>, vector<2x8x8xf32>, vector<2x8x8xf32> -> vector<8x8x8xf32>
    %173 = vector.extract_strided_slice %162 {offsets = [0, 0, 0], sizes = [2, 8, 8], strides = [1, 1, 1]} : vector<2x8x32xf32> to vector<2x8x8xf32>
    %174 = vector.extract_strided_slice %162 {offsets = [0, 0, 8], sizes = [2, 8, 8], strides = [1, 1, 1]} : vector<2x8x32xf32> to vector<2x8x8xf32>
    %175 = vector.extract_strided_slice %162 {offsets = [0, 0, 16], sizes = [2, 8, 8], strides = [1, 1, 1]} : vector<2x8x32xf32> to vector<2x8x8xf32>
    %176 = vector.extract_strided_slice %162 {offsets = [0, 0, 24], sizes = [2, 8, 8], strides = [1, 1, 1]} : vector<2x8x32xf32> to vector<2x8x8xf32>
    %177 = tpu.concatenate %173, %174, %175, %176 in 0 : vector<2x8x8xf32>, vector<2x8x8xf32>, vector<2x8x8xf32>, vector<2x8x8xf32> -> vector<8x8x8xf32>
    "tpu.trace_start"() <{level = 10 : i32, message = "bqd,bkd->bqk"}> : () -> ()
    %cst_68 = arith.constant dense<0.000000e+00> : vector<8x8x8xf32>
    %178 = tpu.matmul %167, %172, %cst_68 {dimension_numbers = #tpu.dot_dimension_numbers<[2], [2], [1], [1], [0, 0, 0, 1, 1, 1], [0], [0]>} : vector<8x8x8xf32>, vector<8x8x8xf32>, vector<8x8x8xf32> -> vector<8x8x8xf32>
    "tpu.trace_stop"() : () -> ()
    %cst_69 = arith.constant 1.250000e-01 : f32
    %179 = vector.broadcast %cst_69 : f32 to vector<8x8x8xf32>
    %180 = arith.mulf %178, %179 : vector<8x8x8xf32>
    %cst_70 = arith.constant dense<0xFF800000> : vector<8x8xf32>
    %181 = vector.multi_reduction <maximumf>, %180, %cst_70 [2] : vector<8x8x8xf32> to vector<8x8xf32>
    %182 = vector.shape_cast %181 : vector<8x8xf32> to vector<8x8x1xf32>
    %183 = vector.broadcast %182 : vector<8x8x1xf32> to vector<8x8x8xf32>
    %184 = arith.subf %180, %183 : vector<8x8x8xf32>
    %185 = math.exp %184 : vector<8x8x8xf32>
    %cst_71 = arith.constant dense<0.000000e+00> : vector<8x8xf32>
    %186 = vector.multi_reduction <add>, %185, %cst_71 [2] : vector<8x8x8xf32> to vector<8x8xf32>
    %187 = vector.shape_cast %186 : vector<8x8xf32> to vector<8x8x1xf32>
    %188 = vector.broadcast %187 : vector<8x8x1xf32> to vector<8x8x8xf32>
    %189 = arith.divf %185, %188 : vector<8x8x8xf32>
    "tpu.trace_start"() <{level = 10 : i32, message = "bqk,bkd->bqd"}> : () -> ()
    %cst_72 = arith.constant dense<0.000000e+00> : vector<8x8x8xf32>
    %190 = tpu.matmul %189, %177, %cst_72 {dimension_numbers = #tpu.dot_dimension_numbers<[2], [1], [1], [2], [0, 0, 0, 1, 1, 2], [0], [0]>} : vector<8x8x8xf32>, vector<8x8x8xf32>, vector<8x8x8xf32> -> vector<8x8x8xf32>
    "tpu.trace_stop"() : () -> ()
    %191 = vector.extract_strided_slice %190 {offsets = [0, 0, 0], sizes = [2, 8, 8], strides = [1, 1, 1]} : vector<8x8x8xf32> to vector<2x8x8xf32>
    %192 = vector.shape_cast %191 : vector<2x8x8xf32> to vector<16x8xf32>
    %193 = vector.extract_strided_slice %159 {offsets = [0, 0], sizes = [8, 32], strides = [1, 1]} : vector<32x32xf32> to vector<8x32xf32>
    %cst_73 = arith.constant dense<0.000000e+00> : vector<16x32xf32>
    %194 = tpu.matmul %192, %193, %cst_73 {dimension_numbers = #tpu.dot_dimension_numbers<[1], [0], [0], [1], [0, 0, 1, 1], [], []>} : vector<16x8xf32>, vector<8x32xf32>, vector<16x32xf32> -> vector<16x32xf32>
    %195 = vector.broadcast %142 : vector<1x32xf32> to vector<16x32xf32>
    %196 = arith.addf %195, %194 : vector<16x32xf32>
    %197 = vector.extract_strided_slice %190 {offsets = [2, 0, 0], sizes = [2, 8, 8], strides = [1, 1, 1]} : vector<8x8x8xf32> to vector<2x8x8xf32>
    %198 = vector.shape_cast %197 : vector<2x8x8xf32> to vector<16x8xf32>
    %199 = vector.extract_strided_slice %159 {offsets = [8, 0], sizes = [8, 32], strides = [1, 1]} : vector<32x32xf32> to vector<8x32xf32>
    %cst_74 = arith.constant dense<0.000000e+00> : vector<16x32xf32>
    %200 = tpu.matmul %198, %199, %cst_74 {dimension_numbers = #tpu.dot_dimension_numbers<[1], [0], [0], [1], [0, 0, 1, 1], [], []>} : vector<16x8xf32>, vector<8x32xf32>, vector<16x32xf32> -> vector<16x32xf32>
    %201 = arith.addf %196, %200 : vector<16x32xf32>
    %202 = vector.extract_strided_slice %190 {offsets = [4, 0, 0], sizes = [2, 8, 8], strides = [1, 1, 1]} : vector<8x8x8xf32> to vector<2x8x8xf32>
    %203 = vector.shape_cast %202 : vector<2x8x8xf32> to vector<16x8xf32>
    %204 = vector.extract_strided_slice %159 {offsets = [16, 0], sizes = [8, 32], strides = [1, 1]} : vector<32x32xf32> to vector<8x32xf32>
    %cst_75 = arith.constant dense<0.000000e+00> : vector<16x32xf32>
    %205 = tpu.matmul %203, %204, %cst_75 {dimension_numbers = #tpu.dot_dimension_numbers<[1], [0], [0], [1], [0, 0, 1, 1], [], []>} : vector<16x8xf32>, vector<8x32xf32>, vector<16x32xf32> -> vector<16x32xf32>
    %206 = arith.addf %201, %205 : vector<16x32xf32>
    %207 = vector.extract_strided_slice %190 {offsets = [6, 0, 0], sizes = [2, 8, 8], strides = [1, 1, 1]} : vector<8x8x8xf32> to vector<2x8x8xf32>
    %208 = vector.shape_cast %207 : vector<2x8x8xf32> to vector<16x8xf32>
    %209 = vector.extract_strided_slice %159 {offsets = [24, 0], sizes = [8, 32], strides = [1, 1]} : vector<32x32xf32> to vector<8x32xf32>
    %cst_76 = arith.constant dense<0.000000e+00> : vector<16x32xf32>
    %210 = tpu.matmul %208, %209, %cst_76 {dimension_numbers = #tpu.dot_dimension_numbers<[1], [0], [0], [1], [0, 0, 1, 1], [], []>} : vector<16x8xf32>, vector<8x32xf32>, vector<16x32xf32> -> vector<16x32xf32>
    %211 = arith.addf %206, %210 : vector<16x32xf32>
    %212 = arith.addf %139, %211 : vector<16x32xf32>
    %cst_77 = arith.constant dense<0.000000e+00> : vector<16xf32>
    %213 = vector.multi_reduction <add>, %212, %cst_77 [1] : vector<16x32xf32> to vector<16xf32>
    %214 = vector.shape_cast %213 : vector<16xf32> to vector<16x1xf32>
    %cst_78 = arith.constant 3.200000e+01 : f32
    %215 = vector.broadcast %cst_78 : f32 to vector<16x1xf32>
    %216 = arith.divf %214, %215 : vector<16x1xf32>
    %217 = vector.broadcast %216 : vector<16x1xf32> to vector<16x32xf32>
    %218 = arith.subf %212, %217 : vector<16x32xf32>
    %219 = arith.mulf %218, %218 : vector<16x32xf32>
    %cst_79 = arith.constant dense<0.000000e+00> : vector<16xf32>
    %220 = vector.multi_reduction <add>, %219, %cst_79 [1] : vector<16x32xf32> to vector<16xf32>
    %221 = vector.shape_cast %220 : vector<16xf32> to vector<16x1xf32>
    %cst_80 = arith.constant 3.200000e+01 : f32
    %222 = vector.broadcast %cst_80 : f32 to vector<16x1xf32>
    %223 = arith.divf %221, %222 : vector<16x1xf32>
    %cst_81 = arith.constant 9.99999974E-6 : f32
    %224 = vector.broadcast %cst_81 : f32 to vector<16x1xf32>
    %225 = arith.addf %223, %224 : vector<16x1xf32>
    %226 = math.rsqrt %225 : vector<16x1xf32>
    %227 = vector.broadcast %226 : vector<16x1xf32> to vector<16x32xf32>
    %228 = arith.mulf %218, %227 : vector<16x32xf32>
    %229 = vector.broadcast %143 : vector<1x32xf32> to vector<16x32xf32>
    %230 = arith.mulf %228, %229 : vector<16x32xf32>
    %231 = vector.broadcast %144 : vector<1x32xf32> to vector<16x32xf32>
    %232 = arith.addf %230, %231 : vector<16x32xf32>
    %c1_82 = arith.constant 1 : index
    %c0_83 = arith.constant 0 : index
    %c0_84 = arith.constant 0 : index
    %233 = vector.load %arg11[%c1_82, %c0_83, %c0_84] : memref<2x32x64xf32, #tpu.memory_space<vmem>>, vector<1x32x64xf32>
    %234 = vector.shape_cast %233 : vector<1x32x64xf32> to vector<32x64xf32>
    %c1_85 = arith.constant 1 : index
    %c0_86 = arith.constant 0 : index
    %c0_87 = arith.constant 0 : index
    %235 = vector.load %arg12[%c1_85, %c0_86, %c0_87] : memref<2x1x64xf32, #tpu.memory_space<vmem>>, vector<1x1x64xf32>
    %236 = vector.shape_cast %235 : vector<1x1x64xf32> to vector<1x64xf32>
    %c1_88 = arith.constant 1 : index
    %c0_89 = arith.constant 0 : index
    %c0_90 = arith.constant 0 : index
    %237 = vector.load %arg13[%c1_88, %c0_89, %c0_90] : memref<2x64x32xf32, #tpu.memory_space<vmem>>, vector<1x64x32xf32>
    %238 = vector.shape_cast %237 : vector<1x64x32xf32> to vector<64x32xf32>
    %cst_91 = arith.constant dense<0.000000e+00> : vector<16x64xf32>
    %239 = tpu.matmul %232, %234, %cst_91 {dimension_numbers = #tpu.dot_dimension_numbers<[1], [0], [0], [1], [0, 0, 1, 1], [], []>} : vector<16x32xf32>, vector<32x64xf32>, vector<16x64xf32> -> vector<16x64xf32>
    %240 = vector.broadcast %236 : vector<1x64xf32> to vector<16x64xf32>
    %241 = arith.addf %239, %240 : vector<16x64xf32>
    %cst_92 = arith.constant 0.000000e+00 : f32
    %242 = vector.broadcast %cst_92 : f32 to vector<16x64xf32>
    %243 = arith.maximumf %241, %242 : vector<16x64xf32>
    %cst_93 = arith.constant dense<0.000000e+00> : vector<16x32xf32>
    %244 = tpu.matmul %243, %238, %cst_93 {dimension_numbers = #tpu.dot_dimension_numbers<[1], [0], [0], [1], [0, 0, 1, 1], [], []>} : vector<16x64xf32>, vector<64x32xf32>, vector<16x32xf32> -> vector<16x32xf32>
    %245 = vector.broadcast %145 : vector<1x32xf32> to vector<16x32xf32>
    %246 = arith.addf %244, %245 : vector<16x32xf32>
    %247 = arith.addf %232, %246 : vector<16x32xf32>
    %cst_94 = arith.constant dense<0.000000e+00> : vector<16xf32>
    %248 = vector.multi_reduction <add>, %247, %cst_94 [1] : vector<16x32xf32> to vector<16xf32>
    %249 = vector.shape_cast %248 : vector<16xf32> to vector<16x1xf32>
    %cst_95 = arith.constant 3.200000e+01 : f32
    %250 = vector.broadcast %cst_95 : f32 to vector<16x1xf32>
    %251 = arith.divf %249, %250 : vector<16x1xf32>
    %252 = vector.broadcast %251 : vector<16x1xf32> to vector<16x32xf32>
    %253 = arith.subf %247, %252 : vector<16x32xf32>
    %254 = arith.mulf %253, %253 : vector<16x32xf32>
    %cst_96 = arith.constant dense<0.000000e+00> : vector<16xf32>
    %255 = vector.multi_reduction <add>, %254, %cst_96 [1] : vector<16x32xf32> to vector<16xf32>
    %256 = vector.shape_cast %255 : vector<16xf32> to vector<16x1xf32>
    %cst_97 = arith.constant 3.200000e+01 : f32
    %257 = vector.broadcast %cst_97 : f32 to vector<16x1xf32>
    %258 = arith.divf %256, %257 : vector<16x1xf32>
    %cst_98 = arith.constant 9.99999974E-6 : f32
    %259 = vector.broadcast %cst_98 : f32 to vector<16x1xf32>
    %260 = arith.addf %258, %259 : vector<16x1xf32>
    %261 = math.rsqrt %260 : vector<16x1xf32>
    %262 = vector.broadcast %261 : vector<16x1xf32> to vector<16x32xf32>
    %263 = arith.mulf %253, %262 : vector<16x32xf32>
    %264 = vector.broadcast %146 : vector<1x32xf32> to vector<16x32xf32>
    %265 = arith.mulf %263, %264 : vector<16x32xf32>
    %266 = vector.broadcast %147 : vector<1x32xf32> to vector<16x32xf32>
    %267 = arith.addf %265, %266 : vector<16x32xf32>
    %268 = tpu.iota {dimensions = array<i32: 0>} : vector<8x8xi32>
    %269 = tpu.iota {dimensions = array<i32: 1>} : vector<8x8xi32>
    %270 = arith.cmpi sgt, %269, %268 : vector<8x8xi32>
    %c0_99 = arith.constant 0 : index
    %c0_100 = arith.constant 0 : index
    %c0_101 = arith.constant 0 : index
    %271 = vector.load %arg25[%c0_99, %c0_100, %c0_101] : memref<2x10x32xf32, #tpu.memory_space<vmem>>, vector<1x10x32xf32>
    %272 = vector.shape_cast %271 : vector<1x10x32xf32> to vector<10x32xf32>
    %273 = vector.extract_strided_slice %272 {offsets = [0, 0], sizes = [1, 32], strides = [1, 1]} : vector<10x32xf32> to vector<1x32xf32>
    %274 = vector.extract_strided_slice %272 {offsets = [1, 0], sizes = [1, 32], strides = [1, 1]} : vector<10x32xf32> to vector<1x32xf32>
    %275 = vector.extract_strided_slice %272 {offsets = [2, 0], sizes = [1, 32], strides = [1, 1]} : vector<10x32xf32> to vector<1x32xf32>
    %276 = vector.extract_strided_slice %272 {offsets = [3, 0], sizes = [1, 32], strides = [1, 1]} : vector<10x32xf32> to vector<1x32xf32>
    %277 = vector.extract_strided_slice %272 {offsets = [4, 0], sizes = [1, 32], strides = [1, 1]} : vector<10x32xf32> to vector<1x32xf32>
    %278 = vector.extract_strided_slice %272 {offsets = [5, 0], sizes = [1, 32], strides = [1, 1]} : vector<10x32xf32> to vector<1x32xf32>
    %279 = vector.extract_strided_slice %272 {offsets = [6, 0], sizes = [1, 32], strides = [1, 1]} : vector<10x32xf32> to vector<1x32xf32>
    %280 = vector.extract_strided_slice %272 {offsets = [7, 0], sizes = [1, 32], strides = [1, 1]} : vector<10x32xf32> to vector<1x32xf32>
    %281 = vector.extract_strided_slice %272 {offsets = [8, 0], sizes = [1, 32], strides = [1, 1]} : vector<10x32xf32> to vector<1x32xf32>
    %282 = vector.extract_strided_slice %272 {offsets = [9, 0], sizes = [1, 32], strides = [1, 1]} : vector<10x32xf32> to vector<1x32xf32>
    %c0_102 = arith.constant 0 : index
    %c0_103 = arith.constant 0 : index
    %c0_104 = arith.constant 0 : index
    %283 = vector.load %arg15[%c0_102, %c0_103, %c0_104] : memref<2x32x96xf32, #tpu.memory_space<vmem>>, vector<1x32x96xf32>
    %284 = vector.shape_cast %283 : vector<1x32x96xf32> to vector<32x96xf32>
    %cst_105 = arith.constant dense<0.000000e+00> : vector<16x96xf32>
    %285 = tpu.matmul %11, %284, %cst_105 {dimension_numbers = #tpu.dot_dimension_numbers<[1], [0], [0], [1], [0, 0, 1, 1], [], []>} : vector<16x32xf32>, vector<32x96xf32>, vector<16x96xf32> -> vector<16x96xf32>
    %c0_106 = arith.constant 0 : index
    %c0_107 = arith.constant 0 : index
    %c0_108 = arith.constant 0 : index
    %286 = vector.load %arg16[%c0_106, %c0_107, %c0_108] : memref<2x1x96xf32, #tpu.memory_space<vmem>>, vector<1x1x96xf32>
    %287 = vector.shape_cast %286 : vector<1x1x96xf32> to vector<1x96xf32>
    %288 = vector.broadcast %287 : vector<1x96xf32> to vector<16x96xf32>
    %289 = arith.addf %285, %288 : vector<16x96xf32>
    %290 = vector.extract_strided_slice %289 {offsets = [0, 0], sizes = [16, 32], strides = [1, 1]} : vector<16x96xf32> to vector<16x32xf32>
    %291 = vector.extract_strided_slice %289 {offsets = [0, 32], sizes = [16, 32], strides = [1, 1]} : vector<16x96xf32> to vector<16x32xf32>
    %292 = vector.extract_strided_slice %289 {offsets = [0, 64], sizes = [16, 32], strides = [1, 1]} : vector<16x96xf32> to vector<16x32xf32>
    %c0_109 = arith.constant 0 : index
    %c0_110 = arith.constant 0 : index
    %c0_111 = arith.constant 0 : index
    %293 = vector.load %arg17[%c0_109, %c0_110, %c0_111] : memref<2x32x32xf32, #tpu.memory_space<vmem>>, vector<1x32x32xf32>
    %294 = vector.shape_cast %293 : vector<1x32x32xf32> to vector<32x32xf32>
    %295 = vector.shape_cast %290 : vector<16x32xf32> to vector<2x8x32xf32>
    %296 = vector.shape_cast %291 : vector<16x32xf32> to vector<2x8x32xf32>
    %297 = vector.shape_cast %292 : vector<16x32xf32> to vector<2x8x32xf32>
    %298 = vector.extract_strided_slice %295 {offsets = [0, 0, 0], sizes = [2, 8, 8], strides = [1, 1, 1]} : vector<2x8x32xf32> to vector<2x8x8xf32>
    %299 = vector.extract_strided_slice %295 {offsets = [0, 0, 8], sizes = [2, 8, 8], strides = [1, 1, 1]} : vector<2x8x32xf32> to vector<2x8x8xf32>
    %300 = vector.extract_strided_slice %295 {offsets = [0, 0, 16], sizes = [2, 8, 8], strides = [1, 1, 1]} : vector<2x8x32xf32> to vector<2x8x8xf32>
    %301 = vector.extract_strided_slice %295 {offsets = [0, 0, 24], sizes = [2, 8, 8], strides = [1, 1, 1]} : vector<2x8x32xf32> to vector<2x8x8xf32>
    %302 = tpu.concatenate %298, %299, %300, %301 in 0 : vector<2x8x8xf32>, vector<2x8x8xf32>, vector<2x8x8xf32>, vector<2x8x8xf32> -> vector<8x8x8xf32>
    %303 = vector.extract_strided_slice %296 {offsets = [0, 0, 0], sizes = [2, 8, 8], strides = [1, 1, 1]} : vector<2x8x32xf32> to vector<2x8x8xf32>
    %304 = vector.extract_strided_slice %296 {offsets = [0, 0, 8], sizes = [2, 8, 8], strides = [1, 1, 1]} : vector<2x8x32xf32> to vector<2x8x8xf32>
    %305 = vector.extract_strided_slice %296 {offsets = [0, 0, 16], sizes = [2, 8, 8], strides = [1, 1, 1]} : vector<2x8x32xf32> to vector<2x8x8xf32>
    %306 = vector.extract_strided_slice %296 {offsets = [0, 0, 24], sizes = [2, 8, 8], strides = [1, 1, 1]} : vector<2x8x32xf32> to vector<2x8x8xf32>
    %307 = tpu.concatenate %303, %304, %305, %306 in 0 : vector<2x8x8xf32>, vector<2x8x8xf32>, vector<2x8x8xf32>, vector<2x8x8xf32> -> vector<8x8x8xf32>
    %308 = vector.extract_strided_slice %297 {offsets = [0, 0, 0], sizes = [2, 8, 8], strides = [1, 1, 1]} : vector<2x8x32xf32> to vector<2x8x8xf32>
    %309 = vector.extract_strided_slice %297 {offsets = [0, 0, 8], sizes = [2, 8, 8], strides = [1, 1, 1]} : vector<2x8x32xf32> to vector<2x8x8xf32>
    %310 = vector.extract_strided_slice %297 {offsets = [0, 0, 16], sizes = [2, 8, 8], strides = [1, 1, 1]} : vector<2x8x32xf32> to vector<2x8x8xf32>
    %311 = vector.extract_strided_slice %297 {offsets = [0, 0, 24], sizes = [2, 8, 8], strides = [1, 1, 1]} : vector<2x8x32xf32> to vector<2x8x8xf32>
    %312 = tpu.concatenate %308, %309, %310, %311 in 0 : vector<2x8x8xf32>, vector<2x8x8xf32>, vector<2x8x8xf32>, vector<2x8x8xf32> -> vector<8x8x8xf32>
    "tpu.trace_start"() <{level = 10 : i32, message = "bqd,bkd->bqk"}> : () -> ()
    %cst_112 = arith.constant dense<0.000000e+00> : vector<8x8x8xf32>
    %313 = tpu.matmul %302, %307, %cst_112 {dimension_numbers = #tpu.dot_dimension_numbers<[2], [2], [1], [1], [0, 0, 0, 1, 1, 1], [0], [0]>} : vector<8x8x8xf32>, vector<8x8x8xf32>, vector<8x8x8xf32> -> vector<8x8x8xf32>
    "tpu.trace_stop"() : () -> ()
    %cst_113 = arith.constant 1.250000e-01 : f32
    %314 = vector.broadcast %cst_113 : f32 to vector<8x8x8xf32>
    %315 = arith.mulf %313, %314 : vector<8x8x8xf32>
    %cst_114 = arith.constant 0xFF800000 : f32
    %316 = vector.shape_cast %270 : vector<8x8xi1> to vector<1x8x8xi1>
    %317 = vector.broadcast %316 : vector<1x8x8xi1> to vector<8x8x8xi1>
    %318 = vector.broadcast %cst_114 : f32 to vector<8x8x8xf32>
    %319 = arith.select %317, %318, %315 : vector<8x8x8xi1>, vector<8x8x8xf32>
    %cst_115 = arith.constant dense<0xFF800000> : vector<8x8xf32>
    %320 = vector.multi_reduction <maximumf>, %319, %cst_115 [2] : vector<8x8x8xf32> to vector<8x8xf32>
    %321 = vector.shape_cast %320 : vector<8x8xf32> to vector<8x8x1xf32>
    %322 = vector.broadcast %321 : vector<8x8x1xf32> to vector<8x8x8xf32>
    %323 = arith.subf %319, %322 : vector<8x8x8xf32>
    %324 = math.exp %323 : vector<8x8x8xf32>
    %cst_116 = arith.constant dense<0.000000e+00> : vector<8x8xf32>
    %325 = vector.multi_reduction <add>, %324, %cst_116 [2] : vector<8x8x8xf32> to vector<8x8xf32>
    %326 = vector.shape_cast %325 : vector<8x8xf32> to vector<8x8x1xf32>
    %327 = vector.broadcast %326 : vector<8x8x1xf32> to vector<8x8x8xf32>
    %328 = arith.divf %324, %327 : vector<8x8x8xf32>
    "tpu.trace_start"() <{level = 10 : i32, message = "bqk,bkd->bqd"}> : () -> ()
    %cst_117 = arith.constant dense<0.000000e+00> : vector<8x8x8xf32>
    %329 = tpu.matmul %328, %312, %cst_117 {dimension_numbers = #tpu.dot_dimension_numbers<[2], [1], [1], [2], [0, 0, 0, 1, 1, 2], [0], [0]>} : vector<8x8x8xf32>, vector<8x8x8xf32>, vector<8x8x8xf32> -> vector<8x8x8xf32>
    "tpu.trace_stop"() : () -> ()
    %330 = vector.extract_strided_slice %329 {offsets = [0, 0, 0], sizes = [2, 8, 8], strides = [1, 1, 1]} : vector<8x8x8xf32> to vector<2x8x8xf32>
    %331 = vector.shape_cast %330 : vector<2x8x8xf32> to vector<16x8xf32>
    %332 = vector.extract_strided_slice %294 {offsets = [0, 0], sizes = [8, 32], strides = [1, 1]} : vector<32x32xf32> to vector<8x32xf32>
    %cst_118 = arith.constant dense<0.000000e+00> : vector<16x32xf32>
    %333 = tpu.matmul %331, %332, %cst_118 {dimension_numbers = #tpu.dot_dimension_numbers<[1], [0], [0], [1], [0, 0, 1, 1], [], []>} : vector<16x8xf32>, vector<8x32xf32>, vector<16x32xf32> -> vector<16x32xf32>
    %334 = vector.broadcast %273 : vector<1x32xf32> to vector<16x32xf32>
    %335 = arith.addf %334, %333 : vector<16x32xf32>
    %336 = vector.extract_strided_slice %329 {offsets = [2, 0, 0], sizes = [2, 8, 8], strides = [1, 1, 1]} : vector<8x8x8xf32> to vector<2x8x8xf32>
    %337 = vector.shape_cast %336 : vector<2x8x8xf32> to vector<16x8xf32>
    %338 = vector.extract_strided_slice %294 {offsets = [8, 0], sizes = [8, 32], strides = [1, 1]} : vector<32x32xf32> to vector<8x32xf32>
    %cst_119 = arith.constant dense<0.000000e+00> : vector<16x32xf32>
    %339 = tpu.matmul %337, %338, %cst_119 {dimension_numbers = #tpu.dot_dimension_numbers<[1], [0], [0], [1], [0, 0, 1, 1], [], []>} : vector<16x8xf32>, vector<8x32xf32>, vector<16x32xf32> -> vector<16x32xf32>
    %340 = arith.addf %335, %339 : vector<16x32xf32>
    %341 = vector.extract_strided_slice %329 {offsets = [4, 0, 0], sizes = [2, 8, 8], strides = [1, 1, 1]} : vector<8x8x8xf32> to vector<2x8x8xf32>
    %342 = vector.shape_cast %341 : vector<2x8x8xf32> to vector<16x8xf32>
    %343 = vector.extract_strided_slice %294 {offsets = [16, 0], sizes = [8, 32], strides = [1, 1]} : vector<32x32xf32> to vector<8x32xf32>
    %cst_120 = arith.constant dense<0.000000e+00> : vector<16x32xf32>
    %344 = tpu.matmul %342, %343, %cst_120 {dimension_numbers = #tpu.dot_dimension_numbers<[1], [0], [0], [1], [0, 0, 1, 1], [], []>} : vector<16x8xf32>, vector<8x32xf32>, vector<16x32xf32> -> vector<16x32xf32>
    %345 = arith.addf %340, %344 : vector<16x32xf32>
    %346 = vector.extract_strided_slice %329 {offsets = [6, 0, 0], sizes = [2, 8, 8], strides = [1, 1, 1]} : vector<8x8x8xf32> to vector<2x8x8xf32>
    %347 = vector.shape_cast %346 : vector<2x8x8xf32> to vector<16x8xf32>
    %348 = vector.extract_strided_slice %294 {offsets = [24, 0], sizes = [8, 32], strides = [1, 1]} : vector<32x32xf32> to vector<8x32xf32>
    %cst_121 = arith.constant dense<0.000000e+00> : vector<16x32xf32>
    %349 = tpu.matmul %347, %348, %cst_121 {dimension_numbers = #tpu.dot_dimension_numbers<[1], [0], [0], [1], [0, 0, 1, 1], [], []>} : vector<16x8xf32>, vector<8x32xf32>, vector<16x32xf32> -> vector<16x32xf32>
    %350 = arith.addf %345, %349 : vector<16x32xf32>
    %351 = arith.addf %11, %350 : vector<16x32xf32>
    %cst_122 = arith.constant dense<0.000000e+00> : vector<16xf32>
    %352 = vector.multi_reduction <add>, %351, %cst_122 [1] : vector<16x32xf32> to vector<16xf32>
    %353 = vector.shape_cast %352 : vector<16xf32> to vector<16x1xf32>
    %cst_123 = arith.constant 3.200000e+01 : f32
    %354 = vector.broadcast %cst_123 : f32 to vector<16x1xf32>
    %355 = arith.divf %353, %354 : vector<16x1xf32>
    %356 = vector.broadcast %355 : vector<16x1xf32> to vector<16x32xf32>
    %357 = arith.subf %351, %356 : vector<16x32xf32>
    %358 = arith.mulf %357, %357 : vector<16x32xf32>
    %cst_124 = arith.constant dense<0.000000e+00> : vector<16xf32>
    %359 = vector.multi_reduction <add>, %358, %cst_124 [1] : vector<16x32xf32> to vector<16xf32>
    %360 = vector.shape_cast %359 : vector<16xf32> to vector<16x1xf32>
    %cst_125 = arith.constant 3.200000e+01 : f32
    %361 = vector.broadcast %cst_125 : f32 to vector<16x1xf32>
    %362 = arith.divf %360, %361 : vector<16x1xf32>
    %cst_126 = arith.constant 9.99999974E-6 : f32
    %363 = vector.broadcast %cst_126 : f32 to vector<16x1xf32>
    %364 = arith.addf %362, %363 : vector<16x1xf32>
    %365 = math.rsqrt %364 : vector<16x1xf32>
    %366 = vector.broadcast %365 : vector<16x1xf32> to vector<16x32xf32>
    %367 = arith.mulf %357, %366 : vector<16x32xf32>
    %368 = vector.broadcast %274 : vector<1x32xf32> to vector<16x32xf32>
    %369 = arith.mulf %367, %368 : vector<16x32xf32>
    %370 = vector.broadcast %275 : vector<1x32xf32> to vector<16x32xf32>
    %371 = arith.addf %369, %370 : vector<16x32xf32>
    %c0_127 = arith.constant 0 : index
    %c0_128 = arith.constant 0 : index
    %c0_129 = arith.constant 0 : index
    %372 = vector.load %arg18[%c0_127, %c0_128, %c0_129] : memref<2x32x32xf32, #tpu.memory_space<vmem>>, vector<1x32x32xf32>
    %373 = vector.shape_cast %372 : vector<1x32x32xf32> to vector<32x32xf32>
    %cst_130 = arith.constant dense<0.000000e+00> : vector<16x32xf32>
    %374 = tpu.matmul %371, %373, %cst_130 {dimension_numbers = #tpu.dot_dimension_numbers<[1], [0], [0], [1], [0, 0, 1, 1], [], []>} : vector<16x32xf32>, vector<32x32xf32>, vector<16x32xf32> -> vector<16x32xf32>
    %375 = vector.broadcast %276 : vector<1x32xf32> to vector<16x32xf32>
    %376 = arith.addf %374, %375 : vector<16x32xf32>
    %c0_131 = arith.constant 0 : index
    %c0_132 = arith.constant 0 : index
    %c0_133 = arith.constant 0 : index
    %377 = vector.load %arg19[%c0_131, %c0_132, %c0_133] : memref<2x32x64xf32, #tpu.memory_space<vmem>>, vector<1x32x64xf32>
    %378 = vector.shape_cast %377 : vector<1x32x64xf32> to vector<32x64xf32>
    %cst_134 = arith.constant dense<0.000000e+00> : vector<16x64xf32>
    %379 = tpu.matmul %267, %378, %cst_134 {dimension_numbers = #tpu.dot_dimension_numbers<[1], [0], [0], [1], [0, 0, 1, 1], [], []>} : vector<16x32xf32>, vector<32x64xf32>, vector<16x64xf32> -> vector<16x64xf32>
    %c0_135 = arith.constant 0 : index
    %c0_136 = arith.constant 0 : index
    %c0_137 = arith.constant 0 : index
    %380 = vector.load %arg20[%c0_135, %c0_136, %c0_137] : memref<2x1x64xf32, #tpu.memory_space<vmem>>, vector<1x1x64xf32>
    %381 = vector.shape_cast %380 : vector<1x1x64xf32> to vector<1x64xf32>
    %382 = vector.broadcast %381 : vector<1x64xf32> to vector<16x64xf32>
    %383 = arith.addf %379, %382 : vector<16x64xf32>
    %384 = vector.extract_strided_slice %383 {offsets = [0, 0], sizes = [16, 32], strides = [1, 1]} : vector<16x64xf32> to vector<16x32xf32>
    %385 = vector.extract_strided_slice %383 {offsets = [0, 32], sizes = [16, 32], strides = [1, 1]} : vector<16x64xf32> to vector<16x32xf32>
    %c0_138 = arith.constant 0 : index
    %c0_139 = arith.constant 0 : index
    %c0_140 = arith.constant 0 : index
    %386 = vector.load %arg21[%c0_138, %c0_139, %c0_140] : memref<2x32x32xf32, #tpu.memory_space<vmem>>, vector<1x32x32xf32>
    %387 = vector.shape_cast %386 : vector<1x32x32xf32> to vector<32x32xf32>
    %388 = vector.shape_cast %376 : vector<16x32xf32> to vector<2x8x32xf32>
    %389 = vector.shape_cast %384 : vector<16x32xf32> to vector<2x8x32xf32>
    %390 = vector.shape_cast %385 : vector<16x32xf32> to vector<2x8x32xf32>
    %391 = vector.extract_strided_slice %388 {offsets = [0, 0, 0], sizes = [2, 8, 8], strides = [1, 1, 1]} : vector<2x8x32xf32> to vector<2x8x8xf32>
    %392 = vector.extract_strided_slice %388 {offsets = [0, 0, 8], sizes = [2, 8, 8], strides = [1, 1, 1]} : vector<2x8x32xf32> to vector<2x8x8xf32>
    %393 = vector.extract_strided_slice %388 {offsets = [0, 0, 16], sizes = [2, 8, 8], strides = [1, 1, 1]} : vector<2x8x32xf32> to vector<2x8x8xf32>
    %394 = vector.extract_strided_slice %388 {offsets = [0, 0, 24], sizes = [2, 8, 8], strides = [1, 1, 1]} : vector<2x8x32xf32> to vector<2x8x8xf32>
    %395 = tpu.concatenate %391, %392, %393, %394 in 0 : vector<2x8x8xf32>, vector<2x8x8xf32>, vector<2x8x8xf32>, vector<2x8x8xf32> -> vector<8x8x8xf32>
    %396 = vector.extract_strided_slice %389 {offsets = [0, 0, 0], sizes = [2, 8, 8], strides = [1, 1, 1]} : vector<2x8x32xf32> to vector<2x8x8xf32>
    %397 = vector.extract_strided_slice %389 {offsets = [0, 0, 8], sizes = [2, 8, 8], strides = [1, 1, 1]} : vector<2x8x32xf32> to vector<2x8x8xf32>
    %398 = vector.extract_strided_slice %389 {offsets = [0, 0, 16], sizes = [2, 8, 8], strides = [1, 1, 1]} : vector<2x8x32xf32> to vector<2x8x8xf32>
    %399 = vector.extract_strided_slice %389 {offsets = [0, 0, 24], sizes = [2, 8, 8], strides = [1, 1, 1]} : vector<2x8x32xf32> to vector<2x8x8xf32>
    %400 = tpu.concatenate %396, %397, %398, %399 in 0 : vector<2x8x8xf32>, vector<2x8x8xf32>, vector<2x8x8xf32>, vector<2x8x8xf32> -> vector<8x8x8xf32>
    %401 = vector.extract_strided_slice %390 {offsets = [0, 0, 0], sizes = [2, 8, 8], strides = [1, 1, 1]} : vector<2x8x32xf32> to vector<2x8x8xf32>
    %402 = vector.extract_strided_slice %390 {offsets = [0, 0, 8], sizes = [2, 8, 8], strides = [1, 1, 1]} : vector<2x8x32xf32> to vector<2x8x8xf32>
    %403 = vector.extract_strided_slice %390 {offsets = [0, 0, 16], sizes = [2, 8, 8], strides = [1, 1, 1]} : vector<2x8x32xf32> to vector<2x8x8xf32>
    %404 = vector.extract_strided_slice %390 {offsets = [0, 0, 24], sizes = [2, 8, 8], strides = [1, 1, 1]} : vector<2x8x32xf32> to vector<2x8x8xf32>
    %405 = tpu.concatenate %401, %402, %403, %404 in 0 : vector<2x8x8xf32>, vector<2x8x8xf32>, vector<2x8x8xf32>, vector<2x8x8xf32> -> vector<8x8x8xf32>
    "tpu.trace_start"() <{level = 10 : i32, message = "bqd,bkd->bqk"}> : () -> ()
    %cst_141 = arith.constant dense<0.000000e+00> : vector<8x8x8xf32>
    %406 = tpu.matmul %395, %400, %cst_141 {dimension_numbers = #tpu.dot_dimension_numbers<[2], [2], [1], [1], [0, 0, 0, 1, 1, 1], [0], [0]>} : vector<8x8x8xf32>, vector<8x8x8xf32>, vector<8x8x8xf32> -> vector<8x8x8xf32>
    "tpu.trace_stop"() : () -> ()
    %cst_142 = arith.constant 1.250000e-01 : f32
    %407 = vector.broadcast %cst_142 : f32 to vector<8x8x8xf32>
    %408 = arith.mulf %406, %407 : vector<8x8x8xf32>
    %cst_143 = arith.constant dense<0xFF800000> : vector<8x8xf32>
    %409 = vector.multi_reduction <maximumf>, %408, %cst_143 [2] : vector<8x8x8xf32> to vector<8x8xf32>
    %410 = vector.shape_cast %409 : vector<8x8xf32> to vector<8x8x1xf32>
    %411 = vector.broadcast %410 : vector<8x8x1xf32> to vector<8x8x8xf32>
    %412 = arith.subf %408, %411 : vector<8x8x8xf32>
    %413 = math.exp %412 : vector<8x8x8xf32>
    %cst_144 = arith.constant dense<0.000000e+00> : vector<8x8xf32>
    %414 = vector.multi_reduction <add>, %413, %cst_144 [2] : vector<8x8x8xf32> to vector<8x8xf32>
    %415 = vector.shape_cast %414 : vector<8x8xf32> to vector<8x8x1xf32>
    %416 = vector.broadcast %415 : vector<8x8x1xf32> to vector<8x8x8xf32>
    %417 = arith.divf %413, %416 : vector<8x8x8xf32>
    "tpu.trace_start"() <{level = 10 : i32, message = "bqk,bkd->bqd"}> : () -> ()
    %cst_145 = arith.constant dense<0.000000e+00> : vector<8x8x8xf32>
    %418 = tpu.matmul %417, %405, %cst_145 {dimension_numbers = #tpu.dot_dimension_numbers<[2], [1], [1], [2], [0, 0, 0, 1, 1, 2], [0], [0]>} : vector<8x8x8xf32>, vector<8x8x8xf32>, vector<8x8x8xf32> -> vector<8x8x8xf32>
    "tpu.trace_stop"() : () -> ()
    %419 = vector.extract_strided_slice %418 {offsets = [0, 0, 0], sizes = [2, 8, 8], strides = [1, 1, 1]} : vector<8x8x8xf32> to vector<2x8x8xf32>
    %420 = vector.shape_cast %419 : vector<2x8x8xf32> to vector<16x8xf32>
    %421 = vector.extract_strided_slice %387 {offsets = [0, 0], sizes = [8, 32], strides = [1, 1]} : vector<32x32xf32> to vector<8x32xf32>
    %cst_146 = arith.constant dense<0.000000e+00> : vector<16x32xf32>
    %422 = tpu.matmul %420, %421, %cst_146 {dimension_numbers = #tpu.dot_dimension_numbers<[1], [0], [0], [1], [0, 0, 1, 1], [], []>} : vector<16x8xf32>, vector<8x32xf32>, vector<16x32xf32> -> vector<16x32xf32>
    %423 = vector.broadcast %277 : vector<1x32xf32> to vector<16x32xf32>
    %424 = arith.addf %423, %422 : vector<16x32xf32>
    %425 = vector.extract_strided_slice %418 {offsets = [2, 0, 0], sizes = [2, 8, 8], strides = [1, 1, 1]} : vector<8x8x8xf32> to vector<2x8x8xf32>
    %426 = vector.shape_cast %425 : vector<2x8x8xf32> to vector<16x8xf32>
    %427 = vector.extract_strided_slice %387 {offsets = [8, 0], sizes = [8, 32], strides = [1, 1]} : vector<32x32xf32> to vector<8x32xf32>
    %cst_147 = arith.constant dense<0.000000e+00> : vector<16x32xf32>
    %428 = tpu.matmul %426, %427, %cst_147 {dimension_numbers = #tpu.dot_dimension_numbers<[1], [0], [0], [1], [0, 0, 1, 1], [], []>} : vector<16x8xf32>, vector<8x32xf32>, vector<16x32xf32> -> vector<16x32xf32>
    %429 = arith.addf %424, %428 : vector<16x32xf32>
    %430 = vector.extract_strided_slice %418 {offsets = [4, 0, 0], sizes = [2, 8, 8], strides = [1, 1, 1]} : vector<8x8x8xf32> to vector<2x8x8xf32>
    %431 = vector.shape_cast %430 : vector<2x8x8xf32> to vector<16x8xf32>
    %432 = vector.extract_strided_slice %387 {offsets = [16, 0], sizes = [8, 32], strides = [1, 1]} : vector<32x32xf32> to vector<8x32xf32>
    %cst_148 = arith.constant dense<0.000000e+00> : vector<16x32xf32>
    %433 = tpu.matmul %431, %432, %cst_148 {dimension_numbers = #tpu.dot_dimension_numbers<[1], [0], [0], [1], [0, 0, 1, 1], [], []>} : vector<16x8xf32>, vector<8x32xf32>, vector<16x32xf32> -> vector<16x32xf32>
    %434 = arith.addf %429, %433 : vector<16x32xf32>
    %435 = vector.extract_strided_slice %418 {offsets = [6, 0, 0], sizes = [2, 8, 8], strides = [1, 1, 1]} : vector<8x8x8xf32> to vector<2x8x8xf32>
    %436 = vector.shape_cast %435 : vector<2x8x8xf32> to vector<16x8xf32>
    %437 = vector.extract_strided_slice %387 {offsets = [24, 0], sizes = [8, 32], strides = [1, 1]} : vector<32x32xf32> to vector<8x32xf32>
    %cst_149 = arith.constant dense<0.000000e+00> : vector<16x32xf32>
    %438 = tpu.matmul %436, %437, %cst_149 {dimension_numbers = #tpu.dot_dimension_numbers<[1], [0], [0], [1], [0, 0, 1, 1], [], []>} : vector<16x8xf32>, vector<8x32xf32>, vector<16x32xf32> -> vector<16x32xf32>
    %439 = arith.addf %434, %438 : vector<16x32xf32>
    %440 = arith.addf %371, %439 : vector<16x32xf32>
    %cst_150 = arith.constant dense<0.000000e+00> : vector<16xf32>
    %441 = vector.multi_reduction <add>, %440, %cst_150 [1] : vector<16x32xf32> to vector<16xf32>
    %442 = vector.shape_cast %441 : vector<16xf32> to vector<16x1xf32>
    %cst_151 = arith.constant 3.200000e+01 : f32
    %443 = vector.broadcast %cst_151 : f32 to vector<16x1xf32>
    %444 = arith.divf %442, %443 : vector<16x1xf32>
    %445 = vector.broadcast %444 : vector<16x1xf32> to vector<16x32xf32>
    %446 = arith.subf %440, %445 : vector<16x32xf32>
    %447 = arith.mulf %446, %446 : vector<16x32xf32>
    %cst_152 = arith.constant dense<0.000000e+00> : vector<16xf32>
    %448 = vector.multi_reduction <add>, %447, %cst_152 [1] : vector<16x32xf32> to vector<16xf32>
    %449 = vector.shape_cast %448 : vector<16xf32> to vector<16x1xf32>
    %cst_153 = arith.constant 3.200000e+01 : f32
    %450 = vector.broadcast %cst_153 : f32 to vector<16x1xf32>
    %451 = arith.divf %449, %450 : vector<16x1xf32>
    %cst_154 = arith.constant 9.99999974E-6 : f32
    %452 = vector.broadcast %cst_154 : f32 to vector<16x1xf32>
    %453 = arith.addf %451, %452 : vector<16x1xf32>
    %454 = math.rsqrt %453 : vector<16x1xf32>
    %455 = vector.broadcast %454 : vector<16x1xf32> to vector<16x32xf32>
    %456 = arith.mulf %446, %455 : vector<16x32xf32>
    %457 = vector.broadcast %278 : vector<1x32xf32> to vector<16x32xf32>
    %458 = arith.mulf %456, %457 : vector<16x32xf32>
    %459 = vector.broadcast %279 : vector<1x32xf32> to vector<16x32xf32>
    %460 = arith.addf %458, %459 : vector<16x32xf32>
    %c0_155 = arith.constant 0 : index
    %c0_156 = arith.constant 0 : index
    %c0_157 = arith.constant 0 : index
    %461 = vector.load %arg22[%c0_155, %c0_156, %c0_157] : memref<2x32x64xf32, #tpu.memory_space<vmem>>, vector<1x32x64xf32>
    %462 = vector.shape_cast %461 : vector<1x32x64xf32> to vector<32x64xf32>
    %c0_158 = arith.constant 0 : index
    %c0_159 = arith.constant 0 : index
    %c0_160 = arith.constant 0 : index
    %463 = vector.load %arg23[%c0_158, %c0_159, %c0_160] : memref<2x1x64xf32, #tpu.memory_space<vmem>>, vector<1x1x64xf32>
    %464 = vector.shape_cast %463 : vector<1x1x64xf32> to vector<1x64xf32>
    %c0_161 = arith.constant 0 : index
    %c0_162 = arith.constant 0 : index
    %c0_163 = arith.constant 0 : index
    %465 = vector.load %arg24[%c0_161, %c0_162, %c0_163] : memref<2x64x32xf32, #tpu.memory_space<vmem>>, vector<1x64x32xf32>
    %466 = vector.shape_cast %465 : vector<1x64x32xf32> to vector<64x32xf32>
    %cst_164 = arith.constant dense<0.000000e+00> : vector<16x64xf32>
    %467 = tpu.matmul %460, %462, %cst_164 {dimension_numbers = #tpu.dot_dimension_numbers<[1], [0], [0], [1], [0, 0, 1, 1], [], []>} : vector<16x32xf32>, vector<32x64xf32>, vector<16x64xf32> -> vector<16x64xf32>
    %468 = vector.broadcast %464 : vector<1x64xf32> to vector<16x64xf32>
    %469 = arith.addf %467, %468 : vector<16x64xf32>
    %cst_165 = arith.constant 0.000000e+00 : f32
    %470 = vector.broadcast %cst_165 : f32 to vector<16x64xf32>
    %471 = arith.maximumf %469, %470 : vector<16x64xf32>
    %cst_166 = arith.constant dense<0.000000e+00> : vector<16x32xf32>
    %472 = tpu.matmul %471, %466, %cst_166 {dimension_numbers = #tpu.dot_dimension_numbers<[1], [0], [0], [1], [0, 0, 1, 1], [], []>} : vector<16x64xf32>, vector<64x32xf32>, vector<16x32xf32> -> vector<16x32xf32>
    %473 = vector.broadcast %280 : vector<1x32xf32> to vector<16x32xf32>
    %474 = arith.addf %472, %473 : vector<16x32xf32>
    %475 = arith.addf %460, %474 : vector<16x32xf32>
    %cst_167 = arith.constant dense<0.000000e+00> : vector<16xf32>
    %476 = vector.multi_reduction <add>, %475, %cst_167 [1] : vector<16x32xf32> to vector<16xf32>
    %477 = vector.shape_cast %476 : vector<16xf32> to vector<16x1xf32>
    %cst_168 = arith.constant 3.200000e+01 : f32
    %478 = vector.broadcast %cst_168 : f32 to vector<16x1xf32>
    %479 = arith.divf %477, %478 : vector<16x1xf32>
    %480 = vector.broadcast %479 : vector<16x1xf32> to vector<16x32xf32>
    %481 = arith.subf %475, %480 : vector<16x32xf32>
    %482 = arith.mulf %481, %481 : vector<16x32xf32>
    %cst_169 = arith.constant dense<0.000000e+00> : vector<16xf32>
    %483 = vector.multi_reduction <add>, %482, %cst_169 [1] : vector<16x32xf32> to vector<16xf32>
    %484 = vector.shape_cast %483 : vector<16xf32> to vector<16x1xf32>
    %cst_170 = arith.constant 3.200000e+01 : f32
    %485 = vector.broadcast %cst_170 : f32 to vector<16x1xf32>
    %486 = arith.divf %484, %485 : vector<16x1xf32>
    %cst_171 = arith.constant 9.99999974E-6 : f32
    %487 = vector.broadcast %cst_171 : f32 to vector<16x1xf32>
    %488 = arith.addf %486, %487 : vector<16x1xf32>
    %489 = math.rsqrt %488 : vector<16x1xf32>
    %490 = vector.broadcast %489 : vector<16x1xf32> to vector<16x32xf32>
    %491 = arith.mulf %481, %490 : vector<16x32xf32>
    %492 = vector.broadcast %281 : vector<1x32xf32> to vector<16x32xf32>
    %493 = arith.mulf %491, %492 : vector<16x32xf32>
    %494 = vector.broadcast %282 : vector<1x32xf32> to vector<16x32xf32>
    %495 = arith.addf %493, %494 : vector<16x32xf32>
    %c1_172 = arith.constant 1 : index
    %c0_173 = arith.constant 0 : index
    %c0_174 = arith.constant 0 : index
    %496 = vector.load %arg25[%c1_172, %c0_173, %c0_174] : memref<2x10x32xf32, #tpu.memory_space<vmem>>, vector<1x10x32xf32>
    %497 = vector.shape_cast %496 : vector<1x10x32xf32> to vector<10x32xf32>
    %498 = vector.extract_strided_slice %497 {offsets = [0, 0], sizes = [1, 32], strides = [1, 1]} : vector<10x32xf32> to vector<1x32xf32>
    %499 = vector.extract_strided_slice %497 {offsets = [1, 0], sizes = [1, 32], strides = [1, 1]} : vector<10x32xf32> to vector<1x32xf32>
    %500 = vector.extract_strided_slice %497 {offsets = [2, 0], sizes = [1, 32], strides = [1, 1]} : vector<10x32xf32> to vector<1x32xf32>
    %501 = vector.extract_strided_slice %497 {offsets = [3, 0], sizes = [1, 32], strides = [1, 1]} : vector<10x32xf32> to vector<1x32xf32>
    %502 = vector.extract_strided_slice %497 {offsets = [4, 0], sizes = [1, 32], strides = [1, 1]} : vector<10x32xf32> to vector<1x32xf32>
    %503 = vector.extract_strided_slice %497 {offsets = [5, 0], sizes = [1, 32], strides = [1, 1]} : vector<10x32xf32> to vector<1x32xf32>
    %504 = vector.extract_strided_slice %497 {offsets = [6, 0], sizes = [1, 32], strides = [1, 1]} : vector<10x32xf32> to vector<1x32xf32>
    %505 = vector.extract_strided_slice %497 {offsets = [7, 0], sizes = [1, 32], strides = [1, 1]} : vector<10x32xf32> to vector<1x32xf32>
    %506 = vector.extract_strided_slice %497 {offsets = [8, 0], sizes = [1, 32], strides = [1, 1]} : vector<10x32xf32> to vector<1x32xf32>
    %507 = vector.extract_strided_slice %497 {offsets = [9, 0], sizes = [1, 32], strides = [1, 1]} : vector<10x32xf32> to vector<1x32xf32>
    %c1_175 = arith.constant 1 : index
    %c0_176 = arith.constant 0 : index
    %c0_177 = arith.constant 0 : index
    %508 = vector.load %arg15[%c1_175, %c0_176, %c0_177] : memref<2x32x96xf32, #tpu.memory_space<vmem>>, vector<1x32x96xf32>
    %509 = vector.shape_cast %508 : vector<1x32x96xf32> to vector<32x96xf32>
    %cst_178 = arith.constant dense<0.000000e+00> : vector<16x96xf32>
    %510 = tpu.matmul %495, %509, %cst_178 {dimension_numbers = #tpu.dot_dimension_numbers<[1], [0], [0], [1], [0, 0, 1, 1], [], []>} : vector<16x32xf32>, vector<32x96xf32>, vector<16x96xf32> -> vector<16x96xf32>
    %c1_179 = arith.constant 1 : index
    %c0_180 = arith.constant 0 : index
    %c0_181 = arith.constant 0 : index
    %511 = vector.load %arg16[%c1_179, %c0_180, %c0_181] : memref<2x1x96xf32, #tpu.memory_space<vmem>>, vector<1x1x96xf32>
    %512 = vector.shape_cast %511 : vector<1x1x96xf32> to vector<1x96xf32>
    %513 = vector.broadcast %512 : vector<1x96xf32> to vector<16x96xf32>
    %514 = arith.addf %510, %513 : vector<16x96xf32>
    %515 = vector.extract_strided_slice %514 {offsets = [0, 0], sizes = [16, 32], strides = [1, 1]} : vector<16x96xf32> to vector<16x32xf32>
    %516 = vector.extract_strided_slice %514 {offsets = [0, 32], sizes = [16, 32], strides = [1, 1]} : vector<16x96xf32> to vector<16x32xf32>
    %517 = vector.extract_strided_slice %514 {offsets = [0, 64], sizes = [16, 32], strides = [1, 1]} : vector<16x96xf32> to vector<16x32xf32>
    %c1_182 = arith.constant 1 : index
    %c0_183 = arith.constant 0 : index
    %c0_184 = arith.constant 0 : index
    %518 = vector.load %arg17[%c1_182, %c0_183, %c0_184] : memref<2x32x32xf32, #tpu.memory_space<vmem>>, vector<1x32x32xf32>
    %519 = vector.shape_cast %518 : vector<1x32x32xf32> to vector<32x32xf32>
    %520 = vector.shape_cast %515 : vector<16x32xf32> to vector<2x8x32xf32>
    %521 = vector.shape_cast %516 : vector<16x32xf32> to vector<2x8x32xf32>
    %522 = vector.shape_cast %517 : vector<16x32xf32> to vector<2x8x32xf32>
    %523 = vector.extract_strided_slice %520 {offsets = [0, 0, 0], sizes = [2, 8, 8], strides = [1, 1, 1]} : vector<2x8x32xf32> to vector<2x8x8xf32>
    %524 = vector.extract_strided_slice %520 {offsets = [0, 0, 8], sizes = [2, 8, 8], strides = [1, 1, 1]} : vector<2x8x32xf32> to vector<2x8x8xf32>
    %525 = vector.extract_strided_slice %520 {offsets = [0, 0, 16], sizes = [2, 8, 8], strides = [1, 1, 1]} : vector<2x8x32xf32> to vector<2x8x8xf32>
    %526 = vector.extract_strided_slice %520 {offsets = [0, 0, 24], sizes = [2, 8, 8], strides = [1, 1, 1]} : vector<2x8x32xf32> to vector<2x8x8xf32>
    %527 = tpu.concatenate %523, %524, %525, %526 in 0 : vector<2x8x8xf32>, vector<2x8x8xf32>, vector<2x8x8xf32>, vector<2x8x8xf32> -> vector<8x8x8xf32>
    %528 = vector.extract_strided_slice %521 {offsets = [0, 0, 0], sizes = [2, 8, 8], strides = [1, 1, 1]} : vector<2x8x32xf32> to vector<2x8x8xf32>
    %529 = vector.extract_strided_slice %521 {offsets = [0, 0, 8], sizes = [2, 8, 8], strides = [1, 1, 1]} : vector<2x8x32xf32> to vector<2x8x8xf32>
    %530 = vector.extract_strided_slice %521 {offsets = [0, 0, 16], sizes = [2, 8, 8], strides = [1, 1, 1]} : vector<2x8x32xf32> to vector<2x8x8xf32>
    %531 = vector.extract_strided_slice %521 {offsets = [0, 0, 24], sizes = [2, 8, 8], strides = [1, 1, 1]} : vector<2x8x32xf32> to vector<2x8x8xf32>
    %532 = tpu.concatenate %528, %529, %530, %531 in 0 : vector<2x8x8xf32>, vector<2x8x8xf32>, vector<2x8x8xf32>, vector<2x8x8xf32> -> vector<8x8x8xf32>
    %533 = vector.extract_strided_slice %522 {offsets = [0, 0, 0], sizes = [2, 8, 8], strides = [1, 1, 1]} : vector<2x8x32xf32> to vector<2x8x8xf32>
    %534 = vector.extract_strided_slice %522 {offsets = [0, 0, 8], sizes = [2, 8, 8], strides = [1, 1, 1]} : vector<2x8x32xf32> to vector<2x8x8xf32>
    %535 = vector.extract_strided_slice %522 {offsets = [0, 0, 16], sizes = [2, 8, 8], strides = [1, 1, 1]} : vector<2x8x32xf32> to vector<2x8x8xf32>
    %536 = vector.extract_strided_slice %522 {offsets = [0, 0, 24], sizes = [2, 8, 8], strides = [1, 1, 1]} : vector<2x8x32xf32> to vector<2x8x8xf32>
    %537 = tpu.concatenate %533, %534, %535, %536 in 0 : vector<2x8x8xf32>, vector<2x8x8xf32>, vector<2x8x8xf32>, vector<2x8x8xf32> -> vector<8x8x8xf32>
    "tpu.trace_start"() <{level = 10 : i32, message = "bqd,bkd->bqk"}> : () -> ()
    %cst_185 = arith.constant dense<0.000000e+00> : vector<8x8x8xf32>
    %538 = tpu.matmul %527, %532, %cst_185 {dimension_numbers = #tpu.dot_dimension_numbers<[2], [2], [1], [1], [0, 0, 0, 1, 1, 1], [0], [0]>} : vector<8x8x8xf32>, vector<8x8x8xf32>, vector<8x8x8xf32> -> vector<8x8x8xf32>
    "tpu.trace_stop"() : () -> ()
    %cst_186 = arith.constant 1.250000e-01 : f32
    %539 = vector.broadcast %cst_186 : f32 to vector<8x8x8xf32>
    %540 = arith.mulf %538, %539 : vector<8x8x8xf32>
    %cst_187 = arith.constant 0xFF800000 : f32
    %541 = vector.shape_cast %270 : vector<8x8xi1> to vector<1x8x8xi1>
    %542 = vector.broadcast %541 : vector<1x8x8xi1> to vector<8x8x8xi1>
    %543 = vector.broadcast %cst_187 : f32 to vector<8x8x8xf32>
    %544 = arith.select %542, %543, %540 : vector<8x8x8xi1>, vector<8x8x8xf32>
    %cst_188 = arith.constant dense<0xFF800000> : vector<8x8xf32>
    %545 = vector.multi_reduction <maximumf>, %544, %cst_188 [2] : vector<8x8x8xf32> to vector<8x8xf32>
    %546 = vector.shape_cast %545 : vector<8x8xf32> to vector<8x8x1xf32>
    %547 = vector.broadcast %546 : vector<8x8x1xf32> to vector<8x8x8xf32>
    %548 = arith.subf %544, %547 : vector<8x8x8xf32>
    %549 = math.exp %548 : vector<8x8x8xf32>
    %cst_189 = arith.constant dense<0.000000e+00> : vector<8x8xf32>
    %550 = vector.multi_reduction <add>, %549, %cst_189 [2] : vector<8x8x8xf32> to vector<8x8xf32>
    %551 = vector.shape_cast %550 : vector<8x8xf32> to vector<8x8x1xf32>
    %552 = vector.broadcast %551 : vector<8x8x1xf32> to vector<8x8x8xf32>
    %553 = arith.divf %549, %552 : vector<8x8x8xf32>
    "tpu.trace_start"() <{level = 10 : i32, message = "bqk,bkd->bqd"}> : () -> ()
    %cst_190 = arith.constant dense<0.000000e+00> : vector<8x8x8xf32>
    %554 = tpu.matmul %553, %537, %cst_190 {dimension_numbers = #tpu.dot_dimension_numbers<[2], [1], [1], [2], [0, 0, 0, 1, 1, 2], [0], [0]>} : vector<8x8x8xf32>, vector<8x8x8xf32>, vector<8x8x8xf32> -> vector<8x8x8xf32>
    "tpu.trace_stop"() : () -> ()
    %555 = vector.extract_strided_slice %554 {offsets = [0, 0, 0], sizes = [2, 8, 8], strides = [1, 1, 1]} : vector<8x8x8xf32> to vector<2x8x8xf32>
    %556 = vector.shape_cast %555 : vector<2x8x8xf32> to vector<16x8xf32>
    %557 = vector.extract_strided_slice %519 {offsets = [0, 0], sizes = [8, 32], strides = [1, 1]} : vector<32x32xf32> to vector<8x32xf32>
    %cst_191 = arith.constant dense<0.000000e+00> : vector<16x32xf32>
    %558 = tpu.matmul %556, %557, %cst_191 {dimension_numbers = #tpu.dot_dimension_numbers<[1], [0], [0], [1], [0, 0, 1, 1], [], []>} : vector<16x8xf32>, vector<8x32xf32>, vector<16x32xf32> -> vector<16x32xf32>
    %559 = vector.broadcast %498 : vector<1x32xf32> to vector<16x32xf32>
    %560 = arith.addf %559, %558 : vector<16x32xf32>
    %561 = vector.extract_strided_slice %554 {offsets = [2, 0, 0], sizes = [2, 8, 8], strides = [1, 1, 1]} : vector<8x8x8xf32> to vector<2x8x8xf32>
    %562 = vector.shape_cast %561 : vector<2x8x8xf32> to vector<16x8xf32>
    %563 = vector.extract_strided_slice %519 {offsets = [8, 0], sizes = [8, 32], strides = [1, 1]} : vector<32x32xf32> to vector<8x32xf32>
    %cst_192 = arith.constant dense<0.000000e+00> : vector<16x32xf32>
    %564 = tpu.matmul %562, %563, %cst_192 {dimension_numbers = #tpu.dot_dimension_numbers<[1], [0], [0], [1], [0, 0, 1, 1], [], []>} : vector<16x8xf32>, vector<8x32xf32>, vector<16x32xf32> -> vector<16x32xf32>
    %565 = arith.addf %560, %564 : vector<16x32xf32>
    %566 = vector.extract_strided_slice %554 {offsets = [4, 0, 0], sizes = [2, 8, 8], strides = [1, 1, 1]} : vector<8x8x8xf32> to vector<2x8x8xf32>
    %567 = vector.shape_cast %566 : vector<2x8x8xf32> to vector<16x8xf32>
    %568 = vector.extract_strided_slice %519 {offsets = [16, 0], sizes = [8, 32], strides = [1, 1]} : vector<32x32xf32> to vector<8x32xf32>
    %cst_193 = arith.constant dense<0.000000e+00> : vector<16x32xf32>
    %569 = tpu.matmul %567, %568, %cst_193 {dimension_numbers = #tpu.dot_dimension_numbers<[1], [0], [0], [1], [0, 0, 1, 1], [], []>} : vector<16x8xf32>, vector<8x32xf32>, vector<16x32xf32> -> vector<16x32xf32>
    %570 = arith.addf %565, %569 : vector<16x32xf32>
    %571 = vector.extract_strided_slice %554 {offsets = [6, 0, 0], sizes = [2, 8, 8], strides = [1, 1, 1]} : vector<8x8x8xf32> to vector<2x8x8xf32>
    %572 = vector.shape_cast %571 : vector<2x8x8xf32> to vector<16x8xf32>
    %573 = vector.extract_strided_slice %519 {offsets = [24, 0], sizes = [8, 32], strides = [1, 1]} : vector<32x32xf32> to vector<8x32xf32>
    %cst_194 = arith.constant dense<0.000000e+00> : vector<16x32xf32>
    %574 = tpu.matmul %572, %573, %cst_194 {dimension_numbers = #tpu.dot_dimension_numbers<[1], [0], [0], [1], [0, 0, 1, 1], [], []>} : vector<16x8xf32>, vector<8x32xf32>, vector<16x32xf32> -> vector<16x32xf32>
    %575 = arith.addf %570, %574 : vector<16x32xf32>
    %576 = arith.addf %495, %575 : vector<16x32xf32>
    %cst_195 = arith.constant dense<0.000000e+00> : vector<16xf32>
    %577 = vector.multi_reduction <add>, %576, %cst_195 [1] : vector<16x32xf32> to vector<16xf32>
    %578 = vector.shape_cast %577 : vector<16xf32> to vector<16x1xf32>
    %cst_196 = arith.constant 3.200000e+01 : f32
    %579 = vector.broadcast %cst_196 : f32 to vector<16x1xf32>
    %580 = arith.divf %578, %579 : vector<16x1xf32>
    %581 = vector.broadcast %580 : vector<16x1xf32> to vector<16x32xf32>
    %582 = arith.subf %576, %581 : vector<16x32xf32>
    %583 = arith.mulf %582, %582 : vector<16x32xf32>
    %cst_197 = arith.constant dense<0.000000e+00> : vector<16xf32>
    %584 = vector.multi_reduction <add>, %583, %cst_197 [1] : vector<16x32xf32> to vector<16xf32>
    %585 = vector.shape_cast %584 : vector<16xf32> to vector<16x1xf32>
    %cst_198 = arith.constant 3.200000e+01 : f32
    %586 = vector.broadcast %cst_198 : f32 to vector<16x1xf32>
    %587 = arith.divf %585, %586 : vector<16x1xf32>
    %cst_199 = arith.constant 9.99999974E-6 : f32
    %588 = vector.broadcast %cst_199 : f32 to vector<16x1xf32>
    %589 = arith.addf %587, %588 : vector<16x1xf32>
    %590 = math.rsqrt %589 : vector<16x1xf32>
    %591 = vector.broadcast %590 : vector<16x1xf32> to vector<16x32xf32>
    %592 = arith.mulf %582, %591 : vector<16x32xf32>
    %593 = vector.broadcast %499 : vector<1x32xf32> to vector<16x32xf32>
    %594 = arith.mulf %592, %593 : vector<16x32xf32>
    %595 = vector.broadcast %500 : vector<1x32xf32> to vector<16x32xf32>
    %596 = arith.addf %594, %595 : vector<16x32xf32>
    %c1_200 = arith.constant 1 : index
    %c0_201 = arith.constant 0 : index
    %c0_202 = arith.constant 0 : index
    %597 = vector.load %arg18[%c1_200, %c0_201, %c0_202] : memref<2x32x32xf32, #tpu.memory_space<vmem>>, vector<1x32x32xf32>
    %598 = vector.shape_cast %597 : vector<1x32x32xf32> to vector<32x32xf32>
    %cst_203 = arith.constant dense<0.000000e+00> : vector<16x32xf32>
    %599 = tpu.matmul %596, %598, %cst_203 {dimension_numbers = #tpu.dot_dimension_numbers<[1], [0], [0], [1], [0, 0, 1, 1], [], []>} : vector<16x32xf32>, vector<32x32xf32>, vector<16x32xf32> -> vector<16x32xf32>
    %600 = vector.broadcast %501 : vector<1x32xf32> to vector<16x32xf32>
    %601 = arith.addf %599, %600 : vector<16x32xf32>
    %c1_204 = arith.constant 1 : index
    %c0_205 = arith.constant 0 : index
    %c0_206 = arith.constant 0 : index
    %602 = vector.load %arg19[%c1_204, %c0_205, %c0_206] : memref<2x32x64xf32, #tpu.memory_space<vmem>>, vector<1x32x64xf32>
    %603 = vector.shape_cast %602 : vector<1x32x64xf32> to vector<32x64xf32>
    %cst_207 = arith.constant dense<0.000000e+00> : vector<16x64xf32>
    %604 = tpu.matmul %267, %603, %cst_207 {dimension_numbers = #tpu.dot_dimension_numbers<[1], [0], [0], [1], [0, 0, 1, 1], [], []>} : vector<16x32xf32>, vector<32x64xf32>, vector<16x64xf32> -> vector<16x64xf32>
    %c1_208 = arith.constant 1 : index
    %c0_209 = arith.constant 0 : index
    %c0_210 = arith.constant 0 : index
    %605 = vector.load %arg20[%c1_208, %c0_209, %c0_210] : memref<2x1x64xf32, #tpu.memory_space<vmem>>, vector<1x1x64xf32>
    %606 = vector.shape_cast %605 : vector<1x1x64xf32> to vector<1x64xf32>
    %607 = vector.broadcast %606 : vector<1x64xf32> to vector<16x64xf32>
    %608 = arith.addf %604, %607 : vector<16x64xf32>
    %609 = vector.extract_strided_slice %608 {offsets = [0, 0], sizes = [16, 32], strides = [1, 1]} : vector<16x64xf32> to vector<16x32xf32>
    %610 = vector.extract_strided_slice %608 {offsets = [0, 32], sizes = [16, 32], strides = [1, 1]} : vector<16x64xf32> to vector<16x32xf32>
    %c1_211 = arith.constant 1 : index
    %c0_212 = arith.constant 0 : index
    %c0_213 = arith.constant 0 : index
    %611 = vector.load %arg21[%c1_211, %c0_212, %c0_213] : memref<2x32x32xf32, #tpu.memory_space<vmem>>, vector<1x32x32xf32>
    %612 = vector.shape_cast %611 : vector<1x32x32xf32> to vector<32x32xf32>
    %613 = vector.shape_cast %601 : vector<16x32xf32> to vector<2x8x32xf32>
    %614 = vector.shape_cast %609 : vector<16x32xf32> to vector<2x8x32xf32>
    %615 = vector.shape_cast %610 : vector<16x32xf32> to vector<2x8x32xf32>
    %616 = vector.extract_strided_slice %613 {offsets = [0, 0, 0], sizes = [2, 8, 8], strides = [1, 1, 1]} : vector<2x8x32xf32> to vector<2x8x8xf32>
    %617 = vector.extract_strided_slice %613 {offsets = [0, 0, 8], sizes = [2, 8, 8], strides = [1, 1, 1]} : vector<2x8x32xf32> to vector<2x8x8xf32>
    %618 = vector.extract_strided_slice %613 {offsets = [0, 0, 16], sizes = [2, 8, 8], strides = [1, 1, 1]} : vector<2x8x32xf32> to vector<2x8x8xf32>
    %619 = vector.extract_strided_slice %613 {offsets = [0, 0, 24], sizes = [2, 8, 8], strides = [1, 1, 1]} : vector<2x8x32xf32> to vector<2x8x8xf32>
    %620 = tpu.concatenate %616, %617, %618, %619 in 0 : vector<2x8x8xf32>, vector<2x8x8xf32>, vector<2x8x8xf32>, vector<2x8x8xf32> -> vector<8x8x8xf32>
    %621 = vector.extract_strided_slice %614 {offsets = [0, 0, 0], sizes = [2, 8, 8], strides = [1, 1, 1]} : vector<2x8x32xf32> to vector<2x8x8xf32>
    %622 = vector.extract_strided_slice %614 {offsets = [0, 0, 8], sizes = [2, 8, 8], strides = [1, 1, 1]} : vector<2x8x32xf32> to vector<2x8x8xf32>
    %623 = vector.extract_strided_slice %614 {offsets = [0, 0, 16], sizes = [2, 8, 8], strides = [1, 1, 1]} : vector<2x8x32xf32> to vector<2x8x8xf32>
    %624 = vector.extract_strided_slice %614 {offsets = [0, 0, 24], sizes = [2, 8, 8], strides = [1, 1, 1]} : vector<2x8x32xf32> to vector<2x8x8xf32>
    %625 = tpu.concatenate %621, %622, %623, %624 in 0 : vector<2x8x8xf32>, vector<2x8x8xf32>, vector<2x8x8xf32>, vector<2x8x8xf32> -> vector<8x8x8xf32>
    %626 = vector.extract_strided_slice %615 {offsets = [0, 0, 0], sizes = [2, 8, 8], strides = [1, 1, 1]} : vector<2x8x32xf32> to vector<2x8x8xf32>
    %627 = vector.extract_strided_slice %615 {offsets = [0, 0, 8], sizes = [2, 8, 8], strides = [1, 1, 1]} : vector<2x8x32xf32> to vector<2x8x8xf32>
    %628 = vector.extract_strided_slice %615 {offsets = [0, 0, 16], sizes = [2, 8, 8], strides = [1, 1, 1]} : vector<2x8x32xf32> to vector<2x8x8xf32>
    %629 = vector.extract_strided_slice %615 {offsets = [0, 0, 24], sizes = [2, 8, 8], strides = [1, 1, 1]} : vector<2x8x32xf32> to vector<2x8x8xf32>
    %630 = tpu.concatenate %626, %627, %628, %629 in 0 : vector<2x8x8xf32>, vector<2x8x8xf32>, vector<2x8x8xf32>, vector<2x8x8xf32> -> vector<8x8x8xf32>
    "tpu.trace_start"() <{level = 10 : i32, message = "bqd,bkd->bqk"}> : () -> ()
    %cst_214 = arith.constant dense<0.000000e+00> : vector<8x8x8xf32>
    %631 = tpu.matmul %620, %625, %cst_214 {dimension_numbers = #tpu.dot_dimension_numbers<[2], [2], [1], [1], [0, 0, 0, 1, 1, 1], [0], [0]>} : vector<8x8x8xf32>, vector<8x8x8xf32>, vector<8x8x8xf32> -> vector<8x8x8xf32>
    "tpu.trace_stop"() : () -> ()
    %cst_215 = arith.constant 1.250000e-01 : f32
    %632 = vector.broadcast %cst_215 : f32 to vector<8x8x8xf32>
    %633 = arith.mulf %631, %632 : vector<8x8x8xf32>
    %cst_216 = arith.constant dense<0xFF800000> : vector<8x8xf32>
    %634 = vector.multi_reduction <maximumf>, %633, %cst_216 [2] : vector<8x8x8xf32> to vector<8x8xf32>
    %635 = vector.shape_cast %634 : vector<8x8xf32> to vector<8x8x1xf32>
    %636 = vector.broadcast %635 : vector<8x8x1xf32> to vector<8x8x8xf32>
    %637 = arith.subf %633, %636 : vector<8x8x8xf32>
    %638 = math.exp %637 : vector<8x8x8xf32>
    %cst_217 = arith.constant dense<0.000000e+00> : vector<8x8xf32>
    %639 = vector.multi_reduction <add>, %638, %cst_217 [2] : vector<8x8x8xf32> to vector<8x8xf32>
    %640 = vector.shape_cast %639 : vector<8x8xf32> to vector<8x8x1xf32>
    %641 = vector.broadcast %640 : vector<8x8x1xf32> to vector<8x8x8xf32>
    %642 = arith.divf %638, %641 : vector<8x8x8xf32>
    "tpu.trace_start"() <{level = 10 : i32, message = "bqk,bkd->bqd"}> : () -> ()
    %cst_218 = arith.constant dense<0.000000e+00> : vector<8x8x8xf32>
    %643 = tpu.matmul %642, %630, %cst_218 {dimension_numbers = #tpu.dot_dimension_numbers<[2], [1], [1], [2], [0, 0, 0, 1, 1, 2], [0], [0]>} : vector<8x8x8xf32>, vector<8x8x8xf32>, vector<8x8x8xf32> -> vector<8x8x8xf32>
    "tpu.trace_stop"() : () -> ()
    %644 = vector.extract_strided_slice %643 {offsets = [0, 0, 0], sizes = [2, 8, 8], strides = [1, 1, 1]} : vector<8x8x8xf32> to vector<2x8x8xf32>
    %645 = vector.shape_cast %644 : vector<2x8x8xf32> to vector<16x8xf32>
    %646 = vector.extract_strided_slice %612 {offsets = [0, 0], sizes = [8, 32], strides = [1, 1]} : vector<32x32xf32> to vector<8x32xf32>
    %cst_219 = arith.constant dense<0.000000e+00> : vector<16x32xf32>
    %647 = tpu.matmul %645, %646, %cst_219 {dimension_numbers = #tpu.dot_dimension_numbers<[1], [0], [0], [1], [0, 0, 1, 1], [], []>} : vector<16x8xf32>, vector<8x32xf32>, vector<16x32xf32> -> vector<16x32xf32>
    %648 = vector.broadcast %502 : vector<1x32xf32> to vector<16x32xf32>
    %649 = arith.addf %648, %647 : vector<16x32xf32>
    %650 = vector.extract_strided_slice %643 {offsets = [2, 0, 0], sizes = [2, 8, 8], strides = [1, 1, 1]} : vector<8x8x8xf32> to vector<2x8x8xf32>
    %651 = vector.shape_cast %650 : vector<2x8x8xf32> to vector<16x8xf32>
    %652 = vector.extract_strided_slice %612 {offsets = [8, 0], sizes = [8, 32], strides = [1, 1]} : vector<32x32xf32> to vector<8x32xf32>
    %cst_220 = arith.constant dense<0.000000e+00> : vector<16x32xf32>
    %653 = tpu.matmul %651, %652, %cst_220 {dimension_numbers = #tpu.dot_dimension_numbers<[1], [0], [0], [1], [0, 0, 1, 1], [], []>} : vector<16x8xf32>, vector<8x32xf32>, vector<16x32xf32> -> vector<16x32xf32>
    %654 = arith.addf %649, %653 : vector<16x32xf32>
    %655 = vector.extract_strided_slice %643 {offsets = [4, 0, 0], sizes = [2, 8, 8], strides = [1, 1, 1]} : vector<8x8x8xf32> to vector<2x8x8xf32>
    %656 = vector.shape_cast %655 : vector<2x8x8xf32> to vector<16x8xf32>
    %657 = vector.extract_strided_slice %612 {offsets = [16, 0], sizes = [8, 32], strides = [1, 1]} : vector<32x32xf32> to vector<8x32xf32>
    %cst_221 = arith.constant dense<0.000000e+00> : vector<16x32xf32>
    %658 = tpu.matmul %656, %657, %cst_221 {dimension_numbers = #tpu.dot_dimension_numbers<[1], [0], [0], [1], [0, 0, 1, 1], [], []>} : vector<16x8xf32>, vector<8x32xf32>, vector<16x32xf32> -> vector<16x32xf32>
    %659 = arith.addf %654, %658 : vector<16x32xf32>
    %660 = vector.extract_strided_slice %643 {offsets = [6, 0, 0], sizes = [2, 8, 8], strides = [1, 1, 1]} : vector<8x8x8xf32> to vector<2x8x8xf32>
    %661 = vector.shape_cast %660 : vector<2x8x8xf32> to vector<16x8xf32>
    %662 = vector.extract_strided_slice %612 {offsets = [24, 0], sizes = [8, 32], strides = [1, 1]} : vector<32x32xf32> to vector<8x32xf32>
    %cst_222 = arith.constant dense<0.000000e+00> : vector<16x32xf32>
    %663 = tpu.matmul %661, %662, %cst_222 {dimension_numbers = #tpu.dot_dimension_numbers<[1], [0], [0], [1], [0, 0, 1, 1], [], []>} : vector<16x8xf32>, vector<8x32xf32>, vector<16x32xf32> -> vector<16x32xf32>
    %664 = arith.addf %659, %663 : vector<16x32xf32>
    %665 = arith.addf %596, %664 : vector<16x32xf32>
    %cst_223 = arith.constant dense<0.000000e+00> : vector<16xf32>
    %666 = vector.multi_reduction <add>, %665, %cst_223 [1] : vector<16x32xf32> to vector<16xf32>
    %667 = vector.shape_cast %666 : vector<16xf32> to vector<16x1xf32>
    %cst_224 = arith.constant 3.200000e+01 : f32
    %668 = vector.broadcast %cst_224 : f32 to vector<16x1xf32>
    %669 = arith.divf %667, %668 : vector<16x1xf32>
    %670 = vector.broadcast %669 : vector<16x1xf32> to vector<16x32xf32>
    %671 = arith.subf %665, %670 : vector<16x32xf32>
    %672 = arith.mulf %671, %671 : vector<16x32xf32>
    %cst_225 = arith.constant dense<0.000000e+00> : vector<16xf32>
    %673 = vector.multi_reduction <add>, %672, %cst_225 [1] : vector<16x32xf32> to vector<16xf32>
    %674 = vector.shape_cast %673 : vector<16xf32> to vector<16x1xf32>
    %cst_226 = arith.constant 3.200000e+01 : f32
    %675 = vector.broadcast %cst_226 : f32 to vector<16x1xf32>
    %676 = arith.divf %674, %675 : vector<16x1xf32>
    %cst_227 = arith.constant 9.99999974E-6 : f32
    %677 = vector.broadcast %cst_227 : f32 to vector<16x1xf32>
    %678 = arith.addf %676, %677 : vector<16x1xf32>
    %679 = math.rsqrt %678 : vector<16x1xf32>
    %680 = vector.broadcast %679 : vector<16x1xf32> to vector<16x32xf32>
    %681 = arith.mulf %671, %680 : vector<16x32xf32>
    %682 = vector.broadcast %503 : vector<1x32xf32> to vector<16x32xf32>
    %683 = arith.mulf %681, %682 : vector<16x32xf32>
    %684 = vector.broadcast %504 : vector<1x32xf32> to vector<16x32xf32>
    %685 = arith.addf %683, %684 : vector<16x32xf32>
    %c1_228 = arith.constant 1 : index
    %c0_229 = arith.constant 0 : index
    %c0_230 = arith.constant 0 : index
    %686 = vector.load %arg22[%c1_228, %c0_229, %c0_230] : memref<2x32x64xf32, #tpu.memory_space<vmem>>, vector<1x32x64xf32>
    %687 = vector.shape_cast %686 : vector<1x32x64xf32> to vector<32x64xf32>
    %c1_231 = arith.constant 1 : index
    %c0_232 = arith.constant 0 : index
    %c0_233 = arith.constant 0 : index
    %688 = vector.load %arg23[%c1_231, %c0_232, %c0_233] : memref<2x1x64xf32, #tpu.memory_space<vmem>>, vector<1x1x64xf32>
    %689 = vector.shape_cast %688 : vector<1x1x64xf32> to vector<1x64xf32>
    %c1_234 = arith.constant 1 : index
    %c0_235 = arith.constant 0 : index
    %c0_236 = arith.constant 0 : index
    %690 = vector.load %arg24[%c1_234, %c0_235, %c0_236] : memref<2x64x32xf32, #tpu.memory_space<vmem>>, vector<1x64x32xf32>
    %691 = vector.shape_cast %690 : vector<1x64x32xf32> to vector<64x32xf32>
    %cst_237 = arith.constant dense<0.000000e+00> : vector<16x64xf32>
    %692 = tpu.matmul %685, %687, %cst_237 {dimension_numbers = #tpu.dot_dimension_numbers<[1], [0], [0], [1], [0, 0, 1, 1], [], []>} : vector<16x32xf32>, vector<32x64xf32>, vector<16x64xf32> -> vector<16x64xf32>
    %693 = vector.broadcast %689 : vector<1x64xf32> to vector<16x64xf32>
    %694 = arith.addf %692, %693 : vector<16x64xf32>
    %cst_238 = arith.constant 0.000000e+00 : f32
    %695 = vector.broadcast %cst_238 : f32 to vector<16x64xf32>
    %696 = arith.maximumf %694, %695 : vector<16x64xf32>
    %cst_239 = arith.constant dense<0.000000e+00> : vector<16x32xf32>
    %697 = tpu.matmul %696, %691, %cst_239 {dimension_numbers = #tpu.dot_dimension_numbers<[1], [0], [0], [1], [0, 0, 1, 1], [], []>} : vector<16x64xf32>, vector<64x32xf32>, vector<16x32xf32> -> vector<16x32xf32>
    %698 = vector.broadcast %505 : vector<1x32xf32> to vector<16x32xf32>
    %699 = arith.addf %697, %698 : vector<16x32xf32>
    %700 = arith.addf %685, %699 : vector<16x32xf32>
    %cst_240 = arith.constant dense<0.000000e+00> : vector<16xf32>
    %701 = vector.multi_reduction <add>, %700, %cst_240 [1] : vector<16x32xf32> to vector<16xf32>
    %702 = vector.shape_cast %701 : vector<16xf32> to vector<16x1xf32>
    %cst_241 = arith.constant 3.200000e+01 : f32
    %703 = vector.broadcast %cst_241 : f32 to vector<16x1xf32>
    %704 = arith.divf %702, %703 : vector<16x1xf32>
    %705 = vector.broadcast %704 : vector<16x1xf32> to vector<16x32xf32>
    %706 = arith.subf %700, %705 : vector<16x32xf32>
    %707 = arith.mulf %706, %706 : vector<16x32xf32>
    %cst_242 = arith.constant dense<0.000000e+00> : vector<16xf32>
    %708 = vector.multi_reduction <add>, %707, %cst_242 [1] : vector<16x32xf32> to vector<16xf32>
    %709 = vector.shape_cast %708 : vector<16xf32> to vector<16x1xf32>
    %cst_243 = arith.constant 3.200000e+01 : f32
    %710 = vector.broadcast %cst_243 : f32 to vector<16x1xf32>
    %711 = arith.divf %709, %710 : vector<16x1xf32>
    %cst_244 = arith.constant 9.99999974E-6 : f32
    %712 = vector.broadcast %cst_244 : f32 to vector<16x1xf32>
    %713 = arith.addf %711, %712 : vector<16x1xf32>
    %714 = math.rsqrt %713 : vector<16x1xf32>
    %715 = vector.broadcast %714 : vector<16x1xf32> to vector<16x32xf32>
    %716 = arith.mulf %706, %715 : vector<16x32xf32>
    %717 = vector.broadcast %506 : vector<1x32xf32> to vector<16x32xf32>
    %718 = arith.mulf %716, %717 : vector<16x32xf32>
    %719 = vector.broadcast %507 : vector<1x32xf32> to vector<16x32xf32>
    %720 = arith.addf %718, %719 : vector<16x32xf32>
    %c0_245 = arith.constant 0 : index
    %c0_246 = arith.constant 0 : index
    %721 = vector.load %arg26[%c0_245, %c0_246] : memref<32x1xf32, #tpu.memory_space<vmem>>, vector<32x1xf32>
    %cst_247 = arith.constant dense<0.000000e+00> : vector<16x1xf32>
    %722 = tpu.matmul %720, %721, %cst_247 {dimension_numbers = #tpu.dot_dimension_numbers<[1], [0], [0], [1], [0, 0, 1, 1], [], []>} : vector<16x32xf32>, vector<32x1xf32>, vector<16x1xf32> -> vector<16x1xf32>
    %c0_248 = arith.constant 0 : index
    %c0_249 = arith.constant 0 : index
    %723 = vector.load %arg28[%c0_248, %c0_249] : memref<1x1xf32, #tpu.memory_space<vmem>>, vector<1x1xf32>
    %724 = vector.broadcast %723 : vector<1x1xf32> to vector<16x1xf32>
    %725 = arith.addf %722, %724 : vector<16x1xf32>
    %c0_250 = arith.constant 0 : index
    %c0_251 = arith.constant 0 : index
    %726 = vector.load %arg3[%c0_250, %c0_251] : memref<2x3xf32, #tpu.memory_space<vmem>>, vector<2x3xf32>
    %c0_252 = arith.constant 0 : index
    %c0_253 = arith.constant 0 : index
    %727 = vector.load %arg27[%c0_252, %c0_253] : memref<1x3xf32, #tpu.memory_space<vmem>>, vector<1x3xf32>
    %728 = vector.broadcast %727 : vector<1x3xf32> to vector<2x3xf32>
    %729 = arith.mulf %726, %728 : vector<2x3xf32>
    %cst_254 = arith.constant dense<0.000000e+00> : vector<2xf32>
    %730 = vector.multi_reduction <add>, %729, %cst_254 [1] : vector<2x3xf32> to vector<2xf32>
    %731 = vector.shape_cast %730 : vector<2xf32> to vector<2x1xf32>
    %732 = vector.extract_strided_slice %731 {offsets = [0, 0], sizes = [1, 1], strides = [1, 1]} : vector<2x1xf32> to vector<1x1xf32>
    %733 = vector.shape_cast %732 : vector<1x1xf32> to vector<1x1xf32>
    %734 = vector.broadcast %733 : vector<1x1xf32> to vector<8x1xf32>
    %735 = vector.extract_strided_slice %731 {offsets = [1, 0], sizes = [1, 1], strides = [1, 1]} : vector<2x1xf32> to vector<1x1xf32>
    %736 = vector.shape_cast %735 : vector<1x1xf32> to vector<1x1xf32>
    %737 = vector.broadcast %736 : vector<1x1xf32> to vector<8x1xf32>
    %738 = tpu.concatenate %734, %737 in 0 : vector<8x1xf32>, vector<8x1xf32> -> vector<16x1xf32>
    %739 = arith.addf %725, %738 : vector<16x1xf32>
    %c0_255 = arith.constant 0 : index
    %c0_256 = arith.constant 0 : index
    %740 = vector.load %arg29[%c0_255, %c0_256] : memref<16x1xf32, #tpu.memory_space<vmem>>, vector<16x1xf32>
    tpu.vector_store %arg29[%c0_255, %c0_256], %739 {strides = array<i32>} : memref<16x1xf32, #tpu.memory_space<vmem>>, vector<16x1xf32>,
    return
  }
  func.func @transform_0(%arg0: i32) -> (i32, i32) {
    %c0_i32 = arith.constant 0 : i32
    %c0_i32_0 = arith.constant 0 : i32
    %c0_i32_1 = arith.constant 0 : i32
    return %c0_i32, %c0_i32_0 : i32, i32
  }
  func.func @transform_1(%arg0: i32) -> (i32, i32) {
    %c0_i32 = arith.constant 0 : i32
    %c0_i32_0 = arith.constant 0 : i32
    %c0_i32_1 = arith.constant 0 : i32
    return %c0_i32, %c0_i32_0 : i32, i32
  }
  func.func @transform_2(%arg0: i32) -> (i32, i32) {
    %c0_i32 = arith.constant 0 : i32
    %c0_i32_0 = arith.constant 0 : i32
    %c0_i32_1 = arith.constant 0 : i32
    return %c0_i32, %c0_i32_0 : i32, i32
  }
  func.func @transform_3(%arg0: i32) -> (i32, i32) {
    %c0_i32 = arith.constant 0 : i32
    %c0_i32_0 = arith.constant 0 : i32
    %c0_i32_1 = arith.constant 0 : i32
    return %c0_i32, %c0_i32_0 : i32, i32
  }
  func.func @transform_4(%arg0: i32) -> (i32, i32) {
    %c0_i32 = arith.constant 0 : i32
    %c0_i32_0 = arith.constant 0 : i32
    %c0_i32_1 = arith.constant 0 : i32
    return %c0_i32, %c0_i32_0 : i32, i32
  }
  func.func @transform_5(%arg0: i32) -> (i32, i32) {
    %c0_i32 = arith.constant 0 : i32
    %c0_i32_0 = arith.constant 0 : i32
    %c0_i32_1 = arith.constant 0 : i32
    return %c0_i32, %c0_i32_0 : i32, i32
  }
  func.func @transform_6(%arg0: i32) -> (i32, i32) {
    %c0_i32 = arith.constant 0 : i32
    %c0_i32_0 = arith.constant 0 : i32
    %c0_i32_1 = arith.constant 0 : i32
    return %c0_i32, %c0_i32_0 : i32, i32
  }
  func.func @transform_7(%arg0: i32) -> (i32, i32, i32) {
    %c0_i32 = arith.constant 0 : i32
    %c0_i32_0 = arith.constant 0 : i32
    %c0_i32_1 = arith.constant 0 : i32
    %c0_i32_2 = arith.constant 0 : i32
    return %c0_i32, %c0_i32_0, %c0_i32_1 : i32, i32, i32
  }
  func.func @transform_8(%arg0: i32) -> (i32, i32, i32) {
    %c0_i32 = arith.constant 0 : i32
    %c0_i32_0 = arith.constant 0 : i32
    %c0_i32_1 = arith.constant 0 : i32
    %c0_i32_2 = arith.constant 0 : i32
    return %c0_i32, %c0_i32_0, %c0_i32_1 : i32, i32, i32
  }
  func.func @transform_9(%arg0: i32) -> (i32, i32, i32) {
    %c0_i32 = arith.constant 0 : i32
    %c0_i32_0 = arith.constant 0 : i32
    %c0_i32_1 = arith.constant 0 : i32
    %c0_i32_2 = arith.constant 0 : i32
    return %c0_i32, %c0_i32_0, %c0_i32_1 : i32, i32, i32
  }
  func.func @transform_10(%arg0: i32) -> (i32, i32, i32) {
    %c0_i32 = arith.constant 0 : i32
    %c0_i32_0 = arith.constant 0 : i32
    %c0_i32_1 = arith.constant 0 : i32
    %c0_i32_2 = arith.constant 0 : i32
    return %c0_i32, %c0_i32_0, %c0_i32_1 : i32, i32, i32
  }
  func.func @transform_11(%arg0: i32) -> (i32, i32, i32) {
    %c0_i32 = arith.constant 0 : i32
    %c0_i32_0 = arith.constant 0 : i32
    %c0_i32_1 = arith.constant 0 : i32
    %c0_i32_2 = arith.constant 0 : i32
    return %c0_i32, %c0_i32_0, %c0_i32_1 : i32, i32, i32
  }
  func.func @transform_12(%arg0: i32) -> (i32, i32, i32) {
    %c0_i32 = arith.constant 0 : i32
    %c0_i32_0 = arith.constant 0 : i32
    %c0_i32_1 = arith.constant 0 : i32
    %c0_i32_2 = arith.constant 0 : i32
    return %c0_i32, %c0_i32_0, %c0_i32_1 : i32, i32, i32
  }
  func.func @transform_13(%arg0: i32) -> (i32, i32, i32) {
    %c0_i32 = arith.constant 0 : i32
    %c0_i32_0 = arith.constant 0 : i32
    %c0_i32_1 = arith.constant 0 : i32
    %c0_i32_2 = arith.constant 0 : i32
    return %c0_i32, %c0_i32_0, %c0_i32_1 : i32, i32, i32
  }
  func.func @transform_14(%arg0: i32) -> (i32, i32, i32) {
    %c0_i32 = arith.constant 0 : i32
    %c0_i32_0 = arith.constant 0 : i32
    %c0_i32_1 = arith.constant 0 : i32
    %c0_i32_2 = arith.constant 0 : i32
    return %c0_i32, %c0_i32_0, %c0_i32_1 : i32, i32, i32
  }
  func.func @transform_15(%arg0: i32) -> (i32, i32, i32) {
    %c0_i32 = arith.constant 0 : i32
    %c0_i32_0 = arith.constant 0 : i32
    %c0_i32_1 = arith.constant 0 : i32
    %c0_i32_2 = arith.constant 0 : i32
    return %c0_i32, %c0_i32_0, %c0_i32_1 : i32, i32, i32
  }
  func.func @transform_16(%arg0: i32) -> (i32, i32, i32) {
    %c0_i32 = arith.constant 0 : i32
    %c0_i32_0 = arith.constant 0 : i32
    %c0_i32_1 = arith.constant 0 : i32
    %c0_i32_2 = arith.constant 0 : i32
    return %c0_i32, %c0_i32_0, %c0_i32_1 : i32, i32, i32
  }
  func.func @transform_17(%arg0: i32) -> (i32, i32, i32) {
    %c0_i32 = arith.constant 0 : i32
    %c0_i32_0 = arith.constant 0 : i32
    %c0_i32_1 = arith.constant 0 : i32
    %c0_i32_2 = arith.constant 0 : i32
    return %c0_i32, %c0_i32_0, %c0_i32_1 : i32, i32, i32
  }
  func.func @transform_18(%arg0: i32) -> (i32, i32, i32) {
    %c0_i32 = arith.constant 0 : i32
    %c0_i32_0 = arith.constant 0 : i32
    %c0_i32_1 = arith.constant 0 : i32
    %c0_i32_2 = arith.constant 0 : i32
    return %c0_i32, %c0_i32_0, %c0_i32_1 : i32, i32, i32
  }
  func.func @transform_19(%arg0: i32) -> (i32, i32, i32) {
    %c0_i32 = arith.constant 0 : i32
    %c0_i32_0 = arith.constant 0 : i32
    %c0_i32_1 = arith.constant 0 : i32
    %c0_i32_2 = arith.constant 0 : i32
    return %c0_i32, %c0_i32_0, %c0_i32_1 : i32, i32, i32
  }
  func.func @transform_20(%arg0: i32) -> (i32, i32, i32) {
    %c0_i32 = arith.constant 0 : i32
    %c0_i32_0 = arith.constant 0 : i32
    %c0_i32_1 = arith.constant 0 : i32
    %c0_i32_2 = arith.constant 0 : i32
    return %c0_i32, %c0_i32_0, %c0_i32_1 : i32, i32, i32
  }
  func.func @transform_21(%arg0: i32) -> (i32, i32, i32) {
    %c0_i32 = arith.constant 0 : i32
    %c0_i32_0 = arith.constant 0 : i32
    %c0_i32_1 = arith.constant 0 : i32
    %c0_i32_2 = arith.constant 0 : i32
    return %c0_i32, %c0_i32_0, %c0_i32_1 : i32, i32, i32
  }
  func.func @transform_22(%arg0: i32) -> (i32, i32, i32) {
    %c0_i32 = arith.constant 0 : i32
    %c0_i32_0 = arith.constant 0 : i32
    %c0_i32_1 = arith.constant 0 : i32
    %c0_i32_2 = arith.constant 0 : i32
    return %c0_i32, %c0_i32_0, %c0_i32_1 : i32, i32, i32
  }
  func.func @transform_23(%arg0: i32) -> (i32, i32, i32) {
    %c0_i32 = arith.constant 0 : i32
    %c0_i32_0 = arith.constant 0 : i32
    %c0_i32_1 = arith.constant 0 : i32
    %c0_i32_2 = arith.constant 0 : i32
    return %c0_i32, %c0_i32_0, %c0_i32_1 : i32, i32, i32
  }
  func.func @transform_24(%arg0: i32) -> (i32, i32, i32) {
    %c0_i32 = arith.constant 0 : i32
    %c0_i32_0 = arith.constant 0 : i32
    %c0_i32_1 = arith.constant 0 : i32
    %c0_i32_2 = arith.constant 0 : i32
    return %c0_i32, %c0_i32_0, %c0_i32_1 : i32, i32, i32
  }
  func.func @transform_25(%arg0: i32) -> (i32, i32) {
    %c0_i32 = arith.constant 0 : i32
    %c0_i32_0 = arith.constant 0 : i32
    %c0_i32_1 = arith.constant 0 : i32
    return %c0_i32, %c0_i32_0 : i32, i32
  }
  func.func @transform_26(%arg0: i32) -> (i32, i32) {
    %c0_i32 = arith.constant 0 : i32
    %c0_i32_0 = arith.constant 0 : i32
    %c0_i32_1 = arith.constant 0 : i32
    return %c0_i32, %c0_i32_0 : i32, i32
  }
  func.func @transform_27(%arg0: i32) -> (i32, i32) {
    %c0_i32 = arith.constant 0 : i32
    %c0_i32_0 = arith.constant 0 : i32
    %c0_i32_1 = arith.constant 0 : i32
    return %c0_i32, %c0_i32_0 : i32, i32
  }
  func.func @transform_28(%arg0: i32) -> (i32, i32) {
    %c0_i32 = arith.constant 0 : i32
    %c0_i32_0 = arith.constant 0 : i32
    %c0_i32_1 = arith.constant 0 : i32
    return %c0_i32, %c0_i32_0 : i32, i32
  }
}

</mosaic_0001>

<bundles_post_ra>
// kernel: transformer_forward.1
= control target key start
LH: loop header
LB: loop body
LE: loop exit
PB: predicated region body
PF: predicated region fallthrough
CT: control target
= control target key end

     0   :  { %vm105_vm0 = vcmask 1043456   ;;  %vm98_vm1 = vcmask 31744   ;;  %vm180_vm2 = vcmask 261120   ;;  %s8708_s29 = smov 104   ;;  %vm230_vm3 = vcmask 64512   ;;  %s8662_s3 = inlined_call_operand.vmem [shape: f32[4,32], index: 3, kind: input, shape index: {}]   ;;  %s8663_s0 = inlined_call_operand.vmem [shape: f32[16,4], index: 0, kind: input, shape index: {}]   ;;  %s8664_s7 = inlined_call_operand.vmem [shape: f32[2,32,96], index: 7, kind: input, shape index: {}]   ;;  %s8665_s4 = inlined_call_operand.vmem [shape: f32[1,32], index: 4, kind: input, shape index: {}]   ;;  %s8666_s8 = inlined_call_operand.vmem [shape: f32[2,1,96], index: 8, kind: input, shape index: {}]   ;;  %s8667_s6 = inlined_call_operand.vmem [shape: f32[1,32], index: 6, kind: input, shape index: {}]   ;;  %s8668_s5 = inlined_call_operand.vmem [shape: f32[4,32], index: 5, kind: input, shape index: {}]   ;;  %s8669_s1 = inlined_call_operand.vmem [shape: f32[16,4], index: 1, kind: input, shape index: {}]   ;;  %s8670_s9 = inlined_call_operand.vmem [shape: f32[2,32,32], index: 9, kind: input, shape index: {}]   ;;  %s8671_s13 = inlined_call_operand.vmem [shape: f32[2,6,32], index: 13, kind: input, shape index: {}]   ;;  %s8672_s11 = inlined_call_operand.vmem [shape: f32[2,1,64], index: 11, kind: input, shape index: {}]   ;;  %s8673_s10 = inlined_call_operand.vmem [shape: f32[2,32,64], index: 10, kind: input, shape index: {}]   ;;  %s8674_s12 = inlined_call_operand.vmem [shape: f32[2,64,32], index: 12, kind: input, shape index: {}]   ;;  %s8675_s14 = inlined_call_operand.vmem [shape: f32[2,32,96], index: 14, kind: input, shape index: {}]   ;;  %s8676_s15 = inlined_call_operand.vmem [shape: f32[2,1,96], index: 15, kind: input, shape index: {}]   ;;  %s8677_s16 = inlined_call_operand.vmem [shape: f32[2,32,32], index: 16, kind: input, shape index: {}]   ;;  %s8678_s24 = inlined_call_operand.vmem [shape: f32[2,10,32], index: 24, kind: input, shape index: {}]   ;;  %s8679_s18 = inlined_call_operand.vmem [shape: f32[2,32,64], index: 18, kind: input, shape index: {}]   ;;  %s8680_s19 = inlined_call_operand.vmem [shape: f32[2,1,64], index: 19, kind: input, shape index: {}]   ;;  %s8681_s17 = inlined_call_operand.vmem [shape: f32[2,32,32], index: 17, kind: input, shape index: {}]   ;;  %s8682_s20 = inlined_call_operand.vmem [shape: f32[2,32,32], index: 20, kind: input, shape index: {}]   ;;  %s8683_s22 = inlined_call_operand.vmem [shape: f32[2,1,64], index: 22, kind: input, shape index: {}]   ;;  %s8684_s21 = inlined_call_operand.vmem [shape: f32[2,32,64], index: 21, kind: input, shape index: {}]   ;;  %s8685_s23 = inlined_call_operand.vmem [shape: f32[2,64,32], index: 23, kind: input, shape index: {}]   ;;  %s8686_s26 = inlined_call_operand.vmem [shape: f32[1,3], index: 26, kind: input, shape index: {}]   ;;  %s8687_s25 = inlined_call_operand.vmem [shape: f32[32,1], index: 25, kind: input, shape index: {}]   ;;  %s8688_s2 = inlined_call_operand.vmem [shape: f32[2,3], index: 2, kind: input, shape index: {}]   ;;  %s8689_s27 = inlined_call_operand.<no memory space> [shape: f32[1,1], index: 27, kind: input, shape index: {}]   ;;  %s8690_s28 = inlined_call_operand.vmem [shape: f32[16,1], index: 28, kind: output, shape index: {}]  }
   0x1   :  { %8712 = sst [smem:[#allocation3_spill]] %s8662_s3 }
   0x2   :  { %8713 = sst [smem:[#allocation4_spill]] %s8663_s0 }
   0x3   :  { %8714 = sst [smem:[#allocation5_spill]] %s8664_s7  ;;  %s8706_s7 = smov 120  }
   0x4   :  { %8715 = sst [smem:[#allocation6_spill]] %s8665_s4 }
   0x5   :  { %8716 = sst [smem:[#allocation7_spill]] %s8666_s8  ;;  %s8746_s8 = smov 104  }
   0x6   :  { %8717 = sst [smem:[#allocation8_spill]] %s8667_s6  ;;  %s8748_s6 = smov 112  }
   0x7   :  { %8718 = sst [smem:[#allocation9_spill]] %s8668_s5 }
   0x8   :  { %8719 = sst [smem:[#allocation10_spill]] %s8669_s1  ;;  %s8704_s1 = smov 112  }
   0x9   :  { %8720 = sst [smem:[#allocation11_spill]] %s8670_s9 }
   0xa   :  { %8721 = sst [smem:[#allocation12_spill]] %s8671_s13 }
   0xb   :  { %8722 = sst [smem:[#allocation13_spill]] %s8672_s11  ;;  %s8700_s11 = smov 64  }
   0xc   :  { %8723 = sst [smem:[#allocation14_spill]] %s8673_s10 }
   0xd   :  { %8724 = sst [smem:[#allocation15_spill]] %s8674_s12  ;;  %s8702_s12 = smov 96  }
   0xe   :  { %8725 = sst [smem:[#allocation16_spill]] %s8686_s26 }
   0xf   :  { %8726 = sst [smem:[#allocation17_spill]] %s8687_s25 }
  0x10   :  { %8727 = sst [smem:[#allocation18_spill]] %s8688_s2 }
  0x11   :  { %8728 = sst [smem:[#allocation19_spill]] %s8689_s27 }
  0x12   :  { %8729 = sst [smem:[#allocation20_spill]] %s8690_s28 }
  0x13   :  { %s8730_s13 = sld [smem:[#allocation3_spill]] }
  0x14   :  { %s8731_s5 = sld [smem:[#allocation4_spill]] }
  0x15   :  { %s8732_s10 = sld [smem:[#allocation5_spill]] }
  0x16   :  { %s8733_s4 = sld [smem:[#allocation6_spill]] }
  0x17   :  { %s8734_s0 = sld [smem:[#allocation7_spill]] }
  0x18   :  { %s8735_s9 = sld [smem:[#allocation9_spill]] }
  0x19   :  { %v93_v0 = vld [vmem:[%s8730_s13] sm:$0xf]  ;;  %s8736_s30 = sld [smem:[#allocation10_spill]] }
  0x1a   :  { %v91_v1 = vld [vmem:[%s8731_s5] sm:$0xff]  ;;  %5948 = vmatpush.msk.msra.mxu0 %vm105_vm0, %v93_v0  ;;  %v92_v4 = vld [vmem:[%s8731_s5 + $0x8] sm:$0xff]  ;;  %s8742_s13 = sld [smem:[#allocation12_spill]] }
  0x1b   :  { %v175_v2 = vld [vmem:[%s8732_s10 + $0x18] sm:$0xff]  ;;  %v174_v3 = vld [vmem:[%s8732_s10 + $0x10] sm:$0xff]  ;;  %5949 = vmatmul.msk.f32.vlgmr.msra.gmra.mxu0 %vm98_vm1, %v91_v1  ;;  %v173_v5 = vld [vmem:[%s8732_s10 + $0x8] sm:$0xff]  ;;  %s8743_s5 = sld [smem:[#allocation14_spill]] }
  0x1c   :  { %199 = vmatpush.msra.mxu2 %v175_v2  ;;  %v172_v6 = vld [vmem:[%s8732_s10] sm:$0xff]  ;;  %s8744_s3 = sld [smem:[#allocation15_spill]] }
  0x1d   :  { %v6336_v7 = vld [vmem:[%s8733_s4] ss:$0 sm:$0xff]  ;;  %s8761_s26 = sld [smem:[#allocation8_spill]] }
  0x1e   :  { %200 = vmatpush.msra.mxu2 %v174_v3  ;;  %v6337_v12 = vld [vmem:[%s8734_s0] ss:$0 sm:$0xff]  ;;  %s8783_s25 = sld [smem:[#allocation19_spill]] }
  0x1f   :  { %v134_v25 = vld [vmem:[%s8735_s9] sm:$0xf]  ;;  %v133_v27 = vld [vmem:[%s8736_s30 + $0x8] sm:$0xff]  ;;  %s8741_s9 = sld [smem:[#allocation11_spill]] }
  0x20   :  { %201 = vmatpush.msra.mxu2 %v173_v5  ;;  %v132_v26 = vld [vmem:[%s8736_s30] sm:$0xff]  ;;  %5951 = vmatpush.msk.msra.mxu1 %vm105_vm0, %v134_v25  ;;  %s8784_s27 = sld [smem:[#allocation20_spill]] }
  0x21   :  { %5952 = vmatmul.msk.f32.vlgmr.msra.gmra.mxu1 %vm98_vm1, %v132_v26 }
  0x22   :  { %202 = vmatpush.msra.mxu2 %v172_v6 }
  0x23   :  { %5950 = vmatmul.msk.f32.gmra.mxu0 %vm98_vm1, %v92_v4 }
  0x29   :  { %5953 = vmatmul.msk.f32.gmra.mxu1 %vm98_vm1, %v133_v27 }
  0x98   :  { %v126_v8 = vpop.f32.mrf.mxu0 }
  0x99   :  { %v6765_v9 = vadd.f32 %v6336_v7, %v126_v8 }
  0x9b   :  { %5954 = vmatmul.msk.f32.vlgmr.msra.gmra.mxu2 %vm180_vm2, %v6765_v9 }
  0x9e   :  { %v6858_v40 = vpop.f32.mrf.mxu1 }
  0xa0   :  { %v129_v10 = vpop.f32.mrf.mxu0 }
  0xa1   :  { %v6769_v11 = vadd.f32 %v6336_v7, %v129_v10 }
  0xa3   :  { %5955 = vmatmul.msk.f32.gmra.mxu2 %vm180_vm2, %v6769_v11 }
  0xa6   :  { %v6860_v42 = vpop.f32.mrf.mxu1 }
 0x11e   :  { %v204_v13 = vpop.f32.mrf.mxu2 }
 0x11f   :  { %v6776_v14 = vadd.f32 %v6337_v12, %v204_v13 }
 0x121   :  { %224 = vrot.lane.b32.xlu2 %v6776_v14, %s8708_s29  ;;  %220 = vrot.lane.b32.xlu0 %v6776_v14, %s8704_s1 }
 0x126   :  { %v207_v15 = vpop.f32.mrf.mxu2 }
 0x127   :  { %v6782_v16 = vadd.f32 %v6337_v12, %v207_v15 }
 0x129   :  { %222 = vrot.lane.b32.xlu1 %v6782_v16, %s8704_s1  ;;  %216 = vrot.lane.b32.xlu0 %v6776_v14, %s8706_s7  ;;  %v6246_v61 = vpack.i.bf16 %v6782_v16, %v6776_v14  ;;  %s8750_s1 = smov 64  }
 0x12a   :  { %226 = vrot.lane.b32.xlu2 %v6782_v16, %s8708_s29  ;;  %s8745_s29 = sld [smem:[#allocation13_spill]] }
 0x131   :  { %218 = vrot.lane.b32.xlu1 %v6782_v16, %s8706_s7  ;;  %228 = vrot.lane.b32.xlu0 %v6776_v14, %s8702_s12 }
 0x139   :  { %255 = vrot.lane.b32.xlu1 %v6782_v16, %s8702_s12 }
 0x17b   :  { %v6800_v18 = vpop.permute.xlu2 %224 }
 0x184   :  { %v6810_v21 = vpop.permute.xlu2 %226 }
 0x193   :  { %v6796_v17 = vpop.permute.xlu0 %220 }
 0x194   :  { %333 = vrot.lane.b32.xlu2 %v6796_v17, %s8702_s12 }
 0x19b   :  { %v6802_v19 = vpop.permute.xlu1 %222  ;;  %v6804_v20 = vpop.permute.xlu0 %216 }
 0x19c   :  { %359 = vrot.lane.b32.xlu1 %v6802_v19, %s8702_s12  ;;  %281 = vrot.lane.b32.xlu0 %v6804_v20, %s8702_s12  ;;  %v6251_v60 = vpack.i.bf16 %v6796_v17, %v6804_v20 }
 0x1a3   :  { %v6812_v22 = vpop.permute.xlu1 %218  ;;  %v229_v23 = vpop.permute.xlu0 %228 }
 0x1a4   :  { %411 = vrot.lane.b32.xlu1 %v6810_v21, %s8702_s12  ;;  %307 = vrot.lane.b32.xlu2 %v6812_v22, %s8702_s12 }
 0x1a5   :  { %385 = vrot.lane.b32.xlu0 %v6800_v18, %s8702_s12  ;;  %5956 = vmatpush.xpose.msk.msrb.mxu2 %vm230_vm3, %v229_v23 }
 0x1a8   :  { %5957 = vmatmul.msk.f32.vlgmr.msrb.gmra.mxu2 %vm230_vm3, %v6776_v14 }
 0x1ab   :  { %v256_v24 = vpop.permute.xlu1 %255 }
 0x1ac   :  { %5958 = vmatpush.xpose.msk.msra.mxu3 %vm230_vm3, %v256_v24 }
 0x1af   :  { %5959 = vmatmul.msk.f32.vlgmr.msra.gmra.mxu3 %vm230_vm3, %v6782_v16 }
 0x1ee   :  { %v334_v28 = vpop.permute.xlu2 %333 }
 0x1ef   :  { %5964 = vmatpush.xpose.msk.msrb.mxu3 %vm230_vm3, %v334_v28 }
 0x1f2   :  { %5965 = vmatmul.msk.f32.vlgmr.msrb.gmra.mxu3 %vm230_vm3, %v6796_v17 }
 0x1fe   :  { %v308_v29 = vpop.permute.xlu2 %307 }
 0x1ff   :  { %5962 = vmatpush.xpose.msk.msrb.mxu1 %vm230_vm3, %v308_v29 }
 0x202   :  { %5963 = vmatmul.msk.f32.vlgmr.msrb.gmra.mxu1 %vm230_vm3, %v6812_v22 }
 0x20e   :  { %v360_v30 = vpop.permute.xlu1 %359  ;;  %v282_v31 = vpop.permute.xlu0 %281 }
 0x20f   :  { %5960 = vmatpush.xpose.msk.msrb.mxu0 %vm230_vm3, %v282_v31  ;;  %5966 = vmatpush.xpose.msk.msra.mxu2 %vm230_vm3, %v360_v30 }
 0x212   :  { %5961 = vmatmul.msk.f32.vlgmr.msrb.gmra.mxu0 %vm230_vm3, %v6804_v20  ;;  %5967 = vmatmul.msk.f32.vlgmr.msra.gmra.mxu2 %vm230_vm3, %v6802_v19 }
 0x216   :  { %v412_v32 = vpop.permute.xlu1 %411 }
 0x217   :  { %v386_v33 = vpop.permute.xlu0 %385  ;;  %5970 = vmatpush.xpose.msk.msra.mxu1 %vm230_vm3, %v412_v32 }
 0x218   :  { %5968 = vmatpush.xpose.msk.msra.mxu0 %vm230_vm3, %v386_v33 }
 0x21a   :  { %5971 = vmatmul.msk.f32.vlgmr.msra.gmra.mxu1 %vm230_vm3, %v6810_v21 }
 0x21b   :  { %5969 = vmatmul.msk.f32.vlgmr.msra.gmra.mxu0 %vm230_vm3, %v6800_v18 }
 0x22b   :  { %v252_v34 = vpop.f32.mrf.mxu2 }
 0x22c   :  { %v437_v35 = vmul.f32 0.125, %v252_v34 }
 0x22e   :  { %v445_v36 = vsel %vm230_vm3, %v437_v35, -inf }
 0x22f   :  { %446 = vmax.xlane.f32.xlu2 %v445_v36 }
 0x232   :  { %v278_v37 = vpop.f32.mrf.mxu3 }
 0x233   :  { %v438_v38 = vmul.f32 0.125, %v278_v37 }
 0x235   :  { %v448_v39 = vsel %vm230_vm3, %v438_v38, -inf }
 0x236   :  { %449 = vmax.xlane.f32.xlu0 %v448_v39 }
 0x275   :  { %v356_v41 = vpop.f32.mrf.mxu3 }
 0x276   :  { %v441_v43 = vmul.f32 0.125, %v356_v41 }
 0x278   :  { %v457_v44 = vsel %vm230_vm3, %v441_v43, -inf }
 0x279   :  { %458 = vmax.xlane.f32.xlu2 %v457_v44 }
 0x27f   :  { %v330_v45 = vpop.f32.mrf.mxu1 }
 0x280   :  { %v440_v46 = vmul.f32 0.125, %v330_v45 }
 0x282   :  { %v454_v47 = vsel %vm230_vm3, %v440_v46, -inf }
 0x283   :  { %455 = vmax.xlane.f32.xlu2 %v454_v47 }
 0x28f   :  { %v304_v48 = vpop.f32.mrf.mxu0 }
 0x290   :  { %v439_v49 = vmul.f32 0.125, %v304_v48 }
 0x292   :  { %v451_v50 = vsel %vm230_vm3, %v439_v49, -inf }
 0x293   :  { %452 = vmax.xlane.f32.xlu1 %v451_v50 }
 0x295   :  { %v382_v51 = vpop.f32.mrf.mxu2 }
 0x296   :  { %v442_v52 = vmul.f32 0.125, %v382_v51 }
 0x297   :  { %v434_v53 = vpop.f32.mrf.mxu1 }
 0x298   :  { %v408_v54 = vpop.f32.mrf.mxu0  ;;  %v444_v55 = vmul.f32 0.125, %v434_v53  ;;  %v460_v56 = vsel %vm230_vm3, %v442_v52, -inf }
 0x299   :  { %v443_v57 = vmul.f32 0.125, %v408_v54  ;;  %461 = vmax.xlane.f32.xlu0 %v460_v56 }
 0x29a   :  { %v466_v58 = vsel %vm230_vm3, %v444_v55, -inf }
 0x29b   :  { %467 = vmax.xlane.f32.xlu2 %v466_v58  ;;  %v463_v59 = vsel %vm230_vm3, %v443_v57, -inf }
 0x29c   :  { %464 = vmax.xlane.f32.xlu1 %v463_v59 }
 0x2a2   :  { %v447_v62 = vpop.xlane.xlu2 %446 }
 0x2a3   :  { %v469_v63 = vsub.f32 %v437_v35, %v447_v62 }
 0x2a5   :  { %v477_v0 = vmul.f32 1.442695, %v469_v63 }
 0x2a7   :  { %6350 = vpow2.f32 %v477_v0 }
 0x2a9   :  { %v450_v1 = vpop.xlane.xlu0 %449 }
 0x2aa   :  { %v470_v2 = vsub.f32 %v438_v38, %v450_v1 }
 0x2ac   :  { %v479_v3 = vmul.f32 1.442695, %v470_v2 }
 0x2ad   :  { %6252 = vrot.lane.b32.xlu0 %v6251_v60, %s8700_s11  ;;  %v6874_v4 = vpop.eup %6350 }
 0x2ae   :  { %6352 = vpow2.f32 %v479_v3  ;;  %v493_v5 = vsel %vm230_vm3, %v6874_v4, 0.0 }
 0x2b4   :  { %v6878_v6 = vpop.eup %6352 }
 0x2b5   :  { %6247 = vrot.lane.b32.xlu1 %v6246_v61, %s8700_s11  ;;  %v496_v7 = vsel %vm230_vm3, %v6878_v6, 0.0 }
 0x2d7   :  { %494 = vadd.xlane.f32.xlu0 %v493_v5 }
 0x2df   :  { %497 = vadd.xlane.f32.xlu1 %v496_v7 }
 0x2ec   :  { %v459_v8 = vpop.xlane.xlu2 %458 }
 0x2ed   :  { %v473_v10 = vsub.f32 %v441_v43, %v459_v8 }
 0x2ef   :  { %v485_v12 = vmul.f32 1.442695, %v473_v10 }
 0x2f1   :  { %6354 = vpow2.f32 %v485_v12 }
 0x2f6   :  { %v456_v13 = vpop.xlane.xlu2 %455 }
 0x2f7   :  { %v6882_v14 = vpop.eup %6354  ;;  %v472_v15 = vsub.f32 %v440_v46, %v456_v13 }
 0x2f8   :  { %v505_v16 = vsel %vm230_vm3, %v6882_v14, 0.0 }
 0x2f9   :  { %v483_v17 = vmul.f32 1.442695, %v472_v15  ;;  %506 = vadd.xlane.f32.xlu0 %v505_v16 }
 0x2fb   :  { %6356 = vpow2.f32 %v483_v17 }
 0x301   :  { %v6886_v20 = vpop.eup %6356 }
 0x302   :  { %v502_v23 = vsel %vm230_vm3, %v6886_v20, 0.0 }
 0x303   :  { %503 = vadd.xlane.f32.xlu1 %v502_v23 }
 0x306   :  { %v453_v24 = vpop.xlane.xlu1 %452 }
 0x307   :  { %v471_v25 = vsub.f32 %v439_v49, %v453_v24 }
 0x309   :  { %v481_v26 = vmul.f32 1.442695, %v471_v25 }
 0x30b   :  { %6358 = vpow2.f32 %v481_v26 }
 0x30c   :  { %v462_v27 = vpop.xlane.xlu0 %461 }
 0x30d   :  { %v474_v28 = vsub.f32 %v442_v52, %v462_v27 }
 0x30e   :  { %v468_v29 = vpop.xlane.xlu2 %467 }
 0x30f   :  { %v487_v30 = vmul.f32 1.442695, %v474_v28  ;;  %v465_v31 = vpop.xlane.xlu1 %464  ;;  %v476_v34 = vsub.f32 %v444_v55, %v468_v29 }
 0x310   :  { %v475_v32 = vsub.f32 %v443_v57, %v465_v31 }
 0x311   :  { %v6890_v33 = vpop.eup %6358  ;;  %6360 = vpow2.f32 %v487_v30  ;;  %v491_v37 = vmul.f32 1.442695, %v476_v34 }
 0x312   :  { %v489_v35 = vmul.f32 1.442695, %v475_v32  ;;  %v499_v36 = vsel %vm230_vm3, %v6890_v33, 0.0 }
 0x313   :  { %500 = vadd.xlane.f32.xlu2 %v499_v36 }
 0x314   :  { %6362 = vpow2.f32 %v489_v35 }
 0x315   :  { %6364 = vpow2.f32 %v491_v37 }
 0x317   :  { %v6894_v38 = vpop.eup %6360 }
 0x318   :  { %v508_v41 = vsel %vm230_vm3, %v6894_v38, 0.0 }
 0x31a   :  { %v6896_v39 = vpop.eup %6362 }
 0x31b   :  { %v511_v43 = vsel %vm230_vm3, %v6896_v39, 0.0  ;;  %509 = vadd.xlane.f32.xlu2 %v508_v41  ;;  %v6904_v44 = vpop.eup %6364 }
 0x31c   :  { %512 = vadd.xlane.f32.xlu0 %v511_v43  ;;  %793 = vrot.lane.b32.xlu1 %v6800_v18, %s8700_s11  ;;  %v514_v47 = vsel %vm230_vm3, %v6904_v44, 0.0  ;;  %v6256_v18 = vpack.i.bf16 %v6802_v19, %v6812_v22 }
 0x31f   :  { %v6253_v45 = vpop.permute.xlu0 %6252 }
 0x320   :  { %v6254_v46 = vunpack.i.l.bf16 %v6253_v45  ;;  %v6255_v51 = vunpack.i.h.bf16 %v6253_v45 }
 0x322   :  { %710 = vmatpush.msrb.mxu0 %v6254_v46 }
 0x323   :  { %515 = vadd.xlane.f32.xlu2 %v514_v47 }
 0x327   :  { %v6248_v48 = vpop.permute.xlu1 %6247 }
 0x328   :  { %v6250_v49 = vunpack.i.h.bf16 %v6248_v48  ;;  %v6249_v50 = vunpack.i.l.bf16 %v6248_v48 }
 0x32a   :  { %658 = vmatpush.msra.mxu3 %v6249_v50  ;;  %684 = vmatpush.msrb.mxu2 %v6250_v49 }
 0x32c   :  { %762 = vmatpush.msrb.mxu3 %v6255_v51 }
 0x330   :  { %819 = vrot.lane.b32.xlu0 %v6810_v21, %s8700_s11 }
 0x33b   :  { %6257 = vrot.lane.b32.xlu2 %v6256_v18, %s8700_s11  ;;  %s8747_s11 = smov 120  }
 0x34a   :  { %v495_v52 = vpop.xlane.xlu0 %494 }
 0x34b   :  { %6366 = vrcp.f32 %v495_v52  ;;  %v528_v57 = vand.u32 2147483648, %v495_v52  ;;  %v526_v59 = vand.u32 2147483647, %v495_v52  ;;  %vm522_vm5 = vweird.f32 %v495_v52 }
 0x34d   :  { %v529_v21 = vor.u32 1.1754944e-38, %v528_v57  ;;  %vm527_vm7 = vcmp.eq.f32.partialorder %v526_v59, 8.507059e+37 }
 0x351   :  { %v6367_v53 = vpop.eup %6366 }
 0x352   :  { %v518_v54 = vmul.f32 %v6367_v53, %v495_v52  ;;  %v498_v55 = vpop.xlane.xlu1 %497  ;;  %vm523_vm4 = vweird.f32 %v6367_v53  ;;  %v6971_v52 = vld [vmem:[%s8742_s13] sm:$0x3f] }
 0x353   :  { %6368 = vrcp.f32 %v498_v55  ;;  %vm524_vm6 = vmor %vm522_vm5, %vm523_vm4  ;;  %v543_v1 = vand.u32 2147483648, %v498_v55  ;;  %v541_v3 = vand.u32 2147483647, %v498_v55  ;;  %vm537_vm9 = vweird.f32 %v498_v55 }
 0x354   :  { %v519_v56 = vsub.f32 1.0, %v518_v54 }
 0x355   :  { %v544_v7 = vor.u32 1.1754944e-38, %v543_v1  ;;  %vm542_vm11 = vcmp.eq.f32.partialorder %v541_v3, 8.507059e+37 }
 0x356   :  { %v520_v58 = vmul.f32 %v6367_v53, %v519_v56 }
 0x358   :  { %v521_v60 = vadd.f32 %v6367_v53, %v520_v58 }
 0x359   :  { %v6369_v61 = vpop.eup %6368 }
 0x35a   :  { %v525_v62 = vsel %vm524_vm6, %v6367_v53, %v521_v60  ;;  %v533_v19 = vmul.f32 %v6369_v61, %v498_v55  ;;  %vm538_vm8 = vweird.f32 %v6369_v61 }
 0x35b   :  { %v530_v22 = vsel %vm527_vm7, %v529_v21, %v525_v62  ;;  %vm539_vm10 = vmor %vm537_vm9, %vm538_vm8 }
 0x35c   :  { %v534_v63 = vsub.f32 1.0, %v533_v19  ;;  %v531_v0 = vmul.f32 %v6874_v4, %v530_v22 }
 0x35e   :  { %v535_v2 = vmul.f32 %v6369_v61, %v534_v63  ;;  %5972 = vmatmul.msk.f32.vlgmr.msra.gmra.mxu3 %vm230_vm3, %v531_v0 }
 0x360   :  { %v536_v5 = vadd.f32 %v6369_v61, %v535_v2 }
 0x362   :  { %v540_v8 = vsel %vm539_vm10, %v6369_v61, %v536_v5 }
 0x363   :  { %v545_v10 = vsel %vm542_vm11, %v544_v7, %v540_v8 }
 0x364   :  { %v546_v12 = vmul.f32 %v6878_v6, %v545_v10 }
 0x366   :  { %5973 = vmatmul.msk.f32.vlgmr.msrb.gmra.mxu2 %vm230_vm3, %v546_v12 }
 0x36c   :  { %v507_v13 = vpop.xlane.xlu0 %506 }
 0x36d   :  { %6370 = vrcp.f32 %v507_v13  ;;  %v588_v17 = vand.u32 2147483648, %v507_v13  ;;  %v586_v24 = vand.u32 2147483647, %v507_v13  ;;  %vm582_vm13 = vweird.f32 %v507_v13 }
 0x36f   :  { %v589_v26 = vor.u32 1.1754944e-38, %v588_v17  ;;  %vm587_vm15 = vcmp.eq.f32.partialorder %v586_v24, 8.507059e+37 }
 0x373   :  { %v6371_v4 = vpop.eup %6370 }
 0x374   :  { %v578_v15 = vmul.f32 %v6371_v4, %v507_v13  ;;  %vm583_vm12 = vweird.f32 %v6371_v4 }
 0x375   :  { %vm584_vm14 = vmor %vm582_vm13, %vm583_vm12 }
 0x376   :  { %v579_v16 = vsub.f32 1.0, %v578_v15  ;;  %v504_v28 = vpop.xlane.xlu1 %503 }
 0x377   :  { %6372 = vrcp.f32 %v504_v28  ;;  %v573_v48 = vand.u32 2147483648, %v504_v28  ;;  %vm567_vm6 = vweird.f32 %v504_v28  ;;  %v571_v59 = vand.u32 2147483647, %v504_v28 }
 0x378   :  { %v580_v23 = vmul.f32 %v6371_v4, %v579_v16 }
 0x379   :  { %v574_v21 = vor.u32 1.1754944e-38, %v573_v48  ;;  %vm572_vm10 = vcmp.eq.f32.partialorder %v571_v59, 8.507059e+37 }
 0x37a   :  { %v581_v25 = vadd.f32 %v6371_v4, %v580_v23 }
 0x37c   :  { %v585_v27 = vsel %vm584_vm14, %v6371_v4, %v581_v25 }
 0x37d   :  { %v590_v29 = vsel %vm587_vm15, %v589_v26, %v585_v27  ;;  %v6373_v30 = vpop.eup %6372 }
 0x37e   :  { %v591_v6 = vmul.f32 %v6882_v14, %v590_v29  ;;  %v563_v32 = vmul.f32 %v6373_v30, %v504_v28  ;;  %vm568_vm1 = vweird.f32 %v6373_v30 }
 0x37f   :  { %vm6927_vm7 = vmor %vm567_vm6, %vm568_vm1 }
 0x380   :  { %5976 = vmatmul.msk.f32.vlgmr.msrb.gmra.mxu3 %vm230_vm3, %v591_v6  ;;  %v564_v34 = vsub.f32 1.0, %v563_v32 }
 0x382   :  { %v565_v45 = vmul.f32 %v6373_v30, %v564_v34 }
 0x384   :  { %v566_v50 = vadd.f32 %v6373_v30, %v565_v45  ;;  %v212_v45 = vld [vmem:[%s8741_s9 + $0x10] sm:$0xff] }
 0x386   :  { %v501_v31 = vpop.xlane.xlu2 %500  ;;  %v570_v61 = vsel %vm6927_vm7, %v6373_v30, %v566_v50 }
 0x387   :  { %6374 = vrcp.f32 %v501_v31  ;;  %v558_v14 = vand.u32 2147483648, %v501_v31  ;;  %v556_v49 = vand.u32 2147483647, %v501_v31  ;;  %vm552_vm4 = vweird.f32 %v501_v31 }
 0x388   :  { %v575_v10 = vsel %vm572_vm10, %v574_v21, %v570_v61 }
 0x389   :  { %v559_v55 = vor.u32 1.1754944e-38, %v558_v14  ;;  %vm557_vm8 = vcmp.eq.f32.partialorder %v556_v49, 8.507059e+37  ;;  %v576_v28 = vmul.f32 %v6886_v20, %v575_v10  ;;  %v6592_v10 = vmov 32.0  }
 0x38d   :  { %v6375_v35 = vpop.eup %6374 }
 0x38e   :  { %v548_v36 = vmul.f32 %v6375_v35, %v501_v31  ;;  %v794_v37 = vpop.permute.xlu1 %793  ;;  %v510_v41 = vpop.xlane.xlu2 %509  ;;  %vm553_vm0 = vweird.f32 %v6375_v35 }
 0x38f   :  { %6376 = vrcp.f32 %v510_v41  ;;  %v513_v43 = vpop.xlane.xlu0 %512  ;;  %814 = vmatpush.msra.mxu0 %v794_v37  ;;  %vm6919_vm5 = vmor %vm552_vm4, %vm553_vm0  ;;  %v601_v22 = vand.u32 2147483647, %v510_v41  ;;  %v603_v63 = vand.u32 2147483648, %v510_v41  ;;  %vm597_vm12 = vweird.f32 %v510_v41 }
 0x390   :  { %v549_v46 = vsub.f32 1.0, %v548_v36  ;;  %6378 = vrcp.f32 %v513_v43  ;;  %v616_v3 = vand.u32 2147483647, %v513_v43  ;;  %v618_v5 = vand.u32 2147483648, %v513_v43 }
 0x391   :  { %vm602_vm14 = vcmp.eq.f32.partialorder %v601_v22, 8.507059e+37  ;;  %v604_v13 = vor.u32 1.1754944e-38, %v603_v63  ;;  %vm612_vm15 = vweird.f32 %v513_v43 }
 0x392   :  { %v550_v47 = vmul.f32 %v6375_v35, %v549_v46  ;;  %vm617_vm1 = vcmp.eq.f32.partialorder %v616_v3, 8.507059e+37 }
 0x394   :  { %v551_v51 = vadd.f32 %v6375_v35, %v550_v47  ;;  %v213_v47 = vld [vmem:[%s8741_s9 + $0x18] sm:$0xff] }
 0x395   :  { %v6377_v18 = vpop.eup %6376 }
 0x396   :  { %v6379_v53 = vpop.eup %6378  ;;  %v555_v54 = vsel %vm6919_vm5, %v6375_v35, %v551_v51  ;;  %v593_v56 = vmul.f32 %v6377_v18, %v510_v41  ;;  %v6925_v57 = vpop.xlane.xlu2 %515  ;;  %vm598_vm9 = vweird.f32 %v6377_v18  ;;  %v210_v41 = vld [vmem:[%s8741_s9] sm:$0xff] }
 0x397   :  { %v608_v60 = vmul.f32 %v6379_v53, %v513_v43  ;;  %6380 = vrcp.f32 %v6925_v57  ;;  %v560_v19 = vsel %vm557_vm8, %v559_v55, %v555_v54  ;;  %vm613_vm11 = vweird.f32 %v6379_v53  ;;  %vm599_vm13 = vmor %vm597_vm12, %vm598_vm9  ;;  %866 = vmatpush.msra.mxu3 %v210_v41 }
 0x398   :  { %v594_v62 = vsub.f32 1.0, %v593_v56  ;;  %v561_v1 = vmul.f32 %v6890_v33, %v560_v19  ;;  %vm614_vm0 = vmor %vm612_vm15, %vm613_vm11  ;;  %v619_v33 = vor.u32 1.1754944e-38, %v618_v5  ;;  %v633_v30 = vand.u32 2147483648, %v6925_v57 }
 0x399   :  { %v609_v0 = vsub.f32 1.0, %v608_v60  ;;  %v631_v34 = vand.u32 2147483647, %v6925_v57  ;;  %vm627_vm5 = vweird.f32 %v6925_v57  ;;  %v874_v54 = vperm.slane %v6971_v52, 0 }
 0x39a   :  { %v595_v2 = vmul.f32 %v6377_v18, %v594_v62  ;;  %5974 = vmatmul.msk.f32.vlgmr.msrb.gmra.mxu0 %vm230_vm3, %v561_v1  ;;  %6382 = vrcp.f32 %v6592_v10  ;;  %vm1077_vm15 = vcmask 523264  }
 0x39b   :  { %v610_v7 = vmul.f32 %v6379_v53, %v609_v0  ;;  %vm632_vm7 = vcmp.eq.f32.partialorder %v631_v34, 8.507059e+37  ;;  %929 = vmatpush.msrb.mxu0 %v212_v45 }
 0x39c   :  { %v596_v8 = vadd.f32 %v6377_v18, %v595_v2 }
 0x39d   :  { %v6381_v12 = vpop.eup %6380  ;;  %v611_v4 = vadd.f32 %v6379_v53, %v610_v7 }
 0x39e   :  { %v600_v15 = vsel %vm599_vm13, %v6377_v18, %v596_v8  ;;  %v623_v16 = vmul.f32 %v6381_v12, %v6925_v57  ;;  %v6258_v17 = vpop.permute.xlu2 %6257  ;;  %vm628_vm4 = vweird.f32 %v6381_v12 }
 0x39f   :  { %v615_v23 = vsel %vm614_vm0, %v6379_v53, %v611_v4  ;;  %v6260_v24 = vunpack.i.h.bf16 %v6258_v17  ;;  %v6259_v25 = vunpack.i.l.bf16 %v6258_v17  ;;  %v605_v26 = vsel %vm602_vm14, %v604_v13, %v600_v15  ;;  %vm629_vm6 = vmor %vm627_vm5, %vm628_vm4 }
 0x3a0   :  { %v624_v27 = vsub.f32 1.0, %v623_v16  ;;  %v606_v29 = vmul.f32 %v6894_v38, %v605_v26  ;;  %v620_v6 = vsel %vm617_vm1, %v619_v33, %v615_v23  ;;  %v634_v38 = vor.u32 1.1754944e-38, %v633_v30  ;;  %v1031_v30 = vld [vmem:[%s8743_s5 + $0x10] sm:$0xff] }
 0x3a1   :  { %736 = vmatpush.msrb.mxu1 %v6259_v25  ;;  %788 = vmatpush.msra.mxu2 %v6260_v24  ;;  %v621_v31 = vmul.f32 %v6896_v39, %v620_v6  ;;  %v1032_v6 = vld [vmem:[%s8743_s5 + $0x18] sm:$0xff] }
 0x3a2   :  { %v625_v32 = vmul.f32 %v6381_v12, %v624_v27  ;;  %v820_v35 = vpop.permute.xlu0 %819  ;;  %5975 = vmatmul.msk.f32.vlgmr.msrb.gmra.mxu1 %vm230_vm3, %v576_v28  ;;  %5977 = vmatmul.msk.f32.vlgmr.msra.gmra.mxu2 %vm230_vm3, %v606_v29 }
 0x3a3   :  { %5978 = vmatmul.msk.f32.vlgmr.msra.gmra.mxu0 %vm230_vm3, %v621_v31  ;;  %840 = vmatpush.msra.mxu1 %v820_v35  ;;  %v1030_v31 = vld [vmem:[%s8743_s5 + $0x8] sm:$0xff] }
 0x3a4   :  { %v626_v20 = vadd.f32 %v6381_v12, %v625_v32  ;;  %1063 = vmatpush.msrb.mxu3 %v1032_v6  ;;  %v1029_v32 = vld [vmem:[%s8743_s5] sm:$0xff] }
 0x3a5   :  { %960 = vmatpush.msrb.mxu1 %v213_v47 }
 0x3a6   :  { %v630_v36 = vsel %vm629_vm6, %v6381_v12, %v626_v20  ;;  %v6383_v12 = vpop.eup %6382  ;;  %1064 = vmatpush.msrb.mxu3 %v1031_v30 }
 0x3a7   :  { %v635_v39 = vsel %vm632_vm7, %v634_v38, %v630_v36  ;;  %v979_v13 = vmul.f32 32.0, %v6383_v12  ;;  %vm983_vm8 = vweird.f32 %v6383_v12  ;;  %v1041_v38 = vld [vmem:[%s8744_s3 + $0x38] sm:$0xff]  ;;  %v1040_v36 = vld [vmem:[%s8744_s3 + $0x30] sm:$0xff] }
 0x3a8   :  { %v636_v37 = vmul.f32 %v6904_v44, %v635_v39  ;;  %v211_v44 = vld [vmem:[%s8741_s9 + $0x8] sm:$0xff]  ;;  %1065 = vmatpush.msrb.mxu3 %v1030_v31 }
 0x3a9   :  { %898 = vmatpush.msrb.mxu2 %v211_v44  ;;  %v980_v4 = vsub.f32 1.0, %v979_v13  ;;  %v1039_v39 = vld [vmem:[%s8744_s3 + $0x28] sm:$0xff]  ;;  %v1037_v44 = vld [vmem:[%s8744_s3 + $0x18] sm:$0xff] }
 0x3aa   :  { %5979 = vmatmul.msk.f32.vlgmr.msra.gmra.mxu1 %vm230_vm3, %v636_v37  ;;  %1066 = vmatpush.msrb.mxu3 %v1029_v32 }
 0x3ab   :  { %1092 = vmatpush.msra.mxu2 %v1041_v38  ;;  %v5995_v38 = vld [vmem:[%s8732_s10 + $0x30] sm:$0xff] }
 0x3ad   :  { %1093 = vmatpush.msra.mxu2 %v1040_v36  ;;  %v5994_v36 = vld [vmem:[%s8732_s10 + $0x28] sm:$0xff] }
 0x3af   :  { %1094 = vmatpush.msra.mxu2 %v1039_v39  ;;  %v5993_v39 = vld [vmem:[%s8732_s10 + $0x20] sm:$0xff] }
 0x3e1   :  { %v660_v43 = vpop.f32.mrf.mxu3 }
 0x3e2   :  { %5980 = vmatmul.msk.f32.vlgmr.msra.gmra.mxu3 %vm230_vm3, %v660_v43  ;;  %v1038_v43 = vld [vmem:[%s8744_s3 + $0x20] sm:$0xff] }
 0x3e3   :  { %1095 = vmatpush.msra.mxu2 %v1038_v43 }
 0x3e5   :  { %1096 = vmatpush.msra.mxu2 %v1037_v44 }
 0x3e9   :  { %v686_v46 = vpop.f32.mrf.mxu2 }
 0x3ea   :  { %5981 = vmatmul.msk.f32.gmra.mxu3 %vm230_vm3, %v686_v46 }
 0x403   :  { %v764_v14 = vpop.f32.mrf.mxu3 }
 0x404   :  { %5984 = vmatmul.msk.f32.vlgmr.msrb.gmra.mxu0 %vm230_vm3, %v764_v14 }
 0x417   :  { %v712_v48 = vpop.f32.mrf.mxu0 }
 0x418   :  { %5982 = vmatmul.msk.f32.vlgmr.msrb.gmra.mxu2 %vm230_vm3, %v712_v48 }
 0x41f   :  { %v738_v49 = vpop.f32.mrf.mxu1 }
 0x420   :  { %v816_v50 = vpop.f32.mrf.mxu0  ;;  %5983 = vmatmul.msk.f32.gmra.mxu2 %vm230_vm3, %v738_v49 }
 0x421   :  { %5986 = vmatmul.msk.f32.vlgmr.msrb.gmra.mxu1 %vm230_vm3, %v816_v50 }
 0x425   :  { %v790_v51 = vpop.f32.mrf.mxu2 }
 0x426   :  { %5985 = vmatmul.msk.f32.gmra.mxu0 %vm230_vm3, %v790_v51 }
 0x427   :  { %v842_v18 = vpop.f32.mrf.mxu1 }
 0x429   :  { %5987 = vmatmul.msk.f32.gmra.mxu1 %vm230_vm3, %v842_v18 }
 0x465   :  { %v868_v53 = vpop.f32.mrf.mxu3 }
 0x466   :  { %v875_v55 = vadd.f32 %v874_v54, %v868_v53  ;;  %v1023_v53 = vperm.slane %v6971_v52, 1 }
 0x46d   :  { %v871_v61 = vpop.f32.mrf.mxu3 }
 0x46e   :  { %v876_v62 = vadd.f32 %v874_v54, %v871_v61 }
 0x481   :  { %v931_v58 = vpop.f32.mrf.mxu0 }
 0x49b   :  { %v900_v56 = vpop.f32.mrf.mxu2 }
 0x49c   :  { %v906_v57 = vadd.f32 %v900_v56, %v875_v55 }
 0x49e   :  { %v962_v59 = vpop.f32.mrf.mxu1  ;;  %v937_v60 = vadd.f32 %v931_v58, %v906_v57  ;;  %v1026_v57 = vperm.slane %v6971_v52, 2 }
 0x4a0   :  { %v968_v21 = vadd.f32 %v962_v59, %v937_v60 }
 0x4a2   :  { %v970_v19 = vadd.f32 %v968_v21, %v6765_v9  ;;  %v981_v9 = vmul.f32 %v6383_v12, %v980_v4  ;;  %v1076_v4 = vperm.slane %v6971_v52, 3 }
 0x4a3   :  { %v903_v22 = vpop.f32.mrf.mxu2  ;;  %v934_v1 = vpop.f32.mrf.mxu0 }
 0x4a4   :  { %v907_v63 = vadd.f32 %v903_v22, %v876_v62  ;;  %v972_v0 = vsel %vm180_vm2, %v970_v19, 0.0  ;;  %v982_v15 = vadd.f32 %v6383_v12, %v981_v9 }
 0x4a5   :  { %973 = vadd.xlane.f32.xlu1 %v972_v0  ;;  %v1036_v0 = vld [vmem:[%s8744_s3 + $0x10] sm:$0xff] }
 0x4a6   :  { %v938_v2 = vadd.f32 %v934_v1, %v907_v63  ;;  %v965_v3 = vpop.f32.mrf.mxu1  ;;  %v6978_v33 = vsel %vm983_vm8, %v6383_v12, %v982_v15  ;;  %1097 = vmatpush.msra.mxu2 %v1036_v0  ;;  %v1035_v1 = vld [vmem:[%s8744_s3 + $0x8] sm:$0xff] }
 0x4a8   :  { %v969_v5 = vadd.f32 %v965_v3, %v938_v2  ;;  %1098 = vmatpush.msra.mxu2 %v1035_v1  ;;  %v1034_v2 = vld [vmem:[%s8744_s3] sm:$0xff] }
 0x4a9   :  { %v6339_v3 = vld [vmem:[%s8745_s29] ss:$0 sm:$0xff] }
 0x4aa   :  { %v971_v7 = vadd.f32 %v969_v5, %v6769_v11  ;;  %1099 = vmatpush.msra.mxu2 %v1034_v2 }
 0x4ac   :  { %v975_v8 = vsel %vm180_vm2, %v971_v7, 0.0 }
 0x4ad   :  { %976 = vadd.xlane.f32.xlu0 %v975_v8 }
 0x518   :  { %v974_v16 = vpop.xlane.xlu1 %973 }
 0x519   :  { %v985_v17 = vmul.f32 %v6978_v33, %v974_v16 }
 0x51b   :  { %v987_v23 = vsub.f32 %v970_v19, %v985_v17 }
 0x51d   :  { %v989_v24 = vmul.f32 %v987_v23, %v987_v23 }
 0x51f   :  { %v991_v11 = vsel %vm180_vm2, %v989_v24, 0.0 }
 0x520   :  { %992 = vadd.xlane.f32.xlu2 %v991_v11  ;;  %v977_v25 = vpop.xlane.xlu0 %976 }
 0x521   :  { %v986_v26 = vmul.f32 %v6978_v33, %v977_v25 }
 0x523   :  { %v988_v27 = vsub.f32 %v971_v7, %v986_v26 }
 0x525   :  { %v990_v28 = vmul.f32 %v988_v27, %v988_v27 }
 0x527   :  { %v994_v29 = vsel %vm180_vm2, %v990_v28, 0.0 }
 0x528   :  { %995 = vadd.xlane.f32.xlu1 %v994_v29 }
 0x593   :  { %v993_v34 = vpop.xlane.xlu2 %992 }
 0x594   :  { %v997_v35 = vmul.f32 %v993_v34, %v6978_v33 }
 0x596   :  { %v999_v20 = vadd.f32 1e-05, %v997_v35 }
 0x598   :  { %6384 = vrsqrt.f32 %v999_v20  ;;  %vm1007_vm10 = vweird.f32 %v999_v20 }
 0x59b   :  { %v996_v37 = vpop.xlane.xlu1 %995 }
 0x59c   :  { %v998_v41 = vmul.f32 %v996_v37, %v6978_v33 }
 0x59e   :  { %v6385_v45 = vpop.eup %6384  ;;  %v1000_v46 = vadd.f32 1e-05, %v998_v41 }
 0x59f   :  { %v1002_v47 = vmul.f32 %v6385_v45, %v999_v20  ;;  %vm1008_vm9 = vweird.f32 %v6385_v45  ;;  %v5996_v20 = vld [vmem:[%s8732_s10 + $0x38] sm:$0xff] }
 0x5a0   :  { %6386 = vrsqrt.f32 %v1000_v46  ;;  %vm1009_vm11 = vmor %vm1007_vm10, %vm1008_vm9  ;;  %vm1017_vm13 = vweird.f32 %v1000_v46  ;;  %1189 = vmatpush.msra.mxu0 %v5996_v20 }
 0x5a1   :  { %v1003_v14 = vmul.f32 %v6385_v45, %v1002_v47 }
 0x5a2   :  { %1190 = vmatpush.msra.mxu0 %v5995_v38 }
 0x5a3   :  { %v1004_v48 = vmul.f32 0.5, %v1003_v14 }
 0x5a4   :  { %1191 = vmatpush.msra.mxu0 %v5994_v36 }
 0x5a5   :  { %v1005_v49 = vsub.f32 1.5, %v1004_v48 }
 0x5a6   :  { %v6387_v50 = vpop.eup %6386  ;;  %1192 = vmatpush.msra.mxu0 %v5993_v39 }
 0x5a7   :  { %v1006_v51 = vmul.f32 %v6385_v45, %v1005_v49  ;;  %v1012_v18 = vmul.f32 %v6387_v50, %v1000_v46  ;;  %vm1018_vm12 = vweird.f32 %v6387_v50 }
 0x5a8   :  { %vm1019_vm14 = vmor %vm1017_vm13, %vm1018_vm12 }
 0x5a9   :  { %v1010_v54 = vsel %vm1009_vm11, %v6385_v45, %v1006_v51  ;;  %v1013_v55 = vmul.f32 %v6387_v50, %v1012_v18 }
 0x5aa   :  { %v1021_v56 = vmul.f32 %v1010_v54, %v987_v23  ;;  %v1153_v54 = vperm.slane %v6971_v52, 4 }
 0x5ab   :  { %v1014_v58 = vmul.f32 0.5, %v1013_v55 }
 0x5ac   :  { %v1024_v59 = vmul.f32 %v1023_v53, %v1021_v56 }
 0x5ad   :  { %v1015_v60 = vsub.f32 1.5, %v1014_v58  ;;  %v1156_v58 = vperm.slane %v6971_v52, 5  ;;  %v6340_v52 = vld [vmem:[%s8734_s0 + $0x1] ss:$0 sm:$0xff]  ;;  %s8749_s0 = smov 96  }
 0x5ae   :  { %v1027_v61 = vadd.f32 %v1026_v57, %v1024_v59 }
 0x5af   :  { %v1016_v21 = vmul.f32 %v6387_v50, %v1015_v60 }
 0x5b0   :  { %5988 = vmatmul.msk.f32.vlgmr.msrb.gmra.mxu3 %vm180_vm2, %v1027_v61 }
 0x5b1   :  { %v1020_v62 = vsel %vm1019_vm14, %v6387_v50, %v1016_v21 }
 0x5b2   :  { %v1022_v19 = vmul.f32 %v1020_v62, %v988_v27 }
 0x5b4   :  { %v1025_v22 = vmul.f32 %v1023_v53, %v1022_v19 }
 0x5b6   :  { %v1028_v63 = vadd.f32 %v1026_v57, %v1025_v22 }
 0x5b8   :  { %5989 = vmatmul.msk.f32.gmra.mxu3 %vm180_vm2, %v1028_v63 }
 0x633   :  { %v1068_v5 = vpop.f32.mrf.mxu3 }
 0x634   :  { %v1069_v7 = vadd.f32 %v6339_v3, %v1068_v5 }
 0x636   :  { %v1074_v8 = vmax.f32 %v1069_v7, 0.0 }
 0x638   :  { %5990 = vmatmul.msk.f32.vlgmr.msra.gmra.mxu2 %vm1077_vm15, %v1074_v8 }
 0x63b   :  { %v1071_v10 = vpop.f32.mrf.mxu3 }
 0x63c   :  { %v1072_v12 = vadd.f32 %v6339_v3, %v1071_v10 }
 0x63e   :  { %v1075_v13 = vmax.f32 %v1072_v12, 0.0 }
 0x640   :  { %5991 = vmatmul.msk.f32.gmra.mxu2 %vm1077_vm15, %v1075_v13 }
 0x6bb   :  { %v1101_v9 = vpop.f32.mrf.mxu2 }
 0x6bc   :  { %v1102_v15 = vadd.f32 %v1101_v9, %v1076_v4 }
 0x6be   :  { %v1107_v16 = vadd.f32 %v1102_v15, %v1027_v61 }
 0x6c0   :  { %v1109_v17 = vsel %vm180_vm2, %v1107_v16, 0.0 }
 0x6c1   :  { %1110 = vadd.xlane.f32.xlu0 %v1109_v17 }
 0x6c3   :  { %v1104_v23 = vpop.f32.mrf.mxu2 }
 0x6c4   :  { %v1105_v24 = vadd.f32 %v1104_v23, %v1076_v4 }
 0x6c6   :  { %v1108_v11 = vadd.f32 %v1105_v24, %v1028_v63 }
 0x6c8   :  { %v1112_v25 = vsel %vm180_vm2, %v1108_v11, 0.0 }
 0x6c9   :  { %1113 = vadd.xlane.f32.xlu2 %v1112_v25 }
 0x734   :  { %v1111_v26 = vpop.xlane.xlu0 %1110 }
 0x735   :  { %v1115_v27 = vmul.f32 %v1111_v26, %v6978_v33 }
 0x737   :  { %v1117_v28 = vsub.f32 %v1107_v16, %v1115_v27 }
 0x739   :  { %v1119_v29 = vmul.f32 %v1117_v28, %v1117_v28 }
 0x73b   :  { %v1121_v6 = vsel %vm180_vm2, %v1119_v29, 0.0 }
 0x73c   :  { %v1114_v30 = vpop.xlane.xlu2 %1113  ;;  %1122 = vadd.xlane.f32.xlu1 %v1121_v6 }
 0x73d   :  { %v1116_v31 = vmul.f32 %v1114_v30, %v6978_v33 }
 0x73f   :  { %v1118_v32 = vsub.f32 %v1108_v11, %v1116_v31 }
 0x741   :  { %v1120_v34 = vmul.f32 %v1118_v32, %v1118_v32 }
 0x743   :  { %v1124_v35 = vsel %vm180_vm2, %v1120_v34, 0.0 }
 0x744   :  { %1125 = vadd.xlane.f32.xlu0 %v1124_v35 }
 0x7af   :  { %v1123_v37 = vpop.xlane.xlu1 %1122 }
 0x7b0   :  { %v1127_v41 = vmul.f32 %v1123_v37, %v6978_v33 }
 0x7b2   :  { %v1129_v43 = vadd.f32 1e-05, %v1127_v41 }
 0x7b4   :  { %6388 = vrsqrt.f32 %v1129_v43  ;;  %vm1137_vm1 = vweird.f32 %v1129_v43 }
 0x7b7   :  { %v1126_v45 = vpop.xlane.xlu0 %1125 }
 0x7b8   :  { %v1128_v46 = vmul.f32 %v1126_v45, %v6978_v33 }
 0x7ba   :  { %v6389_v44 = vpop.eup %6388  ;;  %v1130_v47 = vadd.f32 1e-05, %v1128_v46 }
 0x7bb   :  { %v1132_v14 = vmul.f32 %v6389_v44, %v1129_v43  ;;  %vm1138_vm0 = vweird.f32 %v6389_v44 }
 0x7bc   :  { %6390 = vrsqrt.f32 %v1130_v47  ;;  %vm1139_vm4 = vmor %vm1137_vm1, %vm1138_vm0  ;;  %vm1147_vm6 = vweird.f32 %v1130_v47 }
 0x7bd   :  { %v1133_v48 = vmul.f32 %v6389_v44, %v1132_v14 }
 0x7bf   :  { %v1134_v49 = vmul.f32 0.5, %v1133_v48 }
 0x7c1   :  { %v1135_v50 = vsub.f32 1.5, %v1134_v49 }
 0x7c2   :  { %v6391_v51 = vpop.eup %6390 }
 0x7c3   :  { %v1136_v18 = vmul.f32 %v6389_v44, %v1135_v50  ;;  %v1142_v53 = vmul.f32 %v6391_v51, %v1130_v47  ;;  %vm1148_vm5 = vweird.f32 %v6391_v51 }
 0x7c4   :  { %vm1149_vm7 = vmor %vm1147_vm6, %vm1148_vm5 }
 0x7c5   :  { %v1140_v55 = vsel %vm1139_vm4, %v6389_v44, %v1136_v18  ;;  %v1143_v56 = vmul.f32 %v6391_v51, %v1142_v53 }
 0x7c6   :  { %v1151_v57 = vmul.f32 %v1140_v55, %v1117_v28 }
 0x7c7   :  { %v1144_v59 = vmul.f32 0.5, %v1143_v56 }
 0x7c8   :  { %v1154_v60 = vmul.f32 %v1153_v54, %v1151_v57 }
 0x7c9   :  { %v1145_v61 = vsub.f32 1.5, %v1144_v59 }
 0x7ca   :  { %v7054_v21 = vadd.f32 %v1156_v58, %v1154_v60 }
 0x7cb   :  { %v1146_v62 = vmul.f32 %v6391_v51, %v1145_v61 }
 0x7cc   :  { %5998 = vmatmul.msk.f32.vlgmr.msra.gmra.mxu0 %vm180_vm2, %v7054_v21 }
 0x7cd   :  { %v1150_v19 = vsel %vm1149_vm7, %v6391_v51, %v1146_v62 }
 0x7ce   :  { %v1152_v22 = vmul.f32 %v1150_v19, %v1118_v32 }
 0x7d0   :  { %v1155_v63 = vmul.f32 %v1153_v54, %v1152_v22 }
 0x7d2   :  { %v7058_v0 = vadd.f32 %v1156_v58, %v1155_v63 }
 0x7d4   :  { %5999 = vmatmul.msk.f32.gmra.mxu0 %vm180_vm2, %v7058_v0 }
 0x849   :  { %v1194_v1 = vpop.f32.mrf.mxu0 }
 0x84a   :  { %v7065_v2 = vadd.f32 %v6340_v52, %v1194_v1 }
 0x84c   :  { %1215 = vrot.lane.b32.xlu0 %v7065_v2, %s8746_s8  ;;  %1207 = vrot.lane.b32.xlu2 %v7065_v2, %s8747_s11 }
 0x851   :  { %v1197_v3 = vpop.f32.mrf.mxu0 }
 0x852   :  { %v7071_v5 = vadd.f32 %v6340_v52, %v1197_v3 }
 0x854   :  { %1211 = vrot.lane.b32.xlu0 %v7065_v2, %s8748_s6  ;;  %1217 = vrot.lane.b32.xlu2 %v7071_v5, %s8746_s8 }
 0x855   :  { %1209 = vrot.lane.b32.xlu1 %v7071_v5, %s8747_s11 }
 0x85d   :  { %1213 = vrot.lane.b32.xlu1 %v7071_v5, %s8748_s6 }
 0x8a6   :  { %v7081_v7 = vpop.permute.xlu2 %1207 }
 0x8a7   :  { %1271 = vrot.lane.b32.xlu2 %v7081_v7, %s8749_s0 }
 0x8ae   :  { %v7101_v13 = vpop.permute.xlu2 %1217 }
 0x8af   :  { %1219 = vrot.lane.b32.xlu2 %v7065_v2, %s8749_s0 }
 0x8be   :  { %v7087_v8 = vpop.permute.xlu0 %1215 }
 0x8bf   :  { %1375 = vrot.lane.b32.xlu1 %v7087_v8, %s8749_s0 }
 0x8c6   :  { %v7091_v10 = vpop.permute.xlu0 %1211 }
 0x8c7   :  { %v7093_v12 = vpop.permute.xlu1 %1209  ;;  %1245 = vrot.lane.b32.xlu1 %v7071_v5, %s8749_s0  ;;  %1323 = vrot.lane.b32.xlu2 %v7091_v10, %s8749_s0 }
 0x8c8   :  { %1297 = vrot.lane.b32.xlu0 %v7093_v12, %s8749_s0  ;;  %v6266_v50 = vpack.i.bf16 %v7087_v8, %v7093_v12 }
 0x8cf   :  { %v7105_v4 = vpop.permute.xlu1 %1213 }
 0x8d0   :  { %1401 = vrot.lane.b32.xlu0 %v7101_v13, %s8749_s0 }
 0x8d8   :  { %1349 = vrot.lane.b32.xlu0 %v7105_v4, %s8749_s0 }
 0x901   :  { %v1272_v9 = vpop.permute.xlu2 %1271 }
 0x902   :  { %6008 = vmatpush.xpose.msk.msra.mxu3 %vm230_vm3, %v1272_v9 }
 0x905   :  { %6009 = vmatmul.msk.f32.vlgmr.msra.gmra.mxu3 %vm230_vm3, %v7081_v7 }
 0x909   :  { %v1220_v15 = vpop.permute.xlu2 %1219 }
 0x90a   :  { %6004 = vmatpush.xpose.msk.msra.mxu1 %vm230_vm3, %v1220_v15 }
 0x90d   :  { %6005 = vmatmul.msk.f32.vlgmr.msra.gmra.mxu1 %vm230_vm3, %v7065_v2 }
 0x921   :  { %v1324_v16 = vpop.permute.xlu2 %1323 }
 0x922   :  { %6012 = vmatpush.xpose.msk.msrb.mxu0 %vm230_vm3, %v1324_v16 }
 0x925   :  { %6013 = vmatmul.msk.f32.vlgmr.msrb.gmra.mxu0 %vm230_vm3, %v7091_v10 }
 0x931   :  { %v1376_v17 = vpop.permute.xlu1 %1375 }
 0x932   :  { %6016 = vmatpush.xpose.msk.msrb.mxu3 %vm230_vm3, %v1376_v17 }
 0x935   :  { %6017 = vmatmul.msk.f32.vlgmr.msrb.gmra.mxu3 %vm230_vm3, %v7087_v8 }
 0x939   :  { %v1246_v23 = vpop.permute.xlu1 %1245 }
 0x93a   :  { %v1298_v24 = vpop.permute.xlu0 %1297  ;;  %6006 = vmatpush.xpose.msk.msrb.mxu1 %vm230_vm3, %v1246_v23 }
 0x93b   :  { %6010 = vmatpush.xpose.msk.msrb.mxu2 %vm230_vm3, %v1298_v24 }
 0x93d   :  { %6007 = vmatmul.msk.f32.vlgmr.msrb.gmra.mxu1 %vm230_vm3, %v7071_v5 }
 0x93e   :  { %6011 = vmatmul.msk.f32.vlgmr.msrb.gmra.mxu2 %vm230_vm3, %v7093_v12 }
 0x942   :  { %v1402_v11 = vpop.permute.xlu0 %1401 }
 0x943   :  { %6018 = vmatpush.xpose.msk.msra.mxu2 %vm230_vm3, %v1402_v11 }
 0x946   :  { %6019 = vmatmul.msk.f32.vlgmr.msra.gmra.mxu2 %vm230_vm3, %v7101_v13 }
 0x94a   :  { %v1350_v25 = vpop.permute.xlu0 %1349 }
 0x94b   :  { %6014 = vmatpush.xpose.msk.msra.mxu1 %vm230_vm3, %v1350_v25 }
 0x94e   :  { %6015 = vmatmul.msk.f32.vlgmr.msra.gmra.mxu1 %vm230_vm3, %v7105_v4 }
 0x988   :  { %v1294_v26 = vpop.f32.mrf.mxu3 }
 0x989   :  { %v1429_v27 = vmul.f32 0.125, %v1294_v26 }
 0x98a   :  { %v1242_v28 = vpop.f32.mrf.mxu1 }
 0x98b   :  { %v1427_v29 = vmul.f32 0.125, %v1242_v28  ;;  %v1441_v6 = vsel %vm230_vm3, %v1429_v27, -inf }
 0x98c   :  { %1442 = vmax.xlane.f32.xlu1 %v1441_v6 }
 0x98d   :  { %v1435_v30 = vsel %vm230_vm3, %v1427_v29, -inf }
 0x98e   :  { %1436 = vmax.xlane.f32.xlu2 %v1435_v30 }
 0x9a2   :  { %v1346_v31 = vpop.f32.mrf.mxu0 }
 0x9a3   :  { %v1431_v32 = vmul.f32 0.125, %v1346_v31 }
 0x9a5   :  { %v1447_v34 = vsel %vm230_vm3, %v1431_v32, -inf }
 0x9a6   :  { %1448 = vmax.xlane.f32.xlu0 %v1447_v34 }
 0x9b8   :  { %v1398_v35 = vpop.f32.mrf.mxu3 }
 0x9b9   :  { %v1433_v20 = vmul.f32 0.125, %v1398_v35 }
 0x9ba   :  { %v1268_v38 = vpop.f32.mrf.mxu1 }
 0x9bb   :  { %v1428_v36 = vmul.f32 0.125, %v1268_v38  ;;  %v1453_v39 = vsel %vm230_vm3, %v1433_v20, -inf }
 0x9bc   :  { %1454 = vmax.xlane.f32.xlu1 %v1453_v39  ;;  %v6261_v39 = vpack.i.bf16 %v7065_v2, %v7081_v7 }
 0x9bd   :  { %v1438_v37 = vsel %vm230_vm3, %v1428_v36, -inf }
 0x9be   :  { %1439 = vmax.xlane.f32.xlu2 %v1438_v37 }
 0x9c1   :  { %v1320_v41 = vpop.f32.mrf.mxu2 }
 0x9c2   :  { %v1430_v43 = vmul.f32 0.125, %v1320_v41  ;;  %v6271_v41 = vpack.i.bf16 %v7091_v10, %v7071_v5 }
 0x9c4   :  { %v1444_v45 = vsel %vm230_vm3, %v1430_v43, -inf }
 0x9c5   :  { %1445 = vmax.xlane.f32.xlu0 %v1444_v45 }
 0x9c9   :  { %v1424_v46 = vpop.f32.mrf.mxu2 }
 0x9ca   :  { %v1434_v44 = vmul.f32 0.125, %v1424_v46 }
 0x9cb   :  { %v1372_v47 = vpop.f32.mrf.mxu1 }
 0x9cc   :  { %v1432_v14 = vmul.f32 0.125, %v1372_v47  ;;  %v1456_v48 = vsel %vm230_vm3, %v1434_v44, -inf }
 0x9cd   :  { %1457 = vmax.xlane.f32.xlu1 %v1456_v48 }
 0x9ce   :  { %v1450_v49 = vsel %vm230_vm3, %v1432_v14, -inf }
 0x9cf   :  { %1451 = vmax.xlane.f32.xlu2 %v1450_v49 }
 0x9d9   :  { %6267 = vrot.lane.b32.xlu0 %v6266_v50, %s8750_s1 }
 0x9ff   :  { %v1443_v51 = vpop.xlane.xlu1 %1442 }
 0xa00   :  { %v1461_v18 = vsub.f32 %v1429_v27, %v1443_v51 }
 0xa01   :  { %v1437_v53 = vpop.xlane.xlu2 %1436 }
 0xa02   :  { %v1471_v54 = vmul.f32 1.442695, %v1461_v18  ;;  %v1459_v55 = vsub.f32 %v1427_v29, %v1437_v53 }
 0xa04   :  { %6392 = vpow2.f32 %v1471_v54  ;;  %v1467_v56 = vmul.f32 1.442695, %v1459_v55 }
 0xa06   :  { %6394 = vpow2.f32 %v1467_v56 }
 0xa0a   :  { %v7144_v57 = vpop.eup %6392 }
 0xa0b   :  { %v1489_v58 = vsel %vm230_vm3, %v7144_v57, 0.0 }
 0xa0c   :  { %v7148_v59 = vpop.eup %6394  ;;  %1490 = vadd.xlane.f32.xlu0 %v1489_v58 }
 0xa0d   :  { %v1483_v60 = vsel %vm230_vm3, %v7148_v59, 0.0 }
 0xa0e   :  { %1484 = vadd.xlane.f32.xlu1 %v1483_v60 }
 0xa19   :  { %v1449_v61 = vpop.xlane.xlu0 %1448 }
 0xa1a   :  { %v1463_v62 = vsub.f32 %v1431_v32, %v1449_v61 }
 0xa1c   :  { %v1475_v19 = vmul.f32 1.442695, %v1463_v62 }
 0xa1e   :  { %6396 = vpow2.f32 %v1475_v19 }
 0xa24   :  { %v7152_v22 = vpop.eup %6396 }
 0xa25   :  { %v1495_v63 = vsel %vm230_vm3, %v7152_v22, 0.0 }
 0xa26   :  { %1496 = vadd.xlane.f32.xlu2 %v1495_v63 }
 0xa2f   :  { %v1455_v52 = vpop.xlane.xlu1 %1454 }
 0xa30   :  { %v1465_v1 = vsub.f32 %v1433_v20, %v1455_v52 }
 0xa31   :  { %v1440_v3 = vpop.xlane.xlu2 %1439 }
 0xa32   :  { %v1479_v8 = vmul.f32 1.442695, %v1465_v1  ;;  %v1460_v12 = vsub.f32 %v1428_v36, %v1440_v3 }
 0xa34   :  { %6398 = vpow2.f32 %v1479_v8  ;;  %v1469_v9 = vmul.f32 1.442695, %v1460_v12 }
 0xa36   :  { %6400 = vpow2.f32 %v1469_v9 }
 0xa38   :  { %v1446_v25 = vpop.xlane.xlu0 %1445 }
 0xa39   :  { %v1462_v29 = vsub.f32 %v1430_v43, %v1446_v25 }
 0xa3a   :  { %v7156_v15 = vpop.eup %6398 }
 0xa3b   :  { %v1501_v16 = vsel %vm230_vm3, %v7156_v15, 0.0  ;;  %v1473_v30 = vmul.f32 1.442695, %v1462_v29 }
 0xa3c   :  { %v7160_v17 = vpop.eup %6400  ;;  %1502 = vadd.xlane.f32.xlu0 %v1501_v16 }
 0xa3d   :  { %v1486_v23 = vsel %vm230_vm3, %v7160_v17, 0.0 }
 0xa3e   :  { %1487 = vadd.xlane.f32.xlu1 %v1486_v23 }
 0xa40   :  { %v1458_v24 = vpop.xlane.xlu1 %1457 }
 0xa41   :  { %v1466_v11 = vsub.f32 %v1434_v44, %v1458_v24 }
 0xa42   :  { %v1452_v26 = vpop.xlane.xlu2 %1451 }
 0xa43   :  { %v1481_v27 = vmul.f32 1.442695, %v1466_v11  ;;  %v1464_v28 = vsub.f32 %v1432_v14, %v1452_v26 }
 0xa45   :  { %6402 = vpow2.f32 %v1481_v27  ;;  %v1477_v6 = vmul.f32 1.442695, %v1464_v28 }
 0xa47   :  { %6404 = vpow2.f32 %v1477_v6 }
 0xa48   :  { %6406 = vpow2.f32 %v1473_v30 }
 0xa4b   :  { %v7164_v31 = vpop.eup %6402  ;;  %v7166_v32 = vpop.permute.xlu0 %6267 }
 0xa4c   :  { %v6269_v34 = vunpack.i.l.bf16 %v7166_v32  ;;  %v1504_v35 = vsel %vm230_vm3, %v7164_v31, 0.0 }
 0xa4d   :  { %v7171_v20 = vpop.eup %6404  ;;  %1505 = vadd.xlane.f32.xlu0 %v1504_v35 }
 0xa4e   :  { %1726 = vmatpush.msrb.mxu2 %v6269_v34  ;;  %v1498_v38 = vsel %vm230_vm3, %v7171_v20, 0.0  ;;  %v7175_v36 = vpop.eup %6406 }
 0xa4f   :  { %1499 = vadd.xlane.f32.xlu2 %v1498_v38  ;;  %v1492_v37 = vsel %vm230_vm3, %v7175_v36, 0.0 }
 0xa57   :  { %1493 = vadd.xlane.f32.xlu2 %v1492_v37  ;;  %6262 = vrot.lane.b32.xlu1 %v6261_v39, %s8750_s1 }
 0xa5f   :  { %1809 = vrot.lane.b32.xlu1 %v7101_v13, %s8750_s1 }
 0xa61   :  { %1757 = vrot.lane.b32.xlu0 %v7105_v4, %s8750_s1 }
 0xa6f   :  { %6272 = vrot.lane.b32.xlu2 %v6271_v41, %s8750_s1 }
 0xa7f   :  { %v1491_v43 = vpop.xlane.xlu0 %1490 }
 0xa80   :  { %6408 = vrcp.f32 %v1491_v43  ;;  %vm1542_vm8 = vweird.f32 %v1491_v43  ;;  %v1548_v55 = vand.u32 2147483648, %v1491_v43  ;;  %v1546_v62 = vand.u32 2147483647, %v1491_v43 }
 0xa81   :  { %v1485_v45 = vpop.xlane.xlu1 %1484 }
 0xa82   :  { %6410 = vrcp.f32 %v1485_v45  ;;  %v1518_v56 = vand.u32 2147483648, %v1485_v45  ;;  %vm1512_vm12 = vweird.f32 %v1485_v45  ;;  %v1516_v19 = vand.u32 2147483647, %v1485_v45 }
 0xa83   :  { %v1549_v3 = vor.u32 1.1754944e-38, %v1548_v55  ;;  %vm1547_vm14 = vcmp.eq.f32.partialorder %v1546_v62, 8.507059e+37 }
 0xa84   :  { %v1519_v8 = vor.u32 1.1754944e-38, %v1518_v56  ;;  %vm1517_vm0 = vcmp.eq.f32.partialorder %v1516_v19, 8.507059e+37 }
 0xa86   :  { %v6409_v2 = vpop.eup %6408 }
 0xa87   :  { %v1538_v44 = vmul.f32 %v6409_v2, %v1491_v43  ;;  %vm1543_vm9 = vweird.f32 %v6409_v2 }
 0xa88   :  { %v6411_v7 = vpop.eup %6410  ;;  %vm7210_vm11 = vmor %vm1542_vm8, %vm1543_vm9 }
 0xa89   :  { %v1508_v47 = vmul.f32 %v6411_v7, %v1485_v45  ;;  %v1539_v5 = vsub.f32 1.0, %v1538_v44  ;;  %vm1513_vm10 = vweird.f32 %v6411_v7 }
 0xa8a   :  { %vm1514_vm13 = vmor %vm1512_vm12, %vm1513_vm10 }
 0xa8b   :  { %v1509_v10 = vsub.f32 1.0, %v1508_v47  ;;  %v1540_v48 = vmul.f32 %v6409_v2, %v1539_v5  ;;  %v2152_v47 = vld [vmem:[%s8675_s14 + $0x8] sm:$0xff] }
 0xa8d   :  { %v1510_v49 = vmul.f32 %v6411_v7, %v1509_v10  ;;  %v1541_v18 = vadd.f32 %v6409_v2, %v1540_v48  ;;  %v6270_v48 = vunpack.i.h.bf16 %v7166_v32 }
 0xa8f   :  { %v1511_v53 = vadd.f32 %v6411_v7, %v1510_v49  ;;  %v1545_v63 = vsel %vm7210_vm11, %v6409_v2, %v1541_v18 }
 0xa90   :  { %v1550_v11 = vsel %vm1547_vm14, %v1549_v3, %v1545_v63 }
 0xa91   :  { %v1515_v52 = vsel %vm1514_vm13, %v6411_v7, %v1511_v53  ;;  %v1551_v29 = vmul.f32 %v7144_v57, %v1550_v11 }
 0xa92   :  { %v1520_v24 = vsel %vm1517_vm0, %v1519_v8, %v1515_v52 }
 0xa93   :  { %v1521_v28 = vmul.f32 %v7148_v59, %v1520_v24 }
 0xa99   :  { %v7189_v46 = vpop.xlane.xlu2 %1496 }
 0xa9a   :  { %6412 = vrcp.f32 %v7189_v46  ;;  %vm1572_vm1 = vweird.f32 %v7189_v46  ;;  %v1576_v6 = vand.u32 2147483647, %v7189_v46  ;;  %v1578_v30 = vand.u32 2147483648, %v7189_v46 }
 0xa9c   :  { %v1579_v18 = vor.u32 1.1754944e-38, %v1578_v30  ;;  %vm1577_vm12 = vcmp.eq.f32.partialorder %v1576_v6, 8.507059e+37 }
 0xaa0   :  { %v7198_v4 = vpop.eup %6412 }
 0xaa1   :  { %v1568_v54 = vmul.f32 %v7198_v4, %v7189_v46  ;;  %vm1573_vm4 = vweird.f32 %v7198_v4 }
 0xaa2   :  { %vm7249_vm8 = vmor %vm1572_vm1, %vm1573_vm4 }
 0xaa3   :  { %v1569_v1 = vsub.f32 1.0, %v1568_v54 }
 0xaa5   :  { %v1570_v25 = vmul.f32 %v7198_v4, %v1569_v1 }
 0xaa7   :  { %v1571_v35 = vadd.f32 %v7198_v4, %v1570_v25 }
 0xaa9   :  { %v1575_v49 = vsel %vm7249_vm8, %v7198_v4, %v1571_v35 }
 0xaaa   :  { %v1580_v56 = vsel %vm1577_vm12, %v1579_v18, %v1575_v49 }
 0xaab   :  { %v1581_v8 = vmul.f32 %v7152_v22, %v1580_v56 }
 0xaaf   :  { %v7191_v14 = vpop.xlane.xlu0 %1502 }
 0xab0   :  { %6414 = vrcp.f32 %v7191_v14  ;;  %vm1602_vm5 = vweird.f32 %v7191_v14  ;;  %v1608_v2 = vand.u32 2147483648, %v7191_v14  ;;  %v1606_v5 = vand.u32 2147483647, %v7191_v14 }
 0xab1   :  { %v7193_v13 = vpop.xlane.xlu1 %1487 }
 0xab2   :  { %6416 = vrcp.f32 %v7193_v13  ;;  %v1533_v7 = vand.u32 2147483648, %v7193_v13  ;;  %vm1527_vm10 = vweird.f32 %v7193_v13  ;;  %v1531_v46 = vand.u32 2147483647, %v7193_v13 }
 0xab3   :  { %v1609_v54 = vor.u32 1.1754944e-38, %v1608_v2  ;;  %vm1607_vm13 = vcmp.eq.f32.partialorder %v1606_v5, 8.507059e+37  ;;  %v2151_v5 = vld [vmem:[%s8675_s14] sm:$0xff] }
 0xab4   :  { %v1534_v55 = vor.u32 1.1754944e-38, %v1533_v7  ;;  %vm1532_vm14 = vcmp.eq.f32.partialorder %v1531_v46, 8.507059e+37 }
 0xab6   :  { %v7200_v50 = vpop.eup %6414 }
 0xab7   :  { %v1598_v58 = vmul.f32 %v7200_v50, %v7191_v14  ;;  %vm1603_vm6 = vweird.f32 %v7200_v50 }
 0xab8   :  { %v7202_v51 = vpop.eup %6416  ;;  %vm7258_vm9 = vmor %vm1602_vm5, %vm1603_vm6 }
 0xab9   :  { %v1523_v60 = vmul.f32 %v7202_v51, %v7193_v13  ;;  %v1599_v12 = vsub.f32 1.0, %v1598_v58  ;;  %vm1528_vm7 = vweird.f32 %v7202_v51 }
 0xaba   :  { %vm7271_vm11 = vmor %vm1527_vm10, %vm1528_vm7 }
 0xabb   :  { %v1524_v9 = vsub.f32 1.0, %v1523_v60  ;;  %v1600_v26 = vmul.f32 %v7200_v50, %v1599_v12 }
 0xabd   :  { %v1525_v27 = vmul.f32 %v7202_v51, %v1524_v9  ;;  %v1601_v57 = vadd.f32 %v7200_v50, %v1600_v26 }
 0xabf   :  { %v1526_v38 = vadd.f32 %v7202_v51, %v1525_v27  ;;  %v1605_v14 = vsel %vm7258_vm9, %v7200_v50, %v1601_v57 }
 0xac0   :  { %v7216_v16 = vpop.xlane.xlu0 %1505  ;;  %v1610_v61 = vsel %vm1607_vm13, %v1609_v54, %v1605_v14  ;;  %v6338_v14 = vld [vmem:[%s8761_s26] ss:$0 sm:$0xff] }
 0xac1   :  { %v1530_v32 = vsel %vm7271_vm11, %v7202_v51, %v1526_v38  ;;  %v1611_v27 = vmul.f32 %v7156_v15, %v1610_v61  ;;  %vm1617_vm11 = vweird.f32 %v7216_v16  ;;  %v1621_v38 = vand.u32 2147483647, %v7216_v16 }
 0xac2   :  { %v7218_v23 = vpop.xlane.xlu2 %1499  ;;  %v1535_v60 = vsel %vm1532_vm14, %v1534_v55, %v1530_v32  ;;  %v7361_v54 = vadd.f32 %v6338_v14, %v6860_v42  ;;  %v7369_v55 = vld [vmem:[%s8742_s13 + $0x8] sm:$0x3f] }
 0xac3   :  { %6418 = vrcp.f32 %v7218_v23  ;;  %v1593_v52 = vand.u32 2147483648, %v7218_v23  ;;  %vm1587_vm1 = vweird.f32 %v7218_v23  ;;  %v1591_v12 = vand.u32 2147483647, %v7218_v23 }
 0xac4   :  { %6420 = vrcp.f32 %v7216_v16  ;;  %v1536_v24 = vmul.f32 %v7160_v17, %v1535_v60  ;;  %vm1622_vm13 = vcmp.eq.f32.partialorder %v1621_v38, 8.507059e+37 }
 0xac5   :  { %vm1592_vm6 = vcmp.eq.f32.partialorder %v1591_v12, 8.507059e+37 }
 0xac9   :  { %v7231_v34 = vpop.eup %6418  ;;  %v6263_v59 = vpop.permute.xlu1 %6262 }
 0xaca   :  { %v1583_v39 = vmul.f32 %v7231_v34, %v7218_v23  ;;  %v6265_v37 = vunpack.i.h.bf16 %v6263_v59  ;;  %v7241_v41 = vpop.xlane.xlu2 %1493  ;;  %v7243_v43 = vpop.eup %6420  ;;  %v6264_v44 = vunpack.i.l.bf16 %v6263_v59  ;;  %vm1588_vm0 = vweird.f32 %v7231_v34 }
 0xacb   :  { %6422 = vrcp.f32 %v7241_v41  ;;  %v1613_v13 = vmul.f32 %v7243_v43, %v7216_v16  ;;  %vm7294_vm4 = vmor %vm1587_vm1, %vm1588_vm0  ;;  %v1561_v25 = vand.u32 2147483647, %v7241_v41  ;;  %v1563_v26 = vand.u32 2147483648, %v7241_v41 }
 0xacc   :  { %v1584_v10 = vsub.f32 1.0, %v1583_v39  ;;  %1648 = vmatpush.msra.mxu0 %v6265_v37  ;;  %1700 = vmatpush.msra.mxu3 %v6264_v44  ;;  %vm1557_vm7 = vweird.f32 %v7241_v41  ;;  %vm1618_vm9 = vweird.f32 %v7243_v43  ;;  %v1623_v59 = vand.u32 2147483648, %v7216_v16  ;;  %v6002_v16 = vld [vmem:[%s8741_s9 + $0x30] sm:$0xff] }
 0xacd   :  { %6020 = vmatmul.msk.f32.vlgmr.msra.gmra.mxu0 %vm230_vm3, %v1521_v28  ;;  %6022 = vmatmul.msk.f32.vlgmr.msra.gmra.mxu3 %vm230_vm3, %v1551_v29  ;;  %v1614_v62 = vsub.f32 1.0, %v1613_v13  ;;  %v1594_v29 = vor.u32 1.1754944e-38, %v1593_v52  ;;  %v1564_v15 = vor.u32 1.1754944e-38, %v1563_v26  ;;  %vm1562_vm10 = vcmp.eq.f32.partialorder %v1561_v25, 8.507059e+37  ;;  %vm1619_vm12 = vmor %vm1617_vm11, %vm1618_vm9  ;;  %v2153_v44 = vld [vmem:[%s8675_s14 + $0x10] sm:$0xff] }
 0xace   :  { %v1585_v4 = vmul.f32 %v7231_v34, %v1584_v10  ;;  %1804 = vmatpush.msrb.mxu3 %v6270_v48  ;;  %v1624_v45 = vor.u32 1.1754944e-38, %v1623_v59  ;;  %v7355_v13 = vadd.f32 %v6338_v14, %v6858_v40  ;;  %v1864_v40 = vperm.slane %v7369_v55, 0 }
 0xacf   :  { %v1615_v22 = vmul.f32 %v7243_v43, %v1614_v62 }
 0xad0   :  { %v1586_v51 = vadd.f32 %v7231_v34, %v1585_v4  ;;  %1919 = vmatpush.msra.mxu3 %v6002_v16  ;;  %v6036_v16 = vld [vmem:[%s8743_s5 + $0x20] sm:$0xff] }
 0xad1   :  { %v6423_v58 = vpop.eup %6422  ;;  %v1810_v50 = vpop.permute.xlu1 %1809 }
 0xad2   :  { %v1553_v19 = vmul.f32 %v6423_v58, %v7241_v41  ;;  %v6273_v63 = vpop.permute.xlu2 %6272  ;;  %1830 = vmatpush.msra.mxu2 %v1810_v50  ;;  %v1590_v23 = vsel %vm7294_vm4, %v7231_v34, %v1586_v51  ;;  %vm1558_vm5 = vweird.f32 %v6423_v58  ;;  %v1616_v34 = vadd.f32 %v7243_v43, %v1615_v22 }
 0xad3   :  { %v6275_v1 = vunpack.i.h.bf16 %v6273_v63  ;;  %v6274_v3 = vunpack.i.l.bf16 %v6273_v63  ;;  %v1758_v17 = vpop.permute.xlu0 %1757  ;;  %vm1559_vm8 = vmor %vm1557_vm7, %vm1558_vm5  ;;  %v1595_v30 = vsel %vm1592_vm6, %v1594_v29, %v1590_v23 }
 0xad4   :  { %v1554_v9 = vsub.f32 1.0, %v1553_v19  ;;  %v1596_v37 = vmul.f32 %v7171_v20, %v1595_v30  ;;  %v1620_v41 = vsel %vm1619_vm12, %v7243_v43, %v1616_v34  ;;  %v6001_v20 = vld [vmem:[%s8741_s9 + $0x28] sm:$0xff]  ;;  %v2154_v43 = vld [vmem:[%s8675_s14 + $0x18] sm:$0xff] }
 0xad5   :  { %1674 = vmatpush.msrb.mxu1 %v6274_v3  ;;  %1752 = vmatpush.msrb.mxu0 %v6275_v1  ;;  %v1625_v2 = vsel %vm1622_vm13, %v1624_v45, %v1620_v41  ;;  %v6039_v41 = vld [vmem:[%s8743_s5 + $0x38] sm:$0xff]  ;;  %v6047_v45 = vld [vmem:[%s8744_s3 + $0x70] sm:$0xff] }
 0xad6   :  { %v1555_v28 = vmul.f32 %v6423_v58, %v1554_v9  ;;  %6021 = vmatmul.msk.f32.vlgmr.msrb.gmra.mxu1 %vm230_vm3, %v1536_v24  ;;  %6024 = vmatmul.msk.f32.vlgmr.msrb.gmra.mxu0 %vm230_vm3, %v1581_v8  ;;  %v1626_v7 = vmul.f32 %v7164_v31, %v1625_v2  ;;  %v6003_v31 = vld [vmem:[%s8741_s9 + $0x38] sm:$0xff]  ;;  %v6038_v2 = vld [vmem:[%s8743_s5 + $0x30] sm:$0xff] }
 0xad7   :  { %1778 = vmatpush.msra.mxu1 %v1758_v17  ;;  %6026 = vmatmul.msk.f32.vlgmr.msrb.gmra.mxu3 %vm230_vm3, %v1611_v27 }
 0xad8   :  { %v1556_v6 = vadd.f32 %v6423_v58, %v1555_v28  ;;  %2177 = vmatpush.msrb.mxu3 %v2154_v43  ;;  %v6043_v43 = vld [vmem:[%s8744_s3 + $0x50] sm:$0xff] }
 0xad9   :  { %1888 = vmatpush.msrb.mxu1 %v6001_v20  ;;  %v6045_v20 = vld [vmem:[%s8744_s3 + $0x60] sm:$0xff] }
 0xada   :  { %v1560_v35 = vsel %vm1559_vm8, %v6423_v58, %v1556_v6  ;;  %2178 = vmatpush.msrb.mxu3 %v2153_v44 }
 0xadb   :  { %v1565_v57 = vsel %vm1562_vm10, %v1564_v15, %v1560_v35 }
 0xadc   :  { %v1566_v39 = vmul.f32 %v7175_v36, %v1565_v57  ;;  %v6000_v36 = vld [vmem:[%s8741_s9 + $0x20] sm:$0xff]  ;;  %2179 = vmatpush.msrb.mxu3 %v2152_v47  ;;  %v6042_v47 = vld [vmem:[%s8744_s3 + $0x48] sm:$0xff] }
 0xadd   :  { %1856 = vmatpush.msra.mxu0 %v6000_v36  ;;  %v6037_v36 = vld [vmem:[%s8743_s5 + $0x28] sm:$0xff] }
 0xade   :  { %6023 = vmatmul.msk.f32.vlgmr.msrb.gmra.mxu2 %vm230_vm3, %v1566_v39  ;;  %6025 = vmatmul.msk.f32.vlgmr.msra.gmra.mxu1 %vm230_vm3, %v1596_v37  ;;  %v6048_v37 = vld [vmem:[%s8744_s3 + $0x78] sm:$0xff] }
 0xadf   :  { %1950 = vmatpush.msrb.mxu2 %v6003_v31  ;;  %2180 = vmatpush.msrb.mxu3 %v2151_v5  ;;  %v6044_v31 = vld [vmem:[%s8744_s3 + $0x58] sm:$0xff] }
 0xae0   :  { %2077 = vmatpush.msra.mxu1 %v6048_v37  ;;  %2049 = vmatpush.msrb.mxu0 %v6039_v41 }
 0xae2   :  { %2078 = vmatpush.msra.mxu1 %v6047_v45  ;;  %2050 = vmatpush.msrb.mxu0 %v6038_v2  ;;  %v2144_v2 = vlaneseq }
 0xae4   :  { %2051 = vmatpush.msrb.mxu0 %v6037_v36  ;;  %v2147_v36 = vand.u32 127, %v2144_v2 }
 0xae6   :  { %6027 = vmatmul.msk.f32.vlgmr.msra.gmra.mxu2 %vm230_vm3, %v1626_v7  ;;  %v6046_v7 = vld [vmem:[%s8744_s3 + $0x68] sm:$0xff]  ;;  %2052 = vmatpush.msrb.mxu0 %v6036_v16 }
 0xae7   :  { %2079 = vmatpush.msra.mxu1 %v6046_v7  ;;  %v2145_v7 = vshrl.u32 %v2144_v2, 7 }
 0xae9   :  { %2080 = vmatpush.msra.mxu1 %v6045_v20  ;;  %vm7512_vm7 = vcmp.gt.s32.totalorder %v2147_v36, %v2145_v7 }
 0xaeb   :  { %2081 = vmatpush.msra.mxu1 %v6044_v31 }
 0xaed   :  { %2082 = vmatpush.msra.mxu1 %v6043_v43 }
 0xaef   :  { %2083 = vmatpush.msra.mxu1 %v6042_v47 }
 0xb4a   :  { %v1650_v46 = vpop.f32.mrf.mxu0 }
 0xb4b   :  { %6028 = vmatmul.msk.f32.vlgmr.msra.gmra.mxu0 %vm230_vm3, %v1650_v46  ;;  %v6041_v46 = vld [vmem:[%s8744_s3 + $0x40] sm:$0xff] }
 0xb4c   :  { %2084 = vmatpush.msra.mxu1 %v6041_v46 }
 0xb50   :  { %v1702_v10 = vpop.f32.mrf.mxu3 }
 0xb51   :  { %6030 = vmatmul.msk.f32.vlgmr.msrb.gmra.mxu1 %vm230_vm3, %v1702_v10 }
 0xb53   :  { %v1676_v48 = vpop.f32.mrf.mxu1  ;;  %v1754_v49 = vpop.f32.mrf.mxu0 }
 0xb54   :  { %6029 = vmatmul.msk.f32.gmra.mxu0 %vm230_vm3, %v1676_v48  ;;  %6032 = vmatmul.msk.f32.vlgmr.msra.gmra.mxu3 %vm230_vm3, %v1754_v49 }
 0xb5a   :  { %v1806_v18 = vpop.f32.mrf.mxu3 }
 0xb5b   :  { %6034 = vmatmul.msk.f32.vlgmr.msrb.gmra.mxu2 %vm230_vm3, %v1806_v18  ;;  %v1780_v53 = vpop.f32.mrf.mxu1 }
 0xb5c   :  { %6033 = vmatmul.msk.f32.gmra.mxu3 %vm230_vm3, %v1780_v53 }
 0xb61   :  { %v1728_v32 = vpop.f32.mrf.mxu2 }
 0xb62   :  { %6031 = vmatmul.msk.f32.gmra.mxu1 %vm230_vm3, %v1728_v32 }
 0xb64   :  { %6053 = vmatmul.msk.f32.vlgmr.msrb.gmra.mxu3 %vm180_vm2, %v7355_v13 }
 0xb69   :  { %v1832_v4 = vpop.f32.mrf.mxu2 }
 0xb6a   :  { %6035 = vmatmul.msk.f32.gmra.mxu2 %vm230_vm3, %v1832_v4 }
 0xb6c   :  { %6054 = vmatmul.msk.f32.gmra.mxu3 %vm180_vm2, %v7361_v54 }
 0xbc8   :  { %v1858_v56 = vpop.f32.mrf.mxu0 }
 0xbc9   :  { %v1865_v50 = vadd.f32 %v1864_v40, %v1858_v56 }
 0xbce   :  { %v1890_v58 = vpop.f32.mrf.mxu1 }
 0xbcf   :  { %v1896_v61 = vadd.f32 %v1890_v58, %v1865_v50 }
 0xbd1   :  { %v1861_v63 = vpop.f32.mrf.mxu0 }
 0xbd2   :  { %v1866_v3 = vadd.f32 %v1864_v40, %v1861_v63 }
 0xbd7   :  { %v1921_v60 = vpop.f32.mrf.mxu3 }
 0xbd8   :  { %v1927_v62 = vadd.f32 %v1921_v60, %v1896_v61  ;;  %v2006_v61 = vperm.slane %v7369_v55, 1 }
 0xbde   :  { %v1952_v42 = vpop.f32.mrf.mxu2 }
 0xbdf   :  { %v1958_v51 = vadd.f32 %v1952_v42, %v1927_v62  ;;  %v1893_v1 = vpop.f32.mrf.mxu1  ;;  %v1924_v12 = vpop.f32.mrf.mxu3 }
 0xbe0   :  { %v1897_v8 = vadd.f32 %v1893_v1, %v1866_v3 }
 0xbe1   :  { %v1960_v19 = vadd.f32 %v1958_v51, %v7054_v21  ;;  %v6341_v21 = vld [vmem:[%s8676_s15] ss:$0 sm:$0xff]  ;;  %v2009_v51 = vperm.slane %v7369_v55, 2 }
 0xbe2   :  { %v1928_v9 = vadd.f32 %v1924_v12, %v1897_v8 }
 0xbe3   :  { %v1962_v52 = vsel %vm180_vm2, %v1960_v19, 0.0 }
 0xbe4   :  { %1963 = vadd.xlane.f32.xlu1 %v1962_v52 }
 0xbe7   :  { %v2182_v27 = vpop.f32.mrf.mxu3 }
 0xbe8   :  { %v7379_v22 = vadd.f32 %v6341_v21, %v2182_v27 }
 0xbed   :  { %v1955_v24 = vpop.f32.mrf.mxu2 }
 0xbee   :  { %v1959_v11 = vadd.f32 %v1955_v24, %v1928_v9 }
 0xbef   :  { %v2185_v23 = vpop.f32.mrf.mxu3 }
 0xbf0   :  { %v1961_v25 = vadd.f32 %v1959_v11, %v7058_v0  ;;  %v7383_v28 = vadd.f32 %v6341_v21, %v2185_v23 }
 0xbf2   :  { %v1965_v26 = vsel %vm180_vm2, %v1961_v25, 0.0 }
 0xbf3   :  { %1966 = vadd.xlane.f32.xlu0 %v1965_v26 }
 0xc07   :  { %2198 = vrot.lane.b32.xlu0 %v7379_v22, %s8748_s6 }
 0xc0f   :  { %2196 = vrot.lane.b32.xlu0 %v7383_v28, %s8747_s11 }
 0xc17   :  { %2204 = vrot.lane.b32.xlu0 %v7383_v28, %s8746_s8 }
 0xc57   :  { %v1964_v0 = vpop.xlane.xlu1 %1963 }
 0xc58   :  { %v1968_v17 = vmul.f32 %v1964_v0, %v6978_v33 }
 0xc5a   :  { %v7390_v29 = vsub.f32 %v1960_v19, %v1968_v17 }
 0xc5c   :  { %v1972_v6 = vmul.f32 %v7390_v29, %v7390_v29 }
 0xc5e   :  { %v1974_v15 = vsel %vm180_vm2, %v1972_v6, 0.0 }
 0xc5f   :  { %1975 = vadd.xlane.f32.xlu2 %v1974_v15 }
 0xc66   :  { %v1967_v30 = vpop.xlane.xlu0 %1966 }
 0xc67   :  { %v1969_v34 = vmul.f32 %v1967_v30, %v6978_v33  ;;  %v6342_v30 = vld [vmem:[%s8745_s29 + $0x1] ss:$0 sm:$0xff] }
 0xc69   :  { %v7396_v35 = vsub.f32 %v1961_v25, %v1969_v34 }
 0xc6b   :  { %v1973_v59 = vmul.f32 %v7396_v35, %v7396_v35 }
 0xc6d   :  { %v1977_v57 = vsel %vm180_vm2, %v1973_v59, 0.0 }
 0xc6e   :  { %1978 = vadd.xlane.f32.xlu1 %v1977_v57 }
 0xc77   :  { %2194 = vrot.lane.b32.xlu2 %v7379_v22, %s8747_s11 }
 0xc79   :  { %v7403_v38 = vpop.permute.xlu0 %2198 }
 0xc7a   :  { %2310 = vrot.lane.b32.xlu0 %v7403_v38, %s8749_s0 }
 0xc7f   :  { %2202 = vrot.lane.b32.xlu2 %v7379_v22, %s8746_s8 }
 0xc81   :  { %v7409_v39 = vpop.permute.xlu0 %2196 }
 0xc82   :  { %2284 = vrot.lane.b32.xlu0 %v7409_v39, %s8749_s0 }
 0xc87   :  { %2232 = vrot.lane.b32.xlu2 %v7383_v28, %s8749_s0  ;;  %2200 = vrot.lane.b32.xlu1 %v7383_v28, %s8748_s6 }
 0xc89   :  { %v7465_v56 = vpop.permute.xlu0 %2204 }
 0xc8f   :  { %2206 = vrot.lane.b32.xlu1 %v7379_v22, %s8749_s0 }
 0xcd2   :  { %v1976_v44 = vpop.xlane.xlu2 %1975 }
 0xcd3   :  { %v1980_v5 = vmul.f32 %v1976_v44, %v6978_v33 }
 0xcd5   :  { %v1982_v10 = vadd.f32 1e-05, %v1980_v5 }
 0xcd7   :  { %6424 = vrsqrt.f32 %v1982_v10  ;;  %vm1990_vm0 = vweird.f32 %v1982_v10 }
 0xcda   :  { %v7456_v48 = vpop.permute.xlu2 %2194 }
 0xcdb   :  { %2258 = vrot.lane.b32.xlu1 %v7456_v48, %s8749_s0 }
 0xcdd   :  { %v6425_v49 = vpop.eup %6424 }
 0xcde   :  { %v1985_v18 = vmul.f32 %v6425_v49, %v1982_v10  ;;  %vm1991_vm14 = vweird.f32 %v6425_v49 }
 0xcdf   :  { %vm1992_vm1 = vmor %vm1990_vm0, %vm1991_vm14 }
 0xce0   :  { %v1986_v53 = vmul.f32 %v6425_v49, %v1985_v18 }
 0xce1   :  { %v1979_v14 = vpop.xlane.xlu1 %1978 }
 0xce2   :  { %v1987_v32 = vmul.f32 0.5, %v1986_v53  ;;  %v7460_v4 = vpop.permute.xlu2 %2202  ;;  %v1981_v40 = vmul.f32 %v1979_v14, %v6978_v33 }
 0xce3   :  { %2362 = vrot.lane.b32.xlu1 %v7460_v4, %s8749_s0 }
 0xce4   :  { %v1988_v58 = vsub.f32 1.5, %v1987_v32  ;;  %v1983_v50 = vadd.f32 1e-05, %v1981_v40 }
 0xce6   :  { %v1989_v60 = vmul.f32 %v6425_v49, %v1988_v58  ;;  %6426 = vrsqrt.f32 %v1983_v50  ;;  %vm2000_vm5 = vweird.f32 %v1983_v50 }
 0xce8   :  { %v1993_v62 = vsel %vm1992_vm1, %v6425_v49, %v1989_v60 }
 0xce9   :  { %v2004_v42 = vmul.f32 %v1993_v62, %v7390_v29 }
 0xcea   :  { %v2233_v17 = vpop.permute.xlu2 %2232 }
 0xceb   :  { %v2007_v19 = vmul.f32 %v2006_v61, %v2004_v42 }
 0xcec   :  { %v6427_v63 = vpop.eup %6426  ;;  %v2311_v52 = vpop.permute.xlu0 %2310 }
 0xced   :  { %v1995_v1 = vmul.f32 %v6427_v63, %v1983_v50  ;;  %6063 = vmatpush.xpose.msk.msra.mxu3 %vm230_vm3, %v2311_v52  ;;  %v7471_v3 = vadd.f32 %v2009_v51, %v2007_v19  ;;  %vm2001_vm4 = vweird.f32 %v6427_v63 }
 0xcee   :  { %vm2002_vm6 = vmor %vm2000_vm5, %vm2001_vm4 }
 0xcef   :  { %v1996_v8 = vmul.f32 %v6427_v63, %v1995_v1  ;;  %6049 = vmatmul.msk.f32.vlgmr.msrb.gmra.mxu0 %vm180_vm2, %v7471_v3 }
 0xcf0   :  { %6064 = vmatmul.msk.f32.vlgmr.msra.gmra.mxu3 %vm230_vm3, %v7403_v38 }
 0xcf1   :  { %v1997_v12 = vmul.f32 0.5, %v1996_v8 }
 0xcf3   :  { %v1998_v9 = vsub.f32 1.5, %v1997_v12 }
 0xcf4   :  { %v2285_v24 = vpop.permute.xlu0 %2284 }
 0xcf5   :  { %v1999_v11 = vmul.f32 %v6427_v63, %v1998_v9  ;;  %6061 = vmatpush.xpose.msk.msrb.mxu1 %vm230_vm3, %v2285_v24 }
 0xcf7   :  { %v2003_v25 = vsel %vm2002_vm6, %v6427_v63, %v1999_v11 }
 0xcf8   :  { %v2005_v26 = vmul.f32 %v2003_v25, %v7396_v35 }
 0xcf9   :  { %v7479_v27 = vpop.permute.xlu1 %2200 }
 0xcfa   :  { %2336 = vrot.lane.b32.xlu2 %v7479_v27, %s8749_s0  ;;  %v2008_v21 = vmul.f32 %v2006_v61, %v2005_v26 }
 0xcfc   :  { %v7483_v23 = vadd.f32 %v2009_v51, %v2008_v21 }
 0xcfe   :  { %6050 = vmatmul.msk.f32.gmra.mxu0 %vm180_vm2, %v7483_v23 }
 0xd01   :  { %v2207_v0 = vpop.permute.xlu1 %2206 }
 0xd02   :  { %6055 = vmatpush.xpose.msk.msra.mxu2 %vm230_vm3, %v2207_v0  ;;  %2388 = vrot.lane.b32.xlu2 %v7465_v56, %s8749_s0 }
 0xd05   :  { %6056 = vmatmul.msk.f32.vlgmr.msra.gmra.mxu2 %vm230_vm3, %v7379_v22 }
 0xd06   :  { %6057 = vmatpush.xpose.msk.msrb.mxu2 %vm230_vm3, %v2233_v17 }
 0xd0d   :  { %6058 = vmatmul.msk.f32.vlgmr.msrb.gmra.mxu2 %vm230_vm3, %v7383_v28 }
 0xd4d   :  { %v2259_v29 = vpop.permute.xlu1 %2258 }
 0xd4e   :  { %6059 = vmatpush.xpose.msk.msra.mxu0 %vm230_vm3, %v2259_v29 }
 0xd51   :  { %6060 = vmatmul.msk.f32.vlgmr.msra.gmra.mxu0 %vm230_vm3, %v7456_v48 }
 0xd54   :  { %v2337_v6 = vpop.permute.xlu2 %2336 }
 0xd55   :  { %v2363_v15 = vpop.permute.xlu1 %2362  ;;  %6065 = vmatpush.xpose.msk.msra.mxu2 %vm230_vm3, %v2337_v6 }
 0xd56   :  { %6067 = vmatpush.xpose.msk.msrb.mxu0 %vm230_vm3, %v2363_v15 }
 0xd58   :  { %6066 = vmatmul.msk.f32.vlgmr.msra.gmra.mxu2 %vm230_vm3, %v7479_v27 }
 0xd59   :  { %6068 = vmatmul.msk.f32.vlgmr.msrb.gmra.mxu0 %vm230_vm3, %v7460_v4 }
 0xd5c   :  { %v2389_v57 = vpop.permute.xlu2 %2388 }
 0xd6c   :  { %v2054_v34 = vpop.f32.mrf.mxu0 }
 0xd6d   :  { %v2055_v35 = vadd.f32 %v6342_v30, %v2054_v34 }
 0xd6f   :  { %v2060_v59 = vmax.f32 %v2055_v35, 0.0 }
 0xd71   :  { %6051 = vmatmul.msk.f32.vlgmr.msra.gmra.mxu1 %vm1077_vm15, %v2060_v59 }
 0xd72   :  { %6069 = vmatpush.xpose.msk.msra.mxu1 %vm230_vm3, %v2389_v57 }
 0xd73   :  { %v2333_v31 = vpop.f32.mrf.mxu3 }
 0xd74   :  { %v2418_v5 = vmul.f32 0.125, %v2333_v31 }
 0xd76   :  { %v2428_v49 = vsel %vm7512_vm7, -inf, %v2418_v5 }
 0xd77   :  { %v2444_v14 = vsel %vm230_vm3, %v2428_v49, -inf }
 0xd7b   :  { %v2057_v37 = vpop.f32.mrf.mxu0 }
 0xd7c   :  { %v2058_v41 = vadd.f32 %v6342_v30, %v2057_v37 }
 0xd7e   :  { %v2061_v45 = vmax.f32 %v2058_v41, 0.0 }
 0xd80   :  { %6052 = vmatmul.msk.f32.gmra.mxu1 %vm1077_vm15, %v2061_v45 }
 0xd88   :  { %v2229_v20 = vpop.f32.mrf.mxu2  ;;  %6062 = vmatmul.msk.f32.vlgmr.msrb.gmra.mxu1 %vm230_vm3, %v7409_v39 }
 0xd89   :  { %v2414_v16 = vmul.f32 0.125, %v2229_v20  ;;  %v6276_v20 = vpack.i.bf16 %v7383_v28, %v7379_v22 }
 0xd8b   :  { %v2424_v44 = vsel %vm7512_vm7, -inf, %v2414_v16 }
 0xd8c   :  { %v2432_v47 = vsel %vm230_vm3, %v2424_v44, -inf }
 0xd8d   :  { %2433 = vmax.xlane.f32.xlu0 %v2432_v47 }
 0xd90   :  { %v2255_v46 = vpop.f32.mrf.mxu2  ;;  %6070 = vmatmul.msk.f32.vlgmr.msra.gmra.mxu1 %vm230_vm3, %v7465_v56 }
 0xd91   :  { %v2415_v10 = vmul.f32 0.125, %v2255_v46 }
 0xd93   :  { %v2425_v18 = vsel %vm7512_vm7, -inf, %v2415_v10 }
 0xd94   :  { %v2435_v53 = vsel %vm230_vm3, %v2425_v18, -inf }
 0xd95   :  { %2436 = vmax.xlane.f32.xlu1 %v2435_v53  ;;  %2445 = vmax.xlane.f32.xlu0 %v2444_v14 }
 0xdce   :  { %v2281_v32 = vpop.f32.mrf.mxu0 }
 0xdcf   :  { %v2416_v40 = vmul.f32 0.125, %v2281_v32 }
 0xdd1   :  { %v2426_v58 = vsel %vm7512_vm7, -inf, %v2416_v40 }
 0xdd2   :  { %v2438_v50 = vsel %vm230_vm3, %v2426_v58, -inf }
 0xdd3   :  { %2439 = vmax.xlane.f32.xlu2 %v2438_v50 }
 0xdd6   :  { %v2385_v59 = vpop.f32.mrf.mxu0 }
 0xdd7   :  { %v2420_v45 = vmul.f32 0.125, %v2385_v59 }
 0xdd9   :  { %v2430_v7 = vsel %vm7512_vm7, -inf, %v2420_v45 }
 0xdda   :  { %v2450_v36 = vsel %vm230_vm3, %v2430_v7, -inf }
 0xddb   :  { %v2359_v60 = vpop.f32.mrf.mxu2 }
 0xddc   :  { %v2419_v61 = vmul.f32 0.125, %v2359_v60 }
 0xdde   :  { %v2429_v62 = vsel %vm7512_vm7, -inf, %v2419_v61 }
 0xddf   :  { %v2447_v42 = vsel %vm230_vm3, %v2429_v62, -inf }
 0xde0   :  { %2448 = vmax.xlane.f32.xlu1 %v2447_v42 }
 0xdee   :  { %v7533_v51 = vpop.f32.mrf.mxu1 }
 0xdfd   :  { %v7535_v19 = vpop.f32.mrf.mxu1 }
 0xe00   :  { %v2434_v63 = vpop.xlane.xlu0 %2433 }
 0xe01   :  { %v2456_v52 = vsub.f32 %v2424_v44, %v2434_v63 }
 0xe03   :  { %v2464_v1 = vmul.f32 1.442695, %v2456_v52 }
 0xe05   :  { %6428 = vpow2.f32 %v2464_v1  ;;  %v2307_v8 = vpop.f32.mrf.mxu1 }
 0xe06   :  { %v2417_v12 = vmul.f32 0.125, %v2307_v8 }
 0xe08   :  { %v2437_v9 = vpop.xlane.xlu1 %2436  ;;  %v2446_v24 = vpop.xlane.xlu0 %2445  ;;  %v2427_v11 = vsel %vm7512_vm7, -inf, %v2417_v12 }
 0xe09   :  { %v2457_v25 = vsub.f32 %v2425_v18, %v2437_v9  ;;  %v2460_v26 = vsub.f32 %v2428_v49, %v2446_v24  ;;  %v2441_v21 = vsel %vm230_vm3, %v2427_v11, -inf }
 0xe0a   :  { %2442 = vmax.xlane.f32.xlu2 %v2441_v21 }
 0xe0b   :  { %v7540_v0 = vpop.eup %6428  ;;  %v2466_v17 = vmul.f32 1.442695, %v2457_v25  ;;  %v2472_v29 = vmul.f32 1.442695, %v2460_v26 }
 0xe0c   :  { %v2480_v6 = vsel %vm230_vm3, %v7540_v0, 0.0 }
 0xe0d   :  { %6430 = vpow2.f32 %v2466_v17  ;;  %v2411_v15 = vpop.f32.mrf.mxu1  ;;  %2481 = vadd.xlane.f32.xlu1 %v2480_v6 }
 0xe0e   :  { %6432 = vpow2.f32 %v2472_v29  ;;  %v2421_v30 = vmul.f32 0.125, %v2411_v15 }
 0xe10   :  { %v2431_v34 = vsel %vm7512_vm7, -inf, %v2421_v30 }
 0xe11   :  { %v2453_v35 = vsel %vm230_vm3, %v2431_v34, -inf }
 0xe12   :  { %2454 = vmax.xlane.f32.xlu2 %v2453_v35 }
 0xe13   :  { %v7547_v57 = vpop.eup %6430 }
 0xe14   :  { %v7549_v37 = vpop.eup %6432  ;;  %v2483_v41 = vsel %vm230_vm3, %v7547_v57, 0.0 }
 0xe15   :  { %2484 = vadd.xlane.f32.xlu0 %v2483_v41  ;;  %v2492_v2 = vsel %vm230_vm3, %v7549_v37, 0.0 }
 0xe16   :  { %2493 = vadd.xlane.f32.xlu1 %v2492_v2 }
 0xe1d   :  { %2451 = vmax.xlane.f32.xlu0 %v2450_v36 }
 0xe31   :  { %6277 = vrot.lane.b32.xlu0 %v6276_v20, %s8750_s1 }
 0xe46   :  { %v2440_v16 = vpop.xlane.xlu2 %2439 }
 0xe47   :  { %v2458_v31 = vsub.f32 %v2426_v58, %v2440_v16 }
 0xe49   :  { %v2468_v44 = vmul.f32 1.442695, %v2458_v31 }
 0xe4b   :  { %6434 = vpow2.f32 %v2468_v44 }
 0xe51   :  { %v7561_v47 = vpop.eup %6434 }
 0xe52   :  { %v2486_v5 = vsel %vm230_vm3, %v7561_v47, 0.0 }
 0xe53   :  { %2487 = vadd.xlane.f32.xlu2 %v2486_v5  ;;  %v2449_v46 = vpop.xlane.xlu1 %2448 }
 0xe54   :  { %v2461_v10 = vsub.f32 %v2429_v62, %v2449_v46 }
 0xe56   :  { %v2474_v49 = vmul.f32 1.442695, %v2461_v10 }
 0xe58   :  { %6436 = vpow2.f32 %v2474_v49  ;;  %v6286_v49 = vpack.i.bf16 %v7479_v27, %v7409_v39 }
 0xe5e   :  { %v7565_v18 = vpop.eup %6436 }
 0xe5f   :  { %v2495_v22 = vsel %vm230_vm3, %v7565_v18, 0.0 }
 0xe60   :  { %2496 = vadd.xlane.f32.xlu2 %v2495_v22 }
 0xe7d   :  { %v2443_v28 = vpop.xlane.xlu2 %2442 }
 0xe7e   :  { %v2459_v53 = vsub.f32 %v2427_v11, %v2443_v28 }
 0xe80   :  { %v2470_v14 = vmul.f32 1.442695, %v2459_v53  ;;  %v2482_v32 = vpop.xlane.xlu1 %2481 }
 0xe81   :  { %vm2509_vm10 = vweird.f32 %v2482_v32  ;;  %v2515_v30 = vand.u32 2147483648, %v2482_v32  ;;  %v2513_v59 = vand.u32 2147483647, %v2482_v32 }
 0xe82   :  { %6438 = vpow2.f32 %v2470_v14 }
 0xe83   :  { %6440 = vrcp.f32 %v2482_v32  ;;  %vm2514_vm14 = vcmp.eq.f32.partialorder %v2513_v59, 8.507059e+37 }
 0xe85   :  { %v2455_v40 = vpop.xlane.xlu2 %2454 }
 0xe86   :  { %v2463_v58 = vsub.f32 %v2431_v34, %v2455_v40 }
 0xe88   :  { %v2478_v50 = vmul.f32 1.442695, %v2463_v58  ;;  %v2485_v60 = vpop.xlane.xlu0 %2484  ;;  %v7569_v61 = vpop.eup %6438 }
 0xe89   :  { %6442 = vrcp.f32 %v2485_v60  ;;  %v6441_v62 = vpop.eup %6440  ;;  %v2489_v42 = vsel %vm230_vm3, %v7569_v61, 0.0  ;;  %v2530_v34 = vand.u32 2147483648, %v2485_v60  ;;  %vm2524_vm12 = vweird.f32 %v2485_v60  ;;  %v7610_v58 = vpop.xlane.xlu1 %2493 }
 0xe8a   :  { %6444 = vpow2.f32 %v2478_v50  ;;  %2490 = vadd.xlane.f32.xlu0 %v2489_v42  ;;  %v2505_v52 = vmul.f32 %v6441_v62, %v2482_v32  ;;  %vm2510_vm8 = vweird.f32 %v6441_v62  ;;  %v2528_v41 = vand.u32 2147483647, %v2485_v60 }
 0xe8b   :  { %vm2511_vm11 = vmor %vm2509_vm10, %vm2510_vm8  ;;  %v2531_v36 = vor.u32 1.1754944e-38, %v2530_v34 }
 0xe8c   :  { %v2506_v11 = vsub.f32 1.0, %v2505_v52  ;;  %vm2529_vm0 = vcmp.eq.f32.partialorder %v2528_v41, 8.507059e+37 }
 0xe8e   :  { %v2507_v21 = vmul.f32 %v6441_v62, %v2506_v11 }
 0xe8f   :  { %v6443_v63 = vpop.eup %6442 }
 0xe90   :  { %v7573_v1 = vpop.eup %6444  ;;  %v2520_v8 = vmul.f32 %v6443_v63, %v2485_v60  ;;  %v2452_v12 = vpop.xlane.xlu0 %2451  ;;  %v2508_v6 = vadd.f32 %v6441_v62, %v2507_v21  ;;  %vm2525_vm9 = vweird.f32 %v6443_v63 }
 0xe91   :  { %v2462_v9 = vsub.f32 %v2430_v7, %v2452_v12  ;;  %v2501_v24 = vsel %vm230_vm3, %v7573_v1, 0.0  ;;  %vm2526_vm13 = vmor %vm2524_vm12, %vm2525_vm9  ;;  %v2516_v7 = vor.u32 1.1754944e-38, %v2515_v30 }
 0xe92   :  { %2502 = vadd.xlane.f32.xlu2 %v2501_v24  ;;  %v2521_v25 = vsub.f32 1.0, %v2520_v8  ;;  %v2512_v45 = vsel %vm2511_vm11, %v6441_v62, %v2508_v6 }
 0xe93   :  { %v2476_v26 = vmul.f32 1.442695, %v2462_v9  ;;  %v2517_v20 = vsel %vm2514_vm14, %v2516_v7, %v2512_v45 }
 0xe94   :  { %v2522_v17 = vmul.f32 %v6443_v63, %v2521_v25  ;;  %v2518_v46 = vmul.f32 %v7540_v0, %v2517_v20  ;;  %v2062_v0 = vperm.slane %v7369_v55, 3 }
 0xe95   :  { %6446 = vpow2.f32 %v2476_v26 }
 0xe96   :  { %v2523_v15 = vadd.f32 %v6443_v63, %v2522_v17 }
 0xe98   :  { %v2527_v2 = vsel %vm2526_vm13, %v6443_v63, %v2523_v15 }
 0xe99   :  { %v2532_v16 = vsel %vm2529_vm0, %v2531_v36, %v2527_v2 }
 0xe9a   :  { %v2533_v10 = vmul.f32 %v7547_v57, %v2532_v16  ;;  %v2090_v57 = vadd.f32 %v7535_v19, %v2062_v0 }
 0xe9b   :  { %v7577_v29 = vpop.eup %6446 }
 0xe9c   :  { %v2498_v35 = vsel %vm230_vm3, %v7577_v29, 0.0  ;;  %v7598_v22 = vadd.f32 %v2090_v57, %v7483_v23 }
 0xe9d   :  { %2499 = vadd.xlane.f32.xlu1 %v2498_v35 }
 0xe9e   :  { %2780 = vrot.lane.b32.xlu0 %v7460_v4, %s8750_s1  ;;  %v6281_v4 = vpack.i.bf16 %v7403_v38, %v7456_v48  ;;  %v2097_v39 = vsel %vm180_vm2, %v7598_v22, 0.0 }
 0xea3   :  { %v6278_v31 = vpop.permute.xlu0 %6277 }
 0xea4   :  { %v6280_v44 = vunpack.i.h.bf16 %v6278_v31  ;;  %v6279_v5 = vunpack.i.l.bf16 %v6278_v31 }
 0xea6   :  { %2645 = vmatpush.msrb.mxu3 %v6279_v5  ;;  %2671 = vmatpush.msrb.mxu2 %v6280_v44 }
 0xea7   :  { %6071 = vmatmul.msk.f32.vlgmr.msrb.gmra.mxu3 %vm230_vm3, %v2518_v46  ;;  %6072 = vmatmul.msk.f32.vlgmr.msrb.gmra.mxu2 %vm230_vm3, %v2533_v10 }
 0xea8   :  { %2806 = vrot.lane.b32.xlu0 %v7465_v56, %s8750_s1  ;;  %v2087_v56 = vadd.f32 %v7533_v51, %v2062_v0 }
 0xeaa   :  { %6287 = vrot.lane.b32.xlu2 %v6286_v49, %s8750_s1  ;;  %v7604_v27 = vadd.f32 %v2087_v56, %v7471_v3 }
 0xeac   :  { %v2094_v38 = vsel %vm180_vm2, %v7604_v27, 0.0 }
 0xeb6   :  { %6282 = vrot.lane.b32.xlu1 %v6281_v4, %s8750_s1 }
 0xec6   :  { %v7608_v48 = vpop.xlane.xlu2 %2487 }
 0xed2   :  { %2098 = vadd.xlane.f32.xlu0 %v2097_v39 }
 0xed3   :  { %v2497_v55 = vpop.xlane.xlu2 %2496 }
 0xed4   :  { %6448 = vrcp.f32 %v2497_v55  ;;  %v2590_v40 = vand.u32 2147483648, %v2497_v55  ;;  %vm2584_vm4 = vweird.f32 %v2497_v55  ;;  %v2588_v50 = vand.u32 2147483647, %v2497_v55 }
 0xed6   :  { %v2591_v42 = vor.u32 1.1754944e-38, %v2590_v40  ;;  %vm2589_vm6 = vcmp.eq.f32.partialorder %v2588_v50, 8.507059e+37 }
 0xeda   :  { %v6449_v19 = vpop.eup %6448 }
 0xedb   :  { %v2580_v23 = vmul.f32 %v6449_v19, %v2497_v55  ;;  %vm2585_vm1 = vweird.f32 %v6449_v19 }
 0xedc   :  { %vm2586_vm5 = vmor %vm2584_vm4, %vm2585_vm1 }
 0xedd   :  { %v2581_v28 = vsub.f32 1.0, %v2580_v23 }
 0xedf   :  { %v2582_v14 = vmul.f32 %v6449_v19, %v2581_v28  ;;  %v2575_v28 = vand.u32 2147483648, %v7610_v58 }
 0xee0   :  { %2095 = vadd.xlane.f32.xlu1 %v2094_v38 }
 0xee1   :  { %v2583_v32 = vadd.f32 %v6449_v19, %v2582_v14  ;;  %v2543_v14 = vand.u32 2147483647, %v7608_v48 }
 0xee3   :  { %v2587_v62 = vsel %vm2586_vm5, %v6449_v19, %v2583_v32  ;;  %vm2569_vm5 = vweird.f32 %v7610_v58 }
 0xee4   :  { %v2592_v12 = vsel %vm2589_vm6, %v2591_v42, %v2587_v62 }
 0xee5   :  { %v2593_v30 = vmul.f32 %v7565_v18, %v2592_v12 }
 0xefd   :  { %v2491_v53 = vpop.xlane.xlu0 %2490 }
 0xefe   :  { %6450 = vrcp.f32 %v2491_v53  ;;  %v2560_v52 = vand.u32 2147483648, %v2491_v53  ;;  %v2558_v24 = vand.u32 2147483647, %v2491_v53  ;;  %vm2554_vm9 = vweird.f32 %v2491_v53 }
 0xf00   :  { %v2561_v6 = vor.u32 1.1754944e-38, %v2560_v52  ;;  %vm2559_vm11 = vcmp.eq.f32.partialorder %v2558_v24, 8.507059e+37  ;;  %v2188_v24 = vld [vmem:[%s8677_s16] sm:$0xff] }
 0xf04   :  { %v6451_v3 = vpop.eup %6450 }
 0xf05   :  { %v2503_v51 = vpop.xlane.xlu2 %2502  ;;  %v2550_v60 = vmul.f32 %v6451_v3, %v2491_v53  ;;  %vm2555_vm8 = vweird.f32 %v6451_v3  ;;  %v2545_v53 = vand.u32 2147483648, %v7608_v48 }
 0xf06   :  { %6452 = vrcp.f32 %v2503_v51  ;;  %vm2556_vm10 = vmor %vm2554_vm9, %vm2555_vm8  ;;  %v2620_v59 = vand.u32 2147483648, %v2503_v51  ;;  %v2618_v36 = vand.u32 2147483647, %v2503_v51  ;;  %vm2614_vm13 = vweird.f32 %v2503_v51 }
 0xf07   :  { %6454 = vrcp.f32 %v7610_v58  ;;  %v2551_v63 = vsub.f32 1.0, %v2550_v60  ;;  %vm2539_vm8 = vweird.f32 %v7608_v48  ;;  %v2546_v50 = vor.u32 1.1754944e-38, %v2545_v53 }
 0xf08   :  { %6456 = vrcp.f32 %v7608_v48  ;;  %v2621_v5 = vor.u32 1.1754944e-38, %v2620_v59  ;;  %vm2619_vm0 = vcmp.eq.f32.partialorder %v2618_v36, 8.507059e+37 }
 0xf09   :  { %v2552_v9 = vmul.f32 %v6451_v3, %v2551_v63 }
 0xf0b   :  { %v2553_v26 = vadd.f32 %v6451_v3, %v2552_v9 }
 0xf0c   :  { %v6453_v8 = vpop.eup %6452 }
 0xf0d   :  { %v2610_v11 = vmul.f32 %v6453_v8, %v2503_v51  ;;  %v6288_v25 = vpop.permute.xlu2 %6287  ;;  %v6455_v34 = vpop.eup %6454  ;;  %v2557_v35 = vsel %vm2556_vm10, %v6451_v3, %v2553_v26  ;;  %vm2615_vm12 = vweird.f32 %v6453_v8  ;;  %v2576_v3 = vor.u32 1.1754944e-38, %v2575_v28 }
 0xf0e   :  { %v6290_v21 = vunpack.i.h.bf16 %v6288_v25  ;;  %v6289_v17 = vunpack.i.l.bf16 %v6288_v25  ;;  %v6457_v45 = vpop.eup %6456  ;;  %v2562_v2 = vsel %vm2559_vm11, %v2561_v6, %v2557_v35  ;;  %v2565_v31 = vmul.f32 %v6455_v34, %v7610_v58  ;;  %vm2616_vm14 = vmor %vm2614_vm13, %vm2615_vm12  ;;  %v2190_v6 = vld [vmem:[%s8677_s16 + $0x10] sm:$0xff] }
 0xf0f   :  { %v2611_v15 = vsub.f32 1.0, %v2610_v11  ;;  %v2563_v20 = vmul.f32 %v7569_v61, %v2562_v2  ;;  %v2535_v44 = vmul.f32 %v6457_v45, %v7608_v48  ;;  %vm2570_vm1 = vweird.f32 %v6455_v34 }
 0xf10   :  { %2723 = vmatpush.msrb.mxu1 %v6289_v17  ;;  %v7615_v41 = vpop.xlane.xlu1 %2499  ;;  %2775 = vmatpush.msra.mxu2 %v6290_v21  ;;  %v2781_v18 = vpop.permute.xlu0 %2780  ;;  %v2566_v49 = vsub.f32 1.0, %v2565_v31  ;;  %vm2540_vm4 = vweird.f32 %v6457_v45  ;;  %vm2571_vm6 = vmor %vm2569_vm5, %vm2570_vm1  ;;  %vm2544_vm11 = vcmp.eq.f32.partialorder %v2543_v14, 8.507059e+37  ;;  %v2189_v17 = vld [vmem:[%s8677_s16 + $0x8] sm:$0xff] }
 0xf11   :  { %v2612_v7 = vmul.f32 %v6453_v8, %v2611_v15  ;;  %6076 = vmatmul.msk.f32.vlgmr.msra.gmra.mxu2 %vm230_vm3, %v2593_v30  ;;  %6458 = vrcp.f32 %v7615_v41  ;;  %6074 = vmatmul.msk.f32.vlgmr.msrb.gmra.mxu1 %vm230_vm3, %v2563_v20  ;;  %v2536_v4 = vsub.f32 1.0, %v2535_v44  ;;  %vm2541_vm9 = vmor %vm2539_vm8, %vm2540_vm4  ;;  %v2605_v52 = vand.u32 2147483648, %v7615_v41 }
 0xf12   :  { %v2567_v39 = vmul.f32 %v6455_v34, %v2566_v49  ;;  %vm2599_vm13 = vweird.f32 %v7615_v41  ;;  %v2603_v48 = vand.u32 2147483647, %v7615_v41  ;;  %2885 = vmatpush.msrb.mxu2 %v2189_v17 }
 0xf13   :  { %v2613_v16 = vadd.f32 %v6453_v8, %v2612_v7  ;;  %v2537_v56 = vmul.f32 %v6457_v45, %v2536_v4  ;;  %v2606_v25 = vor.u32 1.1754944e-38, %v2605_v52 }
 0xf14   :  { %v2568_v55 = vadd.f32 %v6455_v34, %v2567_v39 }
 0xf15   :  { %v2617_v46 = vsel %vm2616_vm14, %v6453_v8, %v2613_v16  ;;  %v2538_v19 = vadd.f32 %v6457_v45, %v2537_v56 }
 0xf16   :  { %v2622_v10 = vsel %vm2619_vm0, %v2621_v5, %v2617_v46  ;;  %v2572_v32 = vsel %vm2571_vm6, %v6455_v34, %v2568_v55  ;;  %vm2604_vm0 = vcmp.eq.f32.partialorder %v2603_v48, 8.507059e+37 }
 0xf17   :  { %v6459_v0 = vpop.eup %6458  ;;  %v2623_v61 = vmul.f32 %v7573_v1, %v2622_v10  ;;  %v2573_v1 = vand.u32 2147483647, %v7610_v58  ;;  %v2542_v51 = vsel %vm2541_vm9, %v6457_v45, %v2538_v19  ;;  %v7664_v45 = vld [vmem:[%s8678_s24] sm:$0xff] }
 0xf18   :  { %v2595_v38 = vmul.f32 %v6459_v0, %v7615_v41  ;;  %v2547_v62 = vsel %vm2544_vm11, %v2546_v50, %v2542_v51  ;;  %vm2600_vm12 = vweird.f32 %v6459_v0  ;;  %v2861_v7 = vperm.slane %v7664_v45, 0  ;;  %v3045_v50 = vld [vmem:[%s8679_s18 + $0x10] sm:$0xff] }
 0xf19   :  { %vm2574_vm10 = vcmp.eq.f32.partialorder %v2573_v1, 8.507059e+37  ;;  %v2548_v12 = vmul.f32 %v7561_v47, %v2547_v62  ;;  %vm2601_vm14 = vmor %vm2599_vm13, %vm2600_vm12  ;;  %v3044_v62 = vld [vmem:[%s8679_s18 + $0x8] sm:$0xff] }
 0xf1a   :  { %v2807_v57 = vpop.permute.xlu0 %2806  ;;  %v2596_v23 = vsub.f32 1.0, %v2595_v38  ;;  %v2577_v60 = vsel %vm2574_vm10, %v2576_v3, %v2572_v32 }
 0xf1b   :  { %2827 = vmatpush.msra.mxu1 %v2807_v57  ;;  %v2578_v9 = vmul.f32 %v7549_v37, %v2577_v60 }
 0xf1c   :  { %6078 = vmatmul.msk.f32.vlgmr.msra.gmra.mxu1 %vm230_vm3, %v2623_v61  ;;  %v2597_v40 = vmul.f32 %v6459_v0, %v2596_v23 }
 0xf1e   :  { %v2598_v42 = vadd.f32 %v6459_v0, %v2597_v40 }
 0xf20   :  { %v2602_v11 = vsel %vm2601_vm14, %v6459_v0, %v2598_v42 }
 0xf21   :  { %v2607_v26 = vsel %vm2604_vm0, %v2606_v25, %v2602_v11 }
 0xf22   :  { %v2608_v47 = vmul.f32 %v7577_v29, %v2607_v26  ;;  %v2191_v29 = vld [vmem:[%s8677_s16 + $0x18] sm:$0xff] }
 0xf23   :  { %2947 = vmatpush.msrb.mxu1 %v2191_v29 }
 0xf28   :  { %v6283_v63 = vpop.permute.xlu1 %6282 }
 0xf29   :  { %v6285_v58 = vunpack.i.h.bf16 %v6283_v63  ;;  %v6284_v8 = vunpack.i.l.bf16 %v6283_v63  ;;  %v3043_v63 = vld [vmem:[%s8679_s18] sm:$0xff] }
 0xf2a   :  { %v2647_v37 = vpop.f32.mrf.mxu3  ;;  %v2673_v21 = vpop.f32.mrf.mxu2 }
 0xf2b   :  { %2697 = vmatpush.msra.mxu0 %v6284_v8  ;;  %2749 = vmatpush.msra.mxu3 %v6285_v58 }
 0xf2c   :  { %6073 = vmatmul.msk.f32.vlgmr.msra.gmra.mxu0 %vm230_vm3, %v2548_v12  ;;  %6075 = vmatmul.msk.f32.vlgmr.msra.gmra.mxu3 %vm230_vm3, %v2578_v9 }
 0xf2d   :  { %2801 = vmatpush.msrb.mxu0 %v2781_v18  ;;  %2853 = vmatpush.msrb.mxu3 %v2188_v24 }
 0xf2f   :  { %2916 = vmatpush.msra.mxu0 %v2190_v6 }
 0xf34   :  { %6077 = vmatmul.msk.f32.vlgmr.msrb.gmra.mxu0 %vm230_vm3, %v2608_v47  ;;  %6079 = vmatmul.msk.f32.vlgmr.msrb.gmra.mxu3 %vm230_vm3, %v2647_v37 }
 0xf3c   :  { %6080 = vmatmul.msk.f32.gmra.mxu3 %vm230_vm3, %v2673_v21 }
 0xf45   :  { %v2099_v38 = vpop.xlane.xlu0 %2098 }
 0xf46   :  { %v2101_v28 = vmul.f32 %v2099_v38, %v6978_v33 }
 0xf48   :  { %v7678_v14 = vsub.f32 %v7598_v22, %v2101_v28 }
 0xf4a   :  { %v2105_v51 = vmul.f32 %v7678_v14, %v7678_v14 }
 0xf4c   :  { %v2109_v40 = vsel %vm180_vm2, %v2105_v51, 0.0 }
 0xf53   :  { %v2096_v31 = vpop.xlane.xlu1 %2095 }
 0xf54   :  { %v2100_v10 = vmul.f32 %v2096_v31, %v6978_v33 }
 0xf56   :  { %v7670_v57 = vsub.f32 %v7604_v27, %v2100_v10 }
 0xf58   :  { %v2104_v1 = vmul.f32 %v7670_v57, %v7670_v57 }
 0xf5a   :  { %v2106_v27 = vsel %vm180_vm2, %v2104_v1, 0.0 }
 0xf8e   :  { %v2725_v30 = vpop.f32.mrf.mxu1 }
 0xf94   :  { %v2777_v59 = vpop.f32.mrf.mxu2 }
 0xf99   :  { %v2829_v41 = vpop.f32.mrf.mxu1 }
 0xfa9   :  { %v2699_v15 = vpop.f32.mrf.mxu0 }
 0xfaa   :  { %6081 = vmatmul.msk.f32.vlgmr.msrb.gmra.mxu2 %vm230_vm3, %v2699_v15 }
 0xfaf   :  { %v2751_v34 = vpop.f32.mrf.mxu3 }
 0xfb0   :  { %6083 = vmatmul.msk.f32.vlgmr.msra.gmra.mxu0 %vm230_vm3, %v2751_v34 }
 0xfb1   :  { %v2803_v35 = vpop.f32.mrf.mxu0 }
 0xfb2   :  { %6082 = vmatmul.msk.f32.gmra.mxu2 %vm230_vm3, %v2725_v30  ;;  %6085 = vmatmul.msk.f32.vlgmr.msrb.gmra.mxu1 %vm230_vm3, %v2803_v35 }
 0xfb7   :  { %v2855_v2 = vpop.f32.mrf.mxu3 }
 0xfb8   :  { %6084 = vmatmul.msk.f32.gmra.mxu0 %vm230_vm3, %v2777_v59  ;;  %v2862_v36 = vadd.f32 %v2861_v7, %v2855_v2  ;;  %v6584_v59 = vld [vmem:[%s8742_s13 + $0x8] sm:$0x3f] }
 0xfba   :  { %6086 = vmatmul.msk.f32.gmra.mxu1 %vm230_vm3, %v2829_v41  ;;  %v2138_v41 = vperm.slane %v6584_v59, 4 }
 0xfbf   :  { %v2858_v46 = vpop.f32.mrf.mxu3 }
 0xfc0   :  { %v2863_v4 = vadd.f32 %v2861_v7, %v2858_v46 }
0x102d   :  { %v2887_v20 = vpop.f32.mrf.mxu2  ;;  %v2918_v16 = vpop.f32.mrf.mxu0 }
0x102e   :  { %v2893_v18 = vadd.f32 %v2887_v20, %v2862_v36  ;;  %v2141_v20 = vperm.slane %v6584_v59, 5 }
0x102f   :  { %v2949_v44 = vpop.f32.mrf.mxu1 }
0x1030   :  { %v2924_v5 = vadd.f32 %v2918_v16, %v2893_v18 }
0x1032   :  { %v2955_v49 = vadd.f32 %v2949_v44, %v2924_v5 }
0x1034   :  { %v2957_v0 = vadd.f32 %v2955_v49, %v7355_v13 }
0x1035   :  { %v2890_v61 = vpop.f32.mrf.mxu2  ;;  %v2921_v55 = vpop.f32.mrf.mxu0 }
0x1036   :  { %v2894_v39 = vadd.f32 %v2890_v61, %v2863_v4  ;;  %v2959_v56 = vsel %vm180_vm2, %v2957_v0, 0.0  ;;  %v3011_v61 = vld [vmem:[%s8681_s17 + $0x10] sm:$0xff] }
0x1037   :  { %2960 = vadd.xlane.f32.xlu2 %v2959_v56  ;;  %v2952_v23 = vpop.f32.mrf.mxu1 }
0x1038   :  { %v2925_v19 = vadd.f32 %v2921_v55, %v2894_v39  ;;  %v3009_v39 = vld [vmem:[%s8681_s17] sm:$0xff] }
0x103a   :  { %v2956_v53 = vadd.f32 %v2952_v23, %v2925_v19 }
0x103c   :  { %v2958_v13 = vadd.f32 %v2956_v53, %v7361_v54  ;;  %v3046_v54 = vld [vmem:[%s8679_s18 + $0x18] sm:$0xff] }
0x103d   :  { %3069 = vmatpush.msra.mxu2 %v3046_v54 }
0x103e   :  { %v2962_v32 = vsel %vm180_vm2, %v2958_v13, 0.0 }
0x103f   :  { %2107 = vadd.xlane.f32.xlu2 %v2106_v27  ;;  %2963 = vadd.xlane.f32.xlu1 %v2962_v32 }
0x1040   :  { %3070 = vmatpush.msra.mxu2 %v3045_v50 }
0x1042   :  { %3071 = vmatpush.msra.mxu2 %v3044_v62  ;;  %v3006_v62 = vperm.slane %v7664_v45, 2 }
0x1044   :  { %3072 = vmatpush.msra.mxu2 %v3043_v63 }
0x1047   :  { %2110 = vadd.xlane.f32.xlu1 %v2109_v40 }
0x10aa   :  { %v2961_v3 = vpop.xlane.xlu2 %2960 }
0x10ab   :  { %v2965_v22 = vmul.f32 %v2961_v3, %v6978_v33  ;;  %v3003_v3 = vperm.slane %v7664_v45, 1 }
0x10ad   :  { %v7692_v60 = vsub.f32 %v2957_v0, %v2965_v22  ;;  %v3012_v0 = vld [vmem:[%s8681_s17 + $0x18] sm:$0xff] }
0x10ae   :  { %3032 = vmatpush.msra.mxu3 %v3012_v0 }
0x10af   :  { %v2969_v42 = vmul.f32 %v7692_v60, %v7692_v60 }
0x10b0   :  { %3033 = vmatpush.msra.mxu3 %v3011_v61 }
0x10b1   :  { %v2971_v52 = vsel %vm180_vm2, %v2969_v42, 0.0 }
0x10b2   :  { %2972 = vadd.xlane.f32.xlu0 %v2971_v52  ;;  %v2108_v58 = vpop.xlane.xlu2 %2107  ;;  %v2964_v8 = vpop.xlane.xlu1 %2963 }
0x10b3   :  { %v2112_v48 = vmul.f32 %v2108_v58, %v6978_v33  ;;  %v2966_v12 = vmul.f32 %v2964_v8, %v6978_v33 }
0x10b5   :  { %v2114_v9 = vadd.f32 1e-05, %v2112_v48  ;;  %v7705_v24 = vsub.f32 %v2958_v13, %v2966_v12 }
0x10b7   :  { %6460 = vrsqrt.f32 %v2114_v9  ;;  %v2970_v11 = vmul.f32 %v7705_v24, %v7705_v24  ;;  %vm2122_vm4 = vweird.f32 %v2114_v9 }
0x10b9   :  { %v2974_v25 = vsel %vm180_vm2, %v2970_v11, 0.0 }
0x10ba   :  { %2975 = vadd.xlane.f32.xlu2 %v2974_v25  ;;  %v2111_v26 = vpop.xlane.xlu1 %2110 }
0x10bb   :  { %v2113_v47 = vmul.f32 %v2111_v26, %v6978_v33 }
0x10bd   :  { %v6461_v37 = vpop.eup %6460  ;;  %v2115_v21 = vadd.f32 1e-05, %v2113_v47 }
0x10be   :  { %v2117_v17 = vmul.f32 %v6461_v37, %v2114_v9  ;;  %vm2123_vm1 = vweird.f32 %v6461_v37 }
0x10bf   :  { %6462 = vrsqrt.f32 %v2115_v21  ;;  %vm2124_vm5 = vmor %vm2122_vm4, %vm2123_vm1  ;;  %vm2132_vm8 = vweird.f32 %v2115_v21 }
0x10c0   :  { %v2118_v6 = vmul.f32 %v6461_v37, %v2117_v17  ;;  %v3013_v17 = vperm.slane %v7664_v45, 3 }
0x10c2   :  { %v2119_v29 = vmul.f32 0.5, %v2118_v6 }
0x10c4   :  { %v2120_v15 = vsub.f32 1.5, %v2119_v29 }
0x10c5   :  { %v6463_v30 = vpop.eup %6462 }
0x10c6   :  { %v2121_v34 = vmul.f32 %v6461_v37, %v2120_v15  ;;  %v2127_v35 = vmul.f32 %v6463_v30, %v2115_v21  ;;  %vm2133_vm6 = vweird.f32 %v6463_v30 }
0x10c7   :  { %vm2134_vm9 = vmor %vm2132_vm8, %vm2133_vm6 }
0x10c8   :  { %v2125_v2 = vsel %vm2124_vm5, %v6461_v37, %v2121_v34  ;;  %v2128_v7 = vmul.f32 %v6463_v30, %v2127_v35 }
0x10c9   :  { %v2136_v36 = vmul.f32 %v2125_v2, %v7670_v57  ;;  %v3010_v57 = vld [vmem:[%s8681_s17 + $0x8] sm:$0xff] }
0x10ca   :  { %v2129_v16 = vmul.f32 0.5, %v2128_v7  ;;  %3034 = vmatpush.msra.mxu3 %v3010_v57 }
0x10cb   :  { %v2139_v18 = vmul.f32 %v2138_v41, %v2136_v36 }
0x10cc   :  { %v2130_v31 = vsub.f32 1.5, %v2129_v16  ;;  %3035 = vmatpush.msra.mxu3 %v3009_v39 }
0x10cd   :  { %v7715_v44 = vadd.f32 %v2141_v20, %v2139_v18 }
0x10ce   :  { %v2131_v5 = vmul.f32 %v6463_v30, %v2130_v31 }
0x10cf   :  { %6089 = vmatmul.msk.f32.vlgmr.msra.gmra.mxu2 %vm180_vm2, %v7715_v44 }
0x10d0   :  { %v2135_v46 = vsel %vm2134_vm9, %v6463_v30, %v2131_v5 }
0x10d1   :  { %v2137_v10 = vmul.f32 %v2135_v46, %v7678_v14 }
0x10d3   :  { %v2140_v49 = vmul.f32 %v2138_v41, %v2137_v10 }
0x10d5   :  { %v7720_v4 = vadd.f32 %v2141_v20, %v2140_v49 }
0x10d7   :  { %6090 = vmatmul.msk.f32.gmra.mxu2 %vm180_vm2, %v7720_v4 }
0x1125   :  { %v2973_v56 = vpop.xlane.xlu0 %2972 }
0x1126   :  { %v2977_v38 = vmul.f32 %v2973_v56, %v6978_v33 }
0x1128   :  { %v2979_v55 = vadd.f32 1e-05, %v2977_v38 }
0x112a   :  { %6464 = vrsqrt.f32 %v2979_v55  ;;  %vm2987_vm11 = vweird.f32 %v2979_v55 }
0x112d   :  { %v2976_v19 = vpop.xlane.xlu2 %2975 }
0x112e   :  { %v2978_v23 = vmul.f32 %v2976_v19, %v6978_v33 }
0x1130   :  { %v6465_v28 = vpop.eup %6464  ;;  %v2980_v53 = vadd.f32 1e-05, %v2978_v23 }
0x1131   :  { %v2982_v1 = vmul.f32 %v6465_v28, %v2979_v55  ;;  %vm2988_vm10 = vweird.f32 %v6465_v28 }
0x1132   :  { %6466 = vrsqrt.f32 %v2980_v53  ;;  %vm2989_vm12 = vmor %vm2987_vm11, %vm2988_vm10  ;;  %vm2997_vm14 = vweird.f32 %v2980_v53 }
0x1133   :  { %v2983_v13 = vmul.f32 %v6465_v28, %v2982_v1 }
0x1135   :  { %v2984_v14 = vmul.f32 0.5, %v2983_v13 }
0x1137   :  { %v2985_v27 = vsub.f32 1.5, %v2984_v14 }
0x1138   :  { %v6467_v32 = vpop.eup %6466 }
0x1139   :  { %v2986_v51 = vmul.f32 %v6465_v28, %v2985_v27  ;;  %v2992_v40 = vmul.f32 %v6467_v32, %v2980_v53  ;;  %vm2998_vm13 = vweird.f32 %v6467_v32 }
0x113a   :  { %vm2999_vm0 = vmor %vm2997_vm14, %vm2998_vm13 }
0x113b   :  { %v2990_v54 = vsel %vm2989_vm12, %v6465_v28, %v2986_v51  ;;  %v2993_v22 = vmul.f32 %v6467_v32, %v2992_v40 }
0x113c   :  { %v3001_v50 = vmul.f32 %v2990_v54, %v7692_v60  ;;  %v6343_v60 = vld [vmem:[%s8680_s19] ss:$0 sm:$0xff] }
0x113d   :  { %v2994_v42 = vmul.f32 0.5, %v2993_v22 }
0x113e   :  { %v3004_v63 = vmul.f32 %v3003_v3, %v3001_v50 }
0x113f   :  { %v2995_v52 = vsub.f32 1.5, %v2994_v42 }
0x1140   :  { %v7741_v58 = vadd.f32 %v3006_v62, %v3004_v63 }
0x1141   :  { %v2996_v8 = vmul.f32 %v6467_v32, %v2995_v52 }
0x1142   :  { %6087 = vmatmul.msk.f32.vlgmr.msra.gmra.mxu3 %vm180_vm2, %v7741_v58 }
0x1143   :  { %v3000_v48 = vsel %vm2999_vm0, %v6467_v32, %v2996_v8 }
0x1144   :  { %v3002_v12 = vmul.f32 %v3000_v48, %v7705_v24 }
0x1146   :  { %v3005_v9 = vmul.f32 %v3003_v3, %v3002_v12 }
0x1148   :  { %v7746_v11 = vadd.f32 %v3006_v62, %v3005_v9 }
0x114a   :  { %6088 = vmatmul.msk.f32.gmra.mxu3 %vm180_vm2, %v7746_v11 }
0x1152   :  { %v3074_v25 = vpop.f32.mrf.mxu2 }
0x1153   :  { %v7753_v26 = vadd.f32 %v6343_v60, %v3074_v25 }
0x1155   :  { %3104 = vrot.lane.b32.xlu0 %v7753_v26, %s8748_s6  ;;  %6091 = vmatpush.xpose.msk.msrb.mxu0 %vm230_vm3, %v7753_v26 }
0x1156   :  { %3100 = vrot.lane.b32.xlu2 %v7753_v26, %s8747_s11 }
0x115a   :  { %v3077_v24 = vpop.f32.mrf.mxu2 }
0x115b   :  { %v7761_v47 = vadd.f32 %v6343_v60, %v3077_v24 }
0x115d   :  { %6093 = vmatpush.xpose.msk.msra.mxu1 %vm230_vm3, %v7761_v47  ;;  %v6291_v52 = vpack.i.bf16 %v7761_v47, %v7753_v26 }
0x115e   :  { %3102 = vrot.lane.b32.xlu2 %v7761_v47, %s8747_s11 }
0x11b0   :  { %v7767_v37 = vpop.permute.xlu2 %3100 }
0x11b1   :  { %6095 = vmatpush.xpose.msk.msra.mxu0 %vm230_vm3, %v7767_v37 }
0x11b8   :  { %v7771_v21 = vpop.permute.xlu2 %3102 }
0x11b9   :  { %6097 = vmatpush.xpose.msk.msrb.mxu1 %vm230_vm3, %v7771_v21 }
0x11c5   :  { %v3037_v6 = vpop.f32.mrf.mxu3 }
0x11c6   :  { %v3038_v29 = vadd.f32 %v3037_v6, %v3013_v17 }
0x11c7   :  { %v7776_v15 = vpop.permute.xlu0 %3104 }
0x11c8   :  { %6099 = vmatpush.xpose.msk.msrb.mxu3 %vm230_vm3, %v7776_v15  ;;  %3086 = vrot.lane.b32.xlu0 %v3038_v29, %s8747_s11  ;;  %v6296_v63 = vpack.i.bf16 %v7776_v15, %v7767_v37 }
0x11c9   :  { %6092 = vmatmul.msk.f32.vlgmr.msrb.gmra.mxu0 %vm230_vm3, %v3038_v29  ;;  %3090 = vrot.lane.b32.xlu1 %v3038_v29, %s8748_s6 }
0x11ca   :  { %3094 = vrot.lane.b32.xlu2 %v3038_v29, %s8746_s8 }
0x11cd   :  { %v3040_v30 = vpop.f32.mrf.mxu3 }
0x11ce   :  { %v3041_v34 = vadd.f32 %v3040_v30, %v3013_v17 }
0x11d0   :  { %3092 = vrot.lane.b32.xlu0 %v3041_v34, %s8748_s6  ;;  %6094 = vmatmul.msk.f32.vlgmr.msra.gmra.mxu1 %vm230_vm3, %v3041_v34 }
0x11d1   :  { %3106 = vrot.lane.b32.xlu1 %v7761_v47, %s8748_s6 }
0x11d8   :  { %3088 = vrot.lane.b32.xlu0 %v3041_v34, %s8747_s11 }
0x11d9   :  { %3108 = vrot.lane.b32.xlu1 %v7753_v26, %s8746_s8 }
0x11e0   :  { %3096 = vrot.lane.b32.xlu0 %v3041_v34, %s8746_s8 }
0x11e1   :  { %3110 = vrot.lane.b32.xlu1 %v7761_v47, %s8746_s8 }
0x1224   :  { %v3095_v5 = vpop.permute.xlu2 %3094 }
0x123a   :  { %v3087_v35 = vpop.permute.xlu0 %3086 }
0x123b   :  { %v3091_v59 = vpop.permute.xlu1 %3090  ;;  %6096 = vmatmul.msk.f32.vlgmr.msra.gmra.mxu0 %vm230_vm3, %v3087_v35 }
0x123c   :  { %6100 = vmatmul.msk.f32.vlgmr.msrb.gmra.mxu3 %vm230_vm3, %v3091_v59 }
0x1242   :  { %v3093_v41 = vpop.permute.xlu0 %3092 }
0x1243   :  { %v7796_v2 = vpop.permute.xlu1 %3106 }
0x1244   :  { %6101 = vmatpush.xpose.msk.msrb.mxu2 %vm230_vm3, %v7796_v2 }
0x1246   :  { %v3133_v7 = vpop.f32.mrf.mxu0 }
0x1247   :  { %v3304_v36 = vmul.f32 0.125, %v3133_v7  ;;  %6102 = vmatmul.msk.f32.vlgmr.msrb.gmra.mxu2 %vm230_vm3, %v3093_v41 }
0x1249   :  { %v3312_v20 = vsel %vm230_vm3, %v3304_v36, -inf }
0x124a   :  { %3313 = vmax.xlane.f32.xlu2 %v3312_v20  ;;  %v3089_v16 = vpop.permute.xlu0 %3088 }
0x124b   :  { %v7802_v18 = vpop.permute.xlu1 %3108  ;;  %6098 = vmatmul.msk.f32.vlgmr.msrb.gmra.mxu1 %vm230_vm3, %v3089_v16 }
0x124c   :  { %6103 = vmatpush.xpose.msk.msrb.mxu0 %vm230_vm3, %v7802_v18 }
0x124d   :  { %v3157_v31 = vpop.f32.mrf.mxu1 }
0x124e   :  { %v3305_v46 = vmul.f32 0.125, %v3157_v31 }
0x124f   :  { %6104 = vmatmul.msk.f32.vlgmr.msrb.gmra.mxu0 %vm230_vm3, %v3095_v5 }
0x1250   :  { %v3315_v10 = vsel %vm230_vm3, %v3305_v46, -inf }
0x1251   :  { %3316 = vmax.xlane.f32.xlu1 %v3315_v10 }
0x1252   :  { %v3097_v0 = vpop.permute.xlu0 %3096 }
0x1253   :  { %v7809_v49 = vpop.permute.xlu1 %3110 }
0x1254   :  { %6105 = vmatpush.xpose.msk.msra.mxu1 %vm230_vm3, %v7809_v49 }
0x1257   :  { %6106 = vmatmul.msk.f32.vlgmr.msra.gmra.mxu1 %vm230_vm3, %v3097_v0 }
0x12b8   :  { %v3181_v61 = vpop.f32.mrf.mxu0 }
0x12b9   :  { %v3306_v57 = vmul.f32 0.125, %v3181_v61 }
0x12bb   :  { %v3318_v39 = vsel %vm230_vm3, %v3306_v57, -inf }
0x12bc   :  { %3319 = vmax.xlane.f32.xlu0 %v3318_v39 }
0x12bd   :  { %v3314_v56 = vpop.xlane.xlu2 %3313 }
0x12be   :  { %v3336_v38 = vsub.f32 %v3304_v36, %v3314_v56 }
0x12bf   :  { %v3229_v55 = vpop.f32.mrf.mxu3 }
0x12c0   :  { %v3344_v19 = vmul.f32 1.442695, %v3336_v38  ;;  %v3308_v23 = vmul.f32 0.125, %v3229_v55 }
0x12c2   :  { %6468 = vpow2.f32 %v3344_v19  ;;  %v3324_v28 = vsel %vm230_vm3, %v3308_v23, -inf }
0x12c3   :  { %3325 = vmax.xlane.f32.xlu2 %v3324_v28 }
0x12c4   :  { %v3317_v8 = vpop.xlane.xlu1 %3316 }
0x12c5   :  { %v3337_v48 = vsub.f32 %v3305_v46, %v3317_v8  ;;  %v6301_v8 = vpack.i.bf16 %v7796_v2, %v7771_v21 }
0x12c7   :  { %v3346_v12 = vmul.f32 1.442695, %v3337_v48 }
0x12c8   :  { %v7816_v53 = vpop.eup %6468  ;;  %v3205_v1 = vpop.f32.mrf.mxu1 }
0x12c9   :  { %v3307_v13 = vmul.f32 0.125, %v3205_v1  ;;  %v3360_v14 = vsel %vm230_vm3, %v7816_v53, 0.0  ;;  %6470 = vpow2.f32 %v3346_v12 }
0x12ca   :  { %3361 = vadd.xlane.f32.xlu0 %v3360_v14  ;;  %v3253_v27 = vpop.f32.mrf.mxu2 }
0x12cb   :  { %v3321_v32 = vsel %vm230_vm3, %v3307_v13, -inf  ;;  %v3309_v40 = vmul.f32 0.125, %v3253_v27 }
0x12cc   :  { %v3277_v51 = vpop.f32.mrf.mxu0  ;;  %3322 = vmax.xlane.f32.xlu1 %v3321_v32 }
0x12cd   :  { %v3310_v3 = vmul.f32 0.125, %v3277_v51  ;;  %v3327_v22 = vsel %vm230_vm3, %v3309_v40, -inf }
0x12cf   :  { %v3330_v54 = vsel %vm230_vm3, %v3310_v3, -inf  ;;  %v7833_v9 = vpop.eup %6470 }
0x12d0   :  { %3331 = vmax.xlane.f32.xlu2 %v3330_v54  ;;  %v3363_v60 = vsel %vm230_vm3, %v7833_v9, 0.0 }
0x12d2   :  { %3328 = vmax.xlane.f32.xlu0 %v3327_v22 }
0x12d4   :  { %v3301_v50 = vpop.f32.mrf.mxu1 }
0x12d5   :  { %v7823_v62 = vmul.f32 0.125, %v3301_v50 }
0x12d7   :  { %v3333_v42 = vsel %vm230_vm3, %v7823_v62, -inf }
0x12d8   :  { %3334 = vmax.xlane.f32.xlu1 %v3333_v42 }
0x12e6   :  { %6297 = vrot.lane.b32.xlu0 %v6296_v63, %s8749_s0 }
0x12e8   :  { %6292 = vrot.lane.b32.xlu2 %v6291_v52, %s8749_s0 }
0x1311   :  { %3364 = vadd.xlane.f32.xlu2 %v3363_v60 }
0x132f   :  { %v3320_v25 = vpop.xlane.xlu0 %3319 }
0x1330   :  { %v3338_v24 = vsub.f32 %v3306_v57, %v3320_v25 }
0x1332   :  { %v3348_v37 = vmul.f32 1.442695, %v3338_v24 }
0x1334   :  { %6472 = vpow2.f32 %v3348_v37 }
0x1336   :  { %v3326_v17 = vpop.xlane.xlu2 %3325 }
0x1337   :  { %v3340_v6 = vsub.f32 %v3308_v23, %v3326_v17 }
0x1339   :  { %v3352_v29 = vmul.f32 1.442695, %v3340_v6 }
0x133a   :  { %v7837_v26 = vpop.eup %6472 }
0x133b   :  { %6474 = vpow2.f32 %v3352_v29  ;;  %v3366_v47 = vsel %vm230_vm3, %v7837_v26, 0.0 }
0x133c   :  { %3367 = vadd.xlane.f32.xlu1 %v3366_v47  ;;  %v3080_v47 = vld [vmem:[%s8682_s20] sm:$0xff] }
0x133d   :  { %v3362_v15 = vpop.xlane.xlu0 %3361 }
0x133e   :  { %6476 = vrcp.f32 %v3362_v15  ;;  %v3395_v0 = vand.u32 2147483648, %v3362_v15  ;;  %v3393_v39 = vand.u32 2147483647, %v3362_v15  ;;  %vm3389_vm4 = vweird.f32 %v3362_v15 }
0x133f   :  { %v3323_v30 = vpop.xlane.xlu1 %3322 }
0x1340   :  { %v3339_v34 = vsub.f32 %v3307_v13, %v3323_v30  ;;  %v3396_v28 = vor.u32 1.1754944e-38, %v3395_v0  ;;  %vm3394_vm6 = vcmp.eq.f32.partialorder %v3393_v39, 8.507059e+37 }
0x1341   :  { %v7841_v35 = vpop.eup %6474 }
0x1342   :  { %v3350_v59 = vmul.f32 1.442695, %v3339_v34  ;;  %v3372_v41 = vsel %vm230_vm3, %v7841_v35, 0.0 }
0x1343   :  { %3373 = vadd.xlane.f32.xlu0 %v3372_v41  ;;  %v3332_v7 = vpop.xlane.xlu2 %3331 }
0x1344   :  { %v6477_v36 = vpop.eup %6476  ;;  %6478 = vpow2.f32 %v3350_v59  ;;  %v3342_v20 = vsub.f32 %v3310_v3, %v3332_v7 }
0x1345   :  { %v3385_v16 = vmul.f32 %v6477_v36, %v3362_v15  ;;  %v3329_v31 = vpop.xlane.xlu0 %3328  ;;  %vm3390_vm1 = vweird.f32 %v6477_v36 }
0x1346   :  { %v3356_v5 = vmul.f32 1.442695, %v3342_v20  ;;  %v3341_v46 = vsub.f32 %v3309_v40, %v3329_v31  ;;  %vm3391_vm5 = vmor %vm3389_vm4, %vm3390_vm1 }
0x1347   :  { %v3386_v10 = vsub.f32 1.0, %v3385_v16 }
0x1348   :  { %6480 = vpow2.f32 %v3356_v5  ;;  %v3354_v61 = vmul.f32 1.442695, %v3341_v46 }
0x1349   :  { %v3387_v57 = vmul.f32 %v6477_v36, %v3386_v10 }
0x134a   :  { %v7845_v56 = vpop.eup %6478  ;;  %6482 = vpow2.f32 %v3354_v61 }
0x134b   :  { %v3388_v38 = vadd.f32 %v6477_v36, %v3387_v57  ;;  %v6293_v55 = vpop.permute.xlu2 %6292  ;;  %v3335_v19 = vpop.xlane.xlu1 %3334  ;;  %v3369_v23 = vsel %vm230_vm3, %v7845_v56, 0.0 }
0x134c   :  { %v6295_v1 = vunpack.i.h.bf16 %v6293_v55  ;;  %v6294_v13 = vunpack.i.l.bf16 %v6293_v55  ;;  %v3343_v14 = vsub.f32 %v7823_v62, %v3335_v19  ;;  %3370 = vadd.xlane.f32.xlu2 %v3369_v23 }
0x134d   :  { %v3392_v27 = vsel %vm3391_vm5, %v6477_v36, %v3388_v38 }
0x134e   :  { %v7850_v32 = vpop.eup %6480  ;;  %v3397_v51 = vsel %vm3394_vm6, %v3396_v28, %v3392_v27  ;;  %v3358_v40 = vmul.f32 1.442695, %v3343_v14  ;;  %3525 = vmatpush.msra.mxu3 %v6294_v13  ;;  %3551 = vmatpush.msra.mxu2 %v6295_v1 }
0x134f   :  { %v3398_v3 = vmul.f32 %v7816_v53, %v3397_v51  ;;  %v3378_v54 = vsel %vm230_vm3, %v7850_v32, 0.0 }
0x1350   :  { %v7855_v22 = vpop.eup %6482  ;;  %6484 = vpow2.f32 %v3358_v40  ;;  %3379 = vadd.xlane.f32.xlu0 %v3378_v54 }
0x1351   :  { %6107 = vmatmul.msk.f32.vlgmr.msra.gmra.mxu3 %vm230_vm3, %v3398_v3  ;;  %v3375_v50 = vsel %vm230_vm3, %v7855_v22, 0.0 }
0x1352   :  { %3376 = vadd.xlane.f32.xlu1 %v3375_v50 }
0x1356   :  { %v7860_v62 = vpop.eup %6484 }
0x1357   :  { %v3381_v53 = vsel %vm230_vm3, %v7860_v62, 0.0 }
0x1358   :  { %v6298_v42 = vpop.permute.xlu0 %6297 }
0x1359   :  { %v6300_v63 = vunpack.i.h.bf16 %v6298_v42  ;;  %v6299_v52 = vunpack.i.l.bf16 %v6298_v42 }
0x135a   :  { %3382 = vadd.xlane.f32.xlu1 %v3381_v53 }
0x135b   :  { %3577 = vmatpush.msra.mxu0 %v6299_v52  ;;  %3629 = vmatpush.msrb.mxu3 %v6300_v63 }
0x135d   :  { %3733 = vmatpush.msra.mxu3 %v3080_v47 }
0x1364   :  { %3686 = vrot.lane.b32.xlu0 %v7809_v49, %s8749_s0  ;;  %3660 = vrot.lane.b32.xlu2 %v7802_v18, %s8749_s0 }
0x1373   :  { %6302 = vrot.lane.b32.xlu1 %v6301_v8, %s8749_s0 }
0x1384   :  { %v3365_v48 = vpop.xlane.xlu2 %3364 }
0x1385   :  { %6486 = vrcp.f32 %v3365_v48  ;;  %v3410_v24 = vand.u32 2147483648, %v3365_v48  ;;  %v3408_v17 = vand.u32 2147483647, %v3365_v48  ;;  %vm3404_vm9 = vweird.f32 %v3365_v48 }
0x1387   :  { %v3411_v49 = vor.u32 1.1754944e-38, %v3410_v24  ;;  %vm3409_vm11 = vcmp.eq.f32.partialorder %v3408_v17, 8.507059e+37 }
0x138b   :  { %v6487_v12 = vpop.eup %6486 }
0x138c   :  { %v3400_v60 = vmul.f32 %v6487_v12, %v3365_v48  ;;  %vm3405_vm8 = vweird.f32 %v6487_v12 }
0x138d   :  { %vm3406_vm10 = vmor %vm3404_vm9, %vm3405_vm8 }
0x138e   :  { %v3401_v25 = vsub.f32 1.0, %v3400_v60 }
0x1390   :  { %v3402_v37 = vmul.f32 %v6487_v12, %v3401_v25 }
0x1392   :  { %v3403_v6 = vadd.f32 %v6487_v12, %v3402_v37 }
0x1394   :  { %v3407_v29 = vsel %vm3406_vm10, %v6487_v12, %v3403_v6 }
0x1395   :  { %v3412_v18 = vsel %vm3409_vm11, %v3411_v49, %v3407_v29 }
0x1396   :  { %v3413_v21 = vmul.f32 %v7833_v9, %v3412_v18 }
0x1398   :  { %6108 = vmatmul.msk.f32.vlgmr.msra.gmra.mxu2 %vm230_vm3, %v3413_v21 }
0x13af   :  { %v3368_v2 = vpop.xlane.xlu1 %3367 }
0x13b0   :  { %6488 = vrcp.f32 %v3368_v2  ;;  %v3425_v41 = vand.u32 2147483648, %v3368_v2  ;;  %v3423_v36 = vand.u32 2147483647, %v3368_v2  ;;  %vm3419_vm13 = vweird.f32 %v3368_v2 }
0x13b2   :  { %v3426_v16 = vor.u32 1.1754944e-38, %v3425_v41  ;;  %vm3424_vm0 = vcmp.eq.f32.partialorder %v3423_v36, 8.507059e+37 }
0x13b6   :  { %v6489_v15 = vpop.eup %6488  ;;  %v3374_v30 = vpop.xlane.xlu0 %3373 }
0x13b7   :  { %v3415_v34 = vmul.f32 %v6489_v15, %v3368_v2  ;;  %6490 = vrcp.f32 %v3374_v30  ;;  %vm3420_vm12 = vweird.f32 %v6489_v15  ;;  %v3455_v57 = vand.u32 2147483648, %v3374_v30 }
0x13b8   :  { %vm3421_vm14 = vmor %vm3419_vm13, %vm3420_vm12  ;;  %v3453_v38 = vand.u32 2147483647, %v3374_v30  ;;  %vm3449_vm4 = vweird.f32 %v3374_v30 }
0x13b9   :  { %v3416_v59 = vsub.f32 1.0, %v3415_v34  ;;  %v3456_v23 = vor.u32 1.1754944e-38, %v3455_v57 }
0x13ba   :  { %vm3454_vm6 = vcmp.eq.f32.partialorder %v3453_v38, 8.507059e+37 }
0x13bb   :  { %v3417_v7 = vmul.f32 %v6489_v15, %v3416_v59 }
0x13bd   :  { %v6491_v20 = vpop.eup %6490  ;;  %v3418_v9 = vadd.f32 %v6489_v15, %v3417_v7 }
0x13be   :  { %v3445_v31 = vmul.f32 %v6491_v20, %v3374_v30  ;;  %vm3450_vm1 = vweird.f32 %v6491_v20 }
0x13bf   :  { %v3422_v5 = vsel %vm3421_vm14, %v6489_v15, %v3418_v9  ;;  %v7876_v46 = vpop.xlane.xlu2 %3370  ;;  %vm3451_vm5 = vmor %vm3449_vm4, %vm3450_vm1 }
0x13c0   :  { %v3427_v10 = vsel %vm3424_vm0, %v3426_v16, %v3422_v5  ;;  %v3446_v0 = vsub.f32 1.0, %v3445_v31  ;;  %vm3434_vm14 = vweird.f32 %v7876_v46  ;;  %v3440_v15 = vand.u32 2147483648, %v7876_v46 }
0x13c1   :  { %v3428_v61 = vmul.f32 %v7837_v26, %v3427_v10  ;;  %v3438_v30 = vand.u32 2147483647, %v7876_v46 }
0x13c2   :  { %v3447_v39 = vmul.f32 %v6491_v20, %v3446_v0  ;;  %v3441_v36 = vor.u32 1.1754944e-38, %v3440_v15 }
0x13c3   :  { %v3380_v55 = vpop.xlane.xlu0 %3379  ;;  %6109 = vmatmul.msk.f32.vlgmr.msra.gmra.mxu0 %vm230_vm3, %v3428_v61 }
0x13c4   :  { %v3448_v19 = vadd.f32 %v6491_v20, %v3447_v39  ;;  %6492 = vrcp.f32 %v3380_v55  ;;  %v3485_v42 = vand.u32 2147483648, %v3380_v55  ;;  %v3483_v52 = vand.u32 2147483647, %v3380_v55 }
0x13c5   :  { %v3377_v28 = vpop.xlane.xlu1 %3376  ;;  %6494 = vrcp.f32 %v7876_v46  ;;  %vm3479_vm9 = vweird.f32 %v3380_v55 }
0x13c6   :  { %v3452_v1 = vsel %vm3451_vm5, %v6491_v20, %v3448_v19  ;;  %6496 = vrcp.f32 %v3377_v28  ;;  %v3486_v48 = vor.u32 1.1754944e-38, %v3485_v42  ;;  %vm3484_vm11 = vcmp.eq.f32.partialorder %v3483_v52, 8.507059e+37 }
0x13c7   :  { %v3457_v13 = vsel %vm3454_vm6, %v3456_v23, %v3452_v1  ;;  %v3661_v14 = vpop.permute.xlu2 %3660  ;;  %vm3464_vm1 = vweird.f32 %v3377_v28  ;;  %v3468_v34 = vand.u32 2147483647, %v3377_v28  ;;  %vm3439_vm5 = vcmp.eq.f32.partialorder %v3438_v30, 8.507059e+37  ;;  %v3082_v1 = vld [vmem:[%s8682_s20 + $0x10] sm:$0xff] }
0x13c8   :  { %v3458_v26 = vmul.f32 %v7841_v35, %v3457_v13  ;;  %3681 = vmatpush.msrb.mxu0 %v3661_v14  ;;  %v3083_v13 = vld [vmem:[%s8682_s20 + $0x18] sm:$0xff] }
0x13c9   :  { %vm3469_vm6 = vcmp.eq.f32.partialorder %v3468_v34, 8.507059e+37 }
0x13ca   :  { %v6493_v27 = vpop.eup %6492  ;;  %6111 = vmatmul.msk.f32.vlgmr.msrb.gmra.mxu3 %vm230_vm3, %v3458_v26  ;;  %3796 = vmatpush.msra.mxu0 %v3082_v1 }
0x13cb   :  { %v3475_v51 = vmul.f32 %v6493_v27, %v3380_v55  ;;  %v6495_v40 = vpop.eup %6494  ;;  %vm3480_vm8 = vweird.f32 %v6493_v27 }
0x13cc   :  { %v6497_v50 = vpop.eup %6496  ;;  %v3430_v53 = vmul.f32 %v6495_v40, %v7876_v46  ;;  %vm3481_vm10 = vmor %vm3479_vm9, %vm3480_vm8  ;;  %vm3435_vm12 = vweird.f32 %v6495_v40 }
0x13cd   :  { %v3476_v3 = vsub.f32 1.0, %v3475_v51  ;;  %v7883_v54 = vpop.xlane.xlu1 %3382  ;;  %v3460_v8 = vmul.f32 %v6497_v50, %v3377_v28  ;;  %vm3465_vm13 = vweird.f32 %v6497_v50  ;;  %vm3436_vm0 = vmor %vm3434_vm14, %vm3435_vm12 }
0x13ce   :  { %6498 = vrcp.f32 %v7883_v54  ;;  %v3431_v24 = vsub.f32 1.0, %v3430_v53  ;;  %vm3466_vm4 = vmor %vm3464_vm1, %vm3465_vm13  ;;  %v3500_v10 = vand.u32 2147483648, %v7883_v54  ;;  %vm3494_vm9 = vweird.f32 %v7883_v54 }
0x13cf   :  { %v3477_v63 = vmul.f32 %v6493_v27, %v3476_v3  ;;  %v3461_v17 = vsub.f32 1.0, %v3460_v8  ;;  %v3498_v39 = vand.u32 2147483647, %v7883_v54  ;;  %v3741_v3 = vperm.slane %v7664_v45, 4 }
0x13d0   :  { %v3432_v49 = vmul.f32 %v6495_v40, %v3431_v24  ;;  %v3501_v19 = vor.u32 1.1754944e-38, %v3500_v10 }
0x13d1   :  { %v3478_v35 = vadd.f32 %v6493_v27, %v3477_v63  ;;  %v3462_v29 = vmul.f32 %v6497_v50, %v3461_v17 }
0x13d2   :  { %v3433_v21 = vadd.f32 %v6495_v40, %v3432_v49 }
0x13d3   :  { %v3482_v12 = vsel %vm3481_vm10, %v6493_v27, %v3478_v35  ;;  %v3463_v2 = vadd.f32 %v6497_v50, %v3462_v29 }
0x13d4   :  { %v3487_v60 = vsel %vm3484_vm11, %v3486_v48, %v3482_v12  ;;  %v3527_v25 = vpop.f32.mrf.mxu3  ;;  %v6499_v6 = vpop.eup %6498  ;;  %v3437_v59 = vsel %vm3436_vm0, %v6495_v40, %v3433_v21  ;;  %vm3499_vm11 = vcmp.eq.f32.partialorder %v3498_v39, 8.507059e+37  ;;  %v6585_v39 = vld [vmem:[%s8678_s24] sm:$0xff] }
0x13d5   :  { %v3488_v37 = vmul.f32 %v7850_v32, %v3487_v60  ;;  %6115 = vmatmul.msk.f32.vlgmr.msra.gmra.mxu3 %vm230_vm3, %v3527_v25  ;;  %v3490_v18 = vmul.f32 %v6499_v6, %v7883_v54  ;;  %v3470_v32 = vand.u32 2147483648, %v3377_v28  ;;  %v3467_v41 = vsel %vm3466_vm4, %v6497_v50, %v3463_v2  ;;  %v3081_v28 = vld [vmem:[%s8682_s20 + $0x8] sm:$0xff] }
0x13d6   :  { %v3442_v9 = vsel %vm3439_vm5, %v3441_v36, %v3437_v59  ;;  %vm3495_vm8 = vweird.f32 %v6499_v6  ;;  %v3687_v55 = vpop.permute.xlu0 %3686  ;;  %v3890_v36 = vld [vmem:[%s8684_s21 + $0x8] sm:$0xff] }
0x13d7   :  { %6113 = vmatmul.msk.f32.vlgmr.msrb.gmra.mxu0 %vm230_vm3, %v3488_v37  ;;  %v3491_v47 = vsub.f32 1.0, %v3490_v18  ;;  %v3471_v20 = vor.u32 1.1754944e-38, %v3470_v32  ;;  %v3443_v46 = vmul.f32 %v7845_v56, %v3442_v9  ;;  %vm3496_vm10 = vmor %vm3494_vm9, %vm3495_vm8 }
0x13d9   :  { %v3492_v7 = vmul.f32 %v6499_v6, %v3491_v47  ;;  %v3472_v16 = vsel %vm3469_vm6, %v3471_v20, %v3467_v41  ;;  %v3889_v20 = vld [vmem:[%s8684_s21] sm:$0xff] }
0x13da   :  { %v3473_v57 = vmul.f32 %v7855_v22, %v3472_v16 }
0x13db   :  { %v3493_v31 = vadd.f32 %v6499_v6, %v3492_v7  ;;  %v3891_v7 = vld [vmem:[%s8684_s21 + $0x10] sm:$0xff] }
0x13dd   :  { %v3497_v38 = vsel %vm3496_vm10, %v6499_v6, %v3493_v31 }
0x13de   :  { %v3502_v23 = vsel %vm3499_vm11, %v3501_v19, %v3497_v38  ;;  %v3883_v38 = vperm.slane %v6585_v39, 5  ;;  %v3886_v19 = vperm.slane %v6585_v39, 6 }
0x13df   :  { %v3503_v56 = vmul.f32 %v7860_v62, %v3502_v23 }
0x13e5   :  { %v6303_v5 = vpop.permute.xlu1 %6302 }
0x13e6   :  { %v6305_v0 = vunpack.i.h.bf16 %v6303_v5  ;;  %v6304_v61 = vunpack.i.l.bf16 %v6303_v5 }
0x13e8   :  { %3603 = vmatpush.msrb.mxu1 %v6304_v61  ;;  %3655 = vmatpush.msrb.mxu2 %v6305_v0 }
0x13e9   :  { %6110 = vmatmul.msk.f32.vlgmr.msrb.gmra.mxu1 %vm230_vm3, %v3443_v46  ;;  %6112 = vmatmul.msk.f32.vlgmr.msrb.gmra.mxu2 %vm230_vm3, %v3473_v57 }
0x13ea   :  { %3707 = vmatpush.msra.mxu1 %v3687_v55  ;;  %3765 = vmatpush.msra.mxu2 %v3081_v28  ;;  %v3900_v28 = vld [vmem:[%s8685_s23 + $0x30] sm:$0xff] }
0x13ec   :  { %3827 = vmatpush.msrb.mxu1 %v3083_v13  ;;  %v3899_v13 = vld [vmem:[%s8685_s23 + $0x28] sm:$0xff] }
0x13f1   :  { %6114 = vmatmul.msk.f32.vlgmr.msra.gmra.mxu1 %vm230_vm3, %v3503_v56 }
0x141b   :  { %v3553_v22 = vpop.f32.mrf.mxu2 }
0x141c   :  { %6116 = vmatmul.msk.f32.gmra.mxu3 %vm230_vm3, %v3553_v22  ;;  %v3901_v22 = vld [vmem:[%s8685_s23 + $0x38] sm:$0xff] }
0x141d   :  { %3951 = vmatpush.msrb.mxu2 %v3901_v22 }
0x141f   :  { %3952 = vmatpush.msrb.mxu2 %v3900_v28 }
0x1421   :  { %3953 = vmatpush.msrb.mxu2 %v3899_v13 }
0x1440   :  { %v3579_v62 = vpop.f32.mrf.mxu0 }
0x1441   :  { %6117 = vmatmul.msk.f32.vlgmr.msra.gmra.mxu2 %vm230_vm3, %v3579_v62 }
0x144d   :  { %v3631_v14 = vpop.f32.mrf.mxu3 }
0x144e   :  { %6119 = vmatmul.msk.f32.vlgmr.msra.gmra.mxu0 %vm230_vm3, %v3631_v14 }
0x1454   :  { %v3683_v26 = vpop.f32.mrf.mxu0 }
0x1455   :  { %6121 = vmatmul.msk.f32.vlgmr.msrb.gmra.mxu1 %vm230_vm3, %v3683_v26  ;;  %v3898_v26 = vld [vmem:[%s8685_s23 + $0x20] sm:$0xff] }
0x1456   :  { %3954 = vmatpush.msrb.mxu2 %v3898_v26 }
0x1458   :  { %v3735_v54 = vpop.f32.mrf.mxu3 }
0x1459   :  { %v3742_v42 = vadd.f32 %v3741_v3, %v3735_v54 }
0x1466   :  { %v3605_v27 = vpop.f32.mrf.mxu1 }
0x1467   :  { %6118 = vmatmul.msk.f32.gmra.mxu2 %vm230_vm3, %v3605_v27 }
0x146c   :  { %v3657_v51 = vpop.f32.mrf.mxu2 }
0x146d   :  { %6120 = vmatmul.msk.f32.gmra.mxu0 %vm230_vm3, %v3657_v51  ;;  %v3897_v51 = vld [vmem:[%s8685_s23 + $0x18] sm:$0xff] }
0x146e   :  { %v3709_v40 = vpop.f32.mrf.mxu1  ;;  %3955 = vmatpush.msrb.mxu2 %v3897_v51 }
0x146f   :  { %6122 = vmatmul.msk.f32.gmra.mxu1 %vm230_vm3, %v3709_v40 }
0x149f   :  { %v3738_v60 = vpop.f32.mrf.mxu3 }
0x14a0   :  { %v3743_v25 = vadd.f32 %v3741_v3, %v3738_v60  ;;  %v3894_v60 = vld [vmem:[%s8685_s23] sm:$0xff] }
0x14c4   :  { %v3767_v50 = vpop.f32.mrf.mxu2 }
0x14c5   :  { %v3773_v52 = vadd.f32 %v3767_v50, %v3742_v42 }
0x14cb   :  { %v3798_v63 = vpop.f32.mrf.mxu0 }
0x14cc   :  { %v3804_v53 = vadd.f32 %v3798_v63, %v3773_v52 }
0x14d2   :  { %v3829_v35 = vpop.f32.mrf.mxu1 }
0x14d3   :  { %v3835_v8 = vadd.f32 %v3829_v35, %v3804_v53 }
0x14d5   :  { %v3837_v48 = vadd.f32 %v3835_v8, %v7741_v58 }
0x14d7   :  { %v3839_v12 = vsel %vm180_vm2, %v3837_v48, 0.0 }
0x14d8   :  { %3840 = vadd.xlane.f32.xlu2 %v3839_v12  ;;  %v3895_v12 = vld [vmem:[%s8685_s23 + $0x8] sm:$0xff] }
0x14ea   :  { %v3770_v24 = vpop.f32.mrf.mxu2  ;;  %v3801_v17 = vpop.f32.mrf.mxu0 }
0x14eb   :  { %v3774_v37 = vadd.f32 %v3770_v24, %v3743_v25  ;;  %v6344_v25 = vld [vmem:[%s8683_s22] ss:$0 sm:$0xff] }
0x14ec   :  { %v3832_v45 = vpop.f32.mrf.mxu1 }
0x14ed   :  { %v3805_v6 = vadd.f32 %v3801_v17, %v3774_v37 }
0x14ef   :  { %v3836_v49 = vadd.f32 %v3832_v45, %v3805_v6 }
0x14f1   :  { %v3838_v29 = vadd.f32 %v3836_v49, %v7746_v11  ;;  %v3892_v11 = vld [vmem:[%s8684_s21 + $0x18] sm:$0xff] }
0x14f2   :  { %3923 = vmatpush.msrb.mxu3 %v3892_v11 }
0x14f3   :  { %v3842_v18 = vsel %vm180_vm2, %v3838_v29, 0.0 }
0x14f4   :  { %3843 = vadd.xlane.f32.xlu0 %v3842_v18  ;;  %3924 = vmatpush.msrb.mxu3 %v3891_v7 }
0x14f6   :  { %3925 = vmatpush.msrb.mxu3 %v3890_v36 }
0x14f8   :  { %3926 = vmatpush.msrb.mxu3 %v3889_v20 }
0x154b   :  { %v3841_v21 = vpop.xlane.xlu2 %3840 }
0x154c   :  { %v3845_v2 = vmul.f32 %v3841_v21, %v6978_v33 }
0x154e   :  { %v3847_v58 = vsub.f32 %v3837_v48, %v3845_v2  ;;  %v3896_v48 = vld [vmem:[%s8685_s23 + $0x10] sm:$0xff] }
0x154f   :  { %3956 = vmatpush.msrb.mxu2 %v3896_v48 }
0x1550   :  { %v3849_v47 = vmul.f32 %v3847_v58, %v3847_v58 }
0x1551   :  { %3957 = vmatpush.msrb.mxu2 %v3895_v12 }
0x1552   :  { %v3851_v15 = vsel %vm180_vm2, %v3849_v47, 0.0 }
0x1553   :  { %3852 = vadd.xlane.f32.xlu1 %v3851_v15  ;;  %3958 = vmatpush.msrb.mxu2 %v3894_v60  ;;  %v6345_v60 = vld [vmem:[%s8676_s15 + $0x1] ss:$0 sm:$0xff] }
0x1567   :  { %v3844_v32 = vpop.xlane.xlu0 %3843 }
0x1568   :  { %v3846_v30 = vmul.f32 %v3844_v32, %v6978_v33 }
0x156a   :  { %v3848_v34 = vsub.f32 %v3838_v29, %v3846_v30  ;;  %v3936_v29 = vperm.slane %v6585_v39, 7 }
0x156c   :  { %v3850_v59 = vmul.f32 %v3848_v34, %v3848_v34 }
0x156e   :  { %v3854_v41 = vsel %vm180_vm2, %v3850_v59, 0.0 }
0x156f   :  { %3855 = vadd.xlane.f32.xlu2 %v3854_v41 }
0x15c6   :  { %v3853_v9 = vpop.xlane.xlu1 %3852 }
0x15c7   :  { %v3857_v16 = vmul.f32 %v3853_v9, %v6978_v33 }
0x15c9   :  { %v3859_v31 = vadd.f32 1e-05, %v3857_v16 }
0x15cb   :  { %6500 = vrsqrt.f32 %v3859_v31  ;;  %vm3867_vm13 = vweird.f32 %v3859_v31 }
0x15d1   :  { %v6501_v5 = vpop.eup %6500 }
0x15d2   :  { %v3862_v10 = vmul.f32 %v6501_v5, %v3859_v31  ;;  %vm3868_vm12 = vweird.f32 %v6501_v5 }
0x15d3   :  { %vm3869_vm14 = vmor %vm3867_vm13, %vm3868_vm12 }
0x15d4   :  { %v3863_v0 = vmul.f32 %v6501_v5, %v3862_v10  ;;  %v6131_v10 = vld [vmem:[%s8675_s14 + $0x30] sm:$0xff] }
0x15d6   :  { %v3864_v61 = vmul.f32 0.5, %v3863_v0  ;;  %v6130_v0 = vld [vmem:[%s8675_s14 + $0x28] sm:$0xff] }
0x15d8   :  { %v3865_v46 = vsub.f32 1.5, %v3864_v61  ;;  %v6129_v61 = vld [vmem:[%s8675_s14 + $0x20] sm:$0xff] }
0x15da   :  { %v3866_v57 = vmul.f32 %v6501_v5, %v3865_v46 }
0x15dc   :  { %v3870_v55 = vsel %vm3869_vm14, %v6501_v5, %v3866_v57  ;;  %v6132_v5 = vld [vmem:[%s8675_s14 + $0x38] sm:$0xff]  ;;  %s8781_s14 = sld [smem:[#allocation16_spill]] }
0x15dd   :  { %v3881_v23 = vmul.f32 %v3870_v55, %v3847_v58  ;;  %4049 = vmatpush.msrb.mxu0 %v6132_v5 }
0x15df   :  { %v3884_v56 = vmul.f32 %v3883_v38, %v3881_v23  ;;  %4050 = vmatpush.msrb.mxu0 %v6131_v10 }
0x15e1   :  { %v3887_v1 = vadd.f32 %v3886_v19, %v3884_v56  ;;  %4051 = vmatpush.msrb.mxu0 %v6130_v0  ;;  %v2150_v56 = vld [vmem:[%s8678_s24 + $0x8] sm:$0x3] }
0x15e2   :  { %v3856_v62 = vpop.xlane.xlu2 %3855 }
0x15e3   :  { %v3858_v14 = vmul.f32 %v3856_v62, %v6978_v33  ;;  %6123 = vmatmul.msk.f32.vlgmr.msrb.gmra.mxu3 %vm180_vm2, %v3887_v1  ;;  %4052 = vmatpush.msrb.mxu0 %v6129_v61  ;;  %v4015_v62 = vperm.slane %v2150_v56, 1 }
0x15e5   :  { %v3860_v27 = vadd.f32 1e-05, %v3858_v14 }
0x15e7   :  { %6502 = vrsqrt.f32 %v3860_v27  ;;  %vm3877_vm1 = vweird.f32 %v3860_v27 }
0x15ed   :  { %v6503_v40 = vpop.eup %6502 }
0x15ee   :  { %v3872_v3 = vmul.f32 %v6503_v40, %v3860_v27  ;;  %vm3878_vm0 = vweird.f32 %v6503_v40 }
0x15ef   :  { %vm3879_vm4 = vmor %vm3877_vm1, %vm3878_vm0 }
0x15f0   :  { %v3873_v54 = vmul.f32 %v6503_v40, %v3872_v3 }
0x15f2   :  { %v3874_v50 = vmul.f32 0.5, %v3873_v54 }
0x15f4   :  { %v3875_v42 = vsub.f32 1.5, %v3874_v50 }
0x15f6   :  { %v3876_v63 = vmul.f32 %v6503_v40, %v3875_v42 }
0x15f8   :  { %v3880_v52 = vsel %vm3879_vm4, %v6503_v40, %v3876_v63 }
0x15f9   :  { %v3882_v53 = vmul.f32 %v3880_v52, %v3848_v34 }
0x15fb   :  { %v3885_v35 = vmul.f32 %v3883_v38, %v3882_v53 }
0x15fd   :  { %v3888_v8 = vadd.f32 %v3886_v19, %v3885_v35 }
0x15ff   :  { %6124 = vmatmul.msk.f32.gmra.mxu3 %vm180_vm2, %v3888_v8 }
0x1666   :  { %v3928_v24 = vpop.f32.mrf.mxu3 }
0x1667   :  { %v3929_v37 = vadd.f32 %v6344_v25, %v3928_v24 }
0x1669   :  { %v3934_v17 = vmax.f32 %v3929_v37, 0.0 }
0x166b   :  { %6125 = vmatmul.msk.f32.vlgmr.msrb.gmra.mxu2 %vm1077_vm15, %v3934_v17 }
0x1682   :  { %v3931_v6 = vpop.f32.mrf.mxu3 }
0x1683   :  { %v3932_v45 = vadd.f32 %v6344_v25, %v3931_v6 }
0x1685   :  { %v3935_v49 = vmax.f32 %v3932_v45, 0.0 }
0x1687   :  { %6126 = vmatmul.msk.f32.gmra.mxu2 %vm1077_vm15, %v3935_v49 }
0x16ee   :  { %v3960_v18 = vpop.f32.mrf.mxu2 }
0x16ef   :  { %v3961_v21 = vadd.f32 %v3960_v18, %v3936_v29 }
0x16f1   :  { %v3966_v2 = vadd.f32 %v3961_v21, %v3887_v1  ;;  %v4012_v1 = vperm.slane %v2150_v56, 0 }
0x16f3   :  { %v3968_v58 = vsel %vm180_vm2, %v3966_v2, 0.0 }
0x16f4   :  { %3969 = vadd.xlane.f32.xlu0 %v3968_v58 }
0x170a   :  { %v3963_v47 = vpop.f32.mrf.mxu2 }
0x170b   :  { %v3964_v15 = vadd.f32 %v3963_v47, %v3936_v29 }
0x170d   :  { %v3967_v32 = vadd.f32 %v3964_v15, %v3888_v8 }
0x170f   :  { %v3971_v30 = vsel %vm180_vm2, %v3967_v32, 0.0 }
0x1710   :  { %3972 = vadd.xlane.f32.xlu1 %v3971_v30 }
0x1767   :  { %v3970_v34 = vpop.xlane.xlu0 %3969 }
0x1768   :  { %v3974_v59 = vmul.f32 %v3970_v34, %v6978_v33 }
0x176a   :  { %v3976_v41 = vsub.f32 %v3966_v2, %v3974_v59 }
0x176c   :  { %v3978_v11 = vmul.f32 %v3976_v41, %v3976_v41 }
0x176e   :  { %v3980_v7 = vsel %vm180_vm2, %v3978_v11, 0.0 }
0x176f   :  { %3981 = vadd.xlane.f32.xlu2 %v3980_v7 }
0x1783   :  { %v3973_v36 = vpop.xlane.xlu1 %3972 }
0x1784   :  { %v3975_v20 = vmul.f32 %v3973_v36, %v6978_v33 }
0x1786   :  { %v3977_v9 = vsub.f32 %v3967_v32, %v3975_v20 }
0x1788   :  { %v3979_v16 = vmul.f32 %v3977_v9, %v3977_v9 }
0x178a   :  { %v3983_v31 = vsel %vm180_vm2, %v3979_v16, 0.0 }
0x178b   :  { %3984 = vadd.xlane.f32.xlu0 %v3983_v31 }
0x17e2   :  { %v3982_v46 = vpop.xlane.xlu2 %3981 }
0x17e3   :  { %v3986_v57 = vmul.f32 %v3982_v46, %v6978_v33 }
0x17e5   :  { %v3988_v39 = vadd.f32 1e-05, %v3986_v57 }
0x17e7   :  { %6504 = vrsqrt.f32 %v3988_v39  ;;  %vm3996_vm6 = vweird.f32 %v3988_v39 }
0x17ed   :  { %v6505_v38 = vpop.eup %6504 }
0x17ee   :  { %v3991_v55 = vmul.f32 %v6505_v38, %v3988_v39  ;;  %vm3997_vm5 = vweird.f32 %v6505_v38 }
0x17ef   :  { %vm3998_vm8 = vmor %vm3996_vm6, %vm3997_vm5 }
0x17f0   :  { %v3992_v19 = vmul.f32 %v6505_v38, %v3991_v55 }
0x17f2   :  { %v3993_v23 = vmul.f32 0.5, %v3992_v19 }
0x17f4   :  { %v3994_v22 = vsub.f32 1.5, %v3993_v23 }
0x17f6   :  { %v3995_v28 = vmul.f32 %v6505_v38, %v3994_v22 }
0x17f8   :  { %v3999_v13 = vsel %vm3998_vm8, %v6505_v38, %v3995_v28 }
0x17f9   :  { %v4010_v14 = vmul.f32 %v3999_v13, %v3976_v41 }
0x17fb   :  { %v4013_v26 = vmul.f32 %v4012_v1, %v4010_v14 }
0x17fd   :  { %v7998_v27 = vadd.f32 %v4015_v62, %v4013_v26 }
0x17fe   :  { %v3985_v51 = vpop.xlane.xlu0 %3984 }
0x17ff   :  { %v3987_v40 = vmul.f32 %v3985_v51, %v6978_v33  ;;  %6134 = vmatmul.msk.f32.vlgmr.msrb.gmra.mxu0 %vm180_vm2, %v7998_v27 }
0x1801   :  { %v3989_v3 = vadd.f32 1e-05, %v3987_v40 }
0x1803   :  { %6506 = vrsqrt.f32 %v3989_v3  ;;  %vm4006_vm10 = vweird.f32 %v3989_v3 }
0x1809   :  { %v6507_v54 = vpop.eup %6506 }
0x180a   :  { %v4001_v50 = vmul.f32 %v6507_v54, %v3989_v3  ;;  %vm4007_vm9 = vweird.f32 %v6507_v54 }
0x180b   :  { %vm4008_vm11 = vmor %vm4006_vm10, %vm4007_vm9 }
0x180c   :  { %v4002_v42 = vmul.f32 %v6507_v54, %v4001_v50 }
0x180e   :  { %v4003_v63 = vmul.f32 0.5, %v4002_v42 }
0x1810   :  { %v4004_v52 = vsub.f32 1.5, %v4003_v63 }
0x1812   :  { %v4005_v53 = vmul.f32 %v6507_v54, %v4004_v52 }
0x1814   :  { %v4009_v35 = vsel %vm4008_vm11, %v6507_v54, %v4005_v53 }
0x1815   :  { %v4011_v8 = vmul.f32 %v4009_v35, %v3977_v9 }
0x1817   :  { %v4014_v48 = vmul.f32 %v4012_v1, %v4011_v8 }
0x1819   :  { %v8003_v12 = vadd.f32 %v4015_v62, %v4014_v48 }
0x181b   :  { %6135 = vmatmul.msk.f32.gmra.mxu0 %vm180_vm2, %v8003_v12 }
0x187c   :  { %v4054_v25 = vpop.f32.mrf.mxu0 }
0x187d   :  { %v8010_v24 = vadd.f32 %v6345_v60, %v4054_v25 }
0x187f   :  { %4075 = vrot.lane.b32.xlu0 %v8010_v24, %s8746_s8  ;;  %4067 = vrot.lane.b32.xlu1 %v8010_v24, %s8747_s11 }
0x1887   :  { %4071 = vrot.lane.b32.xlu1 %v8010_v24, %s8748_s6 }
0x1898   :  { %v4057_v37 = vpop.f32.mrf.mxu0 }
0x1899   :  { %v8018_v17 = vadd.f32 %v6345_v60, %v4057_v37 }
0x189b   :  { %4077 = vrot.lane.b32.xlu0 %v8018_v17, %s8746_s8  ;;  %4069 = vrot.lane.b32.xlu2 %v8018_v17, %s8747_s11 }
0x18a3   :  { %4073 = vrot.lane.b32.xlu2 %v8018_v17, %s8748_s6 }
0x18f1   :  { %v8026_v6 = vpop.permute.xlu1 %4067  ;;  %v8028_v45 = vpop.permute.xlu0 %4075 }
0x18f2   :  { %4131 = vrot.lane.b32.xlu0 %v8026_v6, %s8749_s0  ;;  %4235 = vrot.lane.b32.xlu2 %v8028_v45, %s8749_s0 }
0x18f5   :  { %v8034_v49 = vpop.permute.xlu2 %4069 }
0x18f6   :  { %4157 = vrot.lane.b32.xlu1 %v8034_v49, %s8749_s0  ;;  %v6311_v54 = vpack.i.bf16 %v8028_v45, %v8034_v49 }
0x18f9   :  { %v8042_v29 = vpop.permute.xlu1 %4071 }
0x18fa   :  { %4079 = vrot.lane.b32.xlu0 %v8010_v24, %s8749_s0  ;;  %4105 = vrot.lane.b32.xlu2 %v8018_v17, %s8749_s0 }
0x18fd   :  { %v8050_v21 = vpop.permute.xlu2 %4073 }
0x1902   :  { %4183 = vrot.lane.b32.xlu0 %v8042_v29, %s8749_s0 }
0x190d   :  { %v8046_v18 = vpop.permute.xlu0 %4077 }
0x190e   :  { %4261 = vrot.lane.b32.xlu1 %v8046_v18, %s8749_s0 }
0x1916   :  { %4209 = vrot.lane.b32.xlu1 %v8050_v21, %s8749_s0 }
0x194c   :  { %v4236_v2 = vpop.permute.xlu2 %4235 }
0x1954   :  { %v4106_v32 = vpop.permute.xlu2 %4105 }
0x1964   :  { %v4132_v58 = vpop.permute.xlu0 %4131 }
0x1965   :  { %6144 = vmatpush.xpose.msk.msra.mxu3 %vm230_vm3, %v4132_v58 }
0x1968   :  { %v4158_v47 = vpop.permute.xlu1 %4157  ;;  %6145 = vmatmul.msk.f32.vlgmr.msra.gmra.mxu3 %vm230_vm3, %v8026_v6 }
0x1969   :  { %6152 = vmatpush.xpose.msk.msrb.mxu3 %vm230_vm3, %v4236_v2  ;;  %6146 = vmatpush.xpose.msk.msra.mxu2 %vm230_vm3, %v4158_v47 }
0x196c   :  { %6147 = vmatmul.msk.f32.vlgmr.msra.gmra.mxu2 %vm230_vm3, %v8034_v49  ;;  %v4080_v15 = vpop.permute.xlu0 %4079 }
0x196d   :  { %6140 = vmatpush.xpose.msk.msra.mxu1 %vm230_vm3, %v4080_v15 }
0x1970   :  { %6141 = vmatmul.msk.f32.vlgmr.msra.gmra.mxu1 %vm230_vm3, %v8010_v24  ;;  %6153 = vmatmul.msk.f32.vlgmr.msrb.gmra.mxu3 %vm230_vm3, %v8028_v45 }
0x1971   :  { %6142 = vmatpush.xpose.msk.msrb.mxu1 %vm230_vm3, %v4106_v32 }
0x1974   :  { %v4184_v30 = vpop.permute.xlu0 %4183 }
0x1975   :  { %6148 = vmatpush.xpose.msk.msra.mxu0 %vm230_vm3, %v4184_v30 }
0x1978   :  { %6143 = vmatmul.msk.f32.vlgmr.msrb.gmra.mxu1 %vm230_vm3, %v8018_v17  ;;  %6149 = vmatmul.msk.f32.vlgmr.msra.gmra.mxu0 %vm230_vm3, %v8042_v29 }
0x1980   :  { %v4262_v34 = vpop.permute.xlu1 %4261 }
0x1981   :  { %6154 = vmatpush.xpose.msk.msrb.mxu2 %vm230_vm3, %v4262_v34 }
0x1984   :  { %6155 = vmatmul.msk.f32.vlgmr.msrb.gmra.mxu2 %vm230_vm3, %v8046_v18 }
0x1988   :  { %v4210_v59 = vpop.permute.xlu1 %4209 }
0x1989   :  { %6150 = vmatpush.xpose.msk.msra.mxu1 %vm230_vm3, %v4210_v59 }
0x198c   :  { %6151 = vmatmul.msk.f32.vlgmr.msra.gmra.mxu1 %vm230_vm3, %v8050_v21 }
0x19eb   :  { %v4154_v41 = vpop.f32.mrf.mxu3 }
0x19ec   :  { %v4289_v11 = vmul.f32 0.125, %v4154_v41 }
0x19ed   :  { %v4102_v7 = vpop.f32.mrf.mxu1 }
0x19ee   :  { %v4297_v36 = vsel %vm7512_vm7, -inf, %v4289_v11  ;;  %v4287_v20 = vmul.f32 0.125, %v4102_v7 }
0x19ef   :  { %v4180_v9 = vpop.f32.mrf.mxu2  ;;  %v4309_v16 = vsel %vm230_vm3, %v4297_v36, -inf }
0x19f0   :  { %v4295_v31 = vsel %vm7512_vm7, -inf, %v4287_v20  ;;  %v4290_v5 = vmul.f32 0.125, %v4180_v9  ;;  %4310 = vmax.xlane.f32.xlu2 %v4309_v16 }
0x19f1   :  { %v4303_v10 = vsel %vm230_vm3, %v4295_v31, -inf }
0x19f2   :  { %v8086_v0 = vsel %vm7512_vm7, -inf, %v4290_v5  ;;  %4304 = vmax.xlane.f32.xlu0 %v4303_v10 }
0x19f3   :  { %v4258_v61 = vpop.f32.mrf.mxu3  ;;  %v4312_v46 = vsel %vm230_vm3, %v8086_v0, -inf }
0x19f4   :  { %v4293_v57 = vmul.f32 0.125, %v4258_v61  ;;  %4313 = vmax.xlane.f32.xlu1 %v4312_v46 }
0x19f5   :  { %v4128_v39 = vpop.f32.mrf.mxu1  ;;  %v4206_v38 = vpop.f32.mrf.mxu0 }
0x19f6   :  { %v4301_v55 = vsel %vm7512_vm7, -inf, %v4293_v57  ;;  %v4291_v19 = vmul.f32 0.125, %v4206_v38  ;;  %v4288_v56 = vmul.f32 0.125, %v4128_v39 }
0x19f7   :  { %v4321_v23 = vsel %vm230_vm3, %v4301_v55, -inf }
0x19f8   :  { %v4299_v22 = vsel %vm7512_vm7, -inf, %v4291_v19  ;;  %4322 = vmax.xlane.f32.xlu2 %v4321_v23  ;;  %v4296_v1 = vsel %vm7512_vm7, -inf, %v4288_v56 }
0x19f9   :  { %v4315_v28 = vsel %vm230_vm3, %v4299_v22, -inf  ;;  %v4306_v13 = vsel %vm230_vm3, %v4296_v1, -inf }
0x19fa   :  { %4316 = vmax.xlane.f32.xlu0 %v4315_v28 }
0x1a00   :  { %4307 = vmax.xlane.f32.xlu2 %v4306_v13  ;;  %v6316_v13 = vpack.i.bf16 %v8042_v29, %v8018_v17 }
0x1a07   :  { %v4284_v62 = vpop.f32.mrf.mxu2 }
0x1a08   :  { %v4294_v14 = vmul.f32 0.125, %v4284_v62 }
0x1a09   :  { %v4232_v26 = vpop.f32.mrf.mxu1 }
0x1a0a   :  { %v4302_v51 = vsel %vm7512_vm7, -inf, %v4294_v14  ;;  %v4292_v40 = vmul.f32 0.125, %v4232_v26 }
0x1a0b   :  { %v4324_v3 = vsel %vm230_vm3, %v4302_v51, -inf }
0x1a0c   :  { %v4300_v50 = vsel %vm7512_vm7, -inf, %v4292_v40  ;;  %4325 = vmax.xlane.f32.xlu1 %v4324_v3 }
0x1a0d   :  { %v4318_v42 = vsel %vm230_vm3, %v4300_v50, -inf }
0x1a0e   :  { %4319 = vmax.xlane.f32.xlu2 %v4318_v42  ;;  %6312 = vrot.lane.b32.xlu0 %v6311_v54, %s8750_s1 }
0x1a63   :  { %v4311_v63 = vpop.xlane.xlu2 %4310 }
0x1a64   :  { %v4329_v52 = vsub.f32 %v4297_v36, %v4311_v63 }
0x1a65   :  { %v4305_v53 = vpop.xlane.xlu0 %4304 }
0x1a66   :  { %v4339_v35 = vmul.f32 1.442695, %v4329_v52  ;;  %v4327_v8 = vsub.f32 %v4295_v31, %v4305_v53 }
0x1a67   :  { %v4314_v41 = vpop.xlane.xlu1 %4313 }
0x1a68   :  { %6508 = vpow2.f32 %v4339_v35  ;;  %v4335_v48 = vmul.f32 1.442695, %v4327_v8  ;;  %v4330_v39 = vsub.f32 %v8086_v0, %v4314_v41 }
0x1a6a   :  { %6510 = vpow2.f32 %v4335_v48 }
0x1a6b   :  { %v4323_v60 = vpop.xlane.xlu2 %4322 }
0x1a6c   :  { %v4333_v25 = vsub.f32 %v4301_v55, %v4323_v60  ;;  %v4341_v55 = vmul.f32 1.442695, %v4330_v39 }
0x1a6d   :  { %v4317_v37 = vpop.xlane.xlu0 %4316 }
0x1a6e   :  { %v8108_v45 = vpop.eup %6508  ;;  %v4347_v43 = vmul.f32 1.442695, %v4333_v25  ;;  %v4331_v49 = vsub.f32 %v4299_v22, %v4317_v37 }
0x1a6f   :  { %v4357_v2 = vsel %vm230_vm3, %v8108_v45, 0.0 }
0x1a70   :  { %v8112_v58 = vpop.eup %6510  ;;  %6512 = vpow2.f32 %v4347_v43  ;;  %v4343_v47 = vmul.f32 1.442695, %v4331_v49  ;;  %4358 = vadd.xlane.f32.xlu0 %v4357_v2 }
0x1a71   :  { %v4351_v15 = vsel %vm230_vm3, %v8112_v58, 0.0 }
0x1a72   :  { %6514 = vpow2.f32 %v4343_v47  ;;  %4352 = vadd.xlane.f32.xlu1 %v4351_v15 }
0x1a73   :  { %v4308_v32 = vpop.xlane.xlu2 %4307 }
0x1a74   :  { %v4328_v30 = vsub.f32 %v4296_v1, %v4308_v32  ;;  %v6306_v1 = vpack.i.bf16 %v8010_v24, %v8026_v6 }
0x1a76   :  { %v8116_v34 = vpop.eup %6512  ;;  %v4337_v59 = vmul.f32 1.442695, %v4328_v30 }
0x1a77   :  { %v4369_v11 = vsel %vm230_vm3, %v8116_v34, 0.0 }
0x1a78   :  { %v8120_v7 = vpop.eup %6514  ;;  %6516 = vpow2.f32 %v4337_v59  ;;  %4370 = vadd.xlane.f32.xlu0 %v4369_v11 }
0x1a79   :  { %v4363_v36 = vsel %vm230_vm3, %v8120_v7, 0.0 }
0x1a7a   :  { %4364 = vadd.xlane.f32.xlu2 %v4363_v36 }
0x1a7e   :  { %v8124_v20 = vpop.eup %6516 }
0x1a7f   :  { %v4326_v9 = vpop.xlane.xlu1 %4325  ;;  %v4354_v16 = vsel %vm230_vm3, %v8124_v20, 0.0 }
0x1a80   :  { %v4334_v31 = vsub.f32 %v4302_v51, %v4326_v9  ;;  %4355 = vadd.xlane.f32.xlu1 %v4354_v16  ;;  %v8128_v5 = vpop.permute.xlu0 %6312 }
0x1a81   :  { %v6314_v10 = vunpack.i.l.bf16 %v8128_v5  ;;  %v4320_v61 = vpop.xlane.xlu2 %4319 }
0x1a82   :  { %v4349_v46 = vmul.f32 1.442695, %v4334_v31  ;;  %v4332_v57 = vsub.f32 %v4300_v50, %v4320_v61 }
0x1a83   :  { %4594 = vmatpush.msra.mxu2 %v6314_v10 }
0x1a84   :  { %6518 = vpow2.f32 %v4349_v46  ;;  %v4345_v38 = vmul.f32 1.442695, %v4332_v57 }
0x1a86   :  { %6520 = vpow2.f32 %v4345_v38 }
0x1a87   :  { %6522 = vpow2.f32 %v4341_v55 }
0x1a8a   :  { %v8132_v19 = vpop.eup %6518 }
0x1a8b   :  { %v4372_v23 = vsel %vm230_vm3, %v8132_v19, 0.0 }
0x1a8c   :  { %v8136_v56 = vpop.eup %6520  ;;  %4373 = vadd.xlane.f32.xlu0 %v4372_v23 }
0x1a8d   :  { %v4366_v22 = vsel %vm230_vm3, %v8136_v56, 0.0  ;;  %v8140_v28 = vpop.eup %6522 }
0x1a8e   :  { %4367 = vadd.xlane.f32.xlu2 %v4366_v22  ;;  %v4360_v0 = vsel %vm230_vm3, %v8140_v28, 0.0 }
0x1a96   :  { %4361 = vadd.xlane.f32.xlu2 %v4360_v0 }
0x1a99   :  { %6307 = vrot.lane.b32.xlu1 %v6306_v1, %s8750_s1 }
0x1aa0   :  { %4625 = vrot.lane.b32.xlu0 %v8050_v21, %s8750_s1 }
0x1aa1   :  { %4677 = vrot.lane.b32.xlu1 %v8046_v18, %s8750_s1 }
0x1aae   :  { %6317 = vrot.lane.b32.xlu2 %v6316_v13, %s8750_s1 }
0x1ae3   :  { %v4359_v62 = vpop.xlane.xlu0 %4358 }
0x1ae4   :  { %6524 = vrcp.f32 %v4359_v62  ;;  %vm4410_vm7 = vweird.f32 %v4359_v62  ;;  %v4414_v8 = vand.u32 2147483647, %v4359_v62  ;;  %v4416_v47 = vand.u32 2147483648, %v4359_v62 }
0x1ae5   :  { %v4353_v14 = vpop.xlane.xlu1 %4352 }
0x1ae6   :  { %6526 = vrcp.f32 %v4353_v14  ;;  %v4384_v15 = vand.u32 2147483647, %v4353_v14  ;;  %v4386_v32 = vand.u32 2147483648, %v4353_v14  ;;  %vm4380_vm0 = vweird.f32 %v4353_v14 }
0x1ae7   :  { %vm8185_vm1 = vcmp.eq.f32.partialorder %v4414_v8, 8.507059e+37  ;;  %v4417_v10 = vor.u32 1.1754944e-38, %v4416_v47  ;;  %v6315_v8 = vunpack.i.h.bf16 %v8128_v5 }
0x1ae8   :  { %vm4385_vm5 = vcmp.eq.f32.partialorder %v4384_v15, 8.507059e+37  ;;  %v4387_v61 = vor.u32 1.1754944e-38, %v4386_v32 }
0x1aea   :  { %v6525_v6 = vpop.eup %6524 }
0x1aeb   :  { %v8154_v26 = vpop.xlane.xlu0 %4370  ;;  %v4406_v17 = vmul.f32 %v6525_v6, %v4359_v62  ;;  %vm4411_vm12 = vweird.f32 %v6525_v6 }
0x1aec   :  { %v6527_v51 = vpop.eup %6526  ;;  %6528 = vrcp.f32 %v8154_v26  ;;  %vm8181_vm14 = vmor %vm4410_vm7, %vm4411_vm12  ;;  %vm4470_vm6 = vweird.f32 %v8154_v26  ;;  %v4474_v46 = vand.u32 2147483647, %v8154_v26  ;;  %v4476_v57 = vand.u32 2147483648, %v8154_v26 }
0x1aed   :  { %v8156_v24 = vpop.xlane.xlu2 %4364  ;;  %v4376_v29 = vmul.f32 %v6527_v51, %v4353_v14  ;;  %v4407_v3 = vsub.f32 1.0, %v4406_v17  ;;  %vm4381_vm13 = vweird.f32 %v6527_v51 }
0x1aee   :  { %6530 = vrcp.f32 %v8156_v24  ;;  %vm8190_vm4 = vmor %vm4380_vm0, %vm4381_vm13  ;;  %vm4440_vm9 = vweird.f32 %v8156_v24  ;;  %vm4475_vm0 = vcmp.eq.f32.partialorder %v4474_v46, 8.507059e+37 }
0x1aef   :  { %v4377_v54 = vsub.f32 1.0, %v4376_v29  ;;  %v4408_v63 = vmul.f32 %v6525_v6, %v4407_v3 }
0x1af1   :  { %v4378_v52 = vmul.f32 %v6527_v51, %v4377_v54  ;;  %v4409_v60 = vadd.f32 %v6525_v6, %v4408_v63 }
0x1af2   :  { %v8163_v21 = vpop.eup %6528 }
0x1af3   :  { %v8160_v18 = vpop.xlane.xlu1 %4355  ;;  %v4466_v42 = vmul.f32 %v8163_v21, %v8154_v26  ;;  %v4379_v25 = vadd.f32 %v6527_v51, %v4378_v52  ;;  %v4413_v36 = vsel %vm8181_vm14, %v6525_v6, %v4409_v60  ;;  %vm4471_vm8 = vweird.f32 %v8163_v21 }
0x1af4   :  { %6532 = vrcp.f32 %v8160_v18  ;;  %v8165_v40 = vpop.eup %6530  ;;  %v4418_v38 = vsel %vm8185_vm1, %v4417_v10, %v4413_v36  ;;  %vm8226_vm7 = vmor %vm4470_vm6, %vm4471_vm8  ;;  %v4444_v6 = vand.u32 2147483647, %v8156_v24  ;;  %v4401_v17 = vand.u32 2147483648, %v8160_v18 }
0x1af5   :  { %v4436_v53 = vmul.f32 %v8165_v40, %v8156_v24  ;;  %v4467_v48 = vsub.f32 1.0, %v4466_v42  ;;  %v4383_v9 = vsel %vm8190_vm4, %v6527_v51, %v4379_v25  ;;  %vm4441_vm10 = vweird.f32 %v8165_v40 }
0x1af6   :  { %v4388_v55 = vsel %vm4385_vm5, %v4387_v61, %v4383_v9  ;;  %v4446_v51 = vand.u32 2147483648, %v8156_v24  ;;  %v4419_v29 = vmul.f32 %v8108_v45, %v4418_v38  ;;  %vm8237_vm12 = vmor %vm4440_vm9, %vm4441_vm10  ;;  %vm4395_vm13 = vweird.f32 %v8160_v18 }
0x1af7   :  { %v4437_v37 = vsub.f32 1.0, %v4436_v53  ;;  %v4468_v11 = vmul.f32 %v8163_v21, %v4467_v48  ;;  %v4399_v26 = vand.u32 2147483647, %v8160_v18  ;;  %v4389_v63 = vmul.f32 %v8112_v58, %v4388_v55 }
0x1af8   :  { %v4477_v48 = vor.u32 1.1754944e-38, %v4476_v57  ;;  %v4447_v60 = vor.u32 1.1754944e-38, %v4446_v51  ;;  %v4402_v25 = vor.u32 1.1754944e-38, %v4401_v17  ;;  %vm4445_vm1 = vcmp.eq.f32.partialorder %v4444_v6, 8.507059e+37 }
0x1af9   :  { %v4438_v16 = vmul.f32 %v8165_v40, %v4437_v37  ;;  %v4469_v23 = vadd.f32 %v8163_v21, %v4468_v11  ;;  %vm4400_vm4 = vcmp.eq.f32.partialorder %v4399_v26, 8.507059e+37 }
0x1afa   :  { %v8167_v50 = vpop.eup %6532 }
0x1afb   :  { %v4391_v35 = vmul.f32 %v8167_v50, %v8160_v18  ;;  %v4439_v22 = vadd.f32 %v8165_v40, %v4438_v16  ;;  %vm4396_vm11 = vweird.f32 %v8167_v50  ;;  %v4473_v52 = vsel %vm8226_vm7, %v8163_v21, %v4469_v23 }
0x1afc   :  { %vm8249_vm14 = vmor %vm4395_vm13, %vm4396_vm11 }
0x1afd   :  { %v4392_v43 = vsub.f32 1.0, %v4391_v35  ;;  %v4443_v18 = vsel %vm8237_vm12, %v8165_v40, %v4439_v22 }
0x1afe   :  { %v4448_v37 = vsel %vm4445_vm1, %v4447_v60, %v4443_v18 }
0x1aff   :  { %v8175_v49 = vpop.xlane.xlu0 %4373  ;;  %v4393_v31 = vmul.f32 %v8167_v50, %v4392_v43  ;;  %v4449_v10 = vmul.f32 %v8120_v7, %v4448_v37 }
0x1b01   :  { %v8177_v2 = vpop.xlane.xlu2 %4367  ;;  %v4394_v0 = vadd.f32 %v8167_v50, %v4393_v31 }
0x1b02   :  { %6534 = vrcp.f32 %v8177_v2  ;;  %v4461_v30 = vand.u32 2147483648, %v8177_v2  ;;  %vm4455_vm6 = vweird.f32 %v8177_v2  ;;  %v4459_v36 = vand.u32 2147483647, %v8177_v2 }
0x1b03   :  { %6536 = vrcp.f32 %v8175_v49  ;;  %v4398_v58 = vsel %vm8249_vm14, %v8167_v50, %v4394_v0  ;;  %v4478_v50 = vsel %vm4475_vm0, %v4477_v48, %v4473_v52  ;;  %vm4485_vm14 = vweird.f32 %v8175_v49 }
0x1b04   :  { %v4403_v43 = vsel %vm4400_vm4, %v4402_v25, %v4398_v58  ;;  %v4479_v31 = vmul.f32 %v8116_v34, %v4478_v50  ;;  %v4462_v7 = vor.u32 1.1754944e-38, %v4461_v30  ;;  %vm4460_vm10 = vcmp.eq.f32.partialorder %v4459_v36, 8.507059e+37  ;;  %v6346_v30 = vld [vmem:[%s8680_s19 + $0x1] ss:$0 sm:$0xff] }
0x1b05   :  { %v4404_v11 = vmul.f32 %v8124_v20, %v4403_v43 }
0x1b08   :  { %v8207_v39 = vpop.eup %6534 }
0x1b09   :  { %v4451_v1 = vmul.f32 %v8207_v39, %v8177_v2  ;;  %v8218_v13 = vpop.xlane.xlu2 %4361  ;;  %v8220_v62 = vpop.eup %6536  ;;  %vm4456_vm5 = vweird.f32 %v8207_v39 }
0x1b0a   :  { %6538 = vrcp.f32 %v8218_v13  ;;  %v4481_v35 = vmul.f32 %v8220_v62, %v8175_v49  ;;  %vm8274_vm8 = vmor %vm4455_vm6, %vm4456_vm5  ;;  %v4429_v46 = vand.u32 2147483647, %v8218_v13  ;;  %v4431_v57 = vand.u32 2147483648, %v8218_v13 }
0x1b0b   :  { %v4452_v54 = vsub.f32 1.0, %v4451_v1  ;;  %v6308_v42 = vpop.permute.xlu1 %6307  ;;  %vm4425_vm11 = vweird.f32 %v8218_v13  ;;  %vm4486_vm12 = vweird.f32 %v8220_v62  ;;  %v4491_v1 = vand.u32 2147483648, %v8175_v49 }
0x1b0c   :  { %v6310_v24 = vunpack.i.h.bf16 %v6308_v42  ;;  %v6309_v53 = vunpack.i.l.bf16 %v6308_v42  ;;  %v4482_v47 = vsub.f32 1.0, %v4481_v35  ;;  %v4432_v22 = vor.u32 1.1754944e-38, %v4431_v57  ;;  %vm4487_vm0 = vmor %vm4485_vm14, %vm4486_vm12  ;;  %v6179_v42 = vld [vmem:[%s8679_s18 + $0x28] sm:$0xff] }
0x1b0d   :  { %v4453_v21 = vmul.f32 %v8207_v39, %v4452_v54  ;;  %vm4430_vm13 = vcmp.eq.f32.partialorder %v4429_v46, 8.507059e+37  ;;  %v6180_v54 = vld [vmem:[%s8679_s18 + $0x30] sm:$0xff] }
0x1b0e   :  { %4516 = vmatpush.msrb.mxu0 %v6310_v24  ;;  %4568 = vmatpush.msra.mxu3 %v6309_v53  ;;  %v4483_v20 = vmul.f32 %v8220_v62, %v4482_v47 }
0x1b0f   :  { %6156 = vmatmul.msk.f32.vlgmr.msrb.gmra.mxu0 %vm230_vm3, %v4389_v63  ;;  %6158 = vmatmul.msk.f32.vlgmr.msra.gmra.mxu3 %vm230_vm3, %v4419_v29  ;;  %v4454_v5 = vadd.f32 %v8207_v39, %v4453_v21  ;;  %v4492_v29 = vor.u32 1.1754944e-38, %v4491_v1  ;;  %v6178_v63 = vld [vmem:[%s8679_s18 + $0x20] sm:$0xff]  ;;  %v6175_v1 = vld [vmem:[%s8681_s17 + $0x38] sm:$0xff] }
0x1b10   :  { %v6539_v40 = vpop.eup %6538  ;;  %4672 = vmatpush.msrb.mxu3 %v6315_v8  ;;  %v8339_v8 = vld [vmem:[%s8678_s24 + $0x10] sm:$0xff] }
0x1b11   :  { %v4421_v15 = vmul.f32 %v6539_v40, %v8218_v13  ;;  %v6318_v32 = vpop.permute.xlu2 %6317  ;;  %v4458_v2 = vsel %vm8274_vm8, %v8207_v39, %v4454_v5  ;;  %vm4426_vm9 = vweird.f32 %v6539_v40  ;;  %v4484_v39 = vadd.f32 %v8220_v62, %v4483_v20 }
0x1b12   :  { %v6320_v59 = vunpack.i.h.bf16 %v6318_v32  ;;  %v6319_v41 = vunpack.i.l.bf16 %v6318_v32  ;;  %v4626_v34 = vpop.permute.xlu0 %4625  ;;  %v4463_v23 = vsel %vm4460_vm10, %v4462_v7, %v4458_v2  ;;  %vm4427_vm7 = vmor %vm4425_vm11, %vm4426_vm9  ;;  %v4489_v13 = vand.u32 2147483647, %v8175_v49  ;;  %v6138_v49 = vld [vmem:[%s8677_s16 + $0x30] sm:$0xff] }
0x1b13   :  { %v4422_v9 = vsub.f32 1.0, %v4421_v15  ;;  %v4678_v16 = vpop.permute.xlu1 %4677  ;;  %v4464_v6 = vmul.f32 %v8136_v56, %v4463_v23  ;;  %v4488_v17 = vsel %vm4487_vm0, %v8220_v62, %v4484_v39  ;;  %v6136_v56 = vld [vmem:[%s8677_s16 + $0x20] sm:$0xff]  ;;  %4787 = vmatpush.msra.mxu3 %v6138_v49  ;;  %v6181_v62 = vld [vmem:[%s8679_s18 + $0x38] sm:$0xff]  ;;  %v4732_v48 = vperm.slane %v8339_v8, 0 }
0x1b14   :  { %4542 = vmatpush.msrb.mxu1 %v6319_v41  ;;  %4620 = vmatpush.msra.mxu0 %v6320_v59  ;;  %vm4490_vm1 = vcmp.eq.f32.partialorder %v4489_v13, 8.507059e+37  ;;  %v6173_v13 = vld [vmem:[%s8681_s17 + $0x28] sm:$0xff] }
0x1b15   :  { %v4423_v38 = vmul.f32 %v6539_v40, %v4422_v9  ;;  %4698 = vmatpush.msrb.mxu2 %v4678_v16  ;;  %6157 = vmatmul.msk.f32.vlgmr.msrb.gmra.mxu1 %vm230_vm3, %v4404_v11  ;;  %v4493_v3 = vsel %vm4490_vm1, %v4492_v29, %v4488_v17 }
0x1b16   :  { %4646 = vmatpush.msra.mxu1 %v4626_v34  ;;  %v4494_v26 = vmul.f32 %v8132_v19, %v4493_v3  ;;  %4724 = vmatpush.msrb.mxu0 %v6136_v56  ;;  %v6139_v19 = vld [vmem:[%s8677_s16 + $0x38] sm:$0xff] }
0x1b17   :  { %v4424_v55 = vadd.f32 %v6539_v40, %v4423_v38  ;;  %6160 = vmatmul.msk.f32.vlgmr.msra.gmra.mxu0 %vm230_vm3, %v4449_v10  ;;  %6162 = vmatmul.msk.f32.vlgmr.msrb.gmra.mxu3 %vm230_vm3, %v4479_v31 }
0x1b18   :  { %4904 = vmatpush.msra.mxu0 %v6175_v1 }
0x1b19   :  { %v4428_v0 = vsel %vm4427_vm7, %v6539_v40, %v4424_v55 }
0x1b1a   :  { %v4433_v14 = vsel %vm4430_vm13, %v4432_v22, %v4428_v0 }
0x1b1b   :  { %v4434_v51 = vmul.f32 %v8140_v28, %v4433_v14  ;;  %v6137_v28 = vld [vmem:[%s8677_s16 + $0x28] sm:$0xff]  ;;  %v6174_v14 = vld [vmem:[%s8681_s17 + $0x30] sm:$0xff] }
0x1b1c   :  { %4756 = vmatpush.msrb.mxu1 %v6137_v28  ;;  %4905 = vmatpush.msra.mxu0 %v6174_v14 }
0x1b1d   :  { %6159 = vmatmul.msk.f32.vlgmr.msra.gmra.mxu2 %vm230_vm3, %v4434_v51  ;;  %6161 = vmatmul.msk.f32.vlgmr.msra.gmra.mxu1 %vm230_vm3, %v4464_v6  ;;  %v6172_v6 = vld [vmem:[%s8681_s17 + $0x20] sm:$0xff] }
0x1b1e   :  { %4818 = vmatpush.msra.mxu2 %v6139_v19  ;;  %4937 = vmatpush.msra.mxu1 %v6181_v62 }
0x1b1f   :  { %4906 = vmatpush.msra.mxu0 %v6173_v13 }
0x1b20   :  { %4938 = vmatpush.msra.mxu1 %v6180_v54 }
0x1b21   :  { %4907 = vmatpush.msra.mxu0 %v6172_v6 }
0x1b22   :  { %4939 = vmatpush.msra.mxu1 %v6179_v42 }
0x1b24   :  { %4940 = vmatpush.msra.mxu1 %v6178_v63  ;;  %v4874_v63 = vperm.slane %v8339_v8, 1 }
0x1b25   :  { %6163 = vmatmul.msk.f32.vlgmr.msrb.gmra.mxu2 %vm230_vm3, %v4494_v26 }
0x1b8c   :  { %v4518_v52 = vpop.f32.mrf.mxu0 }
0x1b8d   :  { %6164 = vmatmul.msk.f32.vlgmr.msrb.gmra.mxu0 %vm230_vm3, %v4518_v52 }
0x1b92   :  { %v4544_v45 = vpop.f32.mrf.mxu1  ;;  %v4570_v24 = vpop.f32.mrf.mxu3 }
0x1b93   :  { %6166 = vmatmul.msk.f32.vlgmr.msrb.gmra.mxu1 %vm230_vm3, %v4570_v24 }
0x1b94   :  { %v4622_v53 = vpop.f32.mrf.mxu0 }
0x1b95   :  { %6165 = vmatmul.msk.f32.gmra.mxu0 %vm230_vm3, %v4544_v45  ;;  %6168 = vmatmul.msk.f32.vlgmr.msra.gmra.mxu3 %vm230_vm3, %v4622_v53  ;;  %v4877_v45 = vperm.slane %v8339_v8, 2 }
0x1b9a   :  { %v4674_v18 = vpop.f32.mrf.mxu3  ;;  %v4648_v58 = vpop.f32.mrf.mxu1 }
0x1b9b   :  { %6170 = vmatmul.msk.f32.vlgmr.msra.gmra.mxu2 %vm230_vm3, %v4674_v18 }
0x1b9d   :  { %6169 = vmatmul.msk.f32.gmra.mxu3 %vm230_vm3, %v4648_v58 }
0x1ba0   :  { %v4596_v35 = vpop.f32.mrf.mxu2 }
0x1ba1   :  { %6167 = vmatmul.msk.f32.gmra.mxu1 %vm230_vm3, %v4596_v35 }
0x1ba8   :  { %v4700_v21 = vpop.f32.mrf.mxu2 }
0x1ba9   :  { %6171 = vmatmul.msk.f32.gmra.mxu2 %vm230_vm3, %v4700_v21  ;;  %6183 = vmatmul.msk.f32.vlgmr.msra.gmra.mxu1 %vm180_vm2, %v7715_v44 }
0x1bb1   :  { %6184 = vmatmul.msk.f32.gmra.mxu1 %vm180_vm2, %v7720_v4 }
0x1c0a   :  { %v4726_v60 = vpop.f32.mrf.mxu0 }
0x1c0b   :  { %v4733_v40 = vadd.f32 %v4732_v48, %v4726_v60 }
0x1c10   :  { %v4758_v25 = vpop.f32.mrf.mxu1 }
0x1c11   :  { %v4764_v37 = vadd.f32 %v4758_v25, %v4733_v40 }
0x1c12   :  { %v4729_v32 = vpop.f32.mrf.mxu0 }
0x1c13   :  { %v4734_v59 = vadd.f32 %v4732_v48, %v4729_v32 }
0x1c18   :  { %v4789_v50 = vpop.f32.mrf.mxu3 }
0x1c19   :  { %v4795_v43 = vadd.f32 %v4789_v50, %v4764_v37 }
0x1c1e   :  { %v4761_v47 = vpop.f32.mrf.mxu1  ;;  %v4820_v5 = vpop.f32.mrf.mxu2 }
0x1c1f   :  { %v4826_v15 = vadd.f32 %v4820_v5, %v4795_v43  ;;  %v4765_v11 = vadd.f32 %v4761_v47, %v4734_v59  ;;  %v4885_v5 = vperm.slane %v8339_v8, 3 }
0x1c20   :  { %v4792_v9 = vpop.f32.mrf.mxu3 }
0x1c21   :  { %v4828_v44 = vadd.f32 %v4826_v15, %v7998_v27  ;;  %v4796_v16 = vadd.f32 %v4792_v9, %v4765_v11 }
0x1c23   :  { %v4830_v4 = vsel %vm180_vm2, %v4828_v44, 0.0 }
0x1c24   :  { %4831 = vadd.xlane.f32.xlu1 %v4830_v4 }
0x1c26   :  { %v4942_v41 = vpop.f32.mrf.mxu1 }
0x1c27   :  { %v8347_v36 = vadd.f32 %v6346_v30, %v4942_v41 }
0x1c29   :  { %6189 = vmatpush.xpose.msk.msrb.mxu3 %vm230_vm3, %v8347_v36 }
0x1c2c   :  { %v4823_v31 = vpop.f32.mrf.mxu2 }
0x1c2d   :  { %v4827_v27 = vadd.f32 %v4823_v31, %v4796_v16 }
0x1c2e   :  { %v4945_v10 = vpop.f32.mrf.mxu1 }
0x1c2f   :  { %v4829_v61 = vadd.f32 %v4827_v27, %v8003_v12  ;;  %v8352_v46 = vadd.f32 %v6346_v30, %v4945_v10 }
0x1c31   :  { %6191 = vmatpush.xpose.msk.msrb.mxu2 %vm230_vm3, %v8352_v46  ;;  %v4833_v57 = vsel %vm180_vm2, %v4829_v61, 0.0 }
0x1c32   :  { %4834 = vadd.xlane.f32.xlu0 %v4833_v57 }
0x1c46   :  { %4969 = vrot.lane.b32.xlu0 %v8347_v36, %s8747_s11 }
0x1c4e   :  { %4977 = vrot.lane.b32.xlu0 %v8347_v36, %s8746_s8 }
0x1c97   :  { %v4832_v20 = vpop.xlane.xlu1 %4831 }
0x1c98   :  { %v4836_v2 = vmul.f32 %v4832_v20, %v6978_v33 }
0x1c9a   :  { %v4838_v38 = vsub.f32 %v4828_v44, %v4836_v2 }
0x1c9c   :  { %v4840_v34 = vmul.f32 %v4838_v38, %v4838_v38 }
0x1c9e   :  { %v4842_v12 = vsel %vm180_vm2, %v4840_v34, 0.0 }
0x1c9f   :  { %4843 = vadd.xlane.f32.xlu2 %v4842_v12 }
0x1ca5   :  { %v4835_v7 = vpop.xlane.xlu0 %4834 }
0x1ca6   :  { %v4837_v55 = vmul.f32 %v4835_v7, %v6978_v33 }
0x1ca8   :  { %v4839_v23 = vsub.f32 %v4829_v61, %v4837_v55 }
0x1caa   :  { %v4841_v22 = vmul.f32 %v4839_v23, %v4839_v23 }
0x1cac   :  { %v4845_v39 = vsel %vm180_vm2, %v4841_v22, 0.0 }
0x1cad   :  { %4846 = vadd.xlane.f32.xlu1 %v4845_v39 }
0x1cb8   :  { %v8365_v0 = vpop.permute.xlu0 %4969 }
0x1cb9   :  { %6193 = vmatpush.xpose.msk.msra.mxu3 %vm230_vm3, %v8365_v0 }
0x1cc0   :  { %v8404_v32 = vpop.permute.xlu0 %4977 }
0x1cc6   :  { %4971 = vrot.lane.b32.xlu1 %v8352_v46, %s8747_s11 }
0x1cce   :  { %4979 = vrot.lane.b32.xlu1 %v8352_v46, %s8746_s8 }
0x1d12   :  { %v4844_v51 = vpop.xlane.xlu2 %4843 }
0x1d13   :  { %v4848_v17 = vmul.f32 %v4844_v51, %v6978_v33 }
0x1d15   :  { %v4850_v29 = vadd.f32 1e-05, %v4848_v17 }
0x1d17   :  { %6540 = vrsqrt.f32 %v4850_v29  ;;  %vm4858_vm5 = vweird.f32 %v4850_v29 }
0x1d1d   :  { %v6541_v3 = vpop.eup %6540 }
0x1d1e   :  { %v4853_v26 = vmul.f32 %v6541_v3, %v4850_v29  ;;  %vm4859_vm4 = vweird.f32 %v6541_v3 }
0x1d1f   :  { %vm4860_vm6 = vmor %vm4858_vm5, %vm4859_vm4 }
0x1d20   :  { %v4854_v56 = vmul.f32 %v6541_v3, %v4853_v26  ;;  %v4847_v28 = vpop.xlane.xlu1 %4846 }
0x1d21   :  { %v4849_v49 = vmul.f32 %v4847_v28, %v6978_v33 }
0x1d22   :  { %v4855_v19 = vmul.f32 0.5, %v4854_v56 }
0x1d23   :  { %v4851_v62 = vadd.f32 1e-05, %v4849_v49 }
0x1d24   :  { %v4856_v54 = vsub.f32 1.5, %v4855_v19 }
0x1d25   :  { %6542 = vrsqrt.f32 %v4851_v62  ;;  %vm4868_vm9 = vweird.f32 %v4851_v62 }
0x1d26   :  { %v4857_v42 = vmul.f32 %v6541_v3, %v4856_v54 }
0x1d28   :  { %v4861_v52 = vsel %vm4860_vm6, %v6541_v3, %v4857_v42 }
0x1d29   :  { %v4872_v24 = vmul.f32 %v4861_v52, %v4838_v38 }
0x1d2b   :  { %v6543_v53 = vpop.eup %6542  ;;  %v4875_v18 = vmul.f32 %v4874_v63, %v4872_v24  ;;  %v6321_v24 = vpack.i.bf16 %v8347_v36, %v8365_v0 }
0x1d2c   :  { %v4863_v58 = vmul.f32 %v6543_v53, %v4851_v62  ;;  %vm4869_vm8 = vweird.f32 %v6543_v53 }
0x1d2d   :  { %v8389_v35 = vadd.f32 %v4877_v45, %v4875_v18  ;;  %vm4870_vm10 = vmor %vm4868_vm9, %vm4869_vm8 }
0x1d2e   :  { %v4864_v21 = vmul.f32 %v6543_v53, %v4863_v58 }
0x1d2f   :  { %6176 = vmatmul.msk.f32.vlgmr.msra.gmra.mxu0 %vm180_vm2, %v8389_v35 }
0x1d30   :  { %v4865_v48 = vmul.f32 0.5, %v4864_v21 }
0x1d32   :  { %v4866_v60 = vsub.f32 1.5, %v4865_v48 }
0x1d34   :  { %v4867_v25 = vmul.f32 %v6543_v53, %v4866_v60 }
0x1d36   :  { %v4871_v40 = vsel %vm4870_vm10, %v6543_v53, %v4867_v25 }
0x1d37   :  { %v4873_v50 = vmul.f32 %v4871_v40, %v4839_v23 }
0x1d38   :  { %v8393_v37 = vpop.permute.xlu1 %4971 }
0x1d39   :  { %6195 = vmatpush.xpose.msk.msra.mxu2 %vm230_vm3, %v8393_v37  ;;  %v4876_v43 = vmul.f32 %v4874_v63, %v4873_v50 }
0x1d3b   :  { %v8397_v47 = vadd.f32 %v4877_v45, %v4876_v43  ;;  %v6326_v45 = vpack.i.bf16 %v8404_v32, %v8393_v37 }
0x1d3d   :  { %6177 = vmatmul.msk.f32.gmra.mxu0 %vm180_vm2, %v8397_v47 }
0x1d40   :  { %v8412_v59 = vpop.permute.xlu1 %4979 }
0x1dac   :  { %v4909_v15 = vpop.f32.mrf.mxu0 }
0x1dad   :  { %v4910_v44 = vadd.f32 %v4909_v15, %v4885_v5 }
0x1daf   :  { %4955 = vrot.lane.b32.xlu2 %v4910_v44, %s8747_s11  ;;  %6190 = vmatmul.msk.f32.vlgmr.msrb.gmra.mxu3 %vm230_vm3, %v4910_v44 }
0x1db0   :  { %4963 = vrot.lane.b32.xlu0 %v4910_v44, %s8746_s8  ;;  %4959 = vrot.lane.b32.xlu1 %v4910_v44, %s8748_s6 }
0x1db1   :  { %6201 = vmatpush.xpose.msk.msrb.mxu3 %vm230_vm3, %v8404_v32 }
0x1dba   :  { %v4912_v4 = vpop.f32.mrf.mxu0 }
0x1dbb   :  { %v4913_v30 = vadd.f32 %v4912_v4, %v4885_v5 }
0x1dbd   :  { %4965 = vrot.lane.b32.xlu0 %v4913_v30, %s8746_s8  ;;  %4957 = vrot.lane.b32.xlu2 %v4913_v30, %s8747_s11 }
0x1dbe   :  { %6192 = vmatmul.msk.f32.vlgmr.msrb.gmra.mxu2 %vm230_vm3, %v4913_v30 }
0x1dbf   :  { %6203 = vmatpush.xpose.msk.msrb.mxu2 %vm230_vm3, %v8412_v59 }
0x1dc5   :  { %4961 = vrot.lane.b32.xlu0 %v4913_v30, %s8748_s6  ;;  %4973 = vrot.lane.b32.xlu2 %v8347_v36, %s8748_s6 }
0x1dcd   :  { %4975 = vrot.lane.b32.xlu2 %v8352_v46, %s8748_s6 }
0x1e09   :  { %v4956_v41 = vpop.permute.xlu2 %4955 }
0x1e0a   :  { %6194 = vmatmul.msk.f32.vlgmr.msra.gmra.mxu3 %vm230_vm3, %v4956_v41 }
0x1e17   :  { %v4958_v11 = vpop.permute.xlu2 %4957 }
0x1e18   :  { %6196 = vmatmul.msk.f32.vlgmr.msra.gmra.mxu2 %vm230_vm3, %v4958_v11 }
0x1e1f   :  { %v8424_v9 = vpop.permute.xlu2 %4973 }
0x1e20   :  { %6197 = vmatpush.xpose.msk.msrb.mxu0 %vm230_vm3, %v8424_v9 }
0x1e22   :  { %v4960_v16 = vpop.permute.xlu1 %4959  ;;  %v4964_v31 = vpop.permute.xlu0 %4963 }
0x1e23   :  { %6202 = vmatmul.msk.f32.vlgmr.msrb.gmra.mxu3 %vm230_vm3, %v4964_v31  ;;  %6198 = vmatmul.msk.f32.vlgmr.msrb.gmra.mxu0 %vm230_vm3, %v4960_v16 }
0x1e27   :  { %v8430_v27 = vpop.permute.xlu2 %4975 }
0x1e28   :  { %6199 = vmatpush.xpose.msk.msrb.mxu1 %vm230_vm3, %v8430_v27 }
0x1e2f   :  { %v4966_v10 = vpop.permute.xlu0 %4965 }
0x1e30   :  { %6204 = vmatmul.msk.f32.vlgmr.msrb.gmra.mxu2 %vm230_vm3, %v4966_v10 }
0x1e32   :  { %v5002_v61 = vpop.f32.mrf.mxu3 }
0x1e33   :  { %v5173_v57 = vmul.f32 0.125, %v5002_v61 }
0x1e35   :  { %v5181_v20 = vsel %vm230_vm3, %v5173_v57, -inf }
0x1e36   :  { %5182 = vmax.xlane.f32.xlu2 %v5181_v20 }
0x1e37   :  { %v4962_v2 = vpop.permute.xlu0 %4961 }
0x1e38   :  { %6200 = vmatmul.msk.f32.vlgmr.msrb.gmra.mxu1 %vm230_vm3, %v4962_v2 }
0x1e41   :  { %v5026_v38 = vpop.f32.mrf.mxu2 }
0x1e42   :  { %v5174_v34 = vmul.f32 0.125, %v5026_v38 }
0x1e44   :  { %v5184_v12 = vsel %vm230_vm3, %v5174_v34, -inf }
0x1e45   :  { %5185 = vmax.xlane.f32.xlu2 %v5184_v12 }
0x1e8d   :  { %v5050_v7 = vpop.f32.mrf.mxu3 }
0x1e8e   :  { %v5175_v55 = vmul.f32 0.125, %v5050_v7 }
0x1e90   :  { %v5187_v23 = vsel %vm230_vm3, %v5175_v55, -inf }
0x1e91   :  { %5188 = vmax.xlane.f32.xlu1 %v5187_v23 }
0x1e9b   :  { %v5074_v14 = vpop.f32.mrf.mxu2 }
0x1e9c   :  { %v8440_v6 = vmul.f32 0.125, %v5074_v14 }
0x1e9e   :  { %v5190_v26 = vsel %vm230_vm3, %v8440_v6, -inf }
0x1ea0   :  { %v5098_v22 = vpop.f32.mrf.mxu0 }
0x1ea1   :  { %v5177_v39 = vmul.f32 0.125, %v5098_v22 }
0x1ea3   :  { %v5193_v1 = vsel %vm230_vm3, %v5177_v39, -inf }
0x1ea4   :  { %5194 = vmax.xlane.f32.xlu0 %v5193_v1 }
0x1ea6   :  { %v5146_v13 = vpop.f32.mrf.mxu3 }
0x1ea7   :  { %v5179_v51 = vmul.f32 0.125, %v5146_v13 }
0x1ea9   :  { %v5183_v17 = vpop.xlane.xlu2 %5182  ;;  %v5199_v29 = vsel %vm230_vm3, %v5179_v51, -inf }
0x1eaa   :  { %v5205_v3 = vsub.f32 %v5173_v57, %v5183_v17  ;;  %5200 = vmax.xlane.f32.xlu1 %v5199_v29 }
0x1eac   :  { %v5213_v56 = vmul.f32 1.442695, %v5205_v3  ;;  %5191 = vmax.xlane.f32.xlu0 %v5190_v26 }
0x1eae   :  { %6544 = vpow2.f32 %v5213_v56 }
0x1eb3   :  { %v5170_v62 = vpop.f32.mrf.mxu2 }
0x1eb4   :  { %v8445_v28 = vpop.eup %6544  ;;  %v5180_v63 = vmul.f32 0.125, %v5170_v62 }
0x1eb5   :  { %v5122_v49 = vpop.f32.mrf.mxu1  ;;  %v5229_v19 = vsel %vm230_vm3, %v8445_v28, 0.0 }
0x1eb6   :  { %v5178_v54 = vmul.f32 0.125, %v5122_v49  ;;  %5230 = vadd.xlane.f32.xlu1 %v5229_v19  ;;  %v5202_v52 = vsel %vm230_vm3, %v5180_v63, -inf }
0x1eb8   :  { %v5196_v42 = vsel %vm230_vm3, %v5178_v54, -inf  ;;  %v5186_v53 = vpop.xlane.xlu2 %5185 }
0x1eb9   :  { %5197 = vmax.xlane.f32.xlu2 %v5196_v42  ;;  %v5206_v18 = vsub.f32 %v5174_v34, %v5186_v53 }
0x1ebb   :  { %v5215_v58 = vmul.f32 1.442695, %v5206_v18 }
0x1ebd   :  { %6546 = vpow2.f32 %v5215_v58 }
0x1ebe   :  { %5203 = vmax.xlane.f32.xlu1 %v5202_v52  ;;  %v6331_v52 = vpack.i.bf16 %v8424_v9, %v8352_v46 }
0x1ec0   :  { %6327 = vrot.lane.b32.xlu0 %v6326_v45, %s8749_s0 }
0x1ec3   :  { %v8457_v21 = vpop.eup %6546 }
0x1ec4   :  { %v5232_v48 = vsel %vm230_vm3, %v8457_v21, 0.0 }
0x1ed7   :  { %6322 = vrot.lane.b32.xlu1 %v6321_v24, %s8749_s0 }
0x1f01   :  { %5233 = vadd.xlane.f32.xlu1 %v5232_v48 }
0x1f04   :  { %v5189_v60 = vpop.xlane.xlu1 %5188 }
0x1f05   :  { %v5207_v25 = vsub.f32 %v5175_v55, %v5189_v60 }
0x1f07   :  { %v5217_v40 = vmul.f32 1.442695, %v5207_v25 }
0x1f09   :  { %6548 = vpow2.f32 %v5217_v40 }
0x1f0f   :  { %v8461_v50 = vpop.eup %6548 }
0x1f10   :  { %v5235_v36 = vsel %vm230_vm3, %v8461_v50, 0.0 }
0x1f11   :  { %5236 = vadd.xlane.f32.xlu0 %v5235_v36 }
0x1f17   :  { %v5195_v0 = vpop.xlane.xlu0 %5194 }
0x1f18   :  { %v5209_v37 = vsub.f32 %v5177_v39, %v5195_v0 }
0x1f1a   :  { %v5221_v43 = vmul.f32 1.442695, %v5209_v37  ;;  %5555 = vrot.lane.b32.xlu1 %v8412_v59, %s8749_s0 }
0x1f1c   :  { %6550 = vpow2.f32 %v5221_v43 }
0x1f1d   :  { %v5201_v5 = vpop.xlane.xlu1 %5200 }
0x1f1e   :  { %v5211_v15 = vsub.f32 %v5179_v51, %v5201_v5 }
0x1f1f   :  { %v5192_v16 = vpop.xlane.xlu0 %5191 }
0x1f20   :  { %v5225_v44 = vmul.f32 1.442695, %v5211_v15  ;;  %v5208_v10 = vsub.f32 %v8440_v6, %v5192_v16 }
0x1f22   :  { %v8467_v32 = vpop.eup %6550  ;;  %6552 = vpow2.f32 %v5225_v44  ;;  %v5219_v34 = vmul.f32 1.442695, %v5208_v10 }
0x1f23   :  { %v5241_v4 = vsel %vm230_vm3, %v8467_v32, 0.0 }
0x1f24   :  { %5242 = vadd.xlane.f32.xlu2 %v5241_v4 }
0x1f28   :  { %v8471_v30 = vpop.eup %6552 }
0x1f29   :  { %v5247_v41 = vsel %vm230_vm3, %v8471_v30, 0.0  ;;  %v5231_v11 = vpop.xlane.xlu1 %5230 }
0x1f2a   :  { %5248 = vadd.xlane.f32.xlu0 %v5247_v41  ;;  %6554 = vrcp.f32 %v5231_v11  ;;  %v5264_v29 = vand.u32 2147483648, %v5231_v11  ;;  %vm5258_vm7 = vweird.f32 %v5231_v11  ;;  %v5262_v3 = vand.u32 2147483647, %v5231_v11 }
0x1f2c   :  { %v5198_v59 = vpop.xlane.xlu2 %5197  ;;  %v5265_v56 = vor.u32 1.1754944e-38, %v5264_v29  ;;  %vm5263_vm13 = vcmp.eq.f32.partialorder %v5262_v3, 8.507059e+37 }
0x1f2d   :  { %v5210_v31 = vsub.f32 %v5178_v54, %v5198_v59 }
0x1f2f   :  { %v5223_v61 = vmul.f32 1.442695, %v5210_v31 }
0x1f30   :  { %v6555_v20 = vpop.eup %6554 }
0x1f31   :  { %6556 = vpow2.f32 %v5223_v61  ;;  %v5204_v57 = vpop.xlane.xlu1 %5203  ;;  %v5254_v55 = vmul.f32 %v6555_v20, %v5231_v11  ;;  %vm5259_vm11 = vweird.f32 %v6555_v20 }
0x1f32   :  { %v5212_v2 = vsub.f32 %v5180_v63, %v5204_v57  ;;  %v6328_v38 = vpop.permute.xlu0 %6327  ;;  %vm5260_vm12 = vmor %vm5258_vm7, %vm5259_vm11 }
0x1f33   :  { %v6329_v12 = vunpack.i.l.bf16 %v6328_v38  ;;  %v5255_v39 = vsub.f32 1.0, %v5254_v55  ;;  %v6330_v63 = vunpack.i.h.bf16 %v6328_v38 }
0x1f34   :  { %v5227_v7 = vmul.f32 1.442695, %v5212_v2 }
0x1f35   :  { %5472 = vmatpush.msra.mxu2 %v6329_v12  ;;  %v5256_v13 = vmul.f32 %v6555_v20, %v5255_v39 }
0x1f36   :  { %6558 = vpow2.f32 %v5227_v7 }
0x1f37   :  { %v8476_v23 = vpop.eup %6556  ;;  %6560 = vpow2.f32 %v5219_v34  ;;  %v5257_v17 = vadd.f32 %v6555_v20, %v5256_v13 }
0x1f38   :  { %v5244_v22 = vsel %vm230_vm3, %v8476_v23, 0.0 }
0x1f39   :  { %5245 = vadd.xlane.f32.xlu2 %v5244_v22  ;;  %v5261_v26 = vsel %vm5260_vm12, %v6555_v20, %v5257_v17 }
0x1f3a   :  { %v5266_v49 = vsel %vm5263_vm13, %v5265_v56, %v5261_v26 }
0x1f3b   :  { %v5267_v42 = vmul.f32 %v8445_v28, %v5266_v49 }
0x1f3c   :  { %v8480_v1 = vpop.eup %6558 }
0x1f3d   :  { %v8482_v14 = vpop.eup %6560  ;;  %v5250_v6 = vsel %vm230_vm3, %v8480_v1, 0.0 }
0x1f3e   :  { %5251 = vadd.xlane.f32.xlu0 %v5250_v6  ;;  %v5238_v51 = vsel %vm230_vm3, %v8482_v14, 0.0 }
0x1f41   :  { %5239 = vadd.xlane.f32.xlu2 %v5238_v51 }
0x1f49   :  { %v6323_v19 = vpop.permute.xlu1 %6322 }
0x1f4a   :  { %v6325_v62 = vunpack.i.h.bf16 %v6323_v19  ;;  %v6324_v54 = vunpack.i.l.bf16 %v6323_v19 }
0x1f4c   :  { %5394 = vmatpush.msra.mxu0 %v6325_v62  ;;  %5446 = vmatpush.msra.mxu3 %v6324_v54 }
0x1f4d   :  { %6205 = vmatmul.msk.f32.vlgmr.msra.gmra.mxu0 %vm230_vm3, %v5267_v42 }
0x1f4e   :  { %5550 = vmatpush.msrb.mxu3 %v6330_v63 }
0x1f52   :  { %5503 = vrot.lane.b32.xlu0 %v8430_v27, %s8749_s0 }
0x1f59   :  { %6332 = vrot.lane.b32.xlu2 %v6331_v52, %s8749_s0 }
0x1f74   :  { %v8495_v45 = vpop.xlane.xlu1 %5233 }
0x1f75   :  { %v5279_v13 = vand.u32 2147483648, %v8495_v45  ;;  %vm5273_vm7 = vweird.f32 %v8495_v45 }
0x1f77   :  { %v5280_v19 = vor.u32 1.1754944e-38, %v5279_v13 }
0x1f84   :  { %v5237_v24 = vpop.xlane.xlu0 %5236 }
0x1f85   :  { %6562 = vrcp.f32 %v5237_v24  ;;  %v5294_v48 = vand.u32 2147483648, %v5237_v24  ;;  %v5292_v25 = vand.u32 2147483647, %v5237_v24  ;;  %vm5288_vm0 = vweird.f32 %v5237_v24 }
0x1f86   :  { %6564 = vrcp.f32 %v8495_v45 }
0x1f87   :  { %v5295_v27 = vor.u32 1.1754944e-38, %v5294_v48  ;;  %vm5293_vm4 = vcmp.eq.f32.partialorder %v5292_v25, 8.507059e+37 }
0x1f8b   :  { %v6563_v53 = vpop.eup %6562 }
0x1f8c   :  { %v5284_v28 = vmul.f32 %v6563_v53, %v5237_v24  ;;  %v5556_v18 = vpop.permute.xlu1 %5555  ;;  %vm5289_vm14 = vweird.f32 %v6563_v53  ;;  %v6565_v43 = vpop.eup %6564 }
0x1f8d   :  { %5576 = vmatpush.msrb.mxu2 %v5556_v18  ;;  %vm5290_vm1 = vmor %vm5288_vm0, %vm5289_vm14  ;;  %v5269_v4 = vmul.f32 %v6565_v43, %v8495_v45  ;;  %vm5274_vm10 = vweird.f32 %v6565_v43 }
0x1f8e   :  { %v5285_v58 = vsub.f32 1.0, %v5284_v28  ;;  %vm5275_vm12 = vmor %vm5273_vm7, %vm5274_vm10 }
0x1f8f   :  { %v5270_v31 = vsub.f32 1.0, %v5269_v4 }
0x1f90   :  { %v5286_v60 = vmul.f32 %v6563_v53, %v5285_v58 }
0x1f91   :  { %v5271_v34 = vmul.f32 %v6565_v43, %v5270_v31 }
0x1f92   :  { %v5287_v40 = vadd.f32 %v6563_v53, %v5286_v60 }
0x1f93   :  { %v5272_v39 = vadd.f32 %v6565_v43, %v5271_v34 }
0x1f94   :  { %v5291_v46 = vsel %vm5290_vm1, %v6563_v53, %v5287_v40 }
0x1f95   :  { %v5296_v9 = vsel %vm5293_vm4, %v5295_v27, %v5291_v46  ;;  %v5276_v56 = vsel %vm5275_vm12, %v6565_v43, %v5272_v39 }
0x1f96   :  { %v5297_v36 = vmul.f32 %v8461_v50, %v5296_v9 }
0x1f97   :  { %v5243_v0 = vpop.xlane.xlu2 %5242 }
0x1f98   :  { %6207 = vmatmul.msk.f32.vlgmr.msra.gmra.mxu3 %vm230_vm3, %v5297_v36  ;;  %v5324_v29 = vand.u32 2147483648, %v5243_v0  ;;  %vm5318_vm13 = vweird.f32 %v5243_v0  ;;  %v5322_v3 = vand.u32 2147483647, %v5243_v0  ;;  %v6185_v36 = vld [vmem:[%s8682_s20 + $0x20] sm:$0xff] }
0x1f9a   :  { %v5325_v42 = vor.u32 1.1754944e-38, %v5324_v29  ;;  %vm5323_vm1 = vcmp.eq.f32.partialorder %v5322_v3, 8.507059e+37 }
0x1f9d   :  { %v5249_v37 = vpop.xlane.xlu0 %5248 }
0x1f9e   :  { %6566 = vrcp.f32 %v5249_v37  ;;  %v5354_v16 = vand.u32 2147483648, %v5249_v37  ;;  %v5352_v50 = vand.u32 2147483647, %v5249_v37  ;;  %vm5348_vm6 = vweird.f32 %v5249_v37 }
0x1f9f   :  { %6568 = vrcp.f32 %v5243_v0 }
0x1fa0   :  { %v5355_v57 = vor.u32 1.1754944e-38, %v5354_v16  ;;  %vm5353_vm9 = vcmp.eq.f32.partialorder %v5352_v50, 8.507059e+37 }
0x1fa4   :  { %v6567_v5 = vpop.eup %6566 }
0x1fa5   :  { %v6569_v15 = vpop.eup %6568  ;;  %v5344_v44 = vmul.f32 %v6567_v5, %v5249_v37  ;;  %vm5349_vm5 = vweird.f32 %v6567_v5 }
0x1fa6   :  { %v5314_v11 = vmul.f32 %v6569_v15, %v5243_v0  ;;  %vm5350_vm8 = vmor %vm5348_vm6, %vm5349_vm5  ;;  %vm5319_vm11 = vweird.f32 %v6569_v15 }
0x1fa7   :  { %v5345_v41 = vsub.f32 1.0, %v5344_v44  ;;  %vm5320_vm14 = vmor %vm5318_vm13, %vm5319_vm11 }
0x1fa8   :  { %v5315_v61 = vsub.f32 1.0, %v5314_v11 }
0x1fa9   :  { %v5346_v59 = vmul.f32 %v6567_v5, %v5345_v41 }
0x1faa   :  { %v5316_v7 = vmul.f32 %v6569_v15, %v5315_v61 }
0x1fab   :  { %v5347_v10 = vadd.f32 %v6567_v5, %v5346_v59 }
0x1fac   :  { %v8501_v20 = vpop.xlane.xlu2 %5245  ;;  %v5317_v6 = vadd.f32 %v6569_v15, %v5316_v7 }
0x1fad   :  { %v5351_v2 = vsel %vm5350_vm8, %v6567_v5, %v5347_v10  ;;  %6570 = vrcp.f32 %v8501_v20  ;;  %v5339_v60 = vand.u32 2147483648, %v8501_v20  ;;  %vm5333_vm5 = vweird.f32 %v8501_v20 }
0x1fae   :  { %v5356_v38 = vsel %vm5353_vm9, %v5355_v57, %v5351_v2  ;;  %v5321_v62 = vsel %vm5320_vm14, %v6569_v15, %v5317_v6  ;;  %v5337_v46 = vand.u32 2147483647, %v8501_v20 }
0x1faf   :  { %v5357_v12 = vmul.f32 %v8471_v30, %v5356_v38  ;;  %v5277_v30 = vand.u32 2147483647, %v8495_v45  ;;  %v5326_v24 = vsel %vm5323_vm1, %v5325_v42, %v5321_v62  ;;  %v5340_v15 = vor.u32 1.1754944e-38, %v5339_v60 }
0x1fb0   :  { %v5327_v27 = vmul.f32 %v8467_v32, %v5326_v24  ;;  %vm5338_vm9 = vcmp.eq.f32.partialorder %v5337_v46, 8.507059e+37 }
0x1fb1   :  { %6211 = vmatmul.msk.f32.vlgmr.msrb.gmra.mxu3 %vm230_vm3, %v5357_v12  ;;  %v8506_v55 = vpop.xlane.xlu0 %5251  ;;  %vm5278_vm0 = vcmp.eq.f32.partialorder %v5277_v30, 8.507059e+37  ;;  %v6188_v12 = vld [vmem:[%s8682_s20 + $0x38] sm:$0xff] }
0x1fb2   :  { %6572 = vrcp.f32 %v8506_v55  ;;  %v5281_v52 = vsel %vm5278_vm0, %v5280_v19, %v5276_v56  ;;  %v5369_v50 = vand.u32 2147483648, %v8506_v55  ;;  %vm5363_vm13 = vweird.f32 %v8506_v55 }
0x1fb3   :  { %v6571_v22 = vpop.eup %6570  ;;  %v5282_v48 = vmul.f32 %v8457_v21, %v5281_v52  ;;  %v5367_v61 = vand.u32 2147483647, %v8506_v55 }
0x1fb4   :  { %v5329_v51 = vmul.f32 %v6571_v22, %v8501_v20  ;;  %v5240_v17 = vpop.xlane.xlu2 %5239  ;;  %vm5334_vm4 = vweird.f32 %v6571_v22  ;;  %v5370_v2 = vor.u32 1.1754944e-38, %v5369_v50  ;;  %v6233_v50 = vld [vmem:[%s8685_s23 + $0x78] sm:$0xff] }
0x1fb5   :  { %6574 = vrcp.f32 %v5240_v17  ;;  %vm8525_vm6 = vmor %vm5333_vm5, %vm5334_vm4  ;;  %v5307_v21 = vand.u32 2147483647, %v5240_v17  ;;  %v5309_v37 = vand.u32 2147483648, %v5240_v17  ;;  %vm5303_vm10 = vweird.f32 %v5240_v17 }
0x1fb6   :  { %v5330_v26 = vsub.f32 1.0, %v5329_v51  ;;  %vm5368_vm0 = vcmp.eq.f32.partialorder %v5367_v61, 8.507059e+37  ;;  %v6231_v61 = vld [vmem:[%s8685_s23 + $0x68] sm:$0xff] }
0x1fb7   :  { %v5310_v41 = vor.u32 1.1754944e-38, %v5309_v37  ;;  %vm5308_vm12 = vcmp.eq.f32.partialorder %v5307_v21, 8.507059e+37 }
0x1fb8   :  { %v8513_v49 = vpop.eup %6572  ;;  %v5331_v54 = vmul.f32 %v6571_v22, %v5330_v26 }
0x1fb9   :  { %v5359_v63 = vmul.f32 %v8513_v49, %v8506_v55  ;;  %vm5364_vm7 = vweird.f32 %v8513_v49  ;;  %v6187_v55 = vld [vmem:[%s8682_s20 + $0x30] sm:$0xff] }
0x1fba   :  { %v5332_v53 = vadd.f32 %v6571_v22, %v5331_v54  ;;  %vm5365_vm14 = vmor %vm5363_vm13, %vm5364_vm7  ;;  %5665 = vmatpush.msra.mxu3 %v6187_v55  ;;  %v6229_v55 = vld [vmem:[%s8685_s23 + $0x58] sm:$0xff] }
0x1fbb   :  { %v6575_v45 = vpop.eup %6574  ;;  %v5360_v28 = vsub.f32 1.0, %v5359_v63 }
0x1fbc   :  { %v5299_v18 = vmul.f32 %v6575_v45, %v5240_v17  ;;  %v6333_v58 = vpop.permute.xlu2 %6332  ;;  %v5336_v32 = vsel %vm8525_vm6, %v6571_v22, %v5332_v53  ;;  %vm5304_vm8 = vweird.f32 %v6575_v45  ;;  %v5610_v17 = vperm.slane %v8339_v8, 4 }
0x1fbd   :  { %v6335_v25 = vunpack.i.h.bf16 %v6333_v58  ;;  %v6334_v40 = vunpack.i.l.bf16 %v6333_v58  ;;  %v5361_v43 = vmul.f32 %v8513_v49, %v5360_v28  ;;  %v5341_v4 = vsel %vm5338_vm9, %v5340_v15, %v5336_v32  ;;  %vm5305_vm11 = vmor %vm5303_vm10, %vm5304_vm8  ;;  %v6223_v32 = vld [vmem:[%s8684_s21 + $0x30] sm:$0xff] }
0x1fbe   :  { %v5300_v9 = vsub.f32 1.0, %v5299_v18  ;;  %v5342_v10 = vmul.f32 %v8476_v23, %v5341_v4 }
0x1fbf   :  { %5420 = vmatpush.msra.mxu1 %v6334_v40  ;;  %5498 = vmatpush.msrb.mxu0 %v6335_v25  ;;  %v5362_v11 = vadd.f32 %v8513_v49, %v5361_v43  ;;  %v6222_v43 = vld [vmem:[%s8684_s21 + $0x28] sm:$0xff] }
0x1fc0   :  { %v5301_v5 = vmul.f32 %v6575_v45, %v5300_v9  ;;  %6206 = vmatmul.msk.f32.vlgmr.msra.gmra.mxu1 %vm230_vm3, %v5282_v48  ;;  %6209 = vmatmul.msk.f32.vlgmr.msrb.gmra.mxu0 %vm230_vm3, %v5327_v27 }
0x1fc1   :  { %5602 = vmatpush.msra.mxu0 %v6185_v36  ;;  %v5366_v20 = vsel %vm5365_vm14, %v8513_v49, %v5362_v11  ;;  %vm5941_vm14 = vcmask 7168  }
0x1fc2   :  { %v5302_v44 = vadd.f32 %v6575_v45, %v5301_v5  ;;  %v5371_v34 = vsel %vm5368_vm0, %v5370_v2, %v5366_v20  ;;  %v6221_v5 = vld [vmem:[%s8684_s21 + $0x20] sm:$0xff]  ;;  %v5752_v2 = vperm.slane %v8339_v8, 5 }
0x1fc3   :  { %v5372_v23 = vmul.f32 %v8480_v1, %v5371_v34  ;;  %v6230_v34 = vld [vmem:[%s8685_s23 + $0x60] sm:$0xff] }
0x1fc4   :  { %v5306_v16 = vsel %vm5305_vm11, %v6575_v45, %v5302_v44  ;;  %v5504_v59 = vpop.permute.xlu0 %5503 }
0x1fc5   :  { %v5311_v31 = vsel %vm5308_vm12, %v5310_v41, %v5306_v16  ;;  %5524 = vmatpush.msrb.mxu1 %v5504_v59 }
0x1fc6   :  { %v5312_v57 = vmul.f32 %v8482_v14, %v5311_v31  ;;  %v6186_v14 = vld [vmem:[%s8682_s20 + $0x28] sm:$0xff]  ;;  %v6232_v31 = vld [vmem:[%s8685_s23 + $0x70] sm:$0xff]  ;;  %s8780_s20 = sld [smem:[#allocation17_spill]] }
0x1fc7   :  { %5634 = vmatpush.msra.mxu1 %v6186_v14  ;;  %v5755_v14 = vperm.slane %v8339_v8, 6 }
0x1fc8   :  { %6208 = vmatmul.msk.f32.vlgmr.msra.gmra.mxu2 %vm230_vm3, %v5312_v57  ;;  %6210 = vmatmul.msk.f32.vlgmr.msrb.gmra.mxu1 %vm230_vm3, %v5342_v10 }
0x1fc9   :  { %5696 = vmatpush.msra.mxu2 %v6188_v12  ;;  %5823 = vmatpush.msrb.mxu1 %v6233_v50  ;;  %v6348_v50 = vld [vmem:[%s8781_s14] ss:$0 sm:$0xff] }
0x1fca   :  { %v5396_v38 = vpop.f32.mrf.mxu0 }
0x1fcb   :  { %6213 = vmatmul.msk.f32.vlgmr.msra.gmra.mxu0 %vm230_vm3, %v5396_v38  ;;  %5824 = vmatpush.msrb.mxu1 %v6232_v31 }
0x1fcd   :  { %5825 = vmatpush.msrb.mxu1 %v6231_v61 }
0x1fcf   :  { %5826 = vmatpush.msrb.mxu1 %v6230_v34  ;;  %v6128_v34 = vld [vmem:[%s8678_s24 + $0x18] sm:$0x3] }
0x1fd0   :  { %6212 = vmatmul.msk.f32.vlgmr.msrb.gmra.mxu2 %vm230_vm3, %v5372_v23 }
0x1fd1   :  { %5827 = vmatpush.msrb.mxu1 %v6229_v55 }
0x201b   :  { %v5448_v7 = vpop.f32.mrf.mxu3 }
0x201c   :  { %6215 = vmatmul.msk.f32.vlgmr.msra.gmra.mxu1 %vm230_vm3, %v5448_v7 }
0x2034   :  { %v5552_v1 = vpop.f32.mrf.mxu3 }
0x2035   :  { %6219 = vmatmul.msk.f32.vlgmr.msra.gmra.mxu2 %vm230_vm3, %v5552_v1 }
0x203d   :  { %v5422_v22 = vpop.f32.mrf.mxu1  ;;  %v5500_v39 = vpop.f32.mrf.mxu0 }
0x203e   :  { %6214 = vmatmul.msk.f32.gmra.mxu0 %vm230_vm3, %v5422_v22  ;;  %6217 = vmatmul.msk.f32.vlgmr.msra.gmra.mxu3 %vm230_vm3, %v5500_v39 }
0x2045   :  { %v5526_v13 = vpop.f32.mrf.mxu1 }
0x2046   :  { %6218 = vmatmul.msk.f32.gmra.mxu3 %vm230_vm3, %v5526_v13 }
0x2048   :  { %v5604_v30 = vpop.f32.mrf.mxu0 }
0x2049   :  { %v5611_v3 = vadd.f32 %v5610_v17, %v5604_v30 }
0x204b   :  { %v5474_v6 = vpop.f32.mrf.mxu2 }
0x204c   :  { %6216 = vmatmul.msk.f32.gmra.mxu1 %vm230_vm3, %v5474_v6 }
0x2053   :  { %v5578_v51 = vpop.f32.mrf.mxu2 }
0x2054   :  { %6220 = vmatmul.msk.f32.gmra.mxu2 %vm230_vm3, %v5578_v51 }
0x2099   :  { %v5636_v29 = vpop.f32.mrf.mxu1 }
0x209a   :  { %v5642_v26 = vadd.f32 %v5636_v29, %v5611_v3 }
0x20b8   :  { %v5698_v19 = vpop.f32.mrf.mxu2 }
0x20bb   :  { %v5607_v63 = vpop.f32.mrf.mxu0 }
0x20bc   :  { %v5612_v45 = vadd.f32 %v5610_v17, %v5607_v63 }
0x20c1   :  { %v5667_v56 = vpop.f32.mrf.mxu3 }
0x20c2   :  { %v5673_v49 = vadd.f32 %v5667_v56, %v5642_v26  ;;  %v6228_v56 = vld [vmem:[%s8685_s23 + $0x50] sm:$0xff] }
0x20c3   :  { %5828 = vmatpush.msrb.mxu1 %v6228_v56 }
0x20c4   :  { %v5704_v62 = vadd.f32 %v5698_v19, %v5673_v49  ;;  %v6227_v49 = vld [vmem:[%s8685_s23 + $0x48] sm:$0xff]  ;;  %v6226_v19 = vld [vmem:[%s8685_s23 + $0x40] sm:$0xff] }
0x20c5   :  { %5829 = vmatpush.msrb.mxu1 %v6227_v49 }
0x20c6   :  { %v5706_v54 = vadd.f32 %v5704_v62, %v8389_v35  ;;  %v6347_v62 = vld [vmem:[%s8683_s22 + $0x1] ss:$0 sm:$0xff] }
0x20c7   :  { %5830 = vmatpush.msrb.mxu1 %v6226_v19 }
0x20c8   :  { %v5708_v42 = vsel %vm180_vm2, %v5706_v54, 0.0 }
0x20c9   :  { %5709 = vadd.xlane.f32.xlu1 %v5708_v42  ;;  %v5639_v52 = vpop.f32.mrf.mxu1  ;;  %v5670_v53 = vpop.f32.mrf.mxu3 }
0x20ca   :  { %v5643_v24 = vadd.f32 %v5639_v52, %v5612_v45 }
0x20cc   :  { %v5674_v28 = vadd.f32 %v5670_v53, %v5643_v24  ;;  %v6586_v53 = vld [vmem:[%s8678_s24 + $0x10] sm:$0xff] }
0x20d7   :  { %v5701_v18 = vpop.f32.mrf.mxu2 }
0x20d8   :  { %v5705_v58 = vadd.f32 %v5701_v18, %v5674_v28  ;;  %v5808_v28 = vperm.slane %v6586_v53, 7 }
0x20da   :  { %v5707_v48 = vadd.f32 %v5705_v58, %v8397_v47  ;;  %v6224_v47 = vld [vmem:[%s8684_s21 + $0x38] sm:$0xff]  ;;  %s8782_s21 = sld [smem:[#allocation18_spill]] }
0x20db   :  { %5795 = vmatpush.msrb.mxu0 %v6224_v47 }
0x20dc   :  { %v5711_v60 = vsel %vm180_vm2, %v5707_v48, 0.0 }
0x20dd   :  { %5712 = vadd.xlane.f32.xlu0 %v5711_v60  ;;  %5796 = vmatpush.msrb.mxu0 %v6223_v32 }
0x20df   :  { %5797 = vmatpush.msrb.mxu0 %v6222_v43 }
0x20e1   :  { %5798 = vmatpush.msrb.mxu0 %v6221_v5 }
0x213c   :  { %v5710_v25 = vpop.xlane.xlu1 %5709 }
0x213d   :  { %v5714_v40 = vmul.f32 %v5710_v25, %v6978_v33 }
0x213f   :  { %v5716_v35 = vsub.f32 %v5706_v54, %v5714_v40 }
0x2141   :  { %v5718_v27 = vmul.f32 %v5716_v35, %v5716_v35 }
0x2143   :  { %v5720_v46 = vsel %vm180_vm2, %v5718_v27, 0.0 }
0x2144   :  { %5721 = vadd.xlane.f32.xlu2 %v5720_v46 }
0x2150   :  { %v5713_v9 = vpop.xlane.xlu0 %5712 }
0x2151   :  { %v5715_v36 = vmul.f32 %v5713_v9, %v6978_v33 }
0x2153   :  { %v5717_v0 = vsub.f32 %v5707_v48, %v5715_v36 }
0x2155   :  { %v5719_v21 = vmul.f32 %v5717_v0, %v5717_v0 }
0x2157   :  { %v5723_v37 = vsel %vm180_vm2, %v5719_v21, 0.0 }
0x2158   :  { %5724 = vadd.xlane.f32.xlu1 %v5723_v37 }
0x21b7   :  { %v5722_v15 = vpop.xlane.xlu2 %5721 }
0x21b8   :  { %v5726_v44 = vmul.f32 %v5722_v15, %v6978_v33  ;;  %v5893_v15 = vld [vmem:[%s8780_s20 + $0x18] sm:$0xff] }
0x21b9   :  { %5916 = vmatpush.msrb.mxu3 %v5893_v15 }
0x21ba   :  { %v5728_v4 = vadd.f32 1e-05, %v5726_v44  ;;  %v5892_v44 = vld [vmem:[%s8780_s20 + $0x10] sm:$0xff] }
0x21bb   :  { %5917 = vmatpush.msrb.mxu3 %v5892_v44 }
0x21bc   :  { %6576 = vrsqrt.f32 %v5728_v4  ;;  %vm5736_vm1 = vweird.f32 %v5728_v4 }
0x21c2   :  { %v6577_v41 = vpop.eup %6576 }
0x21c3   :  { %v5731_v11 = vmul.f32 %v6577_v41, %v5728_v4  ;;  %vm5737_vm3 = vweird.f32 %v6577_v41  ;;  %v5891_v4 = vld [vmem:[%s8780_s20 + $0x8] sm:$0xff] }
0x21c4   :  { %vm5738_vm4 = vmor %vm5736_vm1, %vm5737_vm3  ;;  %5918 = vmatpush.msrb.mxu3 %v5891_v4 }
0x21c5   :  { %v5732_v16 = vmul.f32 %v6577_v41, %v5731_v11 }
0x21c7   :  { %v5733_v59 = vmul.f32 0.5, %v5732_v16 }
0x21c9   :  { %v5734_v10 = vsub.f32 1.5, %v5733_v59 }
0x21cb   :  { %v5735_v57 = vmul.f32 %v6577_v41, %v5734_v10  ;;  %v5725_v20 = vpop.xlane.xlu1 %5724  ;;  %v5927_v10 = vld [vmem:[%s8782_s21] sm:$0x3] }
0x21cc   :  { %v5727_v38 = vmul.f32 %v5725_v20, %v6978_v33 }
0x21cd   :  { %v5739_v23 = vsel %vm5738_vm4, %v6577_v41, %v5735_v57  ;;  %v5890_v41 = vld [vmem:[%s8780_s20] sm:$0xff]  ;;  %v5932_v57 = vmul.f32 %v6348_v50, %v5927_v10 }
0x21ce   :  { %v5750_v12 = vmul.f32 %v5739_v23, %v5716_v35  ;;  %v5729_v7 = vadd.f32 1e-05, %v5727_v38  ;;  %5919 = vmatpush.msrb.mxu3 %v5890_v41 }
0x21d0   :  { %v5753_v1 = vmul.f32 %v5752_v2, %v5750_v12  ;;  %6578 = vrsqrt.f32 %v5729_v7  ;;  %vm5746_vm6 = vweird.f32 %v5729_v7 }
0x21d2   :  { %v5756_v22 = vadd.f32 %v5755_v14, %v5753_v1 }
0x21d4   :  { %6234 = vmatmul.msk.f32.vlgmr.msrb.gmra.mxu0 %vm180_vm2, %v5756_v22 }
0x21d6   :  { %v6579_v39 = vpop.eup %6578 }
0x21d7   :  { %v5741_v13 = vmul.f32 %v6579_v39, %v5729_v7  ;;  %vm5747_vm5 = vweird.f32 %v6579_v39  ;;  %v5884_v7 = vperm.slane %v6128_v34, 0 }
0x21d8   :  { %vm5748_vm8 = vmor %vm5746_vm6, %vm5747_vm5 }
0x21d9   :  { %v5742_v6 = vmul.f32 %v6579_v39, %v5741_v13 }
0x21db   :  { %v5743_v51 = vmul.f32 0.5, %v5742_v6 }
0x21dd   :  { %v5744_v17 = vsub.f32 1.5, %v5743_v51 }
0x21df   :  { %v5745_v8 = vmul.f32 %v6579_v39, %v5744_v17 }
0x21e1   :  { %v5749_v30 = vsel %vm5748_vm8, %v6579_v39, %v5745_v8 }
0x21e2   :  { %v5751_v29 = vmul.f32 %v5749_v30, %v5717_v0 }
0x21e4   :  { %v5754_v3 = vmul.f32 %v5752_v2, %v5751_v29 }
0x21e6   :  { %v5757_v26 = vadd.f32 %v5755_v14, %v5754_v3 }
0x21e8   :  { %6235 = vmatmul.msk.f32.gmra.mxu0 %vm180_vm2, %v5757_v26 }
0x2251   :  { %v5800_v54 = vpop.f32.mrf.mxu0 }
0x2252   :  { %v5801_v42 = vadd.f32 %v6347_v62, %v5800_v54 }
0x2254   :  { %v5806_v63 = vmax.f32 %v5801_v42, 0.0 }
0x2256   :  { %6236 = vmatmul.msk.f32.vlgmr.msrb.gmra.mxu1 %vm1077_vm15, %v5806_v63 }
0x2265   :  { %v5803_v52 = vpop.f32.mrf.mxu0 }
0x2266   :  { %v5804_v45 = vadd.f32 %v6347_v62, %v5803_v52  ;;  %v33_v62 = vstv %s8783_s25 }
0x2267   :  { %34 = vst [vmem:[#allocation2] sm:$0x1] %v33_v62 }
0x2268   :  { %v5807_v24 = vmax.f32 %v5804_v45, 0.0 }
0x226a   :  { %6237 = vmatmul.msk.f32.gmra.mxu1 %vm1077_vm15, %v5807_v24  ;;  %vm5933_vm15 = vcmask 17408  }
0x226b   :  { %v5934_v2 = vsel %vm5933_vm15, %v5932_v57, 0.0 }
0x226e   :  { %v6349_v42 = vld [vmem:[#allocation2] ss:$0 sm:$0xff] }
0x22d3   :  { %v5832_v18 = vpop.f32.mrf.mxu1 }
0x22d4   :  { %v5833_v58 = vadd.f32 %v5832_v18, %v5808_v28 }
0x22d6   :  { %v5838_v48 = vadd.f32 %v5833_v58, %v5756_v22  ;;  %v5887_v22 = vperm.slane %v6128_v34, 1 }
0x22d8   :  { %v5840_v60 = vsel %vm180_vm2, %v5838_v48, 0.0 }
0x22d9   :  { %5841 = vadd.xlane.f32.xlu0 %v5840_v60 }
0x22e7   :  { %v5835_v25 = vpop.f32.mrf.mxu1 }
0x22e8   :  { %v5836_v40 = vadd.f32 %v5835_v25, %v5808_v28 }
0x22ea   :  { %v5839_v35 = vadd.f32 %v5836_v40, %v5757_v26 }
0x22ec   :  { %v5843_v27 = vsel %vm180_vm2, %v5839_v35, 0.0 }
0x22ed   :  { %5844 = vadd.xlane.f32.xlu2 %v5843_v27 }
0x22f5   :  { %5935 = vadd.xlane.f32.xlu2 %v5934_v2 }
0x234c   :  { %v5842_v46 = vpop.xlane.xlu0 %5841 }
0x234d   :  { %v5846_v9 = vmul.f32 %v5842_v46, %v6978_v33 }
0x234f   :  { %v5848_v36 = vsub.f32 %v5838_v48, %v5846_v9 }
0x2351   :  { %v5850_v0 = vmul.f32 %v5848_v36, %v5848_v36 }
0x2353   :  { %v5852_v21 = vsel %vm180_vm2, %v5850_v0, 0.0 }
0x2354   :  { %5853 = vadd.xlane.f32.xlu1 %v5852_v21 }
0x2360   :  { %v5845_v37 = vpop.xlane.xlu2 %5844 }
0x2361   :  { %v5847_v47 = vmul.f32 %v5845_v37, %v6978_v33 }
0x2363   :  { %v5849_v32 = vsub.f32 %v5839_v35, %v5847_v47 }
0x2365   :  { %v5851_v43 = vmul.f32 %v5849_v32, %v5849_v32 }
0x2367   :  { %v5855_v5 = vsel %vm180_vm2, %v5851_v43, 0.0 }
0x2368   :  { %5856 = vadd.xlane.f32.xlu0 %v5855_v5  ;;  %v5936_v54 = vpop.xlane.xlu2 %5935 }
0x2369   :  { %v5937_v63 = vperm.slane %v5936_v54, 0  ;;  %v5938_v53 = vperm.slane %v5936_v54, 1 }
0x23c7   :  { %v5854_v11 = vpop.xlane.xlu1 %5853 }
0x23c8   :  { %v5858_v16 = vmul.f32 %v5854_v11, %v6978_v33 }
0x23ca   :  { %v5860_v59 = vadd.f32 1e-05, %v5858_v16 }
0x23cc   :  { %6580 = vrsqrt.f32 %v5860_v59  ;;  %vm5868_vm10 = vweird.f32 %v5860_v59 }
0x23d2   :  { %v6581_v31 = vpop.eup %6580 }
0x23d3   :  { %v5863_v61 = vmul.f32 %v6581_v31, %v5860_v59  ;;  %vm5869_vm9 = vweird.f32 %v6581_v31 }
0x23d4   :  { %vm5870_vm11 = vmor %vm5868_vm10, %vm5869_vm9 }
0x23d5   :  { %v5864_v20 = vmul.f32 %v6581_v31, %v5863_v61 }
0x23d7   :  { %v5865_v38 = vmul.f32 0.5, %v5864_v20 }
0x23d9   :  { %v5866_v23 = vsub.f32 1.5, %v5865_v38 }
0x23db   :  { %v5867_v14 = vmul.f32 %v6581_v31, %v5866_v23  ;;  %v5857_v12 = vpop.xlane.xlu0 %5856 }
0x23dc   :  { %v5859_v55 = vmul.f32 %v5857_v12, %v6978_v33 }
0x23dd   :  { %v5871_v1 = vsel %vm5870_vm11, %v6581_v31, %v5867_v14 }
0x23de   :  { %v5882_v39 = vmul.f32 %v5871_v1, %v5848_v36  ;;  %v5861_v13 = vadd.f32 1e-05, %v5859_v55 }
0x23e0   :  { %v5885_v6 = vmul.f32 %v5884_v7, %v5882_v39  ;;  %6582 = vrsqrt.f32 %v5861_v13  ;;  %vm5878_vm12 = vweird.f32 %v5861_v13 }
0x23e2   :  { %v5888_v51 = vadd.f32 %v5887_v22, %v5885_v6 }
0x23e4   :  { %6238 = vmatmul.msk.f32.vlgmr.msrb.gmra.mxu3 %vm180_vm2, %v5888_v51 }
0x23e6   :  { %v6583_v17 = vpop.eup %6582 }
0x23e7   :  { %v5873_v8 = vmul.f32 %v6583_v17, %v5861_v13  ;;  %vm5879_vm7 = vweird.f32 %v6583_v17 }
0x23e8   :  { %vm5880_vm13 = vmor %vm5878_vm12, %vm5879_vm7 }
0x23e9   :  { %v5874_v30 = vmul.f32 %v6583_v17, %v5873_v8 }
0x23eb   :  { %v5875_v29 = vmul.f32 0.5, %v5874_v30 }
0x23ed   :  { %v5876_v3 = vsub.f32 1.5, %v5875_v29 }
0x23ef   :  { %v5877_v26 = vmul.f32 %v6583_v17, %v5876_v3 }
0x23f1   :  { %v5881_v56 = vsel %vm5880_vm13, %v6583_v17, %v5877_v26 }
0x23f2   :  { %v5883_v33 = vmul.f32 %v5881_v56, %v5849_v32 }
0x23f4   :  { %v5886_v49 = vmul.f32 %v5884_v7, %v5883_v33 }
0x23f6   :  { %v5889_v19 = vadd.f32 %v5887_v22, %v5886_v49 }
0x23f8   :  { %6239 = vmatmul.msk.f32.gmra.mxu3 %vm180_vm2, %v5889_v19 }
0x2467   :  { %v5921_v52 = vpop.f32.mrf.mxu3 }
0x2468   :  { %v5922_v45 = vadd.f32 %v6349_v42, %v5921_v52 }
0x246a   :  { %v5939_v24 = vadd.f32 %v5937_v63, %v5922_v45 }
0x246c   :  { %5942 = vst.msk [vmem:[%s8784_s27] sm:$0xff] %vm5941_vm14, %v5939_v24 }
0x247b   :  { %v5924_v28 = vpop.f32.mrf.mxu3 }
0x247c   :  { %v5925_v18 = vadd.f32 %v6349_v42, %v5924_v28 }
0x247e   :  { %v5940_v58 = vadd.f32 %v5938_v53, %v5925_v18 }
0x2480   :  { %5943 = vst.msk [vmem:[%s8784_s27 + $0x8] sm:$0xff] %vm5941_vm14, %v5940_v58 }

</bundles_post_ra>
